<compile_context>
chip_gen: v7x
topology: tpu7x:2x2x1
jax: 0.10.0
libtpu: 0.0.40
codegen_flags: <defaults>
</compile_context>

<pallas_src>
import numpy as np

import jax
import jax.numpy as jnp
from jax.experimental import pallas as pl
from jax.experimental.pallas import tpu as pltpu

H = 7
W = 7
C = 512
NUM_HEAD = 2
NUM_CLASS = 7
GROUPS = 32
MIP = max(8, C // GROUPS)        # 16
BN_EPS = 1e-5


def _round_up(v, m):
    return -(-v // m) * m


# --------------------------------- kernel -----------------------------------

def _make_kernel(bb, return_heads):
    """bb: batch elements per grid step (static python int)."""
    rows_h = bb * 8                     # x_h slab rows (7 real + 1 pad per sample)

    def kernel(x_ref, whw_ref, bc_ref, w1_ref, b1_ref, w23_ref, wl_ref,
               feat_ref, *maybe_heads):
        heads_ref = maybe_heads[0] if return_heads else None

        x = x_ref[...].astype(jnp.float32)                 # (bb, H, W, C)
        zero_row = jnp.zeros((bb, 1, C), jnp.float32)      # hoisted (no CSE in JAX)

        att_max = None
        for h in range(NUM_HEAD):                          # static unroll
            wh = whw_ref[h, 0]                             # (W, C)
            ww = whw_ref[h, 1]                             # (H, C)
            bh = bc_ref[h]                                 # (C,)
            bw = bc_ref[NUM_HEAD + h]
            b2 = bc_ref[2 * NUM_HEAD + h]
            b3 = bc_ref[3 * NUM_HEAD + h]

            # CoordAtt.Linear_h: depthwise (1,7) conv + folded BN -> (bb, H, C)
            xh = jnp.sum(x * wh[None, None, :, :], axis=2) + bh
            # CoordAtt.Linear_w: depthwise (7,1) conv + folded BN -> (bb, W, C)
            xw = jnp.sum(x * ww[None, :, None, :], axis=1) + bw

            # Pad each sample's 7 rows to 8 so every reshape / slice below is a
            # sublane-aligned free view (no Mosaic relayout copies).
            xh8 = jnp.concatenate([xh, zero_row], axis=1)  # (bb, 8, C)
            xw8 = jnp.concatenate([xw, zero_row], axis=1)  # (bb, 8, C)
            y_cat = jnp.concatenate([xh8, xw8], axis=0).reshape(2 * bb * 8, C)

            # conv1 (1x1, C -> MIP) + folded BN1 on cat([x_h, x_w]), one matmul.
            y1 = jnp.dot(y_cat, w1_ref[h],
                         preferred_element_type=jnp.float32) + b1_ref[h]
            # h_swish: x * relu6(x + 3) / 6
            y1 = y1 * (jnp.clip(y1 + 3.0, 0.0, 6.0) * (1.0 / 6.0))

            # conv2 and conv3 (1x1, MIP -> C) merged into ONE MXU op per head:
            # (rows, MIP) @ (MIP, 2C); conv2 lanes are taken for the x_h rows,
            # conv3 lanes for the x_w rows (both slices are 8/128-aligned).
            a_all = jnp.dot(y1, w23_ref[h], preferred_element_type=jnp.float32)
            ah = jax.nn.sigmoid(a_all[:rows_h, :C] + b2)   # (bb*8, C)
            aw = jax.nn.sigmoid(a_all[rows_h:, C:] + b3)   # (bb*8, C)
            ah = ah.reshape(bb, 8, C)[:, :H, :]            # (bb, H, C)
            aw = aw.reshape(bb, 8, C)[:, :W, :]            # (bb, W, C)

            # att[b, i, j, c] = ah[b, i, c] * aw[b, j, c]
            att = ah[:, :, None, :] * aw[:, None, :, :]    # (bb, H, W, C)
            if return_heads:
                heads_ref[:, h, :, :, :] = att.astype(heads_ref.dtype)
            att_max = att if att_max is None else jnp.maximum(att_max, att)

        # y = x * max over heads; DDAMNet.Linear: depthwise 7x7 valid conv +
        # folded BN -> lane-dense pooled feature (bb, C).
        y = x * att_max
        bl = bc_ref[4 * NUM_HEAD]
        feat_ref[...] = jnp.sum(y * wl_ref[...][None], axis=(1, 2)) + bl

    return kernel


# ------------------------- parameter construction ---------------------------

def init_params(key):
    keys = iter(jax.random.split(key, 64))

    def rnd(shape, scale=0.1):
        return scale * jax.random.normal(next(keys), shape, dtype=jnp.float32)

    def bn(n):
        gamma = 1.0 + rnd((n,), 0.05)
        beta = rnd((n,), 0.05)
        mean = rnd((n,), 0.05)
        var = 1.0 + 0.2 * jax.random.uniform(next(keys), (n,), dtype=jnp.float32)
        s = gamma / jnp.sqrt(var + BN_EPS)
        return s, beta - mean * s

    whw_l, w1_l, b1_l, w23_l = [], [], [], []
    bc_rows = [None] * (4 * NUM_HEAD + 1)
    for h in range(NUM_HEAD):
        # Linear_h: depthwise weight (C, 1, 1, 7), no bias, then BN(C)
        wh = rnd((C, W), 0.2)
        s, b = bn(C)
        wh_t = jnp.transpose(wh * s[:, None])             # (W, C)
        bc_rows[h] = b
        # Linear_w: depthwise weight (C, 1, 7, 1), no bias, then BN(C)
        ww = rnd((C, H), 0.2)
        s, b = bn(C)
        ww_t = jnp.transpose(ww * s[:, None])             # (H, C)
        bc_rows[NUM_HEAD + h] = b
        whw_l.append(jnp.stack([wh_t, ww_t], axis=0))     # (2, 7, C)

        # conv1: weight (MIP, C, 1, 1) + bias, then BN(MIP)
        w1 = rnd((MIP, C), 0.1)
        bc1 = rnd((MIP,), 0.1)
        s, b = bn(MIP)
        w1_l.append(jnp.transpose(w1 * s[:, None]))       # (C, MIP)
        b1_l.append(bc1 * s + b)                          # (MIP,)

        # conv2 / conv3: weight (C, MIP, 1, 1) + bias (sigmoid follows, no BN)
        # packed side-by-side as (MIP, 2C) so the kernel runs them as one matmul.
        w2 = rnd((C, MIP), 0.2); b2 = rnd((C,), 0.1)
        w3 = rnd((C, MIP), 0.2); b3 = rnd((C,), 0.1)
        w23_l.append(jnp.concatenate(
            [jnp.transpose(w2), jnp.transpose(w3)], axis=1))   # (MIP, 2C)
        bc_rows[2 * NUM_HEAD + h] = b2
        bc_rows[3 * NUM_HEAD + h] = b3

    # DDAMNet.Linear: depthwise weight (C, 1, 7, 7), no bias, then BN(C)
    wl = rnd((C, H, W), 0.1)
    s, b = bn(C)
    wl = jnp.transpose(wl * s[:, None, None], (1, 2, 0))  # (H, W, C)
    bc_rows[4 * NUM_HEAD] = b

    # fc: nn.Linear(512, num_class) -- applied in the XLA wrapper (lane-dense).
    wfc = jnp.transpose(rnd((NUM_CLASS, C), 0.1))         # (C, NUM_CLASS)
    bfc = rnd((NUM_CLASS,), 0.1)

    return (jnp.stack(whw_l, 0),            # (NUM_HEAD, 2, 7, C)
            jnp.stack(bc_rows, 0),          # (4*NUM_HEAD+1, C)
            jnp.stack(w1_l, 0),             # (NUM_HEAD, C, MIP)
            jnp.stack(b1_l, 0),             # (NUM_HEAD, MIP)
            jnp.stack(w23_l, 0),            # (NUM_HEAD, MIP, 2C)
            wl, wfc, bfc)


# ------------------------------- wrapper -------------------------------------

def ddamnet_forward(x, params, *, block_batch=32, return_heads=True,
                    heads_dtype=jnp.bfloat16, input_format="NCHW",
                    heads_format=None):
    """Forward pass of DDAMNet after the backbone.

    x: backbone features, (N, 512, 7, 7) for input_format="NCHW" (torch-parity
       path, layout transposed at the boundary) or (N, 7, 7, 512) for "NHWC"
       (fast path, no extra HBM round trip).
    Returns (logits, x, head_out) like the torch module.  head_out is a list of
    per-head attention maps (None when return_heads=False) in `heads_format`
    layout (defaults to input_format) and `heads_dtype` precision (bf16 halves
    the dominant HBM write stream; pass jnp.float32 for exact parity).
    """
    if input_format not in ("NCHW", "NHWC"):
        raise ValueError(f"bad input_format {input_format!r}")
    heads_format = input_format if heads_format is None else heads_format
    if heads_format not in ("NCHW", "NHWC"):
        raise ValueError(f"bad heads_format {heads_format!r}")

    whw, bc, w1, b1, w23, wl, wfc, bfc = params
    kernel_params = (whw, bc, w1, b1, w23, wl)

    if input_format == "NCHW":
        # NOTE: this transpose is a full HBM pass; pass NHWC features directly
        # (input_format="NHWC") to avoid it when the layout contract allows.
        x_nhwc = jnp.transpose(x, (0, 2, 3, 1))
    else:
        x_nhwc = x
    if x_nhwc.dtype != jnp.float32 and x_nhwc.dtype != jnp.bfloat16:
        x_nhwc = x_nhwc.astype(jnp.float32)

    n_batch = x_nhwc.shape[0]

    # ---- block-batch selection ----------------------------------------------
    bb = max(1, min(block_batch, n_batch))
    if n_batch > bb:
        # multi-step grid: keep the (bb, C) feat output block 8-row aligned.
        bb = max(8, (bb // 8) * 8)
    if n_batch >= 16 and -(-n_batch // bb) < 2:
        # keep >= 2 grid steps when cheaply possible (v7x megacore sharding).
        bb = _round_up(-(-n_batch // 2), 8)
    n_pad = _round_up(n_batch, bb)
    if n_pad != n_batch:
        x_nhwc = jnp.concatenate(
            [x_nhwc, jnp.zeros((n_pad - n_batch, H, W, C), x_nhwc.dtype)], axis=0)
    grid = (n_pad // bb,)

    # ---- specs ---------------------------------------------------------------
    def full_spec(arr):
        nd = arr.ndim
        return pl.BlockSpec(arr.shape, lambda n, _nd=nd: (0,) * _nd)

    in_specs = [pl.BlockSpec((bb, H, W, C), lambda n: (n, 0, 0, 0))]
    in_specs += [full_spec(p) for p in kernel_params]

    out_shape = [jax.ShapeDtypeStruct((n_pad, C), jnp.float32)]
    out_specs = [pl.BlockSpec((bb, C), lambda n: (n, 0))]
    if return_heads:
        # batch-major so each step's heads writeback is ONE contiguous region.
        out_shape.append(jax.ShapeDtypeStruct(
            (n_pad, NUM_HEAD, H, W, C), heads_dtype))
        out_specs.append(
            pl.BlockSpec((bb, NUM_HEAD, H, W, C), lambda n: (n, 0, 0, 0, 0)))

    # ---- VMEM budget + cost hint ----------------------------------------------
    in_item = int(x_nhwc.dtype.itemsize)
    heads_item = int(np.dtype(heads_dtype).itemsize)
    x_blk = bb * H * 8 * C * in_item                 # W padded 7->8 in VMEM
    x_blk_f32 = bb * H * 8 * C * 4
    heads_blk = (bb * NUM_HEAD * H * 8 * C * heads_item) if return_heads else 0
    vmem_limit = 2 * (x_blk + heads_blk) + 8 * x_blk_f32 + (6 << 20)
    vmem_limit = int(min(max(vmem_limit, 24 << 20), 96 << 20))

    rows = 2 * 8                                     # conv rows / sample / head
    flops_per_sample = NUM_HEAD * (
        4 * H * W * C                                # depthwise (1,7)/(7,1)
        + 2 * rows * C * MIP                         # conv1
        + 2 * rows * MIP * 2 * C                     # conv2 || conv3 (merged)
        + 3 * H * W * C                              # attention product + max
    ) + 4 * H * W * C + 2 * C * NUM_CLASS            # y = x*att, 7x7 pool, fc
    transcendentals = n_pad * NUM_HEAD * rows * C    # sigmoids
    bytes_accessed = (n_pad * H * W * C * in_item + n_pad * C * 4
                      + (n_pad * NUM_HEAD * H * W * C * heads_item
                         if return_heads else 0))

    outs = pl.pallas_call(
        _make_kernel(bb, return_heads),
        grid=grid,
        in_specs=in_specs,
        out_specs=tuple(out_specs),
        out_shape=tuple(out_shape),
        compiler_params=pltpu.CompilerParams(
            dimension_semantics=("parallel",),
            vmem_limit_bytes=vmem_limit),
        cost_estimate=pl.CostEstimate(
            flops=int(n_pad * flops_per_sample),
            transcendentals=int(transcendentals),
            bytes_accessed=int(bytes_accessed)),
    )(x_nhwc, *kernel_params)

    if return_heads:
        feat, heads = outs
    else:
        (feat,) = outs
    feat = feat[:n_batch]                                      # (N, C)

    # fc done in XLA on the lane-dense pooled feature (NUM_CLASS=7 < 128 lanes).
    logits = feat @ wfc + bfc                                  # (N, NUM_CLASS)

    head_out = None
    if return_heads:
        heads = heads[:n_batch]                                # (N, NUM_HEAD, H, W, C)
        if heads_format == "NCHW":
            head_out = [jnp.transpose(heads[:, i], (0, 3, 1, 2))
                        for i in range(NUM_HEAD)]
        else:
            head_out = [heads[:, i] for i in range(NUM_HEAD)]
    return logits, x, head_out


# ---------------------------- plain-JAX reference ----------------------------

def ref_forward(x_nchw, params):
    whw, bc, w1, b1, w23, wl, wfc, bfc = params
    x = jnp.transpose(x_nchw, (0, 2, 3, 1)).astype(jnp.float32)
    atts = []
    for h in range(NUM_HEAD):
        xh = jnp.einsum('nijc,jc->nic', x, whw[h, 0]) + bc[h]
        xw = jnp.einsum('nijc,ic->njc', x, whw[h, 1]) + bc[NUM_HEAD + h]
        y1h = xh @ w1[h] + b1[h]
        y1w = xw @ w1[h] + b1[h]
        y1h = y1h * jnp.clip(y1h + 3.0, 0.0, 6.0) / 6.0
        y1w = y1w * jnp.clip(y1w + 3.0, 0.0, 6.0) / 6.0
        ah = jax.nn.sigmoid(y1h @ w23[h, :, :C] + bc[2 * NUM_HEAD + h])
        aw = jax.nn.sigmoid(y1w @ w23[h, :, C:] + bc[3 * NUM_HEAD + h])
        atts.append(ah[:, :, None, :] * aw[:, None, :, :])
    amax = atts[0]
    for i in range(1, NUM_HEAD):
        amax = jnp.maximum(amax, atts[i])
    y = x * amax
    feat = jnp.sum(y * wl[None], axis=(1, 2)) + bc[4 * NUM_HEAD]
    return feat @ wfc + bfc, atts


if __name__ == "__main__":
    key = jax.random.PRNGKey(0)
    kx, kp = jax.random.split(key)
    N = 2
    x_nchw = jax.random.normal(kx, (N, C, H, W), dtype=jnp.float32)
    params = init_params(kp)

    ref_logits, ref_atts = ref_forward(x_nchw, params)
    ref_heads_nchw = [jnp.transpose(a, (0, 3, 1, 2)) for a in ref_atts]

    # (1) torch-parity path: NCHW in/out, f32 attention maps.
    logits, feats, head_out = jax.block_until_ready(
        ddamnet_forward(x_nchw, params, heads_dtype=jnp.float32))
    assert logits.shape == (N, NUM_CLASS)
    assert feats.shape == (N, C, H, W)
    assert jnp.allclose(logits, ref_logits, atol=1e-3, rtol=1e-3), "logits mismatch"
    for i in range(NUM_HEAD):
        assert head_out[i].shape == (N, C, H, W)
        assert jnp.allclose(head_out[i], ref_heads_nchw[i],
                            atol=1e-4, rtol=1e-4), "head mismatch"

    # (2) optimized default: bf16 attention-map stores (compute stays f32).
    logits_bf, _, head_bf = jax.block_until_ready(
        ddamnet_forward(x_nchw, params))
    assert jnp.allclose(logits_bf, ref_logits, atol=1e-3, rtol=1e-3), \
        "bf16-path logits mismatch"
    for i in range(NUM_HEAD):
        assert jnp.allclose(head_bf[i].astype(jnp.float32), ref_heads_nchw[i],
                            atol=1.5e-2, rtol=1.5e-2), "bf16 head mismatch"

    # (3) fast path: NHWC features straight from the backbone, no attention-map
    #     writeback and no layout round trips.
    x_nhwc = jnp.transpose(x_nchw, (0, 2, 3, 1))
    logits_fast, _, head_none = jax.block_until_ready(
        ddamnet_forward(x_nhwc, params, return_heads=False,
                        input_format="NHWC", block_batch=64))
    assert head_none is None
    assert jnp.allclose(logits_fast, ref_logits, atol=1e-3, rtol=1e-3), \
        "fast-path mismatch"

    print("KERNEL_OK")
</pallas_src>

<mosaic_0001>
module attributes {stable_mosaic.version = 11 : i64} {
  func.func @kernel(%arg0: i32, %arg1: memref<2x7x7x512xf32, #tpu.memory_space<vmem>>, %arg2: memref<2x2x7x512xf32, #tpu.memory_space<vmem>>, %arg3: memref<9x512xf32, #tpu.memory_space<vmem>>, %arg4: memref<2x512x16xf32, #tpu.memory_space<vmem>>, %arg5: memref<2x16xf32, #tpu.memory_space<vmem>>, %arg6: memref<2x16x1024xf32, #tpu.memory_space<vmem>>, %arg7: memref<7x7x512xf32, #tpu.memory_space<vmem>>, %arg8: memref<2x512xf32, #tpu.memory_space<vmem>>, %arg9: memref<2x2x7x7x512xf32, #tpu.memory_space<vmem>>) attributes {dimension_semantics = [#tpu.dimension_semantics<parallel>], iteration_bounds = array<i64: 1>, scalar_prefetch = 0 : i64, scratch_operands = 0 : i64, tpu.core_type = #tpu.core_type<tc>, window_params = [{transform_indices = @transform_0, window_bounds = array<i64: 2, 7, 7, 512>}, {pipeline_mode = #tpu.pipeline_mode<synchronous>, transform_indices = @transform_1, window_bounds = array<i64: 2, 2, 7, 512>}, {pipeline_mode = #tpu.pipeline_mode<synchronous>, transform_indices = @transform_2, window_bounds = array<i64: 9, 512>}, {pipeline_mode = #tpu.pipeline_mode<synchronous>, transform_indices = @transform_3, window_bounds = array<i64: 2, 512, 16>}, {pipeline_mode = #tpu.pipeline_mode<synchronous>, transform_indices = @transform_4, window_bounds = array<i64: 2, 16>}, {pipeline_mode = #tpu.pipeline_mode<synchronous>, transform_indices = @transform_5, window_bounds = array<i64: 2, 16, 1024>}, {pipeline_mode = #tpu.pipeline_mode<synchronous>, transform_indices = @transform_6, window_bounds = array<i64: 7, 7, 512>}, {transform_indices = @transform_7, window_bounds = array<i64: 2, 512>}, {transform_indices = @transform_8, window_bounds = array<i64: 2, 2, 7, 7, 512>}]} {
    %c0 = arith.constant 0 : index
    %c0_0 = arith.constant 0 : index
    %c0_1 = arith.constant 0 : index
    %c0_2 = arith.constant 0 : index
    %0 = vector.load %arg1[%c0, %c0_0, %c0_1, %c0_2] : memref<2x7x7x512xf32, #tpu.memory_space<vmem>>, vector<2x7x7x512xf32>
    %cst = arith.constant 0.000000e+00 : f32
    %1 = vector.broadcast %cst : f32 to vector<2x1x512xf32>
    %c0_3 = arith.constant 0 : index
    %c0_4 = arith.constant 0 : index
    %c0_5 = arith.constant 0 : index
    %c0_6 = arith.constant 0 : index
    %2 = vector.load %arg2[%c0_3, %c0_4, %c0_5, %c0_6] : memref<2x2x7x512xf32, #tpu.memory_space<vmem>>, vector<1x1x7x512xf32>
    %3 = vector.shape_cast %2 : vector<1x1x7x512xf32> to vector<7x512xf32>
    %c0_7 = arith.constant 0 : index
    %c1 = arith.constant 1 : index
    %c0_8 = arith.constant 0 : index
    %c0_9 = arith.constant 0 : index
    %4 = vector.load %arg2[%c0_7, %c1, %c0_8, %c0_9] : memref<2x2x7x512xf32, #tpu.memory_space<vmem>>, vector<1x1x7x512xf32>
    %5 = vector.shape_cast %4 : vector<1x1x7x512xf32> to vector<7x512xf32>
    %c0_10 = arith.constant 0 : index
    %c0_11 = arith.constant 0 : index
    %6 = vector.load %arg3[%c0_10, %c0_11] : memref<9x512xf32, #tpu.memory_space<vmem>>, vector<1x512xf32>
    %7 = vector.shape_cast %6 : vector<1x512xf32> to vector<512xf32>
    %c2 = arith.constant 2 : index
    %c0_12 = arith.constant 0 : index
    %8 = vector.load %arg3[%c2, %c0_12] : memref<9x512xf32, #tpu.memory_space<vmem>>, vector<1x512xf32>
    %9 = vector.shape_cast %8 : vector<1x512xf32> to vector<512xf32>
    %c4 = arith.constant 4 : index
    %c0_13 = arith.constant 0 : index
    %10 = vector.load %arg3[%c4, %c0_13] : memref<9x512xf32, #tpu.memory_space<vmem>>, vector<1x512xf32>
    %11 = vector.shape_cast %10 : vector<1x512xf32> to vector<512xf32>
    %c6 = arith.constant 6 : index
    %c0_14 = arith.constant 0 : index
    %12 = vector.load %arg3[%c6, %c0_14] : memref<9x512xf32, #tpu.memory_space<vmem>>, vector<1x512xf32>
    %13 = vector.shape_cast %12 : vector<1x512xf32> to vector<512xf32>
    %14 = vector.shape_cast %3 : vector<7x512xf32> to vector<1x1x7x512xf32>
    %15 = vector.broadcast %14 : vector<1x1x7x512xf32> to vector<2x7x7x512xf32>
    %16 = arith.mulf %0, %15 : vector<2x7x7x512xf32>
    %cst_15 = arith.constant dense<0.000000e+00> : vector<2x7x512xf32>
    %17 = vector.multi_reduction <add>, %16, %cst_15 [2] : vector<2x7x7x512xf32> to vector<2x7x512xf32>
    %18 = vector.shape_cast %7 : vector<512xf32> to vector<1x1x512xf32>
    %19 = vector.broadcast %18 : vector<1x1x512xf32> to vector<2x7x512xf32>
    %20 = arith.addf %17, %19 : vector<2x7x512xf32>
    %21 = vector.shape_cast %5 : vector<7x512xf32> to vector<1x7x1x512xf32>
    %22 = vector.broadcast %21 : vector<1x7x1x512xf32> to vector<2x7x7x512xf32>
    %23 = arith.mulf %0, %22 : vector<2x7x7x512xf32>
    %cst_16 = arith.constant dense<0.000000e+00> : vector<2x7x512xf32>
    %24 = vector.multi_reduction <add>, %23, %cst_16 [1] : vector<2x7x7x512xf32> to vector<2x7x512xf32>
    %25 = vector.shape_cast %9 : vector<512xf32> to vector<1x1x512xf32>
    %26 = vector.broadcast %25 : vector<1x1x512xf32> to vector<2x7x512xf32>
    %27 = arith.addf %24, %26 : vector<2x7x512xf32>
    %28 = tpu.concatenate %20, %1 in 1 : vector<2x7x512xf32>, vector<2x1x512xf32> -> vector<2x8x512xf32>
    %29 = tpu.concatenate %27, %1 in 1 : vector<2x7x512xf32>, vector<2x1x512xf32> -> vector<2x8x512xf32>
    %30 = tpu.concatenate %28, %29 in 0 : vector<2x8x512xf32>, vector<2x8x512xf32> -> vector<4x8x512xf32>
    %31 = vector.shape_cast %30 : vector<4x8x512xf32> to vector<32x512xf32>
    %c0_17 = arith.constant 0 : index
    %c0_18 = arith.constant 0 : index
    %c0_19 = arith.constant 0 : index
    %32 = vector.load %arg4[%c0_17, %c0_18, %c0_19] : memref<2x512x16xf32, #tpu.memory_space<vmem>>, vector<1x512x16xf32>
    %33 = vector.shape_cast %32 : vector<1x512x16xf32> to vector<512x16xf32>
    %cst_20 = arith.constant dense<0.000000e+00> : vector<32x16xf32>
    %34 = tpu.matmul %31, %33, %cst_20 {dimension_numbers = #tpu.dot_dimension_numbers<[1], [0], [0], [1], [0, 0, 1, 1], [], []>} : vector<32x512xf32>, vector<512x16xf32>, vector<32x16xf32> -> vector<32x16xf32>
    %c0_21 = arith.constant 0 : index
    %c0_22 = arith.constant 0 : index
    %35 = vector.load %arg5[%c0_21, %c0_22] : memref<2x16xf32, #tpu.memory_space<vmem>>, vector<1x16xf32>
    %36 = vector.shape_cast %35 : vector<1x16xf32> to vector<16xf32>
    %37 = vector.shape_cast %36 : vector<16xf32> to vector<1x16xf32>
    %38 = vector.broadcast %37 : vector<1x16xf32> to vector<32x16xf32>
    %39 = arith.addf %34, %38 : vector<32x16xf32>
    %cst_23 = arith.constant 3.000000e+00 : f32
    %40 = vector.broadcast %cst_23 : f32 to vector<32x16xf32>
    %41 = arith.addf %39, %40 : vector<32x16xf32>
    %cst_24 = arith.constant 0.000000e+00 : f32
    %cst_25 = arith.constant 6.000000e+00 : f32
    %42 = vector.broadcast %cst_24 : f32 to vector<32x16xf32>
    %43 = arith.maximumf %42, %41 : vector<32x16xf32>
    %44 = vector.broadcast %cst_25 : f32 to vector<32x16xf32>
    %45 = arith.minimumf %44, %43 : vector<32x16xf32>
    %cst_26 = arith.constant 0.166666672 : f32
    %46 = vector.broadcast %cst_26 : f32 to vector<32x16xf32>
    %47 = arith.mulf %45, %46 : vector<32x16xf32>
    %48 = arith.mulf %39, %47 : vector<32x16xf32>
    %c0_27 = arith.constant 0 : index
    %c0_28 = arith.constant 0 : index
    %c0_29 = arith.constant 0 : index
    %49 = vector.load %arg6[%c0_27, %c0_28, %c0_29] : memref<2x16x1024xf32, #tpu.memory_space<vmem>>, vector<1x16x1024xf32>
    %50 = vector.shape_cast %49 : vector<1x16x1024xf32> to vector<16x1024xf32>
    %cst_30 = arith.constant dense<0.000000e+00> : vector<32x1024xf32>
    %51 = tpu.matmul %48, %50, %cst_30 {dimension_numbers = #tpu.dot_dimension_numbers<[1], [0], [0], [1], [0, 0, 1, 1], [], []>} : vector<32x16xf32>, vector<16x1024xf32>, vector<32x1024xf32> -> vector<32x1024xf32>
    %52 = vector.extract_strided_slice %51 {offsets = [0, 0], sizes = [16, 512], strides = [1, 1]} : vector<32x1024xf32> to vector<16x512xf32>
    %53 = vector.shape_cast %11 : vector<512xf32> to vector<1x512xf32>
    %54 = vector.broadcast %53 : vector<1x512xf32> to vector<16x512xf32>
    %55 = arith.addf %52, %54 : vector<16x512xf32>
    %56 = arith.negf %55 : vector<16x512xf32>
    %57 = math.exp %56 : vector<16x512xf32>
    %cst_31 = arith.constant 1.000000e+00 : f32
    %58 = vector.broadcast %cst_31 : f32 to vector<16x512xf32>
    %59 = arith.addf %58, %57 : vector<16x512xf32>
    %60 = arith.divf %58, %59 : vector<16x512xf32>
    %61 = vector.extract_strided_slice %51 {offsets = [16, 512], sizes = [16, 512], strides = [1, 1]} : vector<32x1024xf32> to vector<16x512xf32>
    %62 = vector.shape_cast %13 : vector<512xf32> to vector<1x512xf32>
    %63 = vector.broadcast %62 : vector<1x512xf32> to vector<16x512xf32>
    %64 = arith.addf %61, %63 : vector<16x512xf32>
    %65 = arith.negf %64 : vector<16x512xf32>
    %66 = math.exp %65 : vector<16x512xf32>
    %cst_32 = arith.constant 1.000000e+00 : f32
    %67 = vector.broadcast %cst_32 : f32 to vector<16x512xf32>
    %68 = arith.addf %67, %66 : vector<16x512xf32>
    %69 = arith.divf %67, %68 : vector<16x512xf32>
    %70 = vector.shape_cast %60 : vector<16x512xf32> to vector<2x8x512xf32>
    %71 = vector.extract_strided_slice %70 {offsets = [0, 0, 0], sizes = [2, 7, 512], strides = [1, 1, 1]} : vector<2x8x512xf32> to vector<2x7x512xf32>
    %72 = vector.shape_cast %69 : vector<16x512xf32> to vector<2x8x512xf32>
    %73 = vector.extract_strided_slice %72 {offsets = [0, 0, 0], sizes = [2, 7, 512], strides = [1, 1, 1]} : vector<2x8x512xf32> to vector<2x7x512xf32>
    %74 = vector.shape_cast %71 : vector<2x7x512xf32> to vector<2x7x1x512xf32>
    %75 = vector.shape_cast %73 : vector<2x7x512xf32> to vector<2x1x7x512xf32>
    %76 = vector.broadcast %74 : vector<2x7x1x512xf32> to vector<2x7x7x512xf32>
    %77 = vector.broadcast %75 : vector<2x1x7x512xf32> to vector<2x7x7x512xf32>
    %78 = arith.mulf %76, %77 : vector<2x7x7x512xf32>
    %c0_33 = arith.constant 0 : index
    %c0_34 = arith.constant 0 : index
    %c0_35 = arith.constant 0 : index
    %c0_36 = arith.constant 0 : index
    %c0_37 = arith.constant 0 : index
    %79 = vector.load %arg9[%c0_33, %c0_34, %c0_35, %c0_36, %c0_37] : memref<2x2x7x7x512xf32, #tpu.memory_space<vmem>>, vector<2x1x7x7x512xf32>
    %80 = vector.shape_cast %79 : vector<2x1x7x7x512xf32> to vector<2x7x7x512xf32>
    %81 = vector.shape_cast %78 : vector<2x7x7x512xf32> to vector<2x1x7x7x512xf32>
    tpu.vector_store %arg9[%c0_33, %c0_34, %c0_35, %c0_36, %c0_37], %81 {strides = array<i32>} : memref<2x2x7x7x512xf32, #tpu.memory_space<vmem>>, vector<2x1x7x7x512xf32>,
    %c1_38 = arith.constant 1 : index
    %c0_39 = arith.constant 0 : index
    %c0_40 = arith.constant 0 : index
    %c0_41 = arith.constant 0 : index
    %82 = vector.load %arg2[%c1_38, %c0_39, %c0_40, %c0_41] : memref<2x2x7x512xf32, #tpu.memory_space<vmem>>, vector<1x1x7x512xf32>
    %83 = vector.shape_cast %82 : vector<1x1x7x512xf32> to vector<7x512xf32>
    %c1_42 = arith.constant 1 : index
    %c1_43 = arith.constant 1 : index
    %c0_44 = arith.constant 0 : index
    %c0_45 = arith.constant 0 : index
    %84 = vector.load %arg2[%c1_42, %c1_43, %c0_44, %c0_45] : memref<2x2x7x512xf32, #tpu.memory_space<vmem>>, vector<1x1x7x512xf32>
    %85 = vector.shape_cast %84 : vector<1x1x7x512xf32> to vector<7x512xf32>
    %c1_46 = arith.constant 1 : index
    %c0_47 = arith.constant 0 : index
    %86 = vector.load %arg3[%c1_46, %c0_47] : memref<9x512xf32, #tpu.memory_space<vmem>>, vector<1x512xf32>
    %87 = vector.shape_cast %86 : vector<1x512xf32> to vector<512xf32>
    %c3 = arith.constant 3 : index
    %c0_48 = arith.constant 0 : index
    %88 = vector.load %arg3[%c3, %c0_48] : memref<9x512xf32, #tpu.memory_space<vmem>>, vector<1x512xf32>
    %89 = vector.shape_cast %88 : vector<1x512xf32> to vector<512xf32>
    %c5 = arith.constant 5 : index
    %c0_49 = arith.constant 0 : index
    %90 = vector.load %arg3[%c5, %c0_49] : memref<9x512xf32, #tpu.memory_space<vmem>>, vector<1x512xf32>
    %91 = vector.shape_cast %90 : vector<1x512xf32> to vector<512xf32>
    %c7 = arith.constant 7 : index
    %c0_50 = arith.constant 0 : index
    %92 = vector.load %arg3[%c7, %c0_50] : memref<9x512xf32, #tpu.memory_space<vmem>>, vector<1x512xf32>
    %93 = vector.shape_cast %92 : vector<1x512xf32> to vector<512xf32>
    %94 = vector.shape_cast %83 : vector<7x512xf32> to vector<1x1x7x512xf32>
    %95 = vector.broadcast %94 : vector<1x1x7x512xf32> to vector<2x7x7x512xf32>
    %96 = arith.mulf %0, %95 : vector<2x7x7x512xf32>
    %cst_51 = arith.constant dense<0.000000e+00> : vector<2x7x512xf32>
    %97 = vector.multi_reduction <add>, %96, %cst_51 [2] : vector<2x7x7x512xf32> to vector<2x7x512xf32>
    %98 = vector.shape_cast %87 : vector<512xf32> to vector<1x1x512xf32>
    %99 = vector.broadcast %98 : vector<1x1x512xf32> to vector<2x7x512xf32>
    %100 = arith.addf %97, %99 : vector<2x7x512xf32>
    %101 = vector.shape_cast %85 : vector<7x512xf32> to vector<1x7x1x512xf32>
    %102 = vector.broadcast %101 : vector<1x7x1x512xf32> to vector<2x7x7x512xf32>
    %103 = arith.mulf %0, %102 : vector<2x7x7x512xf32>
    %cst_52 = arith.constant dense<0.000000e+00> : vector<2x7x512xf32>
    %104 = vector.multi_reduction <add>, %103, %cst_52 [1] : vector<2x7x7x512xf32> to vector<2x7x512xf32>
    %105 = vector.shape_cast %89 : vector<512xf32> to vector<1x1x512xf32>
    %106 = vector.broadcast %105 : vector<1x1x512xf32> to vector<2x7x512xf32>
    %107 = arith.addf %104, %106 : vector<2x7x512xf32>
    %108 = tpu.concatenate %100, %1 in 1 : vector<2x7x512xf32>, vector<2x1x512xf32> -> vector<2x8x512xf32>
    %109 = tpu.concatenate %107, %1 in 1 : vector<2x7x512xf32>, vector<2x1x512xf32> -> vector<2x8x512xf32>
    %110 = tpu.concatenate %108, %109 in 0 : vector<2x8x512xf32>, vector<2x8x512xf32> -> vector<4x8x512xf32>
    %111 = vector.shape_cast %110 : vector<4x8x512xf32> to vector<32x512xf32>
    %c1_53 = arith.constant 1 : index
    %c0_54 = arith.constant 0 : index
    %c0_55 = arith.constant 0 : index
    %112 = vector.load %arg4[%c1_53, %c0_54, %c0_55] : memref<2x512x16xf32, #tpu.memory_space<vmem>>, vector<1x512x16xf32>
    %113 = vector.shape_cast %112 : vector<1x512x16xf32> to vector<512x16xf32>
    %cst_56 = arith.constant dense<0.000000e+00> : vector<32x16xf32>
    %114 = tpu.matmul %111, %113, %cst_56 {dimension_numbers = #tpu.dot_dimension_numbers<[1], [0], [0], [1], [0, 0, 1, 1], [], []>} : vector<32x512xf32>, vector<512x16xf32>, vector<32x16xf32> -> vector<32x16xf32>
    %c1_57 = arith.constant 1 : index
    %c0_58 = arith.constant 0 : index
    %115 = vector.load %arg5[%c1_57, %c0_58] : memref<2x16xf32, #tpu.memory_space<vmem>>, vector<1x16xf32>
    %116 = vector.shape_cast %115 : vector<1x16xf32> to vector<16xf32>
    %117 = vector.shape_cast %116 : vector<16xf32> to vector<1x16xf32>
    %118 = vector.broadcast %117 : vector<1x16xf32> to vector<32x16xf32>
    %119 = arith.addf %114, %118 : vector<32x16xf32>
    %cst_59 = arith.constant 3.000000e+00 : f32
    %120 = vector.broadcast %cst_59 : f32 to vector<32x16xf32>
    %121 = arith.addf %119, %120 : vector<32x16xf32>
    %cst_60 = arith.constant 0.000000e+00 : f32
    %cst_61 = arith.constant 6.000000e+00 : f32
    %122 = vector.broadcast %cst_60 : f32 to vector<32x16xf32>
    %123 = arith.maximumf %122, %121 : vector<32x16xf32>
    %124 = vector.broadcast %cst_61 : f32 to vector<32x16xf32>
    %125 = arith.minimumf %124, %123 : vector<32x16xf32>
    %cst_62 = arith.constant 0.166666672 : f32
    %126 = vector.broadcast %cst_62 : f32 to vector<32x16xf32>
    %127 = arith.mulf %125, %126 : vector<32x16xf32>
    %128 = arith.mulf %119, %127 : vector<32x16xf32>
    %c1_63 = arith.constant 1 : index
    %c0_64 = arith.constant 0 : index
    %c0_65 = arith.constant 0 : index
    %129 = vector.load %arg6[%c1_63, %c0_64, %c0_65] : memref<2x16x1024xf32, #tpu.memory_space<vmem>>, vector<1x16x1024xf32>
    %130 = vector.shape_cast %129 : vector<1x16x1024xf32> to vector<16x1024xf32>
    %cst_66 = arith.constant dense<0.000000e+00> : vector<32x1024xf32>
    %131 = tpu.matmul %128, %130, %cst_66 {dimension_numbers = #tpu.dot_dimension_numbers<[1], [0], [0], [1], [0, 0, 1, 1], [], []>} : vector<32x16xf32>, vector<16x1024xf32>, vector<32x1024xf32> -> vector<32x1024xf32>
    %132 = vector.extract_strided_slice %131 {offsets = [0, 0], sizes = [16, 512], strides = [1, 1]} : vector<32x1024xf32> to vector<16x512xf32>
    %133 = vector.shape_cast %91 : vector<512xf32> to vector<1x512xf32>
    %134 = vector.broadcast %133 : vector<1x512xf32> to vector<16x512xf32>
    %135 = arith.addf %132, %134 : vector<16x512xf32>
    %136 = arith.negf %135 : vector<16x512xf32>
    %137 = math.exp %136 : vector<16x512xf32>
    %cst_67 = arith.constant 1.000000e+00 : f32
    %138 = vector.broadcast %cst_67 : f32 to vector<16x512xf32>
    %139 = arith.addf %138, %137 : vector<16x512xf32>
    %140 = arith.divf %138, %139 : vector<16x512xf32>
    %141 = vector.extract_strided_slice %131 {offsets = [16, 512], sizes = [16, 512], strides = [1, 1]} : vector<32x1024xf32> to vector<16x512xf32>
    %142 = vector.shape_cast %93 : vector<512xf32> to vector<1x512xf32>
    %143 = vector.broadcast %142 : vector<1x512xf32> to vector<16x512xf32>
    %144 = arith.addf %141, %143 : vector<16x512xf32>
    %145 = arith.negf %144 : vector<16x512xf32>
    %146 = math.exp %145 : vector<16x512xf32>
    %cst_68 = arith.constant 1.000000e+00 : f32
    %147 = vector.broadcast %cst_68 : f32 to vector<16x512xf32>
    %148 = arith.addf %147, %146 : vector<16x512xf32>
    %149 = arith.divf %147, %148 : vector<16x512xf32>
    %150 = vector.shape_cast %140 : vector<16x512xf32> to vector<2x8x512xf32>
    %151 = vector.extract_strided_slice %150 {offsets = [0, 0, 0], sizes = [2, 7, 512], strides = [1, 1, 1]} : vector<2x8x512xf32> to vector<2x7x512xf32>
    %152 = vector.shape_cast %149 : vector<16x512xf32> to vector<2x8x512xf32>
    %153 = vector.extract_strided_slice %152 {offsets = [0, 0, 0], sizes = [2, 7, 512], strides = [1, 1, 1]} : vector<2x8x512xf32> to vector<2x7x512xf32>
    %154 = vector.shape_cast %151 : vector<2x7x512xf32> to vector<2x7x1x512xf32>
    %155 = vector.shape_cast %153 : vector<2x7x512xf32> to vector<2x1x7x512xf32>
    %156 = vector.broadcast %154 : vector<2x7x1x512xf32> to vector<2x7x7x512xf32>
    %157 = vector.broadcast %155 : vector<2x1x7x512xf32> to vector<2x7x7x512xf32>
    %158 = arith.mulf %156, %157 : vector<2x7x7x512xf32>
    %c0_69 = arith.constant 0 : index
    %c1_70 = arith.constant 1 : index
    %c0_71 = arith.constant 0 : index
    %c0_72 = arith.constant 0 : index
    %c0_73 = arith.constant 0 : index
    %159 = vector.load %arg9[%c0_69, %c1_70, %c0_71, %c0_72, %c0_73] : memref<2x2x7x7x512xf32, #tpu.memory_space<vmem>>, vector<2x1x7x7x512xf32>
    %160 = vector.shape_cast %159 : vector<2x1x7x7x512xf32> to vector<2x7x7x512xf32>
    %161 = vector.shape_cast %158 : vector<2x7x7x512xf32> to vector<2x1x7x7x512xf32>
    tpu.vector_store %arg9[%c0_69, %c1_70, %c0_71, %c0_72, %c0_73], %161 {strides = array<i32>} : memref<2x2x7x7x512xf32, #tpu.memory_space<vmem>>, vector<2x1x7x7x512xf32>,
    %162 = arith.maximumf %78, %158 : vector<2x7x7x512xf32>
    %163 = arith.mulf %0, %162 : vector<2x7x7x512xf32>
    %c8 = arith.constant 8 : index
    %c0_74 = arith.constant 0 : index
    %164 = vector.load %arg3[%c8, %c0_74] : memref<9x512xf32, #tpu.memory_space<vmem>>, vector<1x512xf32>
    %165 = vector.shape_cast %164 : vector<1x512xf32> to vector<512xf32>
    %c0_75 = arith.constant 0 : index
    %c0_76 = arith.constant 0 : index
    %c0_77 = arith.constant 0 : index
    %166 = vector.load %arg7[%c0_75, %c0_76, %c0_77] : memref<7x7x512xf32, #tpu.memory_space<vmem>>, vector<7x7x512xf32>
    %167 = vector.shape_cast %166 : vector<7x7x512xf32> to vector<1x7x7x512xf32>
    %168 = vector.broadcast %167 : vector<1x7x7x512xf32> to vector<2x7x7x512xf32>
    %169 = arith.mulf %163, %168 : vector<2x7x7x512xf32>
    %cst_78 = arith.constant dense<0.000000e+00> : vector<2x512xf32>
    %170 = vector.multi_reduction <add>, %169, %cst_78 [1, 2] : vector<2x7x7x512xf32> to vector<2x512xf32>
    %171 = vector.shape_cast %165 : vector<512xf32> to vector<1x512xf32>
    %172 = vector.broadcast %171 : vector<1x512xf32> to vector<2x512xf32>
    %173 = arith.addf %170, %172 : vector<2x512xf32>
    %c0_79 = arith.constant 0 : index
    %c0_80 = arith.constant 0 : index
    %174 = vector.load %arg8[%c0_79, %c0_80] : memref<2x512xf32, #tpu.memory_space<vmem>>, vector<2x512xf32>
    tpu.vector_store %arg8[%c0_79, %c0_80], %173 {strides = array<i32>} : memref<2x512xf32, #tpu.memory_space<vmem>>, vector<2x512xf32>,
    return
  }
  func.func @transform_0(%arg0: i32) -> (i32, i32, i32, i32) {
    %c0_i32 = arith.constant 0 : i32
    %c0_i32_0 = arith.constant 0 : i32
    %c0_i32_1 = arith.constant 0 : i32
    %c0_i32_2 = arith.constant 0 : i32
    return %arg0, %c0_i32, %c0_i32_0, %c0_i32_1 : i32, i32, i32, i32
  }
  func.func @transform_1(%arg0: i32) -> (i32, i32, i32, i32) {
    %c0_i32 = arith.constant 0 : i32
    %c0_i32_0 = arith.constant 0 : i32
    %c0_i32_1 = arith.constant 0 : i32
    %c0_i32_2 = arith.constant 0 : i32
    %c0_i32_3 = arith.constant 0 : i32
    return %c0_i32, %c0_i32_0, %c0_i32_1, %c0_i32_2 : i32, i32, i32, i32
  }
  func.func @transform_2(%arg0: i32) -> (i32, i32) {
    %c0_i32 = arith.constant 0 : i32
    %c0_i32_0 = arith.constant 0 : i32
    %c0_i32_1 = arith.constant 0 : i32
    return %c0_i32, %c0_i32_0 : i32, i32
  }
  func.func @transform_3(%arg0: i32) -> (i32, i32, i32) {
    %c0_i32 = arith.constant 0 : i32
    %c0_i32_0 = arith.constant 0 : i32
    %c0_i32_1 = arith.constant 0 : i32
    %c0_i32_2 = arith.constant 0 : i32
    return %c0_i32, %c0_i32_0, %c0_i32_1 : i32, i32, i32
  }
  func.func @transform_4(%arg0: i32) -> (i32, i32) {
    %c0_i32 = arith.constant 0 : i32
    %c0_i32_0 = arith.constant 0 : i32
    %c0_i32_1 = arith.constant 0 : i32
    return %c0_i32, %c0_i32_0 : i32, i32
  }
  func.func @transform_5(%arg0: i32) -> (i32, i32, i32) {
    %c0_i32 = arith.constant 0 : i32
    %c0_i32_0 = arith.constant 0 : i32
    %c0_i32_1 = arith.constant 0 : i32
    %c0_i32_2 = arith.constant 0 : i32
    return %c0_i32, %c0_i32_0, %c0_i32_1 : i32, i32, i32
  }
  func.func @transform_6(%arg0: i32) -> (i32, i32, i32) {
    %c0_i32 = arith.constant 0 : i32
    %c0_i32_0 = arith.constant 0 : i32
    %c0_i32_1 = arith.constant 0 : i32
    %c0_i32_2 = arith.constant 0 : i32
    return %c0_i32, %c0_i32_0, %c0_i32_1 : i32, i32, i32
  }
  func.func @transform_7(%arg0: i32) -> (i32, i32) {
    %c0_i32 = arith.constant 0 : i32
    %c0_i32_0 = arith.constant 0 : i32
    return %arg0, %c0_i32 : i32, i32
  }
  func.func @transform_8(%arg0: i32) -> (i32, i32, i32, i32, i32) {
    %c0_i32 = arith.constant 0 : i32
    %c0_i32_0 = arith.constant 0 : i32
    %c0_i32_1 = arith.constant 0 : i32
    %c0_i32_2 = arith.constant 0 : i32
    %c0_i32_3 = arith.constant 0 : i32
    return %arg0, %c0_i32, %c0_i32_0, %c0_i32_1, %c0_i32_2 : i32, i32, i32, i32, i32
  }
}

</mosaic_0001>

<bundles_post_ra>
// kernel: tpu_custom_call.1
= control target key start
LH: loop header
LB: loop body
LE: loop exit
PB: predicated region body
PF: predicated region fallthrough
CT: control target
= control target key end

     0   :  { %v551_v60 = vlaneseq  ;;  %vm157_vm0 = vcmask 1046528   ;;  %vm1084_vm1 = vcmask 1041409   ;;  %vm1087_vm2 = vcmask 1042434   ;;  %s11735_s0 = inlined_call_operand.vmem [shape: f32[2,7,7,512], index: 0, kind: input, shape index: {}]   ;;  %s11736_s1 = inlined_call_operand.vmem [shape: f32[2,2,7,512], index: 1, kind: input, shape index: {}]   ;;  %s11737_s2 = inlined_call_operand.vmem [shape: f32[9,512], index: 2, kind: input, shape index: {}]   ;;  %s11738_s3 = inlined_call_operand.vmem [shape: f32[2,512,16], index: 3, kind: input, shape index: {}]   ;;  %s11739_s4 = inlined_call_operand.vmem [shape: f32[2,16], index: 4, kind: input, shape index: {}]   ;;  %s11740_s5 = inlined_call_operand.vmem [shape: f32[2,16,1024], index: 5, kind: input, shape index: {}]   ;;  %s11741_s6 = inlined_call_operand.vmem [shape: f32[7,7,512], index: 6, kind: input, shape index: {}]   ;;  %s11742_s7 = inlined_call_operand.hbm [shape: f32[2,512], index: 7, kind: output, shape index: {0}]   ;;  %s11743_s8 = inlined_call_operand.vmem [shape: f32[2,2,7,7,512], index: 8, kind: output, shape index: {1}]  }
   0x1   :  { %v1225_v0 = vld [vmem:[%s11738_s3 + $0x80] sm:$0xff]  ;;  %v1226_v1 = vld [vmem:[%s11738_s3 + $0x88] sm:$0xff]  ;;  %v1227_v11 = vld [vmem:[%s11738_s3 + $0x90] sm:$0xff]  ;;  %vm1090_vm3 = vcmask 1043459   ;;  %vm1093_vm4 = vcmask 1044484   ;;  %vm1096_vm5 = vcmask 1045509  }
   0x2   :  { %v1209_v2 = vld [vmem:[%s11738_s3] sm:$0xff]  ;;  %v5841_v3 = vpack.c.bf16 %v1226_v1, %v1225_v0  ;;  %v1210_v4 = vld [vmem:[%s11738_s3 + $0x8] sm:$0xff]  ;;  %v1228_v13 = vld [vmem:[%s11738_s3 + $0x98] sm:$0xff]  ;;  %vm1099_vm6 = vcmask 1046534  }
   0x3   :  { %v1257_v5 = vld [vmem:[%s11738_s3 + $0x180] sm:$0xff]  ;;  %v1258_v6 = vld [vmem:[%s11738_s3 + $0x188] sm:$0xff]  ;;  %v5843_v7 = vpack.c.bf16 %v1210_v4, %v1209_v2  ;;  %v1211_v14 = vld [vmem:[%s11738_s3 + $0x10] sm:$0xff]  ;;  %v5845_v16 = vpack.c.bf16 %v1228_v13, %v1227_v11 }
   0x4   :  { %v5873_v8 = vpack.c.bf16 %v1258_v6, %v1257_v5  ;;  %v1241_v9 = vld [vmem:[%s11738_s3 + $0x100] sm:$0xff]  ;;  %v1242_v10 = vld [vmem:[%s11738_s3 + $0x108] sm:$0xff]  ;;  %5842 = vmatprep.subr.bf16.mxu0 %v5841_v3  ;;  %v1212_v15 = vld [vmem:[%s11738_s3 + $0x18] sm:$0xff] }
   0x5   :  { %v5875_v12 = vpack.c.bf16 %v1242_v10, %v1241_v9  ;;  %5844 = vmatpush3.bf16.msra.mxu0 %v5843_v7  ;;  %v5847_v17 = vpack.c.bf16 %v1212_v15, %v1211_v14  ;;  %v1259_v18 = vld [vmem:[%s11738_s3 + $0x190] sm:$0xff]  ;;  %v1260_v19 = vld [vmem:[%s11738_s3 + $0x198] sm:$0xff]  ;;  %v1229_v23 = vld [vmem:[%s11738_s3 + $0xa0] sm:$0xff] }
   0x6   :  { %5874 = vmatprep.subr.bf16.mxu1 %v5873_v8  ;;  %v1243_v20 = vld [vmem:[%s11738_s3 + $0x110] sm:$0xff]  ;;  %v5877_v21 = vpack.c.bf16 %v1260_v19, %v1259_v18  ;;  %v1244_v22 = vld [vmem:[%s11738_s3 + $0x118] sm:$0xff]  ;;  %v1230_v24 = vld [vmem:[%s11738_s3 + $0xa8] sm:$0xff]  ;;  %5846 = vmatprep.subr.bf16.mxu0 %v5845_v16  ;;  %v6548_v16 = vshrl.u32 %v551_v60, 7 }
   0x7   :  { %5876 = vmatpush3.bf16.msra.mxu1 %v5875_v12  ;;  %v5879_v25 = vpack.c.bf16 %v1244_v22, %v1243_v20  ;;  %v5849_v26 = vpack.c.bf16 %v1230_v24, %v1229_v23  ;;  %v1213_v27 = vld [vmem:[%s11738_s3 + $0x20] sm:$0xff]  ;;  %v1214_v28 = vld [vmem:[%s11738_s3 + $0x28] sm:$0xff]  ;;  %v1231_v35 = vld [vmem:[%s11738_s3 + $0xb0] sm:$0xff] }
   0x8   :  { %v1261_v29 = vld [vmem:[%s11738_s3 + $0x1a0] sm:$0xff]  ;;  %5878 = vmatprep.subr.bf16.mxu1 %v5877_v21  ;;  %v1262_v30 = vld [vmem:[%s11738_s3 + $0x1a8] sm:$0xff]  ;;  %v5851_v33 = vpack.c.bf16 %v1214_v28, %v1213_v27  ;;  %v1232_v36 = vld [vmem:[%s11738_s3 + $0xb8] sm:$0xff]  ;;  %12005 = vst [vmem:[#allocation5_spill] sm:$0xff] %v6548_v16  ;;  %v6577_v24 = vsub.s32 1, %v6548_v16 }
   0x9   :  { %v1245_v31 = vld [vmem:[%s11738_s3 + $0x120] sm:$0xff]  ;;  %v1246_v32 = vld [vmem:[%s11738_s3 + $0x128] sm:$0xff]  ;;  %5848 = vmatpush3.bf16.msra.mxu0 %v5847_v17  ;;  %v5881_v34 = vpack.c.bf16 %v1262_v30, %v1261_v29  ;;  %v1215_v37 = vld [vmem:[%s11738_s3 + $0x30] sm:$0xff]  ;;  %v5853_v39 = vpack.c.bf16 %v1232_v36, %v1231_v35 }
   0xa   :  { %5850 = vmatprep.subr.bf16.mxu0 %v5849_v26  ;;  %v5883_v38 = vpack.c.bf16 %v1246_v32, %v1245_v31  ;;  %v1216_v40 = vld [vmem:[%s11738_s3 + $0x38] sm:$0xff]  ;;  %v1263_v41 = vld [vmem:[%s11738_s3 + $0x1b0] sm:$0xff]  ;;  %v1233_v46 = vld [vmem:[%s11738_s3 + $0xc0] sm:$0xff]  ;;  %12006 = vst [vmem:[#allocation6_spill] sm:$0xff] %v6577_v24  ;;  %v6594_v31 = vsub.s32 3, %v6548_v16 }
   0xb   :  { %5880 = vmatpush3.bf16.msra.mxu1 %v5879_v25  ;;  %v1264_v42 = vld [vmem:[%s11738_s3 + $0x1b8] sm:$0xff]  ;;  %v1247_v44 = vld [vmem:[%s11738_s3 + $0x130] sm:$0xff]  ;;  %v1234_v47 = vld [vmem:[%s11738_s3 + $0xc8] sm:$0xff]  ;;  %v5855_v48 = vpack.c.bf16 %v1216_v40, %v1215_v37  ;;  %v6580_v25 = vsub.s32 0, %v6548_v16 }
   0xc   :  { %5882 = vmatprep.subr.bf16.mxu1 %v5881_v34  ;;  %v5885_v43 = vpack.c.bf16 %v1264_v42, %v1263_v41  ;;  %v1248_v45 = vld [vmem:[%s11738_s3 + $0x138] sm:$0xff]  ;;  %v1265_v49 = vld [vmem:[%s11738_s3 + $0x1c0] sm:$0xff]  ;;  %v1266_v50 = vld [vmem:[%s11738_s3 + $0x1c8] sm:$0xff]  ;;  %v5857_v52 = vpack.c.bf16 %v1234_v47, %v1233_v46  ;;  %12008 = vst [vmem:[#allocation8_spill] sm:$0xff] %v6594_v31 }
   0xd   :  { %5852 = vmatpush3.bf16.msra.mxu0 %v5851_v33  ;;  %v5887_v51 = vpack.c.bf16 %v1248_v45, %v1247_v44  ;;  %v1217_v53 = vld [vmem:[%s11738_s3 + $0x40] sm:$0xff]  ;;  %v1218_v54 = vld [vmem:[%s11738_s3 + $0x48] sm:$0xff]  ;;  %v5889_v56 = vpack.c.bf16 %v1266_v50, %v1265_v49  ;;  %v1235_v58 = vld [vmem:[%s11738_s3 + $0xd0] sm:$0xff]  ;;  %12007 = vst [vmem:[#allocation7_spill] sm:$0xff] %v6580_v25 }
   0xe   :  { %5854 = vmatprep.subr.bf16.mxu0 %v5853_v39  ;;  %v1249_v55 = vld [vmem:[%s11738_s3 + $0x140] sm:$0xff]  ;;  %v1250_v57 = vld [vmem:[%s11738_s3 + $0x148] sm:$0xff]  ;;  %v1236_v59 = vld [vmem:[%s11738_s3 + $0xd8] sm:$0xff]  ;;  %v5859_v1 = vpack.c.bf16 %v1218_v54, %v1217_v53  ;;  %v6639_v53 = vsub.s32 2, %v6548_v16 }
   0xf   :  { %5884 = vmatpush3.bf16.msra.mxu1 %v5883_v38  ;;  %v1219_v61 = vld [vmem:[%s11738_s3 + $0x50] sm:$0xff]  ;;  %v1220_v62 = vld [vmem:[%s11738_s3 + $0x58] sm:$0xff]  ;;  %v1237_v4 = vld [vmem:[%s11738_s3 + $0xe0] sm:$0xff]  ;;  %v5891_v6 = vpack.c.bf16 %v1250_v57, %v1249_v55  ;;  %v5861_v7 = vpack.c.bf16 %v1236_v59, %v1235_v58 }
  0x10   :  { %5886 = vmatprep.subr.bf16.mxu1 %v5885_v43  ;;  %v1267_v63 = vld [vmem:[%s11738_s3 + $0x1d0] sm:$0xff]  ;;  %v1268_v0 = vld [vmem:[%s11738_s3 + $0x1d8] sm:$0xff]  ;;  %v1238_v5 = vld [vmem:[%s11738_s3 + $0xe8] sm:$0xff]  ;;  %v5863_v20 = vpack.c.bf16 %v1220_v62, %v1219_v61  ;;  %12009 = vst [vmem:[#allocation9_spill] sm:$0xff] %v6639_v53 }
  0x11   :  { %5856 = vmatpush3.bf16.msra.mxu0 %v5855_v48  ;;  %v1251_v2 = vld [vmem:[%s11738_s3 + $0x150] sm:$0xff]  ;;  %v1252_v3 = vld [vmem:[%s11738_s3 + $0x158] sm:$0xff]  ;;  %v6520_v8 = vld [vmem:[%s11738_s3 + $0x60] sm:$0xff]  ;;  %v5893_v12 = vpack.c.bf16 %v1268_v0, %v1267_v63  ;;  %v5865_v27 = vpack.c.bf16 %v1238_v5, %v1237_v4 }
  0x12   :  { %5858 = vmatprep.subr.bf16.mxu0 %v5857_v52  ;;  %v6525_v9 = vld [vmem:[%s11738_s3 + $0x68] sm:$0xff]  ;;  %v1269_v10 = vld [vmem:[%s11738_s3 + $0x1e0] sm:$0xff]  ;;  %v6546_v15 = vld [vmem:[%s11738_s3 + $0xf0] sm:$0xff]  ;;  %v5895_v26 = vpack.c.bf16 %v1252_v3, %v1251_v2 }
  0x13   :  { %5888 = vmatpush3.bf16.msra.mxu1 %v5887_v51  ;;  %v1270_v11 = vld [vmem:[%s11738_s3 + $0x1e8] sm:$0xff]  ;;  %v6536_v13 = vld [vmem:[%s11738_s3 + $0x160] sm:$0xff]  ;;  %v1240_v17 = vld [vmem:[%s11738_s3 + $0xf8] sm:$0xff]  ;;  %v5867_v32 = vpack.c.bf16 %v6525_v9, %v6520_v8 }
  0x14   :  { %5890 = vmatprep.subr.bf16.mxu1 %v5889_v56  ;;  %v6541_v14 = vld [vmem:[%s11738_s3 + $0x168] sm:$0xff]  ;;  %v6556_v18 = vld [vmem:[%s11738_s3 + $0x70] sm:$0xff]  ;;  %v6561_v19 = vld [vmem:[%s11738_s3 + $0x78] sm:$0xff]  ;;  %v5897_v33 = vpack.c.bf16 %v1270_v11, %v1269_v10  ;;  %v5869_v38 = vpack.c.bf16 %v1240_v17, %v6546_v15 }
  0x15   :  { %5860 = vmatpush3.bf16.msra.mxu0 %v5859_v1  ;;  %v6566_v21 = vld [vmem:[%s11738_s3 + $0x1f0] sm:$0xff]  ;;  %v1272_v22 = vld [vmem:[%s11738_s3 + $0x1f8] sm:$0xff]  ;;  %v30_v29 = vld [vmem:[%s11735_s0 + $0x8] sm:$0x7f]  ;;  %v5899_v34 = vpack.c.bf16 %v6541_v14, %v6536_v13  ;;  %v5871_v39 = vpack.c.bf16 %v6561_v19, %v6556_v18 }
  0x16   :  { %v6574_v23 = vld [vmem:[%s11738_s3 + $0x170] sm:$0xff]  ;;  %5862 = vmatprep.subr.bf16.mxu0 %v5861_v7  ;;  %v6585_v28 = vld [vmem:[%s11738_s3 + $0x178] sm:$0xff]  ;;  %v34_v30 = vld [vmem:[%s11735_s0 + $0x28] sm:$0x7f]  ;;  %v5901_v40 = vpack.c.bf16 %v1272_v22, %v6566_v21 }
  0x17   :  { %5892 = vmatpush3.bf16.msra.mxu1 %v5891_v6  ;;  %v38_v35 = vld [vmem:[%s11735_s0 + $0x48] sm:$0x7f]  ;;  %v5903_v41 = vpack.c.bf16 %v6585_v28, %v6574_v23  ;;  %v29_v62 = vld [vmem:[%s11735_s0] sm:$0x7f] }
  0x18   :  { %5894 = vmatprep.subr.bf16.mxu1 %v5893_v12  ;;  %v42_v36 = vld [vmem:[%s11735_s0 + $0x68] sm:$0x7f]  ;;  %v33_v7 = vld [vmem:[%s11735_s0 + $0x20] sm:$0x7f] }
  0x19   :  { %v46_v37 = vld [vmem:[%s11735_s0 + $0x88] sm:$0x7f]  ;;  %5864 = vmatpush3.bf16.msra.mxu0 %v5863_v20  ;;  %v6661_v8 = vld [vmem:[%s11736_s1] sm:$0x7f] }
  0x1a   :  { %v50_v42 = vld [vmem:[%s11735_s0 + $0xa8] sm:$0x7f]  ;;  %5866 = vmatprep.subr.bf16.mxu0 %v5865_v27  ;;  %v101_v12 = vmul.f32 %v6661_v8, %v29_v62  ;;  %v37_v18 = vld [vmem:[%s11735_s0 + $0x40] sm:$0x7f]  ;;  %v105_v22 = vmul.f32 %v6661_v8, %v33_v7 }
  0x1b   :  { %v54_v43 = vld [vmem:[%s11735_s0 + $0xc8] sm:$0x7f]  ;;  %5896 = vmatpush3.bf16.msra.mxu1 %v5895_v26 }
  0x1c   :  { %v6624_v44 = vld [vmem:[%s11736_s1 + $0x8] sm:$0x7f]  ;;  %5898 = vmatprep.subr.bf16.mxu1 %v5897_v33 }
  0x1d   :  { %v102_v45 = vmul.f32 %v6624_v44, %v30_v29  ;;  %v106_v46 = vmul.f32 %v6624_v44, %v34_v30  ;;  %v110_v47 = vmul.f32 %v6624_v44, %v38_v35  ;;  %v114_v48 = vmul.f32 %v6624_v44, %v42_v36  ;;  %v6633_v49 = vld [vmem:[%s11737_s2] ss:$8 sm:$0xf]  ;;  %5868 = vmatpush3.bf16.msra.mxu0 %v5867_v32 }
  0x1e   :  { %v118_v50 = vmul.f32 %v6624_v44, %v46_v37  ;;  %v122_v51 = vmul.f32 %v6624_v44, %v50_v42  ;;  %v126_v52 = vmul.f32 %v6624_v44, %v54_v43  ;;  %v6653_v2 = vrot.slane %v6633_v49, %v6577_v24  ;;  %5870 = vmatprep.subr.bf16.mxu0 %v5869_v38  ;;  %v41_v29 = vld [vmem:[%s11735_s0 + $0x60] sm:$0x7f] }
  0x1f   :  { %v165_v54 = vsel %vm157_vm0, %v102_v45, 0.0  ;;  %v193_v55 = vsel %vm157_vm0, %v106_v46, 0.0  ;;  %v221_v56 = vsel %vm157_vm0, %v110_v47, 0.0  ;;  %v249_v57 = vsel %vm157_vm0, %v114_v48, 0.0  ;;  %5900 = vmatpush3.bf16.msra.mxu1 %v5899_v34 }
  0x20   :  { %v166_v58 = vrot.slane %v165_v54, 4  ;;  %v194_v59 = vrot.slane %v193_v55, 4  ;;  %v222_v60 = vrot.slane %v221_v56, 4  ;;  %v250_v61 = vrot.slane %v249_v57, 4  ;;  %5902 = vmatprep.subr.bf16.mxu1 %v5901_v40 }
  0x21   :  { %v277_v63 = vsel %vm157_vm0, %v118_v50, 0.0  ;;  %v305_v0 = vsel %vm157_vm0, %v122_v51, 0.0  ;;  %v333_v1 = vsel %vm157_vm0, %v126_v52, 0.0  ;;  %5872 = vmatpush3.bf16.msra.mxu0 %v5871_v39  ;;  %v109_v34 = vmul.f32 %v6661_v8, %v37_v18  ;;  %v45_v39 = vld [vmem:[%s11735_s0 + $0x80] sm:$0x7f] }
  0x22   :  { %v167_v3 = vadd.f32 %v166_v58, %v165_v54  ;;  %v195_v4 = vadd.f32 %v194_v59, %v193_v55  ;;  %v223_v5 = vadd.f32 %v222_v60, %v221_v56  ;;  %v278_v6 = vrot.slane %v277_v63, 4  ;;  %v49_v50 = vld [vmem:[%s11735_s0 + $0xa0] sm:$0x7f] }
  0x23   :  { %v251_v9 = vadd.f32 %v250_v61, %v249_v57  ;;  %v306_v10 = vrot.slane %v305_v0, 4  ;;  %v334_v11 = vrot.slane %v333_v1, 4  ;;  %5904 = vmatpush3.bf16.msra.mxu1 %v5903_v41  ;;  %v113_v43 = vmul.f32 %v6661_v8, %v41_v29  ;;  %v53_v55 = vld [vmem:[%s11735_s0 + $0xc0] sm:$0x7f] }
  0x24   :  { %v168_v13 = vrot.slane %v167_v3, 2  ;;  %v196_v14 = vrot.slane %v195_v4, 2  ;;  %v224_v15 = vrot.slane %v223_v5, 2  ;;  %v279_v17 = vadd.f32 %v278_v6, %v277_v63 }
  0x25   :  { %v252_v19 = vrot.slane %v251_v9, 2  ;;  %v307_v20 = vadd.f32 %v306_v10, %v305_v0  ;;  %v335_v21 = vadd.f32 %v334_v11, %v333_v1  ;;  %v117_v56 = vmul.f32 %v6661_v8, %v45_v39 }
  0x26   :  { %v169_v23 = vadd.f32 %v168_v13, %v167_v3  ;;  %v197_v26 = vadd.f32 %v196_v14, %v195_v4  ;;  %v225_v27 = vadd.f32 %v224_v15, %v223_v5  ;;  %v280_v28 = vrot.slane %v279_v17, 2 }
  0x27   :  { %v253_v30 = vadd.f32 %v252_v19, %v251_v9  ;;  %v308_v32 = vrot.slane %v307_v20, 2  ;;  %v336_v33 = vrot.slane %v335_v21, 2  ;;  %v121_v0 = vmul.f32 %v6661_v8, %v49_v50 }
  0x28   :  { %v170_v35 = vrot.slane %v169_v23, 1  ;;  %v198_v36 = vrot.slane %v197_v26, 1  ;;  %v226_v37 = vrot.slane %v225_v27, 1  ;;  %v281_v38 = vadd.f32 %v280_v28, %v279_v17 }
  0x29   :  { %v254_v40 = vrot.slane %v253_v30, 1  ;;  %v309_v41 = vadd.f32 %v308_v32, %v307_v20  ;;  %v337_v42 = vadd.f32 %v336_v33, %v335_v21  ;;  %v125_v5 = vmul.f32 %v6661_v8, %v53_v55 }
  0x2a   :  { %v171_v45 = vadd.f32 %v170_v35, %v169_v23  ;;  %v199_v46 = vadd.f32 %v198_v36, %v197_v26  ;;  %v227_v47 = vadd.f32 %v226_v37, %v225_v27  ;;  %v282_v48 = vrot.slane %v281_v38, 1 }
  0x2b   :  { %v255_v51 = vadd.f32 %v254_v40, %v253_v30  ;;  %v310_v52 = vrot.slane %v309_v41, 1  ;;  %v338_v54 = vrot.slane %v337_v42, 1  ;;  %v158_v10 = vsel %vm157_vm0, %v101_v12, 0.0 }
  0x2c   :  { %v283_v57 = vadd.f32 %v282_v48, %v281_v38  ;;  %v572_v58 = vadd.f32 %v6653_v2, %v171_v45  ;;  %v576_v59 = vadd.f32 %v6653_v2, %v199_v46  ;;  %v580_v60 = vadd.f32 %v6653_v2, %v227_v47  ;;  %v32_v48 = vld [vmem:[%s11735_s0 + $0x18] sm:$0x7f] }
  0x2d   :  { %v311_v61 = vadd.f32 %v310_v52, %v309_v41  ;;  %v339_v62 = vadd.f32 %v338_v54, %v337_v42  ;;  %v584_v63 = vadd.f32 %v6653_v2, %v255_v51  ;;  %v159_v14 = vrot.slane %v158_v10, 4 }
  0x2e   :  { %v588_v1 = vadd.f32 %v6653_v2, %v283_v57  ;;  %v1101_v3 = vrot.slane %v576_v59, 7  ;;  %v1103_v4 = vrot.slane %v580_v60, 6  ;;  %v186_v15 = vsel %vm157_vm0, %v105_v22, 0.0  ;;  %v36_v59 = vld [vmem:[%s11735_s0 + $0x38] sm:$0x7f] }
  0x2f   :  { %v592_v6 = vadd.f32 %v6653_v2, %v311_v61  ;;  %v596_v7 = vadd.f32 %v6653_v2, %v339_v62  ;;  %v1105_v9 = vrot.slane %v584_v63, 5  ;;  %v187_v20 = vrot.slane %v186_v15, 4  ;;  %v6719_v60 = vld [vmem:[%s11736_s1 + $0x18] sm:$0x7f] }
  0x30   :  { %v1102_v11 = vsel %vm1084_vm1, %v1101_v3, %v572_v58  ;;  %v1107_v13 = vrot.slane %v588_v1, 4  ;;  %v160_v23 = vadd.f32 %v159_v14, %v158_v10  ;;  %v214_v26 = vsel %vm157_vm0, %v109_v34, 0.0  ;;  %v44_v1 = vld [vmem:[%s11735_s0 + $0x78] sm:$0x7f] }
  0x31   :  { %v1104_v17 = vsel %vm1087_vm2, %v1103_v4, %v1102_v11  ;;  %v1109_v18 = vrot.slane %v592_v6, 3  ;;  %v1111_v19 = vrot.slane %v596_v7, 2  ;;  %v242_v27 = vsel %vm157_vm0, %v113_v43, 0.0 }
  0x32   :  { %v1106_v21 = vsel %vm1090_vm3, %v1105_v9, %v1104_v17  ;;  %v188_v28 = vadd.f32 %v187_v20, %v186_v15  ;;  %v215_v29 = vrot.slane %v214_v26, 4  ;;  %v243_v30 = vrot.slane %v242_v27, 4  ;;  %v52_v20 = vld [vmem:[%s11735_s0 + $0xb8] sm:$0x7f] }
  0x33   :  { %v1108_v12 = vsel %vm1093_vm4, %v1107_v13, %v1106_v21  ;;  %v161_v22 = vrot.slane %v160_v23, 2  ;;  %v270_v33 = vsel %vm157_vm0, %v117_v56, 0.0  ;;  %v298_v35 = vsel %vm157_vm0, %v121_v0, 0.0  ;;  %v40_v0 = vld [vmem:[%s11735_s0 + $0x58] sm:$0x7f] }
  0x34   :  { %v1110_v32 = vsel %vm1096_vm5, %v1109_v18, %v1108_v12  ;;  %v189_v37 = vrot.slane %v188_v28, 2  ;;  %v216_v38 = vadd.f32 %v215_v29, %v214_v26  ;;  %v244_v39 = vadd.f32 %v243_v30, %v242_v27 }
  0x35   :  { %v1112_v36 = vsel %vm1099_vm6, %v1111_v19, %v1110_v32  ;;  %v162_v34 = vadd.f32 %v161_v22, %v160_v23  ;;  %v271_v40 = vrot.slane %v270_v33, 4  ;;  %v299_v41 = vrot.slane %v298_v35, 4  ;;  %v48_v19 = vld [vmem:[%s11735_s0 + $0x98] sm:$0x7f] }
  0x36   :  { %5419 = vmatprep.mubr.msk.f32.mxu0 %vm157_vm0, %v1112_v36  ;;  %v326_v42 = vsel %vm157_vm0, %v125_v5, 0.0  ;;  %v190_v43 = vadd.f32 %v189_v37, %v188_v28  ;;  %v217_v45 = vrot.slane %v216_v38, 2  ;;  %v245_v46 = vrot.slane %v244_v39, 2  ;;  %v56_v32 = vld [vmem:[%s11735_s0 + $0xd8] sm:$0x7f] }
  0x37   :  { %v327_v47 = vrot.slane %v326_v42, 4  ;;  %v163_v50 = vrot.slane %v162_v34, 1  ;;  %v272_v51 = vadd.f32 %v271_v40, %v270_v33  ;;  %v300_v52 = vadd.f32 %v299_v41, %v298_v35 }
  0x38   :  { %v6711_v54 = vrot.slane %v6633_v49, %v6580_v25  ;;  %v191_v55 = vrot.slane %v190_v43, 1  ;;  %v218_v56 = vadd.f32 %v217_v45, %v216_v38  ;;  %v246_v57 = vadd.f32 %v245_v46, %v244_v39 }
  0x39   :  { %v328_v58 = vadd.f32 %v327_v47, %v326_v42  ;;  %v164_v61 = vadd.f32 %v163_v50, %v162_v34  ;;  %v273_v62 = vrot.slane %v272_v51, 2  ;;  %v301_v63 = vrot.slane %v300_v52, 2 }
  0x3a   :  { %v104_v3 = vmul.f32 %v6719_v60, %v32_v48  ;;  %v192_v4 = vadd.f32 %v191_v55, %v190_v43  ;;  %v219_v5 = vrot.slane %v218_v56, 1  ;;  %v247_v6 = vrot.slane %v246_v57, 1 }
  0x3b   :  { %v329_v7 = vrot.slane %v328_v58, 2  ;;  %v274_v9 = vadd.f32 %v273_v62, %v272_v51  ;;  %v302_v10 = vadd.f32 %v301_v63, %v300_v52  ;;  %v571_v11 = vadd.f32 %v6711_v54, %v164_v61 }
  0x3c   :  { %v108_v13 = vmul.f32 %v6719_v60, %v36_v59  ;;  %v220_v14 = vadd.f32 %v219_v5, %v218_v56  ;;  %v248_v15 = vadd.f32 %v247_v6, %v246_v57  ;;  %v575_v18 = vadd.f32 %v6711_v54, %v192_v4 }
  0x3d   :  { %v330_v17 = vadd.f32 %v329_v7, %v328_v58  ;;  %v275_v21 = vrot.slane %v274_v9, 1  ;;  %v303_v23 = vrot.slane %v302_v10, 1  ;;  %v112_v26 = vmul.f32 %v6719_v60, %v40_v0 }
  0x3e   :  { %v116_v27 = vmul.f32 %v6719_v60, %v44_v1  ;;  %v579_v28 = vadd.f32 %v6711_v54, %v220_v14  ;;  %v583_v29 = vadd.f32 %v6711_v54, %v248_v15  ;;  %v1083_v30 = vrot.slane %v575_v18, 7 }
  0x3f   :  { %v331_v12 = vrot.slane %v330_v17, 1  ;;  %v276_v22 = vadd.f32 %v275_v21, %v274_v9  ;;  %v304_v33 = vadd.f32 %v303_v23, %v302_v10  ;;  %v120_v35 = vmul.f32 %v6719_v60, %v48_v19 }
  0x40   :  { %v124_v36 = vmul.f32 %v6719_v60, %v52_v20  ;;  %v1085_v38 = vsel %vm1084_vm1, %v1083_v30, %v571_v11  ;;  %v1086_v39 = vrot.slane %v579_v28, 6  ;;  %v1089_v34 = vrot.slane %v583_v29, 5 }
  0x41   :  { %v332_v37 = vadd.f32 %v331_v12, %v330_v17  ;;  %v587_v40 = vadd.f32 %v6711_v54, %v276_v22  ;;  %v591_v41 = vadd.f32 %v6711_v54, %v304_v33  ;;  %v128_v42 = vmul.f32 %v6719_v60, %v56_v32 }
  0x42   :  { %v179_v43 = vsel %vm157_vm0, %v104_v3, 0.0 }
  0x43   :  { %14 = vsyncpa [#allocation3], 0  ;;  %v595_v45 = vadd.f32 %v6711_v54, %v332_v37  ;;  %v1088_v46 = vsel %vm1087_vm2, %v1086_v39, %v1085_v38  ;;  %v180_v47 = vrot.slane %v179_v43, 4  ;;  %v207_v48 = vsel %vm157_vm0, %v108_v13, 0.0  ;;  %v31_v21 = vld [vmem:[%s11735_s0 + $0x10] sm:$0x7f] }
  0x44   :  { %v1091_v50 = vsel %vm1090_vm3, %v1089_v34, %v1088_v46  ;;  %v1092_v51 = vrot.slane %v587_v40, 4  ;;  %v1095_v52 = vrot.slane %v591_v41, 3  ;;  %v208_v55 = vrot.slane %v207_v48, 4  ;;  %v35_v22 = vld [vmem:[%s11735_s0 + $0x30] sm:$0x7f] }
  0x45   :  { %v1098_v56 = vrot.slane %v595_v45, 2  ;;  %v181_v57 = vadd.f32 %v180_v47, %v179_v43  ;;  %v235_v58 = vsel %vm157_vm0, %v112_v26, 0.0  ;;  %v263_v59 = vsel %vm157_vm0, %v116_v27, 0.0  ;;  %v6777_v33 = vld [vmem:[%s11736_s1 + $0x10] sm:$0x7f] }
  0x46   :  { %v1094_v61 = vsel %vm1093_vm4, %v1092_v51, %v1091_v50  ;;  %v209_v62 = vadd.f32 %v208_v55, %v207_v48  ;;  %v236_v63 = vrot.slane %v235_v58, 4  ;;  %v264_v0 = vrot.slane %v263_v59, 4  ;;  %v39_v38 = vld [vmem:[%s11735_s0 + $0x50] sm:$0x7f] }
  0x47   :  { %v1097_v1 = vsel %vm1096_vm5, %v1095_v52, %v1094_v61  ;;  %v182_v3 = vrot.slane %v181_v57, 2  ;;  %v291_v4 = vsel %vm157_vm0, %v120_v35, 0.0  ;;  %v319_v5 = vsel %vm157_vm0, %v124_v36, 0.0  ;;  %v43_v43 = vld [vmem:[%s11735_s0 + $0x70] sm:$0x7f] }
  0x48   :  { %v1100_v6 = vsel %vm1099_vm6, %v1098_v56, %v1097_v1  ;;  %v210_v7 = vrot.slane %v209_v62, 2  ;;  %v237_v9 = vadd.f32 %v236_v63, %v235_v58  ;;  %v265_v10 = vadd.f32 %v264_v0, %v263_v59  ;;  %v47_v56 = vld [vmem:[%s11735_s0 + $0x90] sm:$0x7f] }
  0x49   :  { %5420 = vmatmul.mubr.msk.f32.vlgmr.msra.gmra.mrb[0].mxu0 %vm157_vm0, %v1100_v6  ;;  %v183_v11 = vadd.f32 %v182_v3, %v181_v57  ;;  %v292_v13 = vrot.slane %v291_v4, 4  ;;  %v320_v14 = vrot.slane %v319_v5, 4  ;;  %v347_v15 = vsel %vm157_vm0, %v128_v42, 0.0  ;;  %v51_v57 = vld [vmem:[%s11735_s0 + $0xb0] sm:$0x7f] }
  0x4a   :  { %v211_v17 = vadd.f32 %v210_v7, %v209_v62  ;;  %v238_v18 = vrot.slane %v237_v9, 2  ;;  %v266_v19 = vrot.slane %v265_v10, 2  ;;  %v348_v20 = vrot.slane %v347_v15, 4 }
  0x4b   :  { %v184_v23 = vrot.slane %v183_v11, 1  ;;  %v293_v26 = vadd.f32 %v292_v13, %v291_v4  ;;  %v321_v27 = vadd.f32 %v320_v14, %v319_v5  ;;  %v6769_v12 = vrot.slane %v6633_v49, %v6594_v31  ;;  %v55_v4 = vld [vmem:[%s11735_s0 + $0xd0] sm:$0x7f] }
  0x4c   :  { %v212_v28 = vrot.slane %v211_v17, 1  ;;  %v239_v29 = vadd.f32 %v238_v18, %v237_v9  ;;  %v267_v30 = vadd.f32 %v266_v19, %v265_v10  ;;  %v349_v32 = vadd.f32 %v348_v20, %v347_v15 }
  0x4d   :  { %v185_v35 = vadd.f32 %v184_v23, %v183_v11  ;;  %v294_v36 = vrot.slane %v293_v26, 2  ;;  %v322_v37 = vrot.slane %v321_v27, 2  ;;  %v103_v39 = vmul.f32 %v6777_v33, %v31_v21 }
  0x4e   :  { %v213_v34 = vadd.f32 %v212_v28, %v211_v17  ;;  %v240_v40 = vrot.slane %v239_v29, 1  ;;  %v268_v41 = vrot.slane %v267_v30, 1  ;;  %v350_v42 = vrot.slane %v349_v32, 2 }
  0x4f   :  { %v295_v45 = vadd.f32 %v294_v36, %v293_v26  ;;  %v323_v46 = vadd.f32 %v322_v37, %v321_v27  ;;  %v574_v47 = vadd.f32 %v6769_v12, %v185_v35  ;;  %v107_v48 = vmul.f32 %v6777_v33, %v35_v22 }
  0x50   :  { %v241_v50 = vadd.f32 %v240_v40, %v239_v29  ;;  %v269_v51 = vadd.f32 %v268_v41, %v267_v30  ;;  %v351_v52 = vadd.f32 %v350_v42, %v349_v32  ;;  %v578_v55 = vadd.f32 %v6769_v12, %v213_v34 }
  0x51   :  { %v296_v58 = vrot.slane %v295_v45, 1  ;;  %v324_v59 = vrot.slane %v323_v46, 1  ;;  %v111_v61 = vmul.f32 %v6777_v33, %v39_v38  ;;  %v115_v62 = vmul.f32 %v6777_v33, %v43_v43 }
  0x52   :  { %v352_v63 = vrot.slane %v351_v52, 1  ;;  %v582_v0 = vadd.f32 %v6769_v12, %v241_v50  ;;  %v586_v1 = vadd.f32 %v6769_v12, %v269_v51  ;;  %v1125_v3 = vrot.slane %v578_v55, 7 }
  0x53   :  { %v297_v5 = vadd.f32 %v296_v58, %v295_v45  ;;  %v325_v6 = vadd.f32 %v324_v59, %v323_v46  ;;  %v119_v7 = vmul.f32 %v6777_v33, %v47_v56  ;;  %v123_v9 = vmul.f32 %v6777_v33, %v51_v57 }
  0x54   :  { %v353_v10 = vadd.f32 %v352_v63, %v351_v52  ;;  %v1126_v11 = vsel %vm1084_vm1, %v1125_v3, %v574_v47  ;;  %v1127_v13 = vrot.slane %v582_v0, 6  ;;  %v1129_v14 = vrot.slane %v586_v1, 5 }
  0x55   :  { %v590_v15 = vadd.f32 %v6769_v12, %v297_v5  ;;  %v594_v17 = vadd.f32 %v6769_v12, %v325_v6  ;;  %v127_v18 = vmul.f32 %v6777_v33, %v55_v4  ;;  %v172_v19 = vsel %vm157_vm0, %v103_v39, 0.0 }
  0x56   :  { %v598_v20 = vadd.f32 %v6769_v12, %v353_v10  ;;  %v1128_v21 = vsel %vm1087_vm2, %v1127_v13, %v1126_v11  ;;  %v173_v23 = vrot.slane %v172_v19, 4  ;;  %v200_v26 = vsel %vm157_vm0, %v107_v48, 0.0  ;;  %v6839_v13 = vld [vmem:[%s11735_s0 + $0x128] sm:$0x7f] }
  0x57   :  { %v1130_v27 = vsel %vm1090_vm3, %v1129_v14, %v1128_v21  ;;  %v1131_v28 = vrot.slane %v590_v15, 4  ;;  %v1133_v29 = vrot.slane %v594_v17, 3  ;;  %v201_v30 = vrot.slane %v200_v26, 4 }
  0x58   :  { %v1135_v32 = vrot.slane %v598_v20, 2  ;;  %v174_v22 = vadd.f32 %v173_v23, %v172_v19  ;;  %v228_v35 = vsel %vm157_vm0, %v111_v61, 0.0  ;;  %v256_v36 = vsel %vm157_vm0, %v115_v62, 0.0  ;;  %v6825_v61 = vld [vmem:[%s11735_s0 + $0xe8] sm:$0x7f] }
  0x59   :  { %v1132_v37 = vsel %vm1093_vm4, %v1131_v28, %v1130_v27  ;;  %v202_v38 = vadd.f32 %v201_v30, %v200_v26  ;;  %v229_v39 = vrot.slane %v228_v35, 4  ;;  %v257_v34 = vrot.slane %v256_v36, 4  ;;  %v6846_v19 = vld [vmem:[%s11735_s0 + $0x148] sm:$0x7f] }
  0x5a   :  { %v1134_v40 = vsel %vm1096_vm5, %v1133_v29, %v1132_v37  ;;  %v175_v41 = vrot.slane %v174_v22, 2  ;;  %v284_v42 = vsel %vm157_vm0, %v119_v7, 0.0  ;;  %v312_v43 = vsel %vm157_vm0, %v123_v9, 0.0  ;;  %v6834_v7 = vld [vmem:[%s11735_s0 + $0x108] sm:$0x7f] }
  0x5b   :  { %v1136_v45 = vsel %vm1099_vm6, %v1135_v32, %v1134_v40  ;;  %v203_v46 = vrot.slane %v202_v38, 2  ;;  %v230_v47 = vadd.f32 %v229_v39, %v228_v35  ;;  %v258_v48 = vadd.f32 %v257_v34, %v256_v36  ;;  %v6855_v32 = vld [vmem:[%s11735_s0 + $0x168] sm:$0x7f] }
  0x5c   :  { %5427 = vmatprep.mubr.msk.f32.mxu1 %vm157_vm0, %v1136_v45  ;;  %v176_v50 = vadd.f32 %v175_v41, %v174_v22  ;;  %v285_v51 = vrot.slane %v284_v42, 4  ;;  %v313_v52 = vrot.slane %v312_v43, 4  ;;  %v340_v55 = vsel %vm157_vm0, %v127_v18, 0.0  ;;  %v6860_v22 = vld [vmem:[%s11735_s0 + $0x188] sm:$0x7f] }
  0x5d   :  { %v204_v56 = vadd.f32 %v203_v46, %v202_v38  ;;  %v231_v57 = vrot.slane %v230_v47, 2  ;;  %v259_v58 = vrot.slane %v258_v48, 2  ;;  %v341_v59 = vrot.slane %v340_v55, 4 }
  0x5e   :  { %v177_v62 = vrot.slane %v176_v50, 1  ;;  %v286_v63 = vadd.f32 %v285_v51, %v284_v42  ;;  %v314_v0 = vadd.f32 %v313_v52, %v312_v43  ;;  %v6829_v1 = vrot.slane %v6633_v49, %v6639_v53  ;;  %v6871_v42 = vld [vmem:[%s11735_s0 + $0x1a8] sm:$0x7f] }
  0x5f   :  { %v205_v3 = vrot.slane %v204_v56, 1  ;;  %v232_v4 = vadd.f32 %v231_v57, %v230_v47  ;;  %v260_v5 = vadd.f32 %v259_v58, %v258_v48  ;;  %v342_v6 = vadd.f32 %v341_v59, %v340_v55 }
  0x60   :  { %v178_v9 = vadd.f32 %v177_v62, %v176_v50  ;;  %v287_v10 = vrot.slane %v286_v63, 2  ;;  %v315_v11 = vrot.slane %v314_v0, 2  ;;  %v130_v49 = vmul.f32 %v6624_v44, %v6825_v61 }
  0x61   :  { %v206_v14 = vadd.f32 %v205_v3, %v204_v56  ;;  %v233_v15 = vrot.slane %v232_v4, 1  ;;  %v261_v17 = vrot.slane %v260_v5, 1  ;;  %v343_v18 = vrot.slane %v342_v6, 2 }
  0x62   :  { %v288_v20 = vadd.f32 %v287_v10, %v286_v63  ;;  %v316_v21 = vadd.f32 %v315_v11, %v314_v0  ;;  %v573_v23 = vadd.f32 %v6829_v1, %v178_v9  ;;  %v134_v26 = vmul.f32 %v6624_v44, %v6834_v7 }
  0x63   :  { %v234_v27 = vadd.f32 %v233_v15, %v232_v4  ;;  %v262_v28 = vadd.f32 %v261_v17, %v260_v5  ;;  %v344_v29 = vadd.f32 %v343_v18, %v342_v6  ;;  %v577_v30 = vadd.f32 %v6829_v1, %v206_v14 }
  0x64   :  { %v289_v35 = vrot.slane %v288_v20, 1  ;;  %v317_v36 = vrot.slane %v316_v21, 1  ;;  %v138_v37 = vmul.f32 %v6624_v44, %v6839_v13  ;;  %v142_v38 = vmul.f32 %v6624_v44, %v6846_v19 }
  0x65   :  { %v345_v39 = vrot.slane %v344_v29, 1  ;;  %v581_v34 = vadd.f32 %v6829_v1, %v234_v27  ;;  %v585_v40 = vadd.f32 %v6829_v1, %v262_v28  ;;  %v1113_v41 = vrot.slane %v577_v30, 7  ;;  %v6897_v30 = vld [vmem:[%s11735_s0 + $0xe0] sm:$0x7f] }
  0x66   :  { %v290_v43 = vadd.f32 %v289_v35, %v288_v20  ;;  %v318_v45 = vadd.f32 %v317_v36, %v316_v21  ;;  %v146_v46 = vmul.f32 %v6624_v44, %v6855_v32  ;;  %v150_v47 = vmul.f32 %v6624_v44, %v6860_v22 }
  0x67   :  { %v346_v48 = vadd.f32 %v345_v39, %v344_v29  ;;  %v1114_v50 = vsel %vm1084_vm1, %v1113_v41, %v573_v23  ;;  %v1115_v51 = vrot.slane %v581_v34, 6  ;;  %v1117_v52 = vrot.slane %v585_v40, 5 }
  0x68   :  { %v589_v55 = vadd.f32 %v6829_v1, %v290_v43  ;;  %v593_v56 = vadd.f32 %v6829_v1, %v318_v45  ;;  %v154_v57 = vmul.f32 %v6624_v44, %v6871_v42  ;;  %v361_v58 = vsel %vm157_vm0, %v130_v49, 0.0  ;;  %v6904_v43 = vld [vmem:[%s11735_s0 + $0x100] sm:$0x7f] }
  0x69   :  { %v597_v59 = vadd.f32 %v6829_v1, %v346_v48  ;;  %v1116_v62 = vsel %vm1087_vm2, %v1115_v51, %v1114_v50  ;;  %v362_v63 = vrot.slane %v361_v58, 4  ;;  %v389_v0 = vsel %vm157_vm0, %v134_v26, 0.0 }
  0x6a   :  { %v1118_v3 = vsel %vm1090_vm3, %v1117_v52, %v1116_v62  ;;  %v1119_v4 = vrot.slane %v589_v55, 4  ;;  %v1121_v5 = vrot.slane %v593_v56, 3  ;;  %v390_v6 = vrot.slane %v389_v0, 4  ;;  %v6911_v56 = vld [vmem:[%s11735_s0 + $0x120] sm:$0x7f] }
  0x6b   :  { %v1123_v9 = vrot.slane %v597_v59, 2  ;;  %v363_v10 = vadd.f32 %v362_v63, %v361_v58  ;;  %v417_v11 = vsel %vm157_vm0, %v138_v37, 0.0  ;;  %v445_v44 = vsel %vm157_vm0, %v142_v38, 0.0  ;;  %v6916_v62 = vld [vmem:[%s11735_s0 + $0x140] sm:$0x7f] }
  0x6c   :  { %v1120_v49 = vsel %vm1093_vm4, %v1119_v4, %v1118_v3  ;;  %v391_v14 = vadd.f32 %v390_v6, %v389_v0  ;;  %v418_v15 = vrot.slane %v417_v11, 4  ;;  %v446_v17 = vrot.slane %v445_v44, 4  ;;  %v6923_v6 = vld [vmem:[%s11735_s0 + $0x160] sm:$0x7f] }
  0x6d   :  { %v1122_v18 = vsel %vm1096_vm5, %v1121_v5, %v1120_v49  ;;  %v364_v20 = vrot.slane %v363_v10, 2  ;;  %v473_v21 = vsel %vm157_vm0, %v146_v46, 0.0  ;;  %v501_v23 = vsel %vm157_vm0, %v150_v47, 0.0 }
  0x6e   :  { %v1124_v26 = vsel %vm1099_vm6, %v1123_v9, %v1122_v18  ;;  %v392_v27 = vrot.slane %v391_v14, 2  ;;  %v419_v28 = vadd.f32 %v418_v15, %v417_v11  ;;  %v447_v29 = vadd.f32 %v446_v17, %v445_v44  ;;  %v6932_v18 = vld [vmem:[%s11735_s0 + $0x180] sm:$0x7f] }
  0x6f   :  { %5428 = vmatmul.mubr.msk.f32.vlgmr.msra.gmra.mrb[0].mxu1 %vm157_vm0, %v1124_v26  ;;  %v365_v35 = vadd.f32 %v364_v20, %v363_v10  ;;  %v474_v36 = vrot.slane %v473_v21, 4  ;;  %v502_v37 = vrot.slane %v501_v23, 4  ;;  %v529_v38 = vsel %vm157_vm0, %v154_v57, 0.0  ;;  %v6937_v20 = vld [vmem:[%s11735_s0 + $0x1a0] sm:$0x7f] }
  0x70   :  { %v393_v39 = vadd.f32 %v392_v27, %v391_v14  ;;  %v420_v34 = vrot.slane %v419_v28, 2  ;;  %v448_v40 = vrot.slane %v447_v29, 2  ;;  %v530_v41 = vrot.slane %v529_v38, 4 }
  0x71   :  { %v366_v45 = vrot.slane %v365_v35, 1  ;;  %v475_v46 = vadd.f32 %v474_v36, %v473_v21  ;;  %v503_v47 = vadd.f32 %v502_v37, %v501_v23  ;;  %v129_v48 = vmul.f32 %v6661_v8, %v6897_v30 }
  0x72   :  { %v394_v50 = vrot.slane %v393_v39, 1  ;;  %v421_v51 = vadd.f32 %v420_v34, %v419_v28  ;;  %v449_v52 = vadd.f32 %v448_v40, %v447_v29  ;;  %v531_v55 = vadd.f32 %v530_v41, %v529_v38 }
  0x73   :  { %v367_v57 = vadd.f32 %v366_v45, %v365_v35  ;;  %v476_v58 = vrot.slane %v475_v46, 2  ;;  %v504_v59 = vrot.slane %v503_v47, 2  ;;  %v133_v63 = vmul.f32 %v6661_v8, %v6904_v43 }
  0x74   :  { %v395_v0 = vadd.f32 %v394_v50, %v393_v39  ;;  %v422_v3 = vrot.slane %v421_v51, 1  ;;  %v450_v4 = vrot.slane %v449_v52, 1  ;;  %v532_v5 = vrot.slane %v531_v55, 2 }
  0x75   :  { %v477_v9 = vadd.f32 %v476_v58, %v475_v46  ;;  %v505_v10 = vadd.f32 %v504_v59, %v503_v47  ;;  %v600_v11 = vadd.f32 %v6653_v2, %v367_v57  ;;  %v137_v44 = vmul.f32 %v6661_v8, %v6911_v56 }
  0x76   :  { %v423_v49 = vadd.f32 %v422_v3, %v421_v51  ;;  %v451_v14 = vadd.f32 %v450_v4, %v449_v52  ;;  %v533_v15 = vadd.f32 %v532_v5, %v531_v55  ;;  %v604_v17 = vadd.f32 %v6653_v2, %v395_v0 }
  0x77   :  { %v478_v21 = vrot.slane %v477_v9, 1  ;;  %v506_v23 = vrot.slane %v505_v10, 1  ;;  %v141_v26 = vmul.f32 %v6661_v8, %v6916_v62  ;;  %v145_v27 = vmul.f32 %v6661_v8, %v6923_v6 }
  0x78   :  { %v534_v28 = vrot.slane %v533_v15, 1  ;;  %v608_v29 = vadd.f32 %v6653_v2, %v423_v49  ;;  %v612_v35 = vadd.f32 %v6653_v2, %v451_v14  ;;  %v1149_v36 = vrot.slane %v604_v17, 7 }
  0x79   :  { %v479_v37 = vadd.f32 %v478_v21, %v477_v9  ;;  %v507_v38 = vadd.f32 %v506_v23, %v505_v10  ;;  %v149_v39 = vmul.f32 %v6661_v8, %v6932_v18  ;;  %v153_v34 = vmul.f32 %v6661_v8, %v6937_v20 }
  0x7a   :  { %v535_v40 = vadd.f32 %v534_v28, %v533_v15  ;;  %v1150_v41 = vsel %vm1084_vm1, %v1149_v36, %v600_v11  ;;  %v1151_v45 = vrot.slane %v608_v29, 6  ;;  %v1153_v46 = vrot.slane %v612_v35, 5  ;;  %v6967_v35 = vld [vmem:[%s11735_s0 + $0xf8] sm:$0x7f] }
  0x7b   :  { %v616_v47 = vadd.f32 %v6653_v2, %v479_v37  ;;  %v620_v50 = vadd.f32 %v6653_v2, %v507_v38  ;;  %v354_v51 = vsel %vm157_vm0, %v129_v48, 0.0  ;;  %v382_v52 = vsel %vm157_vm0, %v133_v63, 0.0 }
  0x7c   :  { %v624_v55 = vadd.f32 %v6653_v2, %v535_v40  ;;  %v1152_v57 = vsel %vm1087_vm2, %v1151_v45, %v1150_v41  ;;  %v355_v58 = vrot.slane %v354_v51, 4  ;;  %v383_v59 = vrot.slane %v382_v52, 4  ;;  %v6974_v45 = vld [vmem:[%s11735_s0 + $0x118] sm:$0x7f] }
  0x7d   :  { %v1154_v8 = vsel %vm1090_vm3, %v1153_v46, %v1152_v57  ;;  %v1155_v0 = vrot.slane %v616_v47, 4  ;;  %v1157_v3 = vrot.slane %v620_v50, 3  ;;  %v410_v4 = vsel %vm157_vm0, %v137_v44, 0.0  ;;  %12010 = vst [vmem:[#allocation10_spill] sm:$0xff] %v6974_v45 }
  0x7e   :  { %v1159_v5 = vrot.slane %v624_v55, 2  ;;  %v356_v9 = vadd.f32 %v355_v58, %v354_v51  ;;  %v384_v10 = vadd.f32 %v383_v59, %v382_v52  ;;  %v411_v11 = vrot.slane %v410_v4, 4 }
  0x7f   :  { %v1156_v48 = vsel %vm1093_vm4, %v1155_v0, %v1154_v8  ;;  %v438_v63 = vsel %vm157_vm0, %v141_v26, 0.0  ;;  %v466_v2 = vsel %vm157_vm0, %v145_v27, 0.0  ;;  %v494_v49 = vsel %vm157_vm0, %v149_v39, 0.0 }
  0x80   :  { %v1158_v14 = vsel %vm1096_vm5, %v1157_v3, %v1156_v48  ;;  %v357_v15 = vrot.slane %v356_v9, 2  ;;  %v385_v17 = vrot.slane %v384_v10, 2  ;;  %v412_v21 = vadd.f32 %v411_v11, %v410_v4  ;;  %v6988_v11 = vld [vmem:[%s11735_s0 + $0x158] sm:$0x7f] }
  0x81   :  { %v1160_v23 = vsel %vm1099_vm6, %v1159_v5, %v1158_v14  ;;  %v439_v44 = vrot.slane %v438_v63, 4  ;;  %v467_v28 = vrot.slane %v466_v2, 4  ;;  %v495_v29 = vrot.slane %v494_v49, 4  ;;  %12012 = vst [vmem:[#allocation12_spill] sm:$0xff] %v6988_v11  ;;  %v6993_v48 = vld [vmem:[%s11735_s0 + $0x178] sm:$0x7f] }
  0x82   :  { %5421 = vmatprep.mubr.msk.f32.mxu0 %vm157_vm0, %v1160_v23  ;;  %v358_v26 = vadd.f32 %v357_v15, %v356_v9  ;;  %v386_v27 = vadd.f32 %v385_v17, %v384_v10  ;;  %v413_v36 = vrot.slane %v412_v21, 2  ;;  %v522_v37 = vsel %vm157_vm0, %v153_v34, 0.0  ;;  %v6981_v34 = vld [vmem:[%s11735_s0 + $0x138] sm:$0x7f]  ;;  %12013 = vst [vmem:[#allocation13_spill] sm:$0xff] %v6993_v48 }
  0x83   :  { %v440_v38 = vadd.f32 %v439_v44, %v438_v63  ;;  %v468_v39 = vadd.f32 %v467_v28, %v466_v2  ;;  %v496_v40 = vadd.f32 %v495_v29, %v494_v49  ;;  %v523_v41 = vrot.slane %v522_v37, 4  ;;  %12011 = vst [vmem:[#allocation11_spill] sm:$0xff] %v6981_v34  ;;  %v7000_v14 = vld [vmem:[%s11735_s0 + $0x198] sm:$0x7f] }
  0x84   :  { %v359_v46 = vrot.slane %v358_v26, 1  ;;  %v387_v47 = vrot.slane %v386_v27, 1  ;;  %v414_v50 = vadd.f32 %v413_v36, %v412_v21  ;;  %v132_v51 = vmul.f32 %v6719_v60, %v6967_v35  ;;  %12014 = vst [vmem:[#allocation14_spill] sm:$0xff] %v7000_v14  ;;  %v7007_v28 = vld [vmem:[%s11735_s0 + $0x1b8] sm:$0x7f] }
  0x85   :  { %v441_v52 = vrot.slane %v440_v38, 2  ;;  %v469_v55 = vrot.slane %v468_v39, 2  ;;  %v497_v57 = vrot.slane %v496_v40, 2  ;;  %v524_v58 = vadd.f32 %v523_v41, %v522_v37  ;;  %12015 = vst [vmem:[#allocation15_spill] sm:$0xff] %v7007_v28 }
  0x86   :  { %v360_v59 = vadd.f32 %v359_v46, %v358_v26  ;;  %v388_v8 = vadd.f32 %v387_v47, %v386_v27  ;;  %v415_v0 = vrot.slane %v414_v50, 1  ;;  %v136_v3 = vmul.f32 %v6719_v60, %v6974_v45 }
  0x87   :  { %v442_v4 = vadd.f32 %v441_v52, %v440_v38  ;;  %v470_v5 = vadd.f32 %v469_v55, %v468_v39  ;;  %v498_v9 = vadd.f32 %v497_v57, %v496_v40  ;;  %v525_v10 = vrot.slane %v524_v58, 2 }
  0x88   :  { %v416_v63 = vadd.f32 %v415_v0, %v414_v50  ;;  %v599_v2 = vadd.f32 %v6711_v54, %v360_v59  ;;  %v603_v49 = vadd.f32 %v6711_v54, %v388_v8  ;;  %v140_v15 = vmul.f32 %v6719_v60, %v6981_v34 }
  0x89   :  { %v443_v17 = vrot.slane %v442_v4, 1  ;;  %v471_v21 = vrot.slane %v470_v5, 1  ;;  %v499_v23 = vrot.slane %v498_v9, 1  ;;  %v526_v44 = vadd.f32 %v525_v10, %v524_v58 }
  0x8a   :  { %v607_v29 = vadd.f32 %v6711_v54, %v416_v63  ;;  %v1137_v26 = vrot.slane %v603_v49, 7  ;;  %v144_v27 = vmul.f32 %v6719_v60, %v6988_v11  ;;  %v148_v36 = vmul.f32 %v6719_v60, %v6993_v48  ;;  %v7387_v11 = vld [vmem:[%s11735_s0 + $0x58] sm:$0x7f] }
  0x8b   :  { %v444_v37 = vadd.f32 %v443_v17, %v442_v4  ;;  %v472_v38 = vadd.f32 %v471_v21, %v470_v5  ;;  %v500_v39 = vadd.f32 %v499_v23, %v498_v9  ;;  %v527_v40 = vrot.slane %v526_v44, 1  ;;  %12044 = vst [vmem:[#allocation44_spill] sm:$0xff] %v7387_v11 }
  0x8c   :  { %v1138_v41 = vsel %vm1084_vm1, %v1137_v26, %v599_v2  ;;  %v1139_v46 = vrot.slane %v607_v29, 6  ;;  %v152_v47 = vmul.f32 %v6719_v60, %v7000_v14  ;;  %v156_v50 = vmul.f32 %v6719_v60, %v7007_v28 }
  0x8d   :  { %v528_v52 = vadd.f32 %v527_v40, %v526_v44  ;;  %v611_v55 = vadd.f32 %v6711_v54, %v444_v37  ;;  %v615_v57 = vadd.f32 %v6711_v54, %v472_v38  ;;  %v619_v58 = vadd.f32 %v6711_v54, %v500_v39 }
  0x8e   :  { %v1140_v59 = vsel %vm1087_vm2, %v1139_v46, %v1138_v41  ;;  %v375_v8 = vsel %vm157_vm0, %v132_v51, 0.0  ;;  %v403_v0 = vsel %vm157_vm0, %v136_v3, 0.0  ;;  %v431_v4 = vsel %vm157_vm0, %v140_v15, 0.0 }
  0x8f   :  { %v623_v5 = vadd.f32 %v6711_v54, %v528_v52  ;;  %v1141_v9 = vrot.slane %v611_v55, 5  ;;  %v1143_v10 = vrot.slane %v615_v57, 4  ;;  %v1145_v60 = vrot.slane %v619_v58, 3 }
  0x90   :  { %v376_v63 = vrot.slane %v375_v8, 4  ;;  %v404_v2 = vrot.slane %v403_v0, 4  ;;  %v432_v49 = vrot.slane %v431_v4, 4  ;;  %v459_v17 = vsel %vm157_vm0, %v144_v27, 0.0 }
  0x91   :  { %v1142_v21 = vsel %vm1090_vm3, %v1141_v9, %v1140_v59  ;;  %v1147_v23 = vrot.slane %v623_v5, 2  ;;  %v460_v44 = vrot.slane %v459_v17, 4  ;;  %v487_v51 = vsel %vm157_vm0, %v148_v36, 0.0  ;;  %v7037_v36 = vld [vmem:[%s11735_s0 + $0xf0] sm:$0x7f] }
  0x92   :  { %v1144_v3 = vsel %vm1093_vm4, %v1143_v10, %v1142_v21  ;;  %v377_v29 = vadd.f32 %v376_v63, %v375_v8  ;;  %v405_v15 = vadd.f32 %v404_v2, %v403_v0  ;;  %v433_v26 = vadd.f32 %v432_v49, %v431_v4  ;;  %12016 = vst [vmem:[#allocation16_spill] sm:$0xff] %v7037_v36  ;;  %v7044_v4 = vld [vmem:[%s11735_s0 + $0x110] sm:$0x7f] }
  0x93   :  { %v1146_v54 = vsel %vm1096_vm5, %v1145_v60, %v1144_v3  ;;  %v461_v37 = vadd.f32 %v460_v44, %v459_v17  ;;  %v488_v38 = vrot.slane %v487_v51, 4  ;;  %v515_v39 = vsel %vm157_vm0, %v152_v47, 0.0  ;;  %12017 = vst [vmem:[#allocation17_spill] sm:$0xff] %v7044_v4 }
  0x94   :  { %v1148_v40 = vsel %vm1099_vm6, %v1147_v23, %v1146_v54  ;;  %v378_v27 = vrot.slane %v377_v29, 2  ;;  %v406_v41 = vrot.slane %v405_v15, 2  ;;  %v434_v46 = vrot.slane %v433_v26, 2  ;;  %v7058_v54 = vld [vmem:[%s11735_s0 + $0x150] sm:$0x7f] }
  0x95   :  { %5422 = vmatmul.mubr.msk.f32.gmra.mrb[2].mxu0 %vm157_vm0, %v1148_v40  ;;  %v462_v52 = vrot.slane %v461_v37, 2  ;;  %v489_v55 = vadd.f32 %v488_v38, %v487_v51  ;;  %v516_v57 = vrot.slane %v515_v39, 4  ;;  %v543_v58 = vsel %vm157_vm0, %v156_v50, 0.0  ;;  %v7051_v50 = vld [vmem:[%s11735_s0 + $0x130] sm:$0x7f]  ;;  %12019 = vst [vmem:[#allocation19_spill] sm:$0xff] %v7058_v54 }
  0x96   :  { %v379_v59 = vadd.f32 %v378_v27, %v377_v29  ;;  %v407_v8 = vadd.f32 %v406_v41, %v405_v15  ;;  %v435_v47 = vadd.f32 %v434_v46, %v433_v26  ;;  %v544_v0 = vrot.slane %v543_v58, 4  ;;  %12018 = vst [vmem:[#allocation18_spill] sm:$0xff] %v7051_v50  ;;  %v7063_v40 = vld [vmem:[%s11735_s0 + $0x170] sm:$0x7f] }
  0x97   :  { %v463_v5 = vadd.f32 %v462_v52, %v461_v37  ;;  %v490_v9 = vrot.slane %v489_v55, 2  ;;  %v517_v10 = vadd.f32 %v516_v57, %v515_v39  ;;  %v131_v60 = vmul.f32 %v6777_v33, %v7037_v36  ;;  %12020 = vst [vmem:[#allocation20_spill] sm:$0xff] %v7063_v40  ;;  %v7073_v57 = vld [vmem:[%s11735_s0 + $0x190] sm:$0x7f]  ;;  %v7336_v36 = vld [vmem:[%s11735_s0 + $0xc0] sm:$0x7f] }
  0x98   :  { %v380_v63 = vrot.slane %v379_v59, 1  ;;  %v408_v2 = vrot.slane %v407_v8, 1  ;;  %v436_v49 = vrot.slane %v435_v47, 1  ;;  %v545_v17 = vadd.f32 %v544_v0, %v543_v58  ;;  %12021 = vst [vmem:[#allocation21_spill] sm:$0xff] %v7073_v57  ;;  %12037 = vst [vmem:[#allocation37_spill] sm:$0xff] %v7336_v36 }
  0x99   :  { %v464_v21 = vrot.slane %v463_v5, 1  ;;  %v491_v23 = vadd.f32 %v490_v9, %v489_v55  ;;  %v518_v44 = vrot.slane %v517_v10, 2  ;;  %v135_v51 = vmul.f32 %v6777_v33, %v7044_v4  ;;  %v7326_v4 = vld [vmem:[%s11735_s0 + $0xa0] sm:$0x7f] }
  0x9a   :  { %v381_v3 = vadd.f32 %v380_v63, %v379_v59  ;;  %v409_v29 = vadd.f32 %v408_v2, %v407_v8  ;;  %v437_v15 = vadd.f32 %v436_v49, %v435_v47  ;;  %v546_v26 = vrot.slane %v545_v17, 2  ;;  %v7079_v47 = vld [vmem:[%s11735_s0 + $0x1b0] sm:$0x7f]  ;;  %12036 = vst [vmem:[#allocation36_spill] sm:$0xff] %v7326_v4 }
  0x9b   :  { %v465_v37 = vadd.f32 %v464_v21, %v463_v5  ;;  %v492_v38 = vrot.slane %v491_v23, 1  ;;  %v519_v39 = vadd.f32 %v518_v44, %v517_v10  ;;  %v139_v27 = vmul.f32 %v6777_v33, %v7051_v50  ;;  %12022 = vst [vmem:[#allocation22_spill] sm:$0xff] %v7079_v47  ;;  %v7319_v50 = vld [vmem:[%s11735_s0 + $0x80] sm:$0x7f] }
  0x9c   :  { %v547_v41 = vadd.f32 %v546_v26, %v545_v17  ;;  %v602_v46 = vadd.f32 %v6769_v12, %v381_v3  ;;  %v606_v52 = vadd.f32 %v6769_v12, %v409_v29  ;;  %v610_v55 = vadd.f32 %v6769_v12, %v437_v15  ;;  %12035 = vst [vmem:[#allocation35_spill] sm:$0xff] %v7319_v50 }
  0x9d   :  { %v493_v58 = vadd.f32 %v492_v38, %v491_v23  ;;  %v520_v59 = vrot.slane %v519_v39, 1  ;;  %v614_v8 = vadd.f32 %v6769_v12, %v465_v37  ;;  %v143_v0 = vmul.f32 %v6777_v33, %v7058_v54 }
  0x9e   :  { %v548_v5 = vrot.slane %v547_v41, 1  ;;  %v1173_v9 = vrot.slane %v606_v52, 7  ;;  %v1175_v10 = vrot.slane %v610_v55, 6  ;;  %v147_v63 = vmul.f32 %v6777_v33, %v7063_v40 }
  0x9f   :  { %v521_v2 = vadd.f32 %v520_v59, %v519_v39  ;;  %v618_v49 = vadd.f32 %v6769_v12, %v493_v58  ;;  %v1177_v17 = vrot.slane %v614_v8, 5  ;;  %v151_v21 = vmul.f32 %v6777_v33, %v7073_v57 }
  0xa0   :  { %v549_v23 = vadd.f32 %v548_v5, %v547_v41  ;;  %v1174_v44 = vsel %vm1084_vm1, %v1173_v9, %v602_v46  ;;  %v155_v3 = vmul.f32 %v6777_v33, %v7079_v47  ;;  %v368_v29 = vsel %vm157_vm0, %v131_v60, 0.0 }
  0xa1   :  { %v622_v15 = vadd.f32 %v6769_v12, %v521_v2  ;;  %v1176_v26 = vsel %vm1087_vm2, %v1175_v10, %v1174_v44  ;;  %v1179_v37 = vrot.slane %v618_v49, 4  ;;  %v369_v38 = vrot.slane %v368_v29, 4 }
  0xa2   :  { %v626_v39 = vadd.f32 %v6769_v12, %v549_v23  ;;  %v1178_v52 = vsel %vm1090_vm3, %v1177_v17, %v1176_v26  ;;  %v396_v55 = vsel %vm157_vm0, %v135_v51, 0.0  ;;  %v424_v41 = vsel %vm157_vm0, %v139_v27, 0.0 }
  0xa3   :  { %v1180_v46 = vsel %vm1093_vm4, %v1179_v37, %v1178_v52  ;;  %v1181_v58 = vrot.slane %v622_v15, 3  ;;  %v370_v33 = vadd.f32 %v369_v38, %v368_v29  ;;  %v397_v59 = vrot.slane %v396_v55, 4 }
  0xa4   :  { %v1183_v60 = vrot.slane %v626_v39, 2  ;;  %v425_v8 = vrot.slane %v424_v41, 4  ;;  %v452_v5 = vsel %vm157_vm0, %v143_v0, 0.0  ;;  %v480_v9 = vsel %vm157_vm0, %v147_v63, 0.0 }
  0xa5   :  { %v1182_v10 = vsel %vm1096_vm5, %v1181_v58, %v1180_v46  ;;  %v371_v12 = vrot.slane %v370_v33, 2  ;;  %v398_v2 = vadd.f32 %v397_v59, %v396_v55  ;;  %v453_v49 = vrot.slane %v452_v5, 4 }
  0xa6   :  { %v1184_v51 = vsel %vm1099_vm6, %v1183_v60, %v1182_v10  ;;  %v426_v17 = vadd.f32 %v425_v8, %v424_v41  ;;  %v481_v27 = vrot.slane %v480_v9, 4  ;;  %v508_v23 = vsel %vm157_vm0, %v151_v21, 0.0 }
  0xa7   :  { %5429 = vmatprep.mubr.msk.f32.mxu1 %vm157_vm0, %v1184_v51  ;;  %v372_v44 = vadd.f32 %v371_v12, %v370_v33  ;;  %v399_v29 = vrot.slane %v398_v2, 2  ;;  %v454_v15 = vadd.f32 %v453_v49, %v452_v5  ;;  %v509_v26 = vrot.slane %v508_v23, 4 }
  0xa8   :  { %v427_v0 = vrot.slane %v426_v17, 2  ;;  %v482_v37 = vadd.f32 %v481_v27, %v480_v9  ;;  %v536_v63 = vsel %vm157_vm0, %v155_v3, 0.0  ;;  %v6318_v59 = vmov 1966171168   ;;  %v6005_v3 = vld [vmem:[%s11736_s1 + $0x20] ss:$8 sps:$4 sm:$0xff]  }
  0xa9   :  { %v373_v38 = vrot.slane %v372_v44, 1  ;;  %v400_v39 = vadd.f32 %v399_v29, %v398_v2  ;;  %v455_v52 = vrot.slane %v454_v15, 2  ;;  %v510_v55 = vadd.f32 %v509_v26, %v508_v23 }
  0xaa   :  { %v428_v46 = vadd.f32 %v427_v0, %v426_v17  ;;  %v483_v58 = vrot.slane %v482_v37, 2  ;;  %v537_v41 = vrot.slane %v536_v63, 4  ;;  %v636_v60 = vunpack.c.l.s4 %v6318_v59  ;;  %v6007_v17 = vld [vmem:[%s11736_s1 + $0x24] ss:$8 sps:$4 sm:$0x77]  }
  0xab   :  { %v374_v21 = vadd.f32 %v373_v38, %v372_v44  ;;  %v401_v8 = vrot.slane %v400_v39, 1  ;;  %v456_v10 = vadd.f32 %v455_v52, %v454_v15  ;;  %v511_v33 = vrot.slane %v510_v55, 2  ;;  %v6008_v15 = vld [vmem:[%s11736_s1 + $0x30] ss:$8 sps:$4 sm:$0xff]  }
  0xac   :  { %v429_v12 = vrot.slane %v428_v46, 1  ;;  %v484_v5 = vadd.f32 %v483_v58, %v482_v37  ;;  %v538_v49 = vadd.f32 %v537_v41, %v536_v63  ;;  %v637_v9 = vunpack.c.0.s8 %v636_v60 }
  0xad   :  { %v402_v2 = vadd.f32 %v401_v8, %v400_v39  ;;  %v457_v51 = vrot.slane %v456_v10, 1  ;;  %v512_v27 = vadd.f32 %v511_v33, %v510_v55  ;;  %v601_v63 = vadd.f32 %v6829_v1, %v374_v21  ;;  %v6010_v39 = vld [vmem:[%s11736_s1 + $0x34] ss:$8 sps:$4 sm:$0x77]  }
  0xae   :  { %v430_v23 = vadd.f32 %v429_v12, %v428_v46  ;;  %v485_v44 = vrot.slane %v484_v5, 1  ;;  %v539_v29 = vrot.slane %v538_v49, 2  ;;  %v7116_v26 = vsub.s32 %v637_v9, %v6548_v16 }
  0xaf   :  { %v458_v0 = vadd.f32 %v457_v51, %v456_v10  ;;  %v513_v37 = vrot.slane %v512_v27, 1  ;;  %v605_v38 = vadd.f32 %v6829_v1, %v402_v2  ;;  %vm1484_vm7 = vcmask 130048  }
  0xb0   :  { %12023 = vst [vmem:[#allocation23_spill] sm:$0xff] %v7116_v26  ;;  %v486_v52 = vadd.f32 %v485_v44, %v484_v5  ;;  %v540_v55 = vadd.f32 %v539_v29, %v538_v49  ;;  %v609_v46 = vadd.f32 %v6829_v1, %v430_v23  ;;  %v641_v58 = vrot.slane %v6005_v3, %v7116_v26 }
  0xb1   :  { %v514_v41 = vadd.f32 %v513_v37, %v512_v27  ;;  %v613_v59 = vadd.f32 %v6829_v1, %v458_v0  ;;  %v1161_v60 = vrot.slane %v605_v38, 7  ;;  %v648_v8 = vrot.slane %v6007_v17, %v7116_v26 }
  0xb2   :  { %v541_v10 = vrot.slane %v540_v55, 1  ;;  %v617_v21 = vadd.f32 %v6829_v1, %v486_v52  ;;  %v1163_v33 = vrot.slane %v609_v46, 6  ;;  %v655_v12 = vrot.slane %v6008_v15, %v7116_v26 }
  0xb3   :  { %v621_v9 = vadd.f32 %v6829_v1, %v514_v41  ;;  %v1162_v5 = vsel %vm1084_vm1, %v1161_v60, %v601_v63  ;;  %v1165_v49 = vrot.slane %v613_v59, 5  ;;  %v662_v2 = vrot.slane %v6010_v39, %v7116_v26  ;;  %v7160_v59 = vld [vmem:[%s11737_s2 + $0x2] ss:$8 sm:$0xf] }
  0xb4   :  { %v542_v3 = vadd.f32 %v541_v10, %v540_v55  ;;  %v1164_v51 = vsel %vm1087_vm2, %v1163_v33, %v1162_v5  ;;  %v1167_v27 = vrot.slane %v617_v21, 4  ;;  %v663_v23 = vcombine.low %v641_v58, %v655_v12  ;;  %v7190_v5 = vld [vmem:[%s11735_s0 + $0x8] sm:$0x7f] }
  0xb5   :  { %v1166_v17 = vsel %vm1090_vm3, %v1165_v49, %v1164_v51  ;;  %v1169_v44 = vrot.slane %v621_v9, 3  ;;  %v664_v29 = vcombine.high %v641_v58, %v655_v12  ;;  %v665_v0 = vcombine.low %v648_v8, %v662_v2  ;;  %12024 = vst [vmem:[#allocation24_spill] sm:$0xff] %v7190_v5  ;;  %v7206_v51 = vld [vmem:[%s11735_s0 + $0x28] sm:$0x7f] }
  0xb6   :  { %v625_v37 = vadd.f32 %v6829_v1, %v542_v3  ;;  %v1168_v15 = vsel %vm1093_vm4, %v1167_v27, %v1166_v17  ;;  %v666_v38 = vcombine.high %v648_v8, %v662_v2  ;;  %v7137_v63 = vrot.slane %v663_v23, %v7116_v26  ;;  %12025 = vst [vmem:[#allocation25_spill] sm:$0xff] %v7206_v51  ;;  %v7213_v23 = vld [vmem:[%s11735_s0 + $0x88] sm:$0x7f] }
  0xb7   :  { %v1170_v39 = vsel %vm1096_vm5, %v1169_v44, %v1168_v15  ;;  %v7141_v52 = vrot.slane %v665_v0, %v7116_v26  ;;  %v7144_v55 = vrot.slane %v664_v29, %v7116_v26  ;;  %12026 = vst [vmem:[#allocation26_spill] sm:$0xff] %v7213_v23  ;;  %v7220_v44 = vld [vmem:[%s11735_s0 + $0x48] sm:$0x7f]  ;;  %v7231_v15 = vrot.slane %v7160_v59, %v6580_v25 }
  0xb8   :  { %v1171_v46 = vrot.slane %v625_v37, 2  ;;  %v7147_v58 = vrot.slane %v666_v38, %v7116_v26  ;;  %v7151_v1 = vcombine.high %v7137_v63, %v7137_v63  ;;  %v7155_v41 = vrot.slane %v7137_v63, %v6577_v24  ;;  %12027 = vst [vmem:[#allocation27_spill] sm:$0xff] %v7220_v44  ;;  %v7236_v38 = vld [vmem:[%s11735_s0 + $0x68] sm:$0x7f] }
  0xb9   :  { %v7164_v60 = vcombine.high %v7141_v52, %v7141_v52  ;;  %v7168_v8 = vcombine.high %v7144_v55, %v7144_v55  ;;  %v7172_v10 = vrot.slane %v7144_v55, %v6577_v24  ;;  %v7176_v21 = vrot.slane %v7141_v52, %v6577_v24  ;;  %12028 = vst [vmem:[#allocation28_spill] sm:$0xff] %v7236_v38  ;;  %v7255_v26 = vld [vmem:[%s11735_s0 + $0xc8] sm:$0x7f] }
  0xba   :  { %v1172_v33 = vsel %vm1099_vm6, %v1171_v46, %v1170_v39  ;;  %v7181_v12 = vrot.slane %v7151_v1, %v6577_v24  ;;  %v7185_v9 = vrot.slane %v7147_v58, %v6577_v24  ;;  %v839_v49 = vmul.f32 %v7190_v5, %v7155_v41  ;;  %v7243_v46 = vld [vmem:[%s11735_s0 + $0xa8] sm:$0x7f]  ;;  %12030 = vst [vmem:[#allocation30_spill] sm:$0xff] %v7255_v26 }
  0xbb   :  { %5430 = vmatmul.mubr.msk.f32.gmra.mrb[2].mxu1 %vm157_vm0, %v1172_v33  ;;  %v7197_v2 = vrot.slane %v7168_v8, %v6577_v24  ;;  %v7201_v3 = vrot.slane %v7164_v60, %v6577_v24  ;;  %v843_v27 = vmul.f32 %v7206_v51, %v7172_v10  ;;  %v855_v17 = vmul.f32 %v7213_v23, %v7176_v21 }
  0xbc   :  { %v847_v29 = vmul.f32 %v7220_v44, %v7181_v12  ;;  %v907_v0 = vsel %vm157_vm0, %v839_v49, 0.0  ;;  %v7227_v37 = vrot.slane %v7160_v59, %v6577_v24  ;;  %12029 = vst [vmem:[#allocation29_spill] sm:$0xff] %v7243_v46  ;;  %v859_v33 = vmul.f32 %v7243_v46, %v7185_v9 }
  0xbd   :  { %v851_v39 = vmul.f32 %v7236_v38, %v7197_v2  ;;  %v908_v49 = vsel %vm157_vm0, %v843_v27, 0.0  ;;  %v7250_v16 = vrot.slane %v7137_v63, %v6580_v25  ;;  %v863_v24 = vmul.f32 %v7255_v26, %v7201_v3 }
  0xbe   :  { %v909_v23 = vadd.f32 %v908_v49, %v907_v0  ;;  %v910_v38 = vsel %vm157_vm0, %v847_v29, 0.0  ;;  %v7262_v46 = vrot.slane %v7144_v55, %v6580_v25  ;;  %v914_v5 = vsel %vm157_vm0, %v855_v17, 0.0 }
  0xbf   :  { %v912_v27 = vsel %vm157_vm0, %v851_v39, 0.0  ;;  %v7268_v44 = vrot.slane %v7151_v1, %v6580_v25  ;;  %v7272_v51 = vrot.slane %v7168_v8, %v6580_v25  ;;  %v7276_v29 = vrot.slane %v7141_v52, %v6580_v25  ;;  %v7289_v39 = vld [vmem:[%s11735_s0] sm:$0x7f] }
  0xc0   :  { %v911_v26 = vadd.f32 %v910_v38, %v909_v23  ;;  %v7280_v0 = vrot.slane %v7147_v58, %v6580_v25  ;;  %v7284_v17 = vrot.slane %v7164_v60, %v6580_v25  ;;  %12031 = vst [vmem:[#allocation31_spill] sm:$0xff] %v7289_v39  ;;  %v838_v23 = vmul.f32 %v7289_v39, %v7250_v16  ;;  %v7296_v38 = vld [vmem:[%s11735_s0 + $0x20] sm:$0x7f] }
  0xc1   :  { %12032 = vst [vmem:[#allocation32_spill] sm:$0xff] %v7296_v38  ;;  %v842_v49 = vmul.f32 %v7296_v38, %v7262_v46  ;;  %v7303_v25 = vld [vmem:[%s11735_s0 + $0x40] sm:$0x7f]  ;;  %v916_v54 = vsel %vm157_vm0, %v859_v33, 0.0  ;;  %v918_v38 = vsel %vm157_vm0, %v863_v24, 0.0  ;;  %vm5389_vm8 = vcmask 1047559  }
  0xc2   :  { %12033 = vst [vmem:[#allocation33_spill] sm:$0xff] %v7303_v25  ;;  %v846_v47 = vmul.f32 %v7303_v25, %v7268_v44  ;;  %v7310_v39 = vld [vmem:[%s11735_s0 + $0x60] sm:$0x7f]  ;;  %v913_v40 = vadd.f32 %v912_v27, %v911_v26  ;;  %v854_v25 = vmul.f32 %v7319_v50, %v7276_v29  ;;  %v858_v26 = vmul.f32 %v7326_v4, %v7280_v0 }
  0xc3   :  { %12034 = vst [vmem:[#allocation34_spill] sm:$0xff] %v7310_v39  ;;  %v850_v57 = vmul.f32 %v7310_v39, %v7272_v51  ;;  %v894_v33 = vsel %vm157_vm0, %v838_v23, 0.0  ;;  %v895_v24 = vsel %vm157_vm0, %v842_v49, 0.0  ;;  %v862_v50 = vmul.f32 %v7336_v36, %v7284_v17 }
  0xc4   :  { %v897_v27 = vsel %vm157_vm0, %v846_v47, 0.0  ;;  %v915_v39 = vadd.f32 %v914_v5, %v913_v40  ;;  %v896_v28 = vadd.f32 %v895_v24, %v894_v33  ;;  %v901_v4 = vsel %vm157_vm0, %v854_v25, 0.0 }
  0xc5   :  { %v899_v14 = vsel %vm157_vm0, %v850_v57, 0.0  ;;  %v7344_v23 = vrot.slane %v7137_v63, %v6594_v31  ;;  %v7348_v40 = vrot.slane %v7144_v55, %v6594_v31  ;;  %v7352_v47 = vrot.slane %v7151_v1, %v6594_v31 }
  0xc6   :  { %v917_v5 = vadd.f32 %v916_v54, %v915_v39  ;;  %v898_v49 = vadd.f32 %v897_v27, %v896_v28  ;;  %v7356_v33 = vrot.slane %v7168_v8, %v6594_v31  ;;  %v7360_v25 = vrot.slane %v7141_v52, %v6594_v31  ;;  %v7373_v28 = vld [vmem:[%s11735_s0 + $0x18] sm:$0x7f] }
  0xc7   :  { %12038 = vst [vmem:[#allocation38_spill] sm:$0xff] %v7348_v40  ;;  %12039 = vst [vmem:[#allocation39_spill] sm:$0xff] %v7352_v47  ;;  %v7364_v57 = vrot.slane %v7147_v58, %v6594_v31  ;;  %v7368_v24 = vrot.slane %v7164_v60, %v6594_v31  ;;  %v841_v54 = vmul.f32 %v7373_v28, %v7344_v23  ;;  %v7380_v39 = vld [vmem:[%s11735_s0 + $0x38] sm:$0x7f] }
  0xc8   :  { %12040 = vst [vmem:[#allocation40_spill] sm:$0xff] %v7356_v33  ;;  %12041 = vst [vmem:[#allocation41_spill] sm:$0xff] %v7360_v25  ;;  %v845_v27 = vmul.f32 %v7380_v39, %v7348_v40  ;;  %v919_v36 = vadd.f32 %v918_v38, %v917_v5  ;;  %v900_v48 = vadd.f32 %v899_v14, %v898_v49  ;;  %v7402_v14 = vld [vmem:[%s11735_s0 + $0x98] sm:$0x7f]  ;;  %v905_v40 = vsel %vm157_vm0, %v862_v50, 0.0 }
  0xc9   :  { %12042 = vst [vmem:[#allocation42_spill] sm:$0xff] %v7373_v28  ;;  %12043 = vst [vmem:[#allocation43_spill] sm:$0xff] %v7380_v39  ;;  %v849_v34 = vmul.f32 %v7387_v11, %v7352_v47  ;;  %v7394_v28 = vld [vmem:[%s11735_s0 + $0x78] sm:$0x7f]  ;;  %v903_v39 = vsel %vm157_vm0, %v858_v26, 0.0  ;;  %v857_v38 = vmul.f32 %v7402_v14, %v7360_v25 }
  0xca   :  { %12045 = vst [vmem:[#allocation45_spill] sm:$0xff] %v7394_v28  ;;  %v853_v45 = vmul.f32 %v7394_v28, %v7356_v33  ;;  %12046 = vst [vmem:[#allocation46_spill] sm:$0xff] %v7402_v14  ;;  %v7409_v5 = vld [vmem:[%s11735_s0 + $0xb8] sm:$0x7f]  ;;  %v933_v28 = vsel %vm157_vm0, %v841_v54, 0.0  ;;  %v1020_v26 = vadd.f32 %v7227_v37, %v919_v36  ;;  %v902_v11 = vadd.f32 %v901_v4, %v900_v48 }
  0xcb   :  { %12047 = vst [vmem:[#allocation47_spill] sm:$0xff] %v7409_v5  ;;  %v861_v49 = vmul.f32 %v7409_v5, %v7364_v57  ;;  %v934_v33 = vsel %vm157_vm0, %v845_v27, 0.0  ;;  %v936_v47 = vsel %vm157_vm0, %v849_v34, 0.0  ;;  %v7421_v14 = vld [vmem:[%s11735_s0 + $0xd8] sm:$0x7f]  ;;  %v940_v36 = vsel %vm157_vm0, %v857_v38, 0.0 }
  0xcc   :  { %12048 = vst [vmem:[#allocation48_spill] sm:$0xff] %v7421_v14  ;;  %v865_v25 = vmul.f32 %v7421_v14, %v7368_v24  ;;  %v935_v5 = vadd.f32 %v934_v33, %v933_v28  ;;  %v938_v54 = vsel %vm157_vm0, %v853_v45, 0.0  ;;  %5423 = vmatprep.mubr.msk.f32.mxu0 %vm157_vm0, %v1020_v26  ;;  %v904_v48 = vadd.f32 %v903_v39, %v902_v11  ;;  %v7482_v38 = vld [vmem:[%s11735_s0 + $0x70] sm:$0x7f] }
  0xcd   :  { %v942_v34 = vsel %vm157_vm0, %v861_v49, 0.0  ;;  %v7431_v4 = vrot.slane %v7137_v63, %v6639_v53  ;;  %v7435_v27 = vrot.slane %v7144_v55, %v6639_v53  ;;  %v7439_v33 = vrot.slane %v7151_v1, %v6639_v53  ;;  %v7460_v1 = vld [vmem:[%s11735_s0 + $0x10] sm:$0x7f]  ;;  %12053 = vst [vmem:[#allocation53_spill] sm:$0xff] %v7482_v38 }
  0xce   :  { %v937_v50 = vadd.f32 %v936_v47, %v935_v5  ;;  %v7443_v45 = vrot.slane %v7168_v8, %v6639_v53  ;;  %v906_v11 = vadd.f32 %v905_v40, %v904_v48  ;;  %v7447_v28 = vrot.slane %v7141_v52, %v6639_v53  ;;  %12050 = vst [vmem:[#allocation50_spill] sm:$0xff] %v7460_v1  ;;  %v7467_v52 = vld [vmem:[%s11735_s0 + $0x30] sm:$0x7f] }
  0xcf   :  { %v7451_v63 = vrot.slane %v7147_v58, %v6639_v53  ;;  %v7455_v55 = vrot.slane %v7164_v60, %v6639_v53  ;;  %v840_v8 = vmul.f32 %v7460_v1, %v7431_v4  ;;  %12051 = vst [vmem:[#allocation51_spill] sm:$0xff] %v7467_v52  ;;  %v844_v58 = vmul.f32 %v7467_v52, %v7435_v27  ;;  %v7474_v60 = vld [vmem:[%s11735_s0 + $0x50] sm:$0x7f] }
  0xd0   :  { %v939_v47 = vadd.f32 %v938_v54, %v937_v50  ;;  %12052 = vst [vmem:[#allocation52_spill] sm:$0xff] %v7474_v60  ;;  %v848_v40 = vmul.f32 %v7474_v60, %v7439_v33  ;;  %v1019_v39 = vadd.f32 %v7231_v15, %v906_v11  ;;  %v852_v5 = vmul.f32 %v7482_v38, %v7443_v45  ;;  %v7489_v49 = vld [vmem:[%s11735_s0 + $0x90] sm:$0x7f] }
  0xd1   :  { %12049 = vst [vmem:[#allocation49_spill] sm:$0xff] %v7455_v55  ;;  %12054 = vst [vmem:[#allocation54_spill] sm:$0xff] %v7489_v49  ;;  %v856_v26 = vmul.f32 %v7489_v49, %v7447_v28  ;;  %v6171_v54 = vld [vmem:[%s11735_s0 + $0xb0] sm:$0x7f]  ;;  %v920_v60 = vsel %vm157_vm0, %v840_v8, 0.0  ;;  %v921_v52 = vsel %vm157_vm0, %v844_v58, 0.0  ;;  %v7507_v1 = vrot.slane %v7160_v59, %v6594_v31 }
  0xd2   :  { %v860_v48 = vmul.f32 %v6171_v54, %v7451_v63  ;;  %v941_v50 = vadd.f32 %v940_v36, %v939_v47  ;;  %v6172_v11 = vld [vmem:[%s11735_s0 + $0xd0] sm:$0x7f]  ;;  %5424 = vmatmul.mubr.msk.f32.gmra.mrb[4].mxu0 %vm157_vm0, %v1019_v39  ;;  %v944_v49 = vsel %vm157_vm0, %v865_v25, 0.0  ;;  %v922_v54 = vadd.f32 %v921_v52, %v920_v60 }
  0xd3   :  { %v864_v38 = vmul.f32 %v6172_v11, %v7455_v55  ;;  %v923_v36 = vsel %vm157_vm0, %v848_v40, 0.0  ;;  %v925_v14 = vsel %vm157_vm0, %v852_v5, 0.0  ;;  %v927_v11 = vsel %vm157_vm0, %v856_v26, 0.0 }
  0xd4   :  { %v943_v47 = vadd.f32 %v942_v34, %v941_v50  ;;  %v929_v8 = vsel %vm157_vm0, %v860_v48, 0.0  ;;  %v924_v55 = vadd.f32 %v923_v36, %v922_v54  ;;  %v867_v58 = vmul.f32 %v7155_v41, %v6825_v61  ;;  %v12056_v54 = vld [vmem:[#allocation38_spill] sm:$0xff] }
  0xd5   :  { %v871_v25 = vmul.f32 %v7172_v10, %v6834_v7  ;;  %v875_v39 = vmul.f32 %v7181_v12, %v6839_v13  ;;  %v931_v60 = vsel %vm157_vm0, %v864_v38, 0.0  ;;  %v879_v34 = vmul.f32 %v7197_v2, %v6846_v19 }
  0xd6   :  { %v945_v52 = vadd.f32 %v944_v49, %v943_v47  ;;  %v883_v40 = vmul.f32 %v7176_v21, %v6855_v32  ;;  %v926_v5 = vadd.f32 %v925_v14, %v924_v55  ;;  %v887_v26 = vmul.f32 %v7185_v9, %v6860_v22 }
  0xd7   :  { %v959_v61 = vsel %vm157_vm0, %v867_v58, 0.0  ;;  %v960_v7 = vsel %vm157_vm0, %v871_v25, 0.0  ;;  %v7531_v13 = vrot.slane %v7160_v59, %v6639_v53  ;;  %v962_v19 = vsel %vm157_vm0, %v875_v39, 0.0  ;;  %v12059_v58 = vld [vmem:[#allocation12_spill] sm:$0xff] }
  0xd8   :  { %v1022_v41 = vadd.f32 %v7507_v1, %v945_v52  ;;  %v961_v10 = vadd.f32 %v960_v7, %v959_v61  ;;  %v928_v12 = vadd.f32 %v927_v11, %v926_v5  ;;  %v891_v32 = vmul.f32 %v7201_v3, %v6871_v42  ;;  %v12058_v11 = vld [vmem:[#allocation39_spill] sm:$0xff]  ;;  %v12060_v25 = vld [vmem:[#allocation40_spill] sm:$0xff]  ;;  %v12062_v5 = vld [vmem:[#allocation41_spill] sm:$0xff] }
  0xd9   :  { %v964_v21 = vsel %vm157_vm0, %v879_v34, 0.0  ;;  %v966_v22 = vsel %vm157_vm0, %v883_v40, 0.0  ;;  %v866_v2 = vmul.f32 %v7250_v16, %v6897_v30  ;;  %v870_v59 = vmul.f32 %v7262_v46, %v6904_v43  ;;  %v12061_v40 = vld [vmem:[#allocation13_spill] sm:$0xff] }
  0xda   :  { %5431 = vmatprep.mubr.msk.f32.mxu1 %vm157_vm0, %v1022_v41  ;;  %v963_v9 = vadd.f32 %v962_v19, %v961_v10  ;;  %v874_v14 = vmul.f32 %v7268_v44, %v6911_v56  ;;  %v930_v55 = vadd.f32 %v929_v8, %v928_v12  ;;  %v968_v38 = vsel %vm157_vm0, %v887_v26, 0.0  ;;  %v12063_v10 = vld [vmem:[#allocation14_spill] sm:$0xff]  ;;  %v12064_v12 = vld [vmem:[#allocation15_spill] sm:$0xff] }
  0xdb   :  { %v878_v42 = vmul.f32 %v7272_v51, %v6916_v62  ;;  %v882_v3 = vmul.f32 %v7276_v29, %v6923_v6  ;;  %v886_v48 = vmul.f32 %v7280_v0, %v6932_v18  ;;  %v946_v16 = vsel %vm157_vm0, %v866_v2, 0.0  ;;  %v12055_v0 = vld [vmem:[#allocation10_spill] sm:$0xff]  ;;  %v12065_v2 = vld [vmem:[#allocation16_spill] sm:$0xff] }
  0xdc   :  { %v965_v49 = vadd.f32 %v964_v21, %v963_v9  ;;  %v947_v30 = vsel %vm157_vm0, %v870_v59, 0.0  ;;  %v932_v43 = vadd.f32 %v931_v60, %v930_v55  ;;  %v890_v56 = vmul.f32 %v7284_v17, %v6937_v20  ;;  %v12057_v17 = vld [vmem:[#allocation11_spill] sm:$0xff] }
  0xdd   :  { %v948_v44 = vadd.f32 %v947_v30, %v946_v16  ;;  %v949_v46 = vsel %vm157_vm0, %v874_v14, 0.0  ;;  %v970_v62 = vsel %vm157_vm0, %v891_v32, 0.0  ;;  %v951_v6 = vsel %vm157_vm0, %v878_v42, 0.0  ;;  %v12066_v14 = vld [vmem:[#allocation17_spill] sm:$0xff] }
  0xde   :  { %v967_v50 = vadd.f32 %v966_v22, %v965_v49  ;;  %v1021_v51 = vadd.f32 %v7531_v13, %v932_v43  ;;  %v869_v18 = vmul.f32 %v7344_v23, %v6967_v35  ;;  %v873_v36 = vmul.f32 %v12056_v54, %v12055_v0 }
  0xdf   :  { %v950_v29 = vadd.f32 %v949_v46, %v948_v44  ;;  %v953_v20 = vsel %vm157_vm0, %v882_v3, 0.0  ;;  %v877_v8 = vmul.f32 %v12058_v11, %v12057_v17  ;;  %v881_v39 = vmul.f32 %v12060_v25, %v12059_v58  ;;  %v12067_v3 = vld [vmem:[#allocation18_spill] sm:$0xff]  ;;  %v1476_v44 = vld [vmem:[%s11740_s5 + $0x40] sm:$0xff]  ;;  %v1471_v46 = vld [vmem:[%s11740_s5 + $0x18] sm:$0xff] }
  0xe0   :  { %v969_v47 = vadd.f32 %v968_v38, %v967_v50  ;;  %5432 = vmatmul.mubr.msk.f32.gmra.mrb[4].mxu1 %vm157_vm0, %v1021_v51  ;;  %v955_v60 = vsel %vm157_vm0, %v886_v48, 0.0  ;;  %v957_v34 = vsel %vm157_vm0, %v890_v56, 0.0  ;;  %v985_v35 = vsel %vm157_vm0, %v869_v18, 0.0  ;;  %v1479_v50 = vld [vmem:[%s11740_s5 + $0x58] sm:$0xff]  ;;  %v12070_v51 = vld [vmem:[#allocation21_spill] sm:$0xff]  ;;  %v1478_v17 = vld [vmem:[%s11740_s5 + $0x50] sm:$0xff] }
  0xe1   :  { %v952_v52 = vadd.f32 %v951_v6, %v950_v29  ;;  %v885_v26 = vmul.f32 %v12062_v5, %v12061_v40  ;;  %v986_v61 = vsel %vm157_vm0, %v873_v36, 0.0  ;;  %v988_v7 = vsel %vm157_vm0, %v877_v8, 0.0 }
  0xe2   :  { %v971_v23 = vadd.f32 %v970_v62, %v969_v47  ;;  %v889_v19 = vmul.f32 %v7364_v57, %v12063_v10  ;;  %v893_v32 = vmul.f32 %v7368_v24, %v12064_v12  ;;  %v987_v21 = vadd.f32 %v986_v61, %v985_v35  ;;  %v12068_v57 = vld [vmem:[#allocation19_spill] sm:$0xff]  ;;  %v12069_v24 = vld [vmem:[#allocation20_spill] sm:$0xff] }
  0xe3   :  { %v954_v41 = vadd.f32 %v953_v20, %v952_v52  ;;  %v990_v9 = vsel %vm157_vm0, %v881_v39, 0.0  ;;  %v868_v59 = vmul.f32 %v7431_v4, %v12065_v2  ;;  %v872_v55 = vmul.f32 %v7435_v27, %v12066_v14  ;;  %v1469_v27 = vld [vmem:[%s11740_s5 + $0x8] sm:$0xff]  ;;  %v1470_v20 = vld [vmem:[%s11740_s5 + $0x10] sm:$0xff] }
  0xe4   :  { %v1024_v22 = vadd.f32 %v7227_v37, %v971_v23  ;;  %v989_v42 = vadd.f32 %v988_v7, %v987_v21  ;;  %v876_v49 = vmul.f32 %v7439_v33, %v12067_v3  ;;  %v880_v48 = vmul.f32 %v7443_v45, %v12068_v57  ;;  %v1477_v33 = vld [vmem:[%s11740_s5 + $0x48] sm:$0xff]  ;;  %v1468_v45 = vld [vmem:[%s11740_s5] sm:$0xff] }
  0xe5   :  { %v956_v38 = vadd.f32 %v955_v60, %v954_v41  ;;  %v992_v37 = vsel %vm157_vm0, %v885_v26, 0.0  ;;  %v884_v16 = vmul.f32 %v7447_v28, %v12069_v24  ;;  %v972_v4 = vsel %vm157_vm0, %v868_v59, 0.0  ;;  %v12072_v39 = vld [vmem:[#allocation49_spill] sm:$0xff]  ;;  %v1475_v24 = vld [vmem:[%s11740_s5 + $0x38] sm:$0xff] }
  0xe6   :  { %5425 = vmatprep.mubr.msk.f32.mxu0 %vm157_vm0, %v1024_v22  ;;  %v991_v43 = vadd.f32 %v990_v9, %v989_v42  ;;  %v973_v56 = vsel %vm157_vm0, %v872_v55, 0.0  ;;  %v975_v28 = vsel %vm157_vm0, %v876_v49, 0.0  ;;  %v994_v62 = vsel %vm157_vm0, %v889_v19, 0.0  ;;  %v1473_v3 = vld [vmem:[%s11740_s5 + $0x28] sm:$0xff] }
  0xe7   :  { %v958_v30 = vadd.f32 %v957_v34, %v956_v38  ;;  %v996_v6 = vsel %vm157_vm0, %v893_v32, 0.0  ;;  %v888_v29 = vmul.f32 %v7451_v63, %v12070_v51  ;;  %v974_v18 = vadd.f32 %v973_v56, %v972_v4  ;;  %v7641_v32 = vld [vmem:[%s11739_s4] ss:$0 sm:$0xff]  ;;  %v1481_v49 = vld [vmem:[%s11740_s5 + $0x68] sm:$0xff]  ;;  %v1483_v4 = vld [vmem:[%s11740_s5 + $0x78] sm:$0xff] }
  0xe8   :  { %v993_v54 = vadd.f32 %v992_v37, %v991_v43  ;;  %v977_v36 = vsel %vm157_vm0, %v880_v48, 0.0  ;;  %v5905_v47 = vpack.c.bf16 %v1477_v33, %v1469_v27  ;;  %v5907_v8 = vpack.c.bf16 %v1476_v44, %v1468_v45  ;;  %v1472_v48 = vld [vmem:[%s11740_s5 + $0x20] sm:$0xff]  ;;  %v1474_v27 = vld [vmem:[%s11740_s5 + $0x30] sm:$0xff]  ;;  %v5496_v56 = vld [vmem:[%s11738_s3 + $0x288] sm:$0xff] }
  0xe9   :  { %v1023_v0 = vadd.f32 %v7231_v15, %v958_v30  ;;  %v976_v11 = vadd.f32 %v975_v28, %v974_v18  ;;  %v5909_v58 = vpack.c.bf16 %v1479_v50, %v1471_v46  ;;  %v5911_v25 = vpack.c.bf16 %v1478_v17, %v1470_v20  ;;  %v12071_v15 = vld [vmem:[#allocation22_spill] sm:$0xff]  ;;  %v1480_v37 = vld [vmem:[%s11740_s5 + $0x60] sm:$0xff]  ;;  %v5528_v46 = vld [vmem:[%s11738_s3 + $0x388] sm:$0xff] }
  0xea   :  { %v995_v63 = vadd.f32 %v994_v62, %v993_v54  ;;  %v892_v52 = vmul.f32 %v12072_v39, %v12071_v15  ;;  %v979_v60 = vsel %vm157_vm0, %v884_v16, 0.0  ;;  %5906 = vmatprep.subr.bf16.mxu0 %v5905_v47  ;;  %v981_v23 = vsel %vm157_vm0, %v888_v29, 0.0  ;;  %v1482_v33 = vld [vmem:[%s11740_s5 + $0x70] sm:$0xff]  ;;  %v5495_v43 = vld [vmem:[%s11738_s3 + $0x280] sm:$0xff]  ;;  %v7708_v29 = vld [vmem:[%s11738_s3 + $0x308] sm:$0xff] }
  0xeb   :  { %5426 = vmatmul.mubr.msk.f32.gmra.mrb[6].mxu0 %vm157_vm0, %v1023_v0  ;;  %v978_v34 = vadd.f32 %v977_v36, %v976_v11  ;;  %5910 = vmatprep.subr.bf16.mxu1 %v5909_v58  ;;  %v5913_v57 = vpack.c.bf16 %v1481_v49, %v1473_v3  ;;  %v5915_v16 = vpack.c.bf16 %v1480_v37, %v1472_v48  ;;  %v5527_v44 = vld [vmem:[%s11738_s3 + $0x380] sm:$0xff]  ;;  %v7713_v18 = vld [vmem:[%s11738_s3 + $0x290] sm:$0xff]  ;;  %v7718_v0 = vld [vmem:[%s11738_s3 + $0x298] sm:$0xff] }
  0xec   :  { %5908 = vmatpush1.bf16.msra.mxu0 %v5907_v8  ;;  %v997_v35 = vadd.f32 %v996_v6, %v995_v63  ;;  %5912 = vmatpush1.bf16.msra.mxu1 %v5911_v25  ;;  %v983_v26 = vsel %vm157_vm0, %v892_v52, 0.0  ;;  %v5917_v45 = vpack.c.bf16 %v1483_v4, %v1475_v24  ;;  %v5919_v30 = vpack.c.bf16 %v1482_v33, %v1474_v27  ;;  %v7693_v50 = vld [vmem:[%s11738_s3 + $0x200] sm:$0xff]  ;;  %v7698_v6 = vld [vmem:[%s11738_s3 + $0x208] sm:$0xff]  ;;  %v7723_v54 = vld [vmem:[%s11738_s3 + $0x210] sm:$0xff] }
  0xed   :  { %v980_v40 = vadd.f32 %v979_v60, %v978_v34  ;;  %5914 = vmatprep.subr.bf16.mxu0 %v5913_v57  ;;  %v5921_v28 = vpack.c.bf16 %v5496_v56, %v5495_v43  ;;  %v5953_v62 = vpack.c.bf16 %v5528_v46, %v5527_v44  ;;  %v7703_v51 = vld [vmem:[%s11738_s3 + $0x300] sm:$0xff]  ;;  %v7728_v36 = vld [vmem:[%s11738_s3 + $0x218] sm:$0xff]  ;;  %v7733_v47 = vld [vmem:[%s11738_s3 + $0x390] sm:$0xff] }
  0xee   :  { %v1026_v5 = vadd.f32 %v7507_v1, %v997_v35  ;;  %5918 = vmatprep.subr.bf16.mxu1 %v5917_v45  ;;  %v7738_v20 = vld [vmem:[%s11738_s3 + $0x398] sm:$0xff]  ;;  %v7743_v17 = vld [vmem:[%s11738_s3 + $0x310] sm:$0xff]  ;;  %v7757_v25 = vld [vmem:[%s11738_s3 + $0x2a0] sm:$0xff] }
  0xef   :  { %v982_v61 = vadd.f32 %v981_v23, %v980_v40  ;;  %v7748_v11 = vld [vmem:[%s11738_s3 + $0x318] sm:$0xff]  ;;  %v7762_v63 = vld [vmem:[%s11738_s3 + $0x2a8] sm:$0xff]  ;;  %v7778_v34 = vld [vmem:[%s11738_s3 + $0x220] sm:$0xff] }
  0xf0   :  { %5433 = vmatprep.mubr.msk.f32.mxu1 %vm157_vm0, %v1026_v5  ;;  %v7767_v15 = vld [vmem:[%s11736_s1 + $0x48] sm:$0x7f]  ;;  %v7788_v23 = vld [vmem:[%s11738_s3 + $0x3a0] sm:$0xff]  ;;  %v7836_v3 = vld [vmem:[%s11738_s3 + $0x2b8] sm:$0xff] }
  0xf1   :  { %v984_v7 = vadd.f32 %v983_v26, %v982_v61  ;;  %v7783_v35 = vld [vmem:[%s11738_s3 + $0x228] sm:$0xff]  ;;  %v12078_v49 = vld [vmem:[#allocation26_spill] sm:$0xff]  ;;  %v12079_v24 = vld [vmem:[#allocation31_spill] sm:$0xff] }
  0xf2   :  { %v12073_v40 = vld [vmem:[#allocation25_spill] sm:$0xff]  ;;  %v2560_v57 = vmul.f32 %v12078_v49, %v7767_v15  ;;  %v7851_v27 = vld [vmem:[%s11738_s3 + $0x230] sm:$0xff]  ;;  %v7856_v33 = vld [vmem:[%s11738_s3 + $0x238] sm:$0xff] }
  0xf3   :  { %v1025_v41 = vadd.f32 %v7531_v13, %v984_v7  ;;  %v11795_v13 = vmov 0.0   ;;  %v2548_v5 = vmul.f32 %v12073_v40, %v7767_v15  ;;  %12080 = vst [vmem:[#allocation38_spill] sm:$0xff] %v7851_v27  ;;  %12081 = vst [vmem:[#allocation11_spill] sm:$0xff] %v7856_v33  ;;  %v7861_v45 = vld [vmem:[%s11738_s3 + $0x3b0] sm:$0xff]  ;;  %v7871_v46 = vld [vmem:[%s11738_s3 + $0x3b8] sm:$0xff] }
  0xf4   :  { %1561 = vmatprep.mubr.f32.mxu0 %v11795_v13  ;;  %12082 = vst [vmem:[#allocation39_spill] sm:$0xff] %v7861_v45  ;;  %12084 = vst [vmem:[#allocation12_spill] sm:$0xff] %v7871_v46  ;;  %v7881_v40 = vld [vmem:[%s11738_s3 + $0x338] sm:$0xff]  ;;  %v7893_v4 = vld [vmem:[%s11738_s3 + $0x2c0] sm:$0xff] }
  0xf5   :  { %5434 = vmatmul.mubr.msk.f32.gmra.mrb[6].mxu1 %vm157_vm0, %v1025_v41  ;;  %v7801_v41 = vld [vmem:[%s11738_s3 + $0x3a8] sm:$0xff]  ;;  %v2634_v48 = vsel %vm157_vm0, %v2548_v5, 0.0  ;;  %12086 = vst [vmem:[#allocation13_spill] sm:$0xff] %v7881_v40  ;;  %v12087_v5 = vld [vmem:[#allocation30_spill] sm:$0xff]  ;;  %12088 = vst [vmem:[#allocation41_spill] sm:$0xff] %v7893_v4 }
  0xf6   :  { %1646 = vmatprep.mubr.f32.mxu1 %v11795_v13  ;;  %v7945_v58 = vld [vmem:[%s11738_s3 + $0x2d0] sm:$0xff]  ;;  %v7950_v8 = vld [vmem:[%s11738_s3 + $0x2d8] sm:$0xff]  ;;  %v12122_v4 = vld [vmem:[#allocation33_spill] sm:$0xff] }
  0xf7   :  { %12096 = vst [vmem:[#allocation21_spill] sm:$0xff] %v7945_v58  ;;  %12097 = vst [vmem:[#allocation22_spill] sm:$0xff] %v7950_v8  ;;  %v7981_v52 = vld [vmem:[%s11738_s3 + $0x350] sm:$0xff]  ;;  %v7986_v60 = vld [vmem:[%s11738_s3 + $0x358] sm:$0xff] }
  0xf8   :  { %12103 = vst [vmem:[#allocation26_spill] sm:$0xff] %v7986_v60 }
 0x11c   :  { %v5697_v10 = vpop.f32.mrb[0].mxu0 }
 0x11d   :  { %v5698_v19 = vpop.f32.mrb[1].mxu0 }
 0x11e   :  { %v5699_v12 = vadd.f32 %v5698_v19, %v5697_v10  ;;  %v7806_v10 = vld [vmem:[%s11738_s3 + $0x320] sm:$0xff]  ;;  %v7811_v19 = vld [vmem:[%s11738_s3 + $0x328] sm:$0xff] }
 0x120   :  { %v1345_v1 = vadd.f32 %v5699_v12, %v7641_v32  ;;  %v12074_v12 = vld [vmem:[#allocation27_spill] sm:$0xff] }
 0x142   :  { %v5741_v21 = vpop.f32.mrb[0].mxu1 }
 0x143   :  { %v5742_v22 = vpop.f32.mrb[1].mxu1 }
 0x144   :  { %v5743_v9 = vadd.f32 %v5742_v22, %v5741_v21  ;;  %v2718_v21 = vsel %vm157_vm0, %v2560_v57, 0.0 }
 0x146   :  { %v1430_v2 = vadd.f32 %v5743_v9, %v1345_v1  ;;  %v2552_v1 = vmul.f32 %v12074_v12, %v7767_v15  ;;  %v12075_v9 = vld [vmem:[#allocation24_spill] sm:$0xff]  ;;  %v2568_v12 = vmul.f32 %v12087_v5, %v7767_v15  ;;  %v7898_v5 = vld [vmem:[%s11738_s3 + $0x2c8] sm:$0xff] }
 0x147   :  { %12089 = vst [vmem:[#allocation14_spill] sm:$0xff] %v7898_v5 }
 0x148   :  { %v1448_v59 = vadd.f32 3.0, %v1430_v2  ;;  %v2662_v37 = vsel %vm157_vm0, %v2552_v1, 0.0 }
 0x14a   :  { %v1452_v14 = vmax.f32 %v1448_v59, 0.0  ;;  %v12076_v59 = vld [vmem:[#allocation28_spill] sm:$0xff] }
 0x14b   :  { %12102 = vst [vmem:[#allocation28_spill] sm:$0xff] %v7981_v52 }
 0x14c   :  { %v1456_v55 = vmin.f32 %v1452_v14, 6.0  ;;  %v2556_v14 = vmul.f32 %v12076_v59, %v7767_v15 }
 0x14e   :  { %v1460_v38 = vmul.f32 0.16666667, %v1456_v55  ;;  %v7826_v55 = vld [vmem:[%s11736_s1 + $0x40] sm:$0x7f] }
 0x14f   :  { %v2551_v5 = vmul.f32 %v12122_v4, %v7826_v55  ;;  %v12126_v4 = vld [vmem:[#allocation37_spill] sm:$0xff] }
 0x150   :  { %v7646_v42 = vmul.f32 %v1460_v38, %v1430_v2  ;;  %v2544_v2 = vmul.f32 %v12075_v9, %v7767_v15  ;;  %v7831_v38 = vld [vmem:[%s11738_s3 + $0x2b0] sm:$0xff]  ;;  %v2663_v9 = vrot.slane %v2662_v37, 4 }
 0x151   :  { %12077 = vst [vmem:[#allocation10_spill] sm:$0xff] %v7831_v38 }
 0x152   :  { %5435 = vmatmul.mubr.msk.f32.vlgmr.msra.gmra.mrb[8].mxu0 %vm1484_vm7, %v7646_v42  ;;  %5439 = vmatmul.mubr.msk.f32.vlgmr.msra.gmra.mrb[8].mxu1 %vm1484_vm7, %v7646_v42  ;;  %v2606_v56 = vsel %vm157_vm0, %v2544_v2, 0.0  ;;  %v2664_v7 = vadd.f32 %v2663_v9, %v2662_v37  ;;  %v7916_v37 = vld [vmem:[%s11738_s3 + $0x3c0] sm:$0xff] }
 0x153   :  { %1567 = vmatprep.mubr.f32.mxu0 %v11795_v13  ;;  %1652 = vmatprep.mubr.f32.mxu1 %v11795_v13  ;;  %v2607_v1 = vrot.slane %v2606_v56, 4  ;;  %12092 = vst [vmem:[#allocation17_spill] sm:$0xff] %v7916_v37  ;;  %v7928_v9 = vld [vmem:[%s11738_s3 + $0x340] sm:$0xff]  ;;  %v8054_v37 = vld [vmem:[%s11738_s3 + $0x2f0] sm:$0xff] }
 0x154   :  { %5916 = vmatpush1.bf16.msra.mxu0 %v5915_v16  ;;  %5920 = vmatpush1.bf16.msra.mxu1 %v5919_v30  ;;  %v7844_v16 = vmul.f32 %v12079_v24, %v7826_v55  ;;  %v12083_v30 = vld [vmem:[#allocation29_spill] sm:$0xff]  ;;  %12094 = vst [vmem:[#allocation19_spill] sm:$0xff] %v7928_v9  ;;  %v2665_v61 = vrot.slane %v2664_v7, 2 }
 0x155   :  { %5922 = vmatprep.subr.bf16.mxu0 %v5921_v28  ;;  %5954 = vmatprep.subr.bf16.mxu1 %v5953_v62  ;;  %v2564_v43 = vmul.f32 %v12083_v30, %v7767_v15  ;;  %v2635_v28 = vrot.slane %v2634_v48, 4  ;;  %v7876_v62 = vld [vmem:[%s11738_s3 + $0x330] sm:$0xff]  ;;  %v2690_v30 = vsel %vm157_vm0, %v2556_v14, 0.0  ;;  %v2608_v22 = vadd.f32 %v2607_v1, %v2606_v56  ;;  %v7923_v1 = vld [vmem:[%s11738_s3 + $0x3c8] sm:$0xff] }
 0x156   :  { %12085 = vst [vmem:[#allocation40_spill] sm:$0xff] %v7876_v62  ;;  %v2691_v59 = vrot.slane %v2690_v30, 4  ;;  %v2719_v56 = vrot.slane %v2718_v21, 4  ;;  %12093 = vst [vmem:[#allocation18_spill] sm:$0xff] %v7923_v1 }
 0x157   :  { %v2636_v24 = vadd.f32 %v2635_v28, %v2634_v48  ;;  %v7906_v48 = vld [vmem:[%s11738_s3 + $0x240] sm:$0xff]  ;;  %v7911_v28 = vld [vmem:[%s11738_s3 + $0x248] sm:$0xff]  ;;  %v2609_v14 = vrot.slane %v2608_v22, 2 }
 0x158   :  { %12090 = vst [vmem:[#allocation15_spill] sm:$0xff] %v7906_v48  ;;  %12091 = vst [vmem:[#allocation16_spill] sm:$0xff] %v7911_v28  ;;  %v2692_v26 = vadd.f32 %v2691_v59, %v2690_v30  ;;  %v2720_v13 = vadd.f32 %v2719_v56, %v2718_v21  ;;  %v2774_v21 = vsel %vm157_vm0, %v2568_v12, 0.0  ;;  %v7976_v56 = vld [vmem:[%s11738_s3 + $0x3d8] sm:$0xff] }
 0x159   :  { %v2637_v57 = vrot.slane %v2636_v24, 2  ;;  %v2610_v59 = vadd.f32 %v2609_v14, %v2608_v22  ;;  %v7967_v22 = vld [vmem:[%s11738_s3 + $0x3d0] sm:$0xff]  ;;  %12101 = vst [vmem:[#allocation24_spill] sm:$0xff] %v7976_v56  ;;  %v12113_v56 = vld [vmem:[#allocation32_spill] sm:$0xff] }
 0x15a   :  { %v2693_v30 = vrot.slane %v2692_v26, 2  ;;  %12100 = vst [vmem:[#allocation27_spill] sm:$0xff] %v7967_v22  ;;  %v2721_v9 = vrot.slane %v2720_v13, 2  ;;  %v8038_v22 = vld [vmem:[%s11738_s3 + $0x360] sm:$0xff]  ;;  %12114 = vst [vmem:[#allocation32_spill] sm:$0xff] %v8054_v37  ;;  %v8087_v37 = vld [vmem:[%s11738_s3 + $0x3f8] sm:$0xff] }
 0x15b   :  { %v2638_v39 = vadd.f32 %v2637_v57, %v2636_v24  ;;  %v7957_v24 = vld [vmem:[%s11738_s3 + $0x250] sm:$0xff]  ;;  %v7962_v57 = vld [vmem:[%s11738_s3 + $0x258] sm:$0xff]  ;;  %12111 = vst [vmem:[#allocation58_spill] sm:$0xff] %v8038_v22  ;;  %12119 = vst [vmem:[#allocation64_spill] sm:$0xff] %v8087_v37 }
 0x15c   :  { %12098 = vst [vmem:[#allocation49_spill] sm:$0xff] %v7957_v24  ;;  %12099 = vst [vmem:[#allocation25_spill] sm:$0xff] %v7962_v57  ;;  %v2694_v58 = vadd.f32 %v2693_v30, %v2692_v26  ;;  %v7995_v57 = vld [vmem:[%s11737_s2 + $0x1] ss:$8 sm:$0xf] }
 0x15d   :  { %v8005_v26 = vld [vmem:[%s11738_s3 + $0x2e8] sm:$0xff] }
 0x15e   :  { %12105 = vst [vmem:[#allocation29_spill] sm:$0xff] %v8005_v26  ;;  %v2695_v24 = vrot.slane %v2694_v58, 1  ;;  %v8033_v26 = vld [vmem:[%s11738_s3 + $0x3e8] sm:$0xff] }
 0x15f   :  { %12110 = vst [vmem:[#allocation57_spill] sm:$0xff] %v8033_v26 }
 0x168   :  { %v5700_v2 = vpop.f32.mrb[2].mxu0 }
 0x169   :  { %v5701_v44 = vpop.f32.mrb[3].mxu0 }
 0x16a   :  { %v5702_v49 = vadd.f32 %v5701_v44, %v5700_v2  ;;  %v7933_v2 = vld [vmem:[%s11738_s3 + $0x348] sm:$0xff] }
 0x16b   :  { %12095 = vst [vmem:[#allocation20_spill] sm:$0xff] %v7933_v2  ;;  %v8000_v2 = vld [vmem:[%s11738_s3 + $0x2e0] sm:$0xff] }
 0x16c   :  { %v7936_v44 = vadd.f32 %v5702_v49, %v7641_v32  ;;  %v2666_v49 = vadd.f32 %v2665_v61, %v2664_v7  ;;  %v2639_v61 = vrot.slane %v2638_v39, 1  ;;  %v2746_v7 = vsel %vm157_vm0, %v2564_v43, 0.0  ;;  %12104 = vst [vmem:[#allocation31_spill] sm:$0xff] %v8000_v2 }
 0x16d   :  { %v2611_v43 = vrot.slane %v2610_v59, 1  ;;  %v2747_v52 = vrot.slane %v2746_v7, 4  ;;  %v2547_v2 = vmul.f32 %v12113_v56, %v7826_v55 }
 0x16e   :  { %v2667_v12 = vrot.slane %v2666_v49, 1  ;;  %v2640_v8 = vadd.f32 %v2639_v61, %v2638_v39  ;;  %v8012_v39 = vld [vmem:[%s11738_s3 + $0x260] sm:$0xff]  ;;  %v8017_v61 = vld [vmem:[%s11738_s3 + $0x268] sm:$0xff] }
 0x16f   :  { %v2612_v30 = vadd.f32 %v2611_v43, %v2610_v59  ;;  %12106 = vst [vmem:[#allocation30_spill] sm:$0xff] %v8012_v39  ;;  %12107 = vst [vmem:[#allocation55_spill] sm:$0xff] %v8017_v61  ;;  %v8022_v59 = vld [vmem:[%s11738_s3 + $0x3e0] sm:$0xff]  ;;  %v2775_v43 = vrot.slane %v2774_v21, 4  ;;  %v8074_v61 = vld [vmem:[%s11738_s3 + $0x278] sm:$0xff] }
 0x170   :  { %v2668_v14 = vadd.f32 %v2667_v12, %v2666_v49  ;;  %12108 = vst [vmem:[#allocation56_spill] sm:$0xff] %v8022_v59  ;;  %v2722_v49 = vadd.f32 %v2721_v9, %v2720_v13  ;;  %v12109_v12 = vld [vmem:[#allocation6_spill] sm:$0xff]  ;;  %v8043_v13 = vld [vmem:[%s11738_s3 + $0x368] sm:$0xff]  ;;  %v2696_v9 = vadd.f32 %v2695_v24, %v2694_v58  ;;  %v8059_v58 = vld [vmem:[%s11738_s3 + $0x2f8] sm:$0xff] }
 0x171   :  { %v8026_v60 = vrot.slane %v7995_v57, %v12109_v12  ;;  %12112 = vst [vmem:[#allocation59_spill] sm:$0xff] %v8043_v13  ;;  %v2748_v12 = vadd.f32 %v2747_v52, %v2746_v7  ;;  %v2776_v28 = vadd.f32 %v2775_v43, %v2774_v21  ;;  %12115 = vst [vmem:[#allocation60_spill] sm:$0xff] %v8059_v58  ;;  %v8069_v43 = vld [vmem:[%s11738_s3 + $0x270] sm:$0xff] }
 0x172   :  { %v2723_v48 = vrot.slane %v2722_v49, 1  ;;  %12116 = vst [vmem:[#allocation61_spill] sm:$0xff] %v8069_v43  ;;  %12117 = vst [vmem:[#allocation62_spill] sm:$0xff] %v8074_v61  ;;  %v8092_v58 = vld [vmem:[%s11738_s3 + $0x370] sm:$0xff] }
 0x173   :  { %v2749_v52 = vrot.slane %v2748_v12, 2  ;;  %v3013_v24 = vadd.f32 %v8026_v60, %v2612_v30  ;;  %v3017_v7 = vadd.f32 %v8026_v60, %v2640_v8  ;;  %v3021_v56 = vadd.f32 %v8026_v60, %v2668_v14  ;;  %v8079_v30 = vld [vmem:[%s11738_s3 + $0x3f0] sm:$0xff]  ;;  %12120 = vst [vmem:[#allocation65_spill] sm:$0xff] %v8092_v58 }
 0x174   :  { %12118 = vst [vmem:[#allocation63_spill] sm:$0xff] %v8079_v30  ;;  %v2724_v8 = vadd.f32 %v2723_v48, %v2722_v49  ;;  %v2777_v14 = vrot.slane %v2776_v28, 2  ;;  %v3025_v39 = vadd.f32 %v8026_v60, %v2696_v9  ;;  %v8097_v48 = vld [vmem:[%s11738_s3 + $0x378] sm:$0xff]  ;;  %v2567_v58 = vmul.f32 %v12126_v4, %v7826_v55 }
 0x175   :  { %12121 = vst [vmem:[#allocation66_spill] sm:$0xff] %v8097_v48  ;;  %v2750_v49 = vadd.f32 %v2749_v52, %v2748_v12  ;;  %v3536_v9 = vrot.slane %v3017_v7, 7  ;;  %v3538_v22 = vrot.slane %v3021_v56, 6  ;;  %v12123_v7 = vld [vmem:[#allocation34_spill] sm:$0xff] }
 0x176   :  { %v2778_v61 = vadd.f32 %v2777_v14, %v2776_v28  ;;  %v3029_v13 = vadd.f32 %v8026_v60, %v2724_v8  ;;  %v3540_v1 = vrot.slane %v3025_v39, 5  ;;  %v2555_v56 = vmul.f32 %v12123_v7, %v7826_v55  ;;  %v12124_v28 = vld [vmem:[#allocation35_spill] sm:$0xff]  ;;  %v12125_v14 = vld [vmem:[#allocation36_spill] sm:$0xff] }
 0x177   :  { %v2751_v59 = vrot.slane %v2750_v49, 1  ;;  %v3537_v26 = vsel %vm1084_vm1, %v3536_v9, %v3013_v24  ;;  %v2559_v8 = vmul.f32 %v12124_v28, %v7826_v55  ;;  %v2563_v24 = vmul.f32 %v12125_v14, %v7826_v55 }
 0x178   :  { %v2779_v62 = vrot.slane %v2778_v61, 1  ;;  %v3539_v12 = vsel %vm1087_vm2, %v3538_v22, %v3537_v26  ;;  %v3542_v52 = vrot.slane %v3029_v13, 4  ;;  %v2599_v22 = vsel %vm157_vm0, %v7844_v16, 0.0 }
 0x179   :  { %v2752_v21 = vadd.f32 %v2751_v59, %v2750_v49  ;;  %v3541_v43 = vsel %vm1090_vm3, %v3540_v1, %v3539_v12  ;;  %v2600_v59 = vrot.slane %v2599_v22, 4  ;;  %v2627_v1 = vsel %vm157_vm0, %v2547_v2, 0.0 }
 0x17a   :  { %v2780_v39 = vadd.f32 %v2779_v62, %v2778_v61  ;;  %v3543_v9 = vsel %vm1093_vm4, %v3542_v52, %v3541_v43  ;;  %v2655_v13 = vsel %vm157_vm0, %v2551_v5, 0.0  ;;  %v2628_v12 = vrot.slane %v2627_v1, 4 }
 0x17b   :  { %v3033_v26 = vadd.f32 %v8026_v60, %v2752_v21  ;;  %v2656_v7 = vrot.slane %v2655_v13, 4  ;;  %v2683_v62 = vsel %vm157_vm0, %v2555_v56, 0.0  ;;  %v2601_v43 = vadd.f32 %v2600_v59, %v2599_v22 }
 0x17c   :  { %v3037_v49 = vadd.f32 %v8026_v60, %v2780_v39  ;;  %v2684_v52 = vrot.slane %v2683_v62, 4  ;;  %v2711_v28 = vsel %vm157_vm0, %v2559_v8, 0.0  ;;  %v2629_v16 = vadd.f32 %v2628_v12, %v2627_v1 }
 0x17d   :  { %v3544_v61 = vrot.slane %v3033_v26, 3  ;;  %v2657_v4 = vadd.f32 %v2656_v7, %v2655_v13  ;;  %v2712_v21 = vrot.slane %v2711_v28, 4  ;;  %v2602_v2 = vrot.slane %v2601_v43, 2 }
 0x17e   :  { %v3546_v14 = vrot.slane %v3037_v49, 2  ;;  %v2685_v30 = vadd.f32 %v2684_v52, %v2683_v62  ;;  %v2739_v5 = vsel %vm157_vm0, %v2563_v24, 0.0  ;;  %v2630_v37 = vrot.slane %v2629_v16, 2 }
 0x17f   :  { %v3545_v48 = vsel %vm1096_vm5, %v3544_v61, %v3543_v9  ;;  %v2658_v56 = vrot.slane %v2657_v4, 2  ;;  %v2713_v26 = vadd.f32 %v2712_v21, %v2711_v28  ;;  %v2603_v22 = vadd.f32 %v2602_v2, %v2601_v43  ;;  %v12128_v61 = vld [vmem:[#allocation7_spill] sm:$0xff] }
 0x180   :  { %v8129_v39 = vsel %vm1099_vm6, %v3546_v14, %v3545_v48  ;;  %v2686_v59 = vrot.slane %v2685_v30, 2  ;;  %v2740_v40 = vrot.slane %v2739_v5, 4  ;;  %v2767_v8 = vsel %vm157_vm0, %v2567_v58, 0.0  ;;  %v8139_v43 = vld [vmem:[%s11736_s1 + $0x58] sm:$0x7f] }
 0x181   :  { %12127 = vst [vmem:[#allocation33_spill] sm:$0xff] %v8129_v39  ;;  %v2631_v1 = vadd.f32 %v2630_v37, %v2629_v16  ;;  %v2659_v13 = vadd.f32 %v2658_v56, %v2657_v4  ;;  %v2714_v49 = vrot.slane %v2713_v26, 2  ;;  %v2768_v12 = vrot.slane %v2767_v8, 4  ;;  %v12129_v4 = vld [vmem:[#allocation42_spill] sm:$0xff] }
 0x182   :  { %v2604_v9 = vrot.slane %v2603_v22, 1  ;;  %v2687_v7 = vadd.f32 %v2686_v59, %v2685_v30  ;;  %v2741_v62 = vadd.f32 %v2740_v40, %v2739_v5  ;;  %v8134_v24 = vrot.slane %v7995_v57, %v12128_v61 }
 0x183   :  { %v2632_v48 = vrot.slane %v2631_v1, 1  ;;  %v2660_v52 = vrot.slane %v2659_v13, 1  ;;  %v2715_v14 = vadd.f32 %v2714_v49, %v2713_v26  ;;  %v2769_v28 = vadd.f32 %v2768_v12, %v2767_v8  ;;  %v12130_v8 = vld [vmem:[#allocation43_spill] sm:$0xff] }
 0x184   :  { %v2605_v37 = vadd.f32 %v2604_v9, %v2603_v22  ;;  %v2688_v58 = vrot.slane %v2687_v7, 1  ;;  %v2742_v16 = vrot.slane %v2741_v62, 2  ;;  %v2546_v30 = vmul.f32 %v12129_v4, %v8139_v43 }
 0x185   :  { %v2633_v40 = vadd.f32 %v2632_v48, %v2631_v1  ;;  %v2661_v21 = vadd.f32 %v2660_v52, %v2659_v13  ;;  %v2716_v2 = vrot.slane %v2715_v14, 1  ;;  %v2770_v5 = vrot.slane %v2769_v28, 2  ;;  %v12131_v1 = vld [vmem:[#allocation44_spill] sm:$0xff] }
 0x186   :  { %v2689_v56 = vadd.f32 %v2688_v58, %v2687_v7  ;;  %v2743_v59 = vadd.f32 %v2742_v16, %v2741_v62  ;;  %v3012_v26 = vadd.f32 %v8134_v24, %v2605_v37  ;;  %v2550_v49 = vmul.f32 %v12130_v8, %v8139_v43  ;;  %v12132_v7 = vld [vmem:[#allocation45_spill] sm:$0xff]  ;;  %v12133_v16 = vld [vmem:[#allocation46_spill] sm:$0xff] }
 0x187   :  { %v2717_v12 = vadd.f32 %v2716_v2, %v2715_v14  ;;  %v2771_v61 = vadd.f32 %v2770_v5, %v2769_v28  ;;  %v3016_v22 = vadd.f32 %v8134_v24, %v2633_v40  ;;  %v3020_v9 = vadd.f32 %v8134_v24, %v2661_v21  ;;  %v12134_v21 = vld [vmem:[#allocation47_spill] sm:$0xff] }
 0x188   :  { %v2744_v39 = vrot.slane %v2743_v59, 1  ;;  %v3024_v4 = vadd.f32 %v8134_v24, %v2689_v56  ;;  %v2554_v13 = vmul.f32 %v12131_v1, %v8139_v43  ;;  %v2558_v62 = vmul.f32 %v12132_v7, %v8139_v43  ;;  %v12135_v7 = vld [vmem:[#allocation48_spill] sm:$0xff] }
 0x189   :  { %v2772_v48 = vrot.slane %v2771_v61, 1  ;;  %v3028_v52 = vadd.f32 %v8134_v24, %v2717_v12  ;;  %v3524_v37 = vrot.slane %v3016_v22, 7  ;;  %v3526_v58 = vrot.slane %v3020_v9, 6 }
 0x18a   :  { %v2745_v14 = vadd.f32 %v2744_v39, %v2743_v59  ;;  %v3528_v28 = vrot.slane %v3024_v4, 5  ;;  %v2562_v40 = vmul.f32 %v12133_v16, %v8139_v43  ;;  %v2566_v2 = vmul.f32 %v12134_v21, %v8139_v43 }
 0x18b   :  { %v2773_v56 = vadd.f32 %v2772_v48, %v2771_v61  ;;  %v3525_v8 = vsel %vm1084_vm1, %v3524_v37, %v3012_v26  ;;  %v3530_v1 = vrot.slane %v3028_v52, 4  ;;  %v2570_v27 = vmul.f32 %v12135_v7, %v8139_v43 }
 0x18c   :  { %v3032_v12 = vadd.f32 %v8134_v24, %v2745_v14  ;;  %v3527_v39 = vsel %vm1087_vm2, %v3526_v58, %v3525_v8  ;;  %v2620_v59 = vsel %vm157_vm0, %v2546_v30, 0.0  ;;  %v2648_v22 = vsel %vm157_vm0, %v2550_v49, 0.0 }
 0x18d   :  { %v3036_v4 = vadd.f32 %v8134_v24, %v2773_v56  ;;  %v3529_v61 = vsel %vm1090_vm3, %v3528_v28, %v3527_v39  ;;  %v2621_v48 = vrot.slane %v2620_v59, 4  ;;  %v2649_v37 = vrot.slane %v2648_v22, 4 }
 0x18e   :  { %v5744_v5 = vpop.f32.mrb[2].mxu1  ;;  %v3531_v26 = vsel %vm1093_vm4, %v3530_v1, %v3529_v61  ;;  %v3532_v52 = vrot.slane %v3032_v12, 3  ;;  %v2676_v16 = vsel %vm157_vm0, %v2554_v13, 0.0 }
 0x18f   :  { %v5745_v33 = vpop.f32.mrb[3].mxu1  ;;  %v3534_v21 = vrot.slane %v3036_v4, 2  ;;  %v2622_v58 = vadd.f32 %v2621_v48, %v2620_v59  ;;  %v2677_v8 = vrot.slane %v2676_v16, 4  ;;  %v2650_v49 = vadd.f32 %v2649_v37, %v2648_v22 }
 0x190   :  { %v5746_v9 = vadd.f32 %v5745_v33, %v5744_v5  ;;  %v3533_v30 = vsel %vm1096_vm5, %v3532_v52, %v3531_v26  ;;  %v2704_v33 = vsel %vm157_vm0, %v2558_v62, 0.0  ;;  %v2732_v5 = vsel %vm157_vm0, %v2562_v40, 0.0 }
 0x191   :  { %v8174_v56 = vsel %vm1099_vm6, %v3534_v21, %v3533_v30  ;;  %v2623_v1 = vrot.slane %v2622_v58, 2  ;;  %v2678_v7 = vadd.f32 %v2677_v8, %v2676_v16  ;;  %v2651_v12 = vrot.slane %v2650_v49, 2 }
 0x192   :  { %v1435_v14 = vadd.f32 %v5746_v9, %v7936_v44  ;;  %12136 = vst [vmem:[#allocation34_spill] sm:$0xff] %v8174_v56  ;;  %v2705_v13 = vrot.slane %v2704_v33, 4  ;;  %v2733_v39 = vrot.slane %v2732_v5, 4  ;;  %v2760_v44 = vsel %vm157_vm0, %v2566_v2, 0.0 }
 0x193   :  { %v2624_v9 = vadd.f32 %v2623_v1, %v2622_v58  ;;  %v2679_v4 = vrot.slane %v2678_v7, 2  ;;  %v2761_v61 = vrot.slane %v2760_v44, 4  ;;  %v2652_v22 = vadd.f32 %v2651_v12, %v2650_v49  ;;  %v8187_v12 = vld [vmem:[%s11736_s1 + $0x50] sm:$0x7f] }
 0x194   :  { %v1449_v28 = vadd.f32 3.0, %v1435_v14  ;;  %v2706_v48 = vadd.f32 %v2705_v13, %v2704_v33  ;;  %v2734_v62 = vadd.f32 %v2733_v39, %v2732_v5  ;;  %v2788_v40 = vsel %vm157_vm0, %v2570_v27, 0.0 }
 0x195   :  { %v2625_v52 = vrot.slane %v2624_v9, 1  ;;  %v2680_v37 = vadd.f32 %v2679_v4, %v2678_v7  ;;  %v2762_v21 = vadd.f32 %v2761_v61, %v2760_v44  ;;  %v2653_v30 = vrot.slane %v2652_v22, 1 }
 0x196   :  { %v1453_v59 = vmax.f32 %v1449_v28, 0.0  ;;  %v2707_v16 = vrot.slane %v2706_v48, 2  ;;  %v2735_v8 = vrot.slane %v2734_v62, 2  ;;  %v2789_v56 = vrot.slane %v2788_v40, 4 }
 0x197   :  { %v2626_v46 = vadd.f32 %v2625_v52, %v2624_v9  ;;  %v2681_v2 = vrot.slane %v2680_v37, 1  ;;  %v2763_v28 = vrot.slane %v2762_v21, 2  ;;  %v2654_v58 = vadd.f32 %v2653_v30, %v2652_v22 }
 0x198   :  { %v1457_v26 = vmin.f32 %v1453_v59, 6.0  ;;  %v2708_v1 = vadd.f32 %v2707_v16, %v2706_v48  ;;  %v2736_v38 = vadd.f32 %v2735_v8, %v2734_v62  ;;  %v2790_v49 = vadd.f32 %v2789_v56, %v2788_v40  ;;  %v12137_v59 = vld [vmem:[#allocation50_spill] sm:$0xff] }
 0x199   :  { %v2682_v5 = vadd.f32 %v2681_v2, %v2680_v37  ;;  %v2764_v27 = vadd.f32 %v2763_v28, %v2762_v21  ;;  %v8182_v7 = vrot.slane %v7995_v57, %v6594_v31  ;;  %v2545_v9 = vmul.f32 %v12137_v59, %v8187_v12  ;;  %v12139_v21 = vld [vmem:[#allocation51_spill] sm:$0xff]  ;;  %v12140_v2 = vld [vmem:[#allocation52_spill] sm:$0xff] }
 0x19a   :  { %v1461_v45 = vmul.f32 0.16666667, %v1457_v26  ;;  %v2709_v13 = vrot.slane %v2708_v1, 1  ;;  %v2737_v39 = vrot.slane %v2736_v38, 1  ;;  %v2791_v44 = vrot.slane %v2790_v49, 2 }
 0x19b   :  { %v3019_v56 = vadd.f32 %v8182_v7, %v2654_v58  ;;  %v3023_v4 = vadd.f32 %v8182_v7, %v2682_v5  ;;  %v12138_v61 = vmov 0.0   ;;  %v2613_v40 = vsel %vm157_vm0, %v2545_v9, 0.0  ;;  %v12142_v5 = vld [vmem:[#allocation54_spill] sm:$0xff] }
 0x19c   :  { %v8178_v33 = vmul.f32 %v1461_v45, %v1435_v14  ;;  %v2765_v45 = vrot.slane %v2764_v27, 1  ;;  %v3015_v14 = vadd.f32 %v8182_v7, %v2626_v46  ;;  %v2710_v22 = vadd.f32 %v2709_v13, %v2708_v1  ;;  %v12141_v1 = vld [vmem:[#allocation53_spill] sm:$0xff] }
 0x19d   :  { %v2738_v48 = vadd.f32 %v2737_v39, %v2736_v38  ;;  %v2792_v62 = vadd.f32 %v2791_v44, %v2790_v49  ;;  %v3560_v52 = vrot.slane %v3019_v56, 7  ;;  %v3562_v37 = vrot.slane %v3023_v4, 6 }
 0x19e   :  { %5436 = vmatmul.mubr.msk.f32.gmra.mrb[10].mxu0 %vm1484_vm7, %v8178_v33  ;;  %5440 = vmatmul.mubr.msk.f32.gmra.mrb[10].mxu1 %vm1484_vm7, %v8178_v33  ;;  %v2766_v26 = vadd.f32 %v2765_v45, %v2764_v27  ;;  %v2549_v30 = vmul.f32 %v12139_v21, %v8187_v12  ;;  %v3027_v16 = vadd.f32 %v8182_v7, %v2710_v22  ;;  %v6173_v45 = vld [vmem:[%s11735_s0 + $0xb0] sm:$0x7f]  ;;  %v2614_v22 = vrot.slane %v2613_v40, 4 }
 0x19f   :  { %1573 = vmatprep.mubr.f32.mxu0 %v12138_v61  ;;  %1658 = vmatprep.mubr.f32.mxu1 %v12138_v61  ;;  %v2793_v46 = vrot.slane %v2792_v62, 1  ;;  %v3031_v8 = vadd.f32 %v8182_v7, %v2738_v48  ;;  %v2553_v28 = vmul.f32 %v12140_v2, %v8187_v12  ;;  %v3561_v38 = vsel %vm1084_vm1, %v3560_v52, %v3015_v14  ;;  %v6174_v14 = vld [vmem:[%s11735_s0 + $0xd0] sm:$0x7f] }
 0x1a0   :  { %v3035_v58 = vadd.f32 %v8182_v7, %v2766_v26  ;;  %v2557_v49 = vmul.f32 %v12141_v1, %v8187_v12  ;;  %v2561_v27 = vmul.f32 %v12142_v5, %v8187_v12  ;;  %v3563_v39 = vsel %vm1087_vm2, %v3562_v37, %v3561_v38 }
 0x1a1   :  { %v2794_v13 = vadd.f32 %v2793_v46, %v2792_v62  ;;  %v3564_v44 = vrot.slane %v3027_v16, 5  ;;  %v3566_v59 = vrot.slane %v3031_v8, 4  ;;  %v2565_v56 = vmul.f32 %v6173_v45, %v8187_v12 }
 0x1a2   :  { %v3568_v9 = vrot.slane %v3035_v58, 3  ;;  %v2569_v4 = vmul.f32 %v6174_v14, %v8187_v12  ;;  %v2641_v52 = vsel %vm157_vm0, %v2549_v30, 0.0  ;;  %v2669_v37 = vsel %vm157_vm0, %v2553_v28, 0.0 }
 0x1a3   :  { %v3039_v62 = vadd.f32 %v8182_v7, %v2794_v13  ;;  %v3565_v26 = vsel %vm1090_vm3, %v3564_v44, %v3563_v39  ;;  %v2615_v16 = vadd.f32 %v2614_v22, %v2613_v40  ;;  %v2642_v8 = vrot.slane %v2641_v52, 4 }
 0x1a4   :  { %v3567_v46 = vsel %vm1093_vm4, %v3566_v59, %v3565_v26  ;;  %v2670_v2 = vrot.slane %v2669_v37, 4  ;;  %v2697_v5 = vsel %vm157_vm0, %v2557_v49, 0.0  ;;  %v2725_v40 = vsel %vm157_vm0, %v2561_v27, 0.0 }
 0x1a5   :  { %v5703_v48 = vpop.f32.mrb[4].mxu0  ;;  %v3569_v38 = vsel %vm1096_vm5, %v3568_v9, %v3567_v46  ;;  %v3570_v1 = vrot.slane %v3039_v62, 2  ;;  %v2616_v45 = vrot.slane %v2615_v16, 2  ;;  %v2643_v13 = vadd.f32 %v2642_v8, %v2641_v52 }
 0x1a6   :  { %v5704_v21 = vpop.f32.mrb[5].mxu0  ;;  %v2671_v14 = vadd.f32 %v2670_v2, %v2669_v37  ;;  %v2698_v39 = vrot.slane %v2697_v5, 4  ;;  %v2753_v44 = vsel %vm157_vm0, %v2565_v56, 0.0  ;;  %v2726_v62 = vrot.slane %v2725_v40, 4  ;;  %v6175_v56 = vld [vmem:[%s11735_s0 + $0xe8] sm:$0x7f] }
 0x1a7   :  { %v5705_v58 = vadd.f32 %v5704_v21, %v5703_v48  ;;  %v8233_v28 = vsel %vm1099_vm6, %v3570_v1, %v3569_v38  ;;  %v2617_v59 = vadd.f32 %v2616_v45, %v2615_v16  ;;  %v2644_v22 = vrot.slane %v2643_v13, 2 }
 0x1a8   :  { %v2672_v9 = vrot.slane %v2671_v14, 2  ;;  %v2699_v48 = vadd.f32 %v2698_v39, %v2697_v5  ;;  %v2754_v49 = vrot.slane %v2753_v44, 4  ;;  %v2781_v26 = vsel %vm157_vm0, %v2569_v4, 0.0 }
 0x1a9   :  { %v8230_v30 = vadd.f32 %v5705_v58, %v7641_v32  ;;  %v8240_v52 = vrot.slane %v7995_v57, %v6639_v53  ;;  %v2618_v37 = vrot.slane %v2617_v59, 1  ;;  %v2645_v21 = vadd.f32 %v2644_v22, %v2643_v13  ;;  %v6176_v13 = vld [vmem:[%s11735_s0 + $0x108] sm:$0x7f] }
 0x1aa   :  { %v2673_v46 = vadd.f32 %v2672_v9, %v2671_v14  ;;  %v2700_v8 = vrot.slane %v2699_v48, 2  ;;  %v2727_v2 = vadd.f32 %v2726_v62, %v2725_v40  ;;  %v2755_v27 = vadd.f32 %v2754_v49, %v2753_v44 }
 0x1ab   :  { %12143 = vst [vmem:[#allocation35_spill] sm:$0xff] %v8240_v52  ;;  %v2782_v58 = vrot.slane %v2781_v26, 4  ;;  %v2572_v16 = vmul.f32 %v6175_v56, %v7767_v15  ;;  %v2619_v38 = vadd.f32 %v2618_v37, %v2617_v59  ;;  %v2646_v1 = vrot.slane %v2645_v21, 1 }
 0x1ac   :  { %v2674_v4 = vrot.slane %v2673_v46, 1  ;;  %v2701_v5 = vadd.f32 %v2700_v8, %v2699_v48  ;;  %v2728_v45 = vrot.slane %v2727_v2, 2  ;;  %v2756_v57 = vrot.slane %v2755_v27, 2  ;;  %v6177_v48 = vld [vmem:[%s11735_s0 + $0x128] sm:$0x7f] }
 0x1ad   :  { %v2783_v39 = vadd.f32 %v2782_v58, %v2781_v26  ;;  %v2576_v14 = vmul.f32 %v6176_v13, %v7767_v15  ;;  %v2647_v40 = vadd.f32 %v2646_v1, %v2645_v21  ;;  %v3014_v9 = vadd.f32 %v8240_v52, %v2619_v38  ;;  %v6178_v21 = vld [vmem:[%s11735_s0 + $0x148] sm:$0x7f] }
 0x1ae   :  { %v2675_v44 = vadd.f32 %v2674_v4, %v2673_v46  ;;  %v2702_v22 = vrot.slane %v2701_v5, 1  ;;  %v2729_v62 = vadd.f32 %v2728_v45, %v2727_v2  ;;  %v2757_v49 = vadd.f32 %v2756_v57, %v2755_v27  ;;  %v6179_v1 = vld [vmem:[%s11735_s0 + $0x168] sm:$0x7f] }
 0x1af   :  { %v2784_v59 = vrot.slane %v2783_v39, 2  ;;  %v2580_v26 = vmul.f32 %v6177_v48, %v7767_v15  ;;  %v3018_v8 = vadd.f32 %v8240_v52, %v2647_v40  ;;  %v2584_v46 = vmul.f32 %v6178_v21, %v7767_v15  ;;  %v6180_v40 = vld [vmem:[%s11735_s0 + $0x188] sm:$0x7f] }
 0x1b0   :  { %v2703_v37 = vadd.f32 %v2702_v22, %v2701_v5  ;;  %v3022_v58 = vadd.f32 %v8240_v52, %v2675_v44  ;;  %v2730_v27 = vrot.slane %v2729_v62, 1  ;;  %v2758_v56 = vrot.slane %v2757_v49, 1 }
 0x1b1   :  { %v2785_v38 = vadd.f32 %v2784_v59, %v2783_v39  ;;  %v2588_v4 = vmul.f32 %v6179_v1, %v7767_v15  ;;  %v3548_v57 = vrot.slane %v3018_v8, 7  ;;  %v2592_v44 = vmul.f32 %v6180_v40, %v7767_v15  ;;  %v6181_v1 = vld [vmem:[%s11735_s0 + $0x1a8] sm:$0x7f] }
 0x1b2   :  { %v3026_v45 = vadd.f32 %v8240_v52, %v2703_v37  ;;  %v3550_v13 = vrot.slane %v3022_v58, 6  ;;  %v2731_v48 = vadd.f32 %v2730_v27, %v2729_v62  ;;  %v2759_v39 = vadd.f32 %v2758_v56, %v2757_v49 }
 0x1b3   :  { %v5747_v2 = vpop.f32.mrb[4].mxu1  ;;  %v2786_v59 = vrot.slane %v2785_v38, 1  ;;  %v3549_v21 = vsel %vm1084_vm1, %v3548_v57, %v3014_v9  ;;  %v2596_v37 = vmul.f32 %v6181_v1, %v7767_v15  ;;  %v2802_v8 = vsel %vm157_vm0, %v2572_v16, 0.0 }
 0x1b4   :  { %v5748_v5 = vpop.f32.mrb[5].mxu1  ;;  %v3552_v53 = vrot.slane %v3026_v45, 5  ;;  %v3030_v40 = vadd.f32 %v8240_v52, %v2731_v48  ;;  %v3034_v62 = vadd.f32 %v8240_v52, %v2759_v39  ;;  %v3551_v49 = vsel %vm1087_vm2, %v3550_v13, %v3549_v21 }
 0x1b5   :  { %v5749_v22 = vadd.f32 %v5748_v5, %v5747_v2  ;;  %v2787_v31 = vadd.f32 %v2786_v59, %v2785_v38  ;;  %v2803_v2 = vrot.slane %v2802_v8, 4  ;;  %v2830_v9 = vsel %vm157_vm0, %v2576_v14, 0.0 }
 0x1b6   :  { %v2858_v27 = vsel %vm157_vm0, %v2580_v26, 0.0  ;;  %v3553_v15 = vsel %vm1090_vm3, %v3552_v53, %v3551_v49  ;;  %v3554_v16 = vrot.slane %v3030_v40, 4  ;;  %v3556_v45 = vrot.slane %v3034_v62, 3 }
 0x1b7   :  { %v1440_v58 = vadd.f32 %v5749_v22, %v8230_v30  ;;  %v3038_v5 = vadd.f32 %v8240_v52, %v2787_v31  ;;  %v2804_v30 = vadd.f32 %v2803_v2, %v2802_v8  ;;  %v2831_v38 = vrot.slane %v2830_v9, 4 }
 0x1b8   :  { %v2859_v57 = vrot.slane %v2858_v27, 4  ;;  %v3555_v48 = vsel %vm1093_vm4, %v3554_v16, %v3553_v15  ;;  %v2886_v13 = vsel %vm157_vm0, %v2584_v46, 0.0  ;;  %v2914_v8 = vsel %vm157_vm0, %v2588_v4, 0.0 }
 0x1b9   :  { %v1450_v56 = vadd.f32 3.0, %v1440_v58  ;;  %v3558_v39 = vrot.slane %v3038_v5, 2  ;;  %v3557_v14 = vsel %vm1096_vm5, %v3556_v45, %v3555_v48  ;;  %v2805_v59 = vrot.slane %v2804_v30, 2 }
 0x1ba   :  { %v2832_v26 = vadd.f32 %v2831_v38, %v2830_v9  ;;  %v2860_v21 = vadd.f32 %v2859_v57, %v2858_v27  ;;  %v2887_v40 = vrot.slane %v2886_v13, 4  ;;  %v2915_v5 = vrot.slane %v2914_v8, 4 }
 0x1bb   :  { %v1454_v22 = vmax.f32 %v1450_v56, 0.0  ;;  %v8288_v53 = vsel %vm1099_vm6, %v3558_v39, %v3557_v14  ;;  %v2806_v49 = vadd.f32 %v2805_v59, %v2804_v30  ;;  %v2942_v45 = vsel %vm157_vm0, %v2592_v44, 0.0 }
 0x1bc   :  { %v2833_v2 = vrot.slane %v2832_v26, 2  ;;  %v2861_v56 = vrot.slane %v2860_v21, 2  ;;  %v2888_v16 = vadd.f32 %v2887_v40, %v2886_v13  ;;  %v2916_v57 = vadd.f32 %v2915_v5, %v2914_v8 }
 0x1bd   :  { %v1458_v1 = vmin.f32 %v1454_v22, 6.0  ;;  %v2807_v9 = vrot.slane %v2806_v49, 1  ;;  %v2943_v4 = vrot.slane %v2942_v45, 4 }
 0x1be   :  { %v5706_v31 = vpop.f32.mrb[6].mxu0  ;;  %v2834_v27 = vadd.f32 %v2833_v2, %v2832_v26  ;;  %v2862_v38 = vadd.f32 %v2861_v56, %v2860_v21  ;;  %v2889_v39 = vrot.slane %v2888_v16, 2  ;;  %v2917_v52 = vrot.slane %v2916_v57, 2 }
 0x1bf   :  { %v5707_v62 = vpop.f32.mrb[7].mxu0  ;;  %v1462_v15 = vmul.f32 0.16666667, %v1458_v1  ;;  %v2808_v14 = vadd.f32 %v2807_v9, %v2806_v49  ;;  %v2944_v13 = vadd.f32 %v2943_v4, %v2942_v45  ;;  %v2970_v26 = vsel %vm157_vm0, %v2596_v37, 0.0  ;;  %v8313_v49 = vld [vmem:[%s11735_s0 + $0x100] sm:$0x7f] }
 0x1c0   :  { %v5708_v46 = vadd.f32 %v5707_v62, %v5706_v31  ;;  %v2835_v30 = vrot.slane %v2834_v27, 1  ;;  %v2863_v59 = vrot.slane %v2862_v38, 1  ;;  %v2890_v44 = vadd.f32 %v2889_v39, %v2888_v16  ;;  %v8322_v45 = vld [vmem:[%s11735_s0 + $0x120] sm:$0x7f] }
 0x1c1   :  { %v8292_v22 = vmul.f32 %v1462_v15, %v1440_v58  ;;  %v2918_v31 = vadd.f32 %v2917_v52, %v2916_v57  ;;  %v2971_v40 = vrot.slane %v2970_v26, 4  ;;  %v2945_v62 = vrot.slane %v2944_v13, 2  ;;  %12144 = vst [vmem:[#allocation36_spill] sm:$0xff] %v8322_v45 }
 0x1c2   :  { %v1360_v48 = vadd.f32 %v5708_v46, %v7641_v32  ;;  %v8303_v32 = vld [vmem:[%s11735_s0 + $0xe0] sm:$0x7f]  ;;  %v2836_v21 = vadd.f32 %v2835_v30, %v2834_v27  ;;  %v2864_v1 = vadd.f32 %v2863_v59, %v2862_v38  ;;  %v2891_v8 = vrot.slane %v2890_v44, 1 }
 0x1c3   :  { %5437 = vmatmul.mubr.msk.f32.gmra.mrb[12].mxu0 %vm1484_vm7, %v8292_v22  ;;  %5441 = vmatmul.mubr.msk.f32.gmra.mrb[12].mxu1 %vm1484_vm7, %v8292_v22  ;;  %v2571_v58 = vmul.f32 %v8303_v32, %v7826_v55  ;;  %v3041_v37 = vadd.f32 %v8026_v60, %v2808_v14  ;;  %v2575_v2 = vmul.f32 %v8313_v49, %v7826_v55  ;;  %v2919_v56 = vrot.slane %v2918_v31, 1  ;;  %v8329_v27 = vld [vmem:[%s11735_s0 + $0x140] sm:$0x7f] }
 0x1c4   :  { %1577 = vmatprep.mubr.f32.mxu0 %v12138_v61  ;;  %1662 = vmatprep.mubr.f32.mxu1 %v12138_v61  ;;  %v2972_v5 = vadd.f32 %v2971_v40, %v2970_v26  ;;  %v3045_v15 = vadd.f32 %v8026_v60, %v2836_v21  ;;  %v3049_v46 = vadd.f32 %v8026_v60, %v2864_v1  ;;  %v8337_v26 = vld [vmem:[%s11735_s0 + $0x160] sm:$0x7f] }
 0x1c5   :  { %v2892_v52 = vadd.f32 %v2891_v8, %v2890_v44  ;;  %v2946_v16 = vadd.f32 %v2945_v62, %v2944_v13  ;;  %v2579_v9 = vmul.f32 %v8322_v45, %v7826_v55  ;;  %12145 = vst [vmem:[#allocation37_spill] sm:$0xff] %v8329_v27  ;;  %v2583_v38 = vmul.f32 %v8329_v27, %v7826_v55  ;;  %v8344_v1 = vld [vmem:[%s11735_s0 + $0x180] sm:$0x7f] }
 0x1c6   :  { %v2920_v39 = vadd.f32 %v2919_v56, %v2918_v31  ;;  %v2973_v4 = vrot.slane %v2972_v5, 2  ;;  %v3584_v14 = vrot.slane %v3045_v15, 7  ;;  %v3586_v30 = vrot.slane %v3049_v46, 6  ;;  %12146 = vst [vmem:[#allocation42_spill] sm:$0xff] %v8337_v26  ;;  %12147 = vst [vmem:[#allocation43_spill] sm:$0xff] %v8344_v1 }
 0x1c7   :  { %v2947_v44 = vrot.slane %v2946_v16, 1  ;;  %v3053_v13 = vadd.f32 %v8026_v60, %v2892_v52  ;;  %v2587_v21 = vmul.f32 %v8337_v26, %v7826_v55  ;;  %v2591_v31 = vmul.f32 %v8344_v1, %v7826_v55  ;;  %v8354_v26 = vld [vmem:[%s11735_s0 + $0x1a0] sm:$0x7f] }
 0x1c8   :  { %v5750_v57 = vpop.f32.mrb[6].mxu1  ;;  %v2974_v8 = vadd.f32 %v2973_v4, %v2972_v5  ;;  %v3057_v62 = vadd.f32 %v8026_v60, %v2920_v39  ;;  %v3585_v56 = vsel %vm1084_vm1, %v3584_v14, %v3041_v37  ;;  %12148 = vst [vmem:[#allocation44_spill] sm:$0xff] %v8354_v26  ;;  %v2595_v27 = vmul.f32 %v8354_v26, %v7826_v55 }
 0x1c9   :  { %v5751_v59 = vpop.f32.mrb[7].mxu1  ;;  %v2948_v15 = vadd.f32 %v2947_v44, %v2946_v16  ;;  %v3587_v46 = vsel %vm1087_vm2, %v3586_v30, %v3585_v56  ;;  %v3588_v52 = vrot.slane %v3053_v13, 5  ;;  %v2795_v5 = vsel %vm157_vm0, %v2571_v58, 0.0 }
 0x1ca   :  { %v5752_v40 = vadd.f32 %v5751_v59, %v5750_v57  ;;  %v2975_v1 = vrot.slane %v2974_v8, 1  ;;  %v3590_v57 = vrot.slane %v3057_v62, 4  ;;  %v2796_v16 = vrot.slane %v2795_v5, 4 }
 0x1cb   :  { %v3061_v39 = vadd.f32 %v8026_v60, %v2948_v15  ;;  %v3589_v37 = vsel %vm1090_vm3, %v3588_v52, %v3587_v46  ;;  %v2823_v4 = vsel %vm157_vm0, %v2575_v2, 0.0  ;;  %v2851_v55 = vsel %vm157_vm0, %v2579_v9, 0.0 }
 0x1cc   :  { %v1445_v45 = vadd.f32 %v5752_v40, %v1360_v48  ;;  %v2976_v30 = vadd.f32 %v2975_v1, %v2974_v8  ;;  %v3591_v59 = vsel %vm1093_vm4, %v3590_v57, %v3589_v37  ;;  %v2824_v44 = vrot.slane %v2823_v4, 4 }
 0x1cd   :  { %v3592_v13 = vrot.slane %v3061_v39, 3  ;;  %v2797_v56 = vadd.f32 %v2796_v16, %v2795_v5  ;;  %v2879_v48 = vsel %vm157_vm0, %v2583_v38, 0.0  ;;  %v2852_v15 = vrot.slane %v2851_v55, 4 }
 0x1ce   :  { %v1451_v14 = vadd.f32 3.0, %v1445_v45  ;;  %v3065_v58 = vadd.f32 %v8026_v60, %v2976_v30  ;;  %v2825_v62 = vadd.f32 %v2824_v44, %v2823_v4  ;;  %v2880_v2 = vrot.slane %v2879_v48, 4 }
 0x1cf   :  { %v3593_v46 = vsel %vm1096_vm5, %v3592_v13, %v3591_v59  ;;  %v2798_v52 = vrot.slane %v2797_v56, 2  ;;  %v2907_v1 = vsel %vm157_vm0, %v2587_v21, 0.0  ;;  %v2853_v39 = vadd.f32 %v2852_v15, %v2851_v55 }
 0x1d0   :  { %v1455_v40 = vmax.f32 %v1451_v14, 0.0  ;;  %v3594_v57 = vrot.slane %v3065_v58, 2  ;;  %v2826_v37 = vrot.slane %v2825_v62, 2  ;;  %v2881_v16 = vadd.f32 %v2880_v2, %v2879_v48 }
 0x1d1   :  { %v2799_v5 = vadd.f32 %v2798_v52, %v2797_v56  ;;  %v2908_v9 = vrot.slane %v2907_v1, 4  ;;  %v2935_v38 = vsel %vm157_vm0, %v2591_v31, 0.0  ;;  %v2854_v30 = vrot.slane %v2853_v39, 2 }
 0x1d2   :  { %v1459_v8 = vmin.f32 %v1455_v40, 6.0  ;;  %v8370_v60 = vsel %vm1099_vm6, %v3594_v57, %v3593_v46  ;;  %v2827_v4 = vadd.f32 %v2826_v37, %v2825_v62  ;;  %v2882_v44 = vrot.slane %v2881_v16, 2 }
 0x1d3   :  { %v2800_v59 = vrot.slane %v2799_v5, 1  ;;  %v2909_v13 = vadd.f32 %v2908_v9, %v2907_v1  ;;  %v2936_v26 = vrot.slane %v2935_v38, 4  ;;  %v2855_v58 = vadd.f32 %v2854_v30, %v2853_v39 }
 0x1d4   :  { %v1463_v14 = vmul.f32 0.16666667, %v1459_v8  ;;  %v2828_v40 = vrot.slane %v2827_v4, 1  ;;  %v2963_v56 = vsel %vm157_vm0, %v2595_v27, 0.0  ;;  %v2883_v48 = vadd.f32 %v2882_v44, %v2881_v16 }
 0x1d5   :  { %v2801_v55 = vadd.f32 %v2800_v59, %v2799_v5  ;;  %v2910_v15 = vrot.slane %v2909_v13, 2  ;;  %v2937_v31 = vadd.f32 %v2936_v26, %v2935_v38  ;;  %v2856_v46 = vrot.slane %v2855_v58, 1  ;;  %v8393_v5 = vld [vmem:[%s11735_s0 + $0x118] sm:$0x7f] }
 0x1d6   :  { %v8372_v21 = vmul.f32 %v1463_v14, %v1445_v45  ;;  %v2829_v62 = vadd.f32 %v2828_v40, %v2827_v4  ;;  %v2964_v52 = vrot.slane %v2963_v56, 4  ;;  %v8382_v45 = vld [vmem:[%s11735_s0 + $0xf8] sm:$0x7f]  ;;  %v2884_v26 = vrot.slane %v2883_v48, 1 }
 0x1d7   :  { %v2574_v27 = vmul.f32 %v8382_v45, %v8139_v43  ;;  %v2911_v2 = vadd.f32 %v2910_v15, %v2909_v13  ;;  %v2938_v1 = vrot.slane %v2937_v31, 2  ;;  %v3040_v8 = vadd.f32 %v8134_v24, %v2801_v55  ;;  %v8400_v4 = vld [vmem:[%s11735_s0 + $0x138] sm:$0x7f] }
 0x1d8   :  { %5438 = vmatmul.mubr.msk.f32.gmra.mrb[14].mxu0 %vm1484_vm7, %v8372_v21  ;;  %5442 = vmatmul.mubr.msk.f32.gmra.mrb[14].mxu1 %vm1484_vm7, %v8372_v21  ;;  %v2857_v57 = vadd.f32 %v2856_v46, %v2855_v58  ;;  %v2965_v37 = vadd.f32 %v2964_v52, %v2963_v56  ;;  %v3044_v39 = vadd.f32 %v8134_v24, %v2829_v62  ;;  %v8412_v40 = vld [vmem:[%s11735_s0 + $0x158] sm:$0x7f] }
 0x1d9   :  { %1731 = vmatprep.mubr.f32.mxu0 %v12138_v61  ;;  %1816 = vmatprep.mubr.f32.mxu1 %v12138_v61  ;;  %v2578_v16 = vmul.f32 %v8393_v5, %v8139_v43  ;;  %v2885_v9 = vadd.f32 %v2884_v26, %v2883_v48  ;;  %v2912_v38 = vrot.slane %v2911_v2, 1  ;;  %v2939_v14 = vadd.f32 %v2938_v1, %v2937_v31  ;;  %v8426_v31 = vld [vmem:[%s11735_s0 + $0x178] sm:$0x7f] }
 0x1da   :  { %v2582_v30 = vmul.f32 %v8400_v4, %v8139_v43  ;;  %v2966_v59 = vrot.slane %v2965_v37, 2  ;;  %v3048_v44 = vadd.f32 %v8134_v24, %v2857_v57  ;;  %v3572_v13 = vrot.slane %v3044_v39, 7  ;;  %v8450_v57 = vld [vmem:[%s11735_s0 + $0x1b8] sm:$0x7f] }
 0x1db   :  { %v2586_v58 = vmul.f32 %v8412_v40, %v8139_v43  ;;  %v12149_v56 = vpack.c.bf16 %v7698_v6, %v7693_v50  ;;  %v12150_v55 = vpack.c.bf16 %v7708_v29, %v7703_v51  ;;  %v2940_v48 = vrot.slane %v2939_v14, 1  ;;  %v8436_v29 = vld [vmem:[%s11735_s0 + $0x198] sm:$0x7f] }
 0x1dc   :  { %5443 = vmatmul.mubr.msk.f32.vlgmr.msra.gmra.mrb[16].mxu0 %vm1484_vm7, %v7646_v42  ;;  %5447 = vmatmul.mubr.msk.f32.vlgmr.msra.gmra.mrb[16].mxu1 %vm1484_vm7, %v7646_v42  ;;  %v2913_v42 = vadd.f32 %v2912_v38, %v2911_v2  ;;  %v3052_v15 = vadd.f32 %v8134_v24, %v2885_v9  ;;  %v2590_v62 = vmul.f32 %v8426_v31, %v8139_v43  ;;  %v3574_v51 = vrot.slane %v3048_v44, 6 }
 0x1dd   :  { %5924 = vmatpush3.bf16.msra.mxu0 %v12149_v56  ;;  %5956 = vmatpush3.bf16.msra.mxu1 %v12150_v55  ;;  %v2967_v50 = vadd.f32 %v2966_v59, %v2965_v37  ;;  %v3573_v6 = vsel %vm1084_vm1, %v3572_v13, %v3040_v8  ;;  %v2594_v46 = vmul.f32 %v8436_v29, %v8139_v43  ;;  %v2872_v59 = vsel %vm157_vm0, %v2582_v30, 0.0 }
 0x1de   :  { %1735 = vmatprep.mubr.f32.mxu0 %v12138_v61  ;;  %1820 = vmatprep.mubr.f32.mxu1 %v12138_v61  ;;  %v12151_v52 = vpack.c.bf16 %v7718_v0, %v7713_v18  ;;  %v12152_v26 = vpack.c.bf16 %v7738_v20, %v7733_v47  ;;  %v2941_v2 = vadd.f32 %v2940_v48, %v2939_v14  ;;  %v3576_v8 = vrot.slane %v3052_v15, 5 }
 0x1df   :  { %v3056_v1 = vadd.f32 %v8134_v24, %v2913_v42  ;;  %v2598_v37 = vmul.f32 %v8450_v57, %v8139_v43  ;;  %v2968_v18 = vrot.slane %v2967_v50, 1  ;;  %v3575_v0 = vsel %vm1087_vm2, %v3574_v51, %v3573_v6 }
 0x1e0   :  { %5926 = vmatprep.subr.bf16.mxu0 %v12151_v52  ;;  %5958 = vmatprep.subr.bf16.mxu1 %v12152_v26  ;;  %v2816_v47 = vsel %vm157_vm0, %v2574_v27, 0.0  ;;  %v2844_v20 = vsel %vm157_vm0, %v2578_v16, 0.0  ;;  %v12153_v39 = vpack.c.bf16 %v7728_v36, %v7723_v54  ;;  %v12154_v43 = vpack.c.bf16 %v7748_v11, %v7743_v17 }
 0x1e1   :  { %5444 = vmatmul.mubr.msk.f32.gmra.mrb[18].mxu0 %vm1484_vm7, %v8178_v33  ;;  %5448 = vmatmul.mubr.msk.f32.gmra.mrb[18].mxu1 %vm1484_vm7, %v8178_v33  ;;  %v3060_v9 = vadd.f32 %v8134_v24, %v2941_v2  ;;  %v3577_v38 = vsel %vm1090_vm3, %v3576_v8, %v3575_v0  ;;  %v3578_v33 = vrot.slane %v3056_v1, 4  ;;  %v2817_v14 = vrot.slane %v2816_v47, 4  ;;  %v12165_v0 = vld [vmem:[#allocation38_spill] sm:$0xff] }
 0x1e2   :  { %5928 = vmatpush3.bf16.msra.mxu0 %v12153_v39  ;;  %5960 = vmatpush3.bf16.msra.mxu1 %v12154_v43  ;;  %v2969_v27 = vadd.f32 %v2968_v18, %v2967_v50  ;;  %v2845_v16 = vrot.slane %v2844_v20, 4  ;;  %v2900_v54 = vsel %vm157_vm0, %v2586_v58, 0.0  ;;  %v12155_v36 = vpack.c.bf16 %v7762_v63, %v7757_v25  ;;  %v12164_v18 = vld [vmem:[#allocation11_spill] sm:$0xff]  ;;  %v12168_v39 = vld [vmem:[#allocation40_spill] sm:$0xff] }
 0x1e3   :  { %1739 = vmatprep.mubr.f32.mxu0 %v12138_v61  ;;  %1824 = vmatprep.mubr.f32.mxu1 %v12138_v61  ;;  %v12156_v17 = vpack.c.bf16 %v7801_v41, %v7788_v23  ;;  %v3579_v11 = vsel %vm1093_vm4, %v3578_v33, %v3577_v38  ;;  %v3580_v44 = vrot.slane %v3060_v9, 3  ;;  %v2818_v13 = vadd.f32 %v2817_v14, %v2816_v47 }
 0x1e4   :  { %5930 = vmatprep.subr.bf16.mxu0 %v12155_v36  ;;  %v2873_v56 = vrot.slane %v2872_v59, 4  ;;  %v3064_v30 = vadd.f32 %v8134_v24, %v2969_v27  ;;  %v2846_v58 = vadd.f32 %v2845_v16, %v2844_v20  ;;  %v2901_v25 = vrot.slane %v2900_v54, 4  ;;  %v12167_v20 = vld [vmem:[#allocation13_spill] sm:$0xff] }
 0x1e5   :  { %5962 = vmatprep.subr.bf16.mxu1 %v12156_v17  ;;  %5445 = vmatmul.mubr.msk.f32.gmra.mrb[20].mxu0 %vm1484_vm7, %v8292_v22  ;;  %v2928_v63 = vsel %vm157_vm0, %v2590_v62, 0.0  ;;  %v12157_v23 = vpack.c.bf16 %v7783_v35, %v7778_v34  ;;  %v12158_v41 = vpack.c.bf16 %v7811_v19, %v7806_v10  ;;  %v3581_v55 = vsel %vm1096_vm5, %v3580_v44, %v3579_v11  ;;  %v12159_v34 = vld [vmem:[#allocation10_spill] sm:$0xff]  ;;  %v12161_v10 = vld [vmem:[#allocation12_spill] sm:$0xff]  ;;  %v12162_v19 = vld [vmem:[#allocation39_spill] sm:$0xff] }
 0x1e6   :  { %5449 = vmatmul.mubr.msk.f32.gmra.mrb[20].mxu1 %vm1484_vm7, %v8292_v22  ;;  %v2819_v42 = vrot.slane %v2818_v13, 2  ;;  %v2874_v48 = vadd.f32 %v2873_v56, %v2872_v59  ;;  %v2929_v15 = vrot.slane %v2928_v63, 4  ;;  %1745 = vmatprep.mubr.f32.mxu0 %v12138_v61  ;;  %v3582_v24 = vrot.slane %v3064_v30, 2  ;;  %v12171_v27 = vld [vmem:[#allocation41_spill] sm:$0xff]  ;;  %v12173_v59 = vld [vmem:[#allocation18_spill] sm:$0xff] }
 0x1e7   :  { %5932 = vmatpush3.bf16.msra.mxu0 %v12157_v23  ;;  %5964 = vmatpush3.bf16.msra.mxu1 %v12158_v41  ;;  %v2847_v22 = vrot.slane %v2846_v58, 2  ;;  %v2902_v62 = vadd.f32 %v2901_v25, %v2900_v54  ;;  %v2956_v50 = vsel %vm157_vm0, %v2594_v46, 0.0  ;;  %v12160_v35 = vpack.c.bf16 %v7836_v3, %v12159_v34  ;;  %v12174_v54 = vld [vmem:[#allocation17_spill] sm:$0xff]  ;;  %v8525_v44 = vld [vmem:[%s11735_s0 + $0xf0] sm:$0x7f] }
 0x1e8   :  { %1830 = vmatprep.mubr.f32.mxu1 %v12138_v61  ;;  %v12163_v6 = vpack.c.bf16 %v12161_v10, %v12162_v19  ;;  %v2820_v51 = vadd.f32 %v2819_v42, %v2818_v13  ;;  %v2875_v52 = vrot.slane %v2874_v48, 2  ;;  %v2930_v26 = vadd.f32 %v2929_v15, %v2928_v63  ;;  %v12176_v56 = vld [vmem:[#allocation33_spill] sm:$0xff]  ;;  %v8536_v42 = vld [vmem:[%s11735_s0 + $0x110] sm:$0x7f]  ;;  %v12177_v15 = vld [vmem:[#allocation16_spill] sm:$0xff] }
 0x1e9   :  { %5934 = vmatprep.subr.bf16.mxu0 %v12160_v35  ;;  %v2957_v2 = vrot.slane %v2956_v50, 4  ;;  %5446 = vmatmul.mubr.msk.f32.gmra.mrb[22].mxu0 %vm1484_vm7, %v8372_v21  ;;  %v8507_v46 = vsel %vm1099_vm6, %v3582_v24, %v3581_v55  ;;  %v2848_v1 = vadd.f32 %v2847_v22, %v2846_v58  ;;  %v2903_v3 = vrot.slane %v2902_v62, 2  ;;  %v12178_v24 = vld [vmem:[#allocation15_spill] sm:$0xff] }
 0x1ea   :  { %5966 = vmatprep.subr.bf16.mxu1 %v12163_v6  ;;  %5450 = vmatmul.mubr.msk.f32.gmra.mrb[22].mxu1 %vm1484_vm7, %v8372_v21  ;;  %v2984_v8 = vsel %vm157_vm0, %v2598_v37, 0.0  ;;  %v12166_v47 = vpack.c.bf16 %v12164_v18, %v12165_v0  ;;  %v12169_v43 = vpack.c.bf16 %v12167_v20, %v12168_v39  ;;  %v2821_v9 = vrot.slane %v2820_v51, 1  ;;  %v12170_v21 = vld [vmem:[#allocation14_spill] sm:$0xff]  ;;  %v6219_v61 = vld [vmem:[%s11735_s0 + $0x58] sm:$0x7f] }
 0x1eb   :  { %v2876_v38 = vadd.f32 %v2875_v52, %v2874_v48  ;;  %v2931_v33 = vrot.slane %v2930_v26, 2  ;;  %v2958_v14 = vadd.f32 %v2957_v2, %v2956_v50  ;;  %v12172_v16 = vpack.c.bf16 %v12170_v21, %v12171_v27  ;;  %5544 = vmatprep.mubr.msk.f32.mxu0 %vm157_vm0, %v12176_v56  ;;  %5552 = vmatprep.mubr.msk.f32.mxu1 %vm157_vm0, %v8233_v28  ;;  %v12180_v28 = vld [vmem:[#allocation20_spill] sm:$0xff]  ;;  %v12183_v6 = vld [vmem:[#allocation22_spill] sm:$0xff]  ;;  %v12187_v2 = vld [vmem:[#allocation27_spill] sm:$0xff] }
 0x1ec   :  { %5936 = vmatpush3.bf16.msra.mxu0 %v12166_v47  ;;  %5968 = vmatpush3.bf16.msra.mxu1 %v12169_v43  ;;  %v12175_v36 = vpack.c.bf16 %v12173_v59, %v12174_v54  ;;  %v2849_v37 = vrot.slane %v2848_v1, 1  ;;  %v2904_v17 = vadd.f32 %v2903_v3, %v2902_v62  ;;  %v2985_v11 = vrot.slane %v2984_v8, 4  ;;  %v12181_v62 = vld [vmem:[#allocation19_spill] sm:$0xff]  ;;  %v8557_v0 = vld [vmem:[%s11735_s0 + $0x130] sm:$0x7f]  ;;  %v12191_v59 = vld [vmem:[#allocation25_spill] sm:$0xff] }
 0x1ed   :  { %5938 = vmatprep.subr.bf16.mxu0 %v12172_v16  ;;  %v2573_v13 = vmul.f32 %v8525_v44, %v8187_v12  ;;  %v2822_v30 = vadd.f32 %v2821_v9, %v2820_v51  ;;  %v2877_v58 = vrot.slane %v2876_v38, 1  ;;  %v2932_v25 = vadd.f32 %v2931_v33, %v2930_v26  ;;  %v12184_v51 = vld [vmem:[#allocation21_spill] sm:$0xff]  ;;  %v12186_v26 = vld [vmem:[#allocation24_spill] sm:$0xff]  ;;  %v8565_v9 = vld [vmem:[%s11735_s0 + $0x150] sm:$0x7f] }
 0x1ee   :  { %5970 = vmatprep.subr.bf16.mxu1 %v12175_v36  ;;  %v2959_v63 = vrot.slane %v2958_v14, 2  ;;  %v2850_v23 = vadd.f32 %v2849_v37, %v2848_v1  ;;  %v2905_v41 = vrot.slane %v2904_v17, 1  ;;  %v2986_v55 = vadd.f32 %v2985_v11, %v2984_v8  ;;  %12189 = vst [vmem:[#allocation45_spill] sm:$0xff] %v8565_v9  ;;  %v8573_v27 = vld [vmem:[%s11735_s0 + $0x170] sm:$0x7f]  ;;  %v12192_v54 = vld [vmem:[#allocation49_spill] sm:$0xff] }
 0x1ef   :  { %v2577_v48 = vmul.f32 %v8536_v42, %v8187_v12  ;;  %v12179_v22 = vpack.c.bf16 %v12177_v15, %v12178_v24  ;;  %v12182_v50 = vpack.c.bf16 %v12180_v28, %v12181_v62  ;;  %v2878_v34 = vadd.f32 %v2877_v58, %v2876_v38  ;;  %12190 = vst [vmem:[#allocation46_spill] sm:$0xff] %v8573_v27  ;;  %v12194_v37 = vld [vmem:[#allocation26_spill] sm:$0xff]  ;;  %v12201_v15 = vld [vmem:[#allocation57_spill] sm:$0xff]  ;;  %v12202_v24 = vld [vmem:[#allocation56_spill] sm:$0xff] }
 0x1f0   :  { %v2933_v35 = vrot.slane %v2932_v25, 1  ;;  %v2960_v10 = vadd.f32 %v2959_v63, %v2958_v14  ;;  %v3043_v19 = vadd.f32 %v8182_v7, %v2822_v30  ;;  %v12185_v52 = vpack.c.bf16 %v12183_v6, %v12184_v51 }
 0x1f1   :  { %5940 = vmatpush3.bf16.msra.mxu0 %v12179_v22  ;;  %5972 = vmatpush3.bf16.msra.mxu1 %v12182_v50  ;;  %v12188_v1 = vpack.c.bf16 %v12186_v26, %v12187_v2  ;;  %v2906_v3 = vadd.f32 %v2905_v41, %v2904_v17  ;;  %v2987_v8 = vrot.slane %v2986_v55, 2  ;;  %v3047_v18 = vadd.f32 %v8182_v7, %v2850_v23  ;;  %v12195_v17 = vld [vmem:[#allocation28_spill] sm:$0xff]  ;;  %v12198_v23 = vld [vmem:[#allocation29_spill] sm:$0xff]  ;;  %v12199_v41 = vld [vmem:[#allocation31_spill] sm:$0xff] }
 0x1f2   :  { %5942 = vmatprep.subr.bf16.mxu0 %v12185_v52  ;;  %v2581_v47 = vmul.f32 %v8557_v0, %v8187_v12  ;;  %v2934_v20 = vadd.f32 %v2933_v35, %v2932_v25  ;;  %v2961_v39 = vrot.slane %v2960_v10, 1  ;;  %v3051_v43 = vadd.f32 %v8182_v7, %v2878_v34  ;;  %v8587_v25 = vld [vmem:[%s11735_s0 + $0x190] sm:$0x7f] }
 0x1f3   :  { %5974 = vmatprep.subr.bf16.mxu1 %v12188_v1  ;;  %v2585_v38 = vmul.f32 %v8565_v9, %v8187_v12  ;;  %v2988_v33 = vadd.f32 %v2987_v8, %v2986_v55  ;;  %v3055_v14 = vadd.f32 %v8182_v7, %v2906_v3  ;;  %v3608_v21 = vrot.slane %v3047_v18, 7  ;;  %12197 = vst [vmem:[#allocation47_spill] sm:$0xff] %v8587_v25  ;;  %v8601_v34 = vld [vmem:[%s11735_s0 + $0x1b0] sm:$0x7f]  ;;  %v12205_v3 = vld [vmem:[#allocation55_spill] sm:$0xff]  ;;  %v12230_v9 = vld [vmem:[#allocation9_spill] sm:$0xff] }
 0x1f4   :  { %v2589_v16 = vmul.f32 %v8573_v27, %v8187_v12  ;;  %v12193_v36 = vpack.c.bf16 %v12191_v59, %v12192_v54  ;;  %v12196_v11 = vpack.c.bf16 %v12194_v37, %v12195_v17  ;;  %v2962_v56 = vadd.f32 %v2961_v39, %v2960_v10  ;;  %12204 = vst [vmem:[#allocation48_spill] sm:$0xff] %v8601_v34  ;;  %v12206_v8 = vld [vmem:[#allocation30_spill] sm:$0xff]  ;;  %v12212_v59 = vld [vmem:[#allocation32_spill] sm:$0xff] }
 0x1f5   :  { %v3059_v30 = vadd.f32 %v8182_v7, %v2934_v20  ;;  %v3610_v58 = vrot.slane %v3051_v43, 6  ;;  %v2593_v63 = vmul.f32 %v8587_v25, %v8187_v12  ;;  %v12200_v55 = vpack.c.bf16 %v12198_v23, %v12199_v41  ;;  %v12208_v20 = vld [vmem:[#allocation59_spill] sm:$0xff]  ;;  %v12209_v39 = vld [vmem:[#allocation58_spill] sm:$0xff] }
 0x1f6   :  { %5944 = vmatpush3.bf16.msra.mxu0 %v12193_v36  ;;  %5976 = vmatpush3.bf16.msra.mxu1 %v12196_v11  ;;  %v12203_v22 = vpack.c.bf16 %v12201_v15, %v12202_v24  ;;  %v2989_v28 = vrot.slane %v2988_v33, 1  ;;  %v3609_v62 = vsel %vm1084_vm1, %v3608_v21, %v3043_v19  ;;  %v3612_v50 = vrot.slane %v3055_v14, 5  ;;  %v12214_v36 = vld [vmem:[#allocation64_spill] sm:$0xff] }
 0x1f7   :  { %5946 = vmatprep.subr.bf16.mxu0 %v12200_v55  ;;  %v2597_v35 = vmul.f32 %v8601_v34, %v8187_v12  ;;  %v3063_v10 = vadd.f32 %v8182_v7, %v2962_v56  ;;  %v3611_v6 = vsel %vm1087_vm2, %v3610_v58, %v3609_v62  ;;  %v3614_v51 = vrot.slane %v3059_v30, 4  ;;  %v12217_v62 = vld [vmem:[#allocation62_spill] sm:$0xff] }
 0x1f8   :  { %5978 = vmatprep.subr.bf16.mxu1 %v12203_v22  ;;  %v2809_v52 = vsel %vm157_vm0, %v2573_v13, 0.0  ;;  %v2990_v26 = vadd.f32 %v2989_v28, %v2988_v33  ;;  %v3613_v2 = vsel %vm1090_vm3, %v3612_v50, %v3611_v6  ;;  %v2837_v1 = vsel %vm157_vm0, %v2577_v48, 0.0  ;;  %v12211_v33 = vld [vmem:[#allocation60_spill] sm:$0xff]  ;;  %v12215_v48 = vld [vmem:[#allocation63_spill] sm:$0xff] }
 0x1f9   :  { %v2810_v19 = vrot.slane %v2809_v52, 4  ;;  %v12207_v18 = vpack.c.bf16 %v12205_v3, %v12206_v8  ;;  %v12210_v12 = vpack.c.bf16 %v12208_v20, %v12209_v39  ;;  %v3615_v43 = vsel %vm1093_vm4, %v3614_v51, %v3613_v2  ;;  %v6011_v28 = vld [vmem:[%s11736_s1 + $0x60] ss:$8 sps:$4 sm:$0xff]   ;;  %v6013_v8 = vld [vmem:[%s11736_s1 + $0x64] ss:$8 sps:$4 sm:$0x77]  }
 0x1fa   :  { %v3616_v14 = vrot.slane %v3063_v10, 3  ;;  %v2838_v21 = vrot.slane %v2837_v1, 4  ;;  %v2865_v13 = vsel %vm157_vm0, %v2581_v47, 0.0  ;;  %v12213_v54 = vpack.c.bf16 %v12211_v33, %v12212_v59  ;;  %v12220_v10 = vld [vmem:[#allocation66_spill] sm:$0xff] }
 0x1fb   :  { %5948 = vmatpush3.bf16.msra.mxu0 %v12207_v18  ;;  %5980 = vmatpush3.bf16.msra.mxu1 %v12210_v12  ;;  %v12216_v37 = vpack.c.bf16 %v12214_v36, %v12215_v48  ;;  %v3067_v17 = vadd.f32 %v8182_v7, %v2990_v26  ;;  %v2811_v11 = vadd.f32 %v2810_v19, %v2809_v52  ;;  %v2866_v56 = vrot.slane %v2865_v13, 4  ;;  %v12218_v7 = vld [vmem:[#allocation61_spill] sm:$0xff] }
 0x1fc   :  { %5950 = vmatprep.subr.bf16.mxu0 %v12213_v54  ;;  %v2893_v30 = vsel %vm157_vm0, %v2585_v38, 0.0  ;;  %v3617_v58 = vsel %vm1096_vm5, %v3616_v14, %v3615_v43  ;;  %v2839_v23 = vadd.f32 %v2838_v21, %v2837_v1  ;;  %v2921_v47 = vsel %vm157_vm0, %v2589_v16, 0.0  ;;  %v12221_v38 = vld [vmem:[#allocation65_spill] sm:$0xff]  ;;  %v12223_v43 = vld [vmem:[#allocation34_spill] sm:$0xff] }
 0x1fd   :  { %5982 = vmatprep.subr.bf16.mxu1 %v12216_v37  ;;  %v2894_v41 = vrot.slane %v2893_v30, 4  ;;  %v3618_v55 = vrot.slane %v3067_v17, 2  ;;  %v2812_v15 = vrot.slane %v2811_v11, 2  ;;  %v2867_v24 = vadd.f32 %v2866_v56, %v2865_v13  ;;  %v6014_v21 = vld [vmem:[%s11736_s1 + $0x70] ss:$8 sps:$4 sm:$0xff]  }
 0x1fe   :  { %v2922_v22 = vrot.slane %v2921_v47, 4  ;;  %v12219_v50 = vpack.c.bf16 %v12217_v62, %v12218_v7  ;;  %v12222_v6 = vpack.c.bf16 %v12220_v10, %v12221_v38  ;;  %v2840_v51 = vrot.slane %v2839_v23, 2  ;;  %v12224_v13 = vld [vmem:[#allocation23_spill] sm:$0xff] }
 0x1ff   :  { %v2895_v52 = vadd.f32 %v2894_v41, %v2893_v30  ;;  %v2949_v16 = vsel %vm157_vm0, %v2593_v63, 0.0  ;;  %v2977_v26 = vsel %vm157_vm0, %v2597_v35, 0.0  ;;  %v3619_v2 = vsel %vm1099_vm6, %v3618_v55, %v3617_v58  ;;  %v12225_v55 = vld [vmem:[#allocation35_spill] sm:$0xff] }
 0x200   :  { %5952 = vmatpush3.bf16.msra.mxu0 %v12219_v50  ;;  %5984 = vmatpush3.bf16.msra.mxu1 %v12222_v6  ;;  %v2813_v19 = vadd.f32 %v2812_v15, %v2811_v11  ;;  %v2868_v1 = vrot.slane %v2867_v24, 2  ;;  %v2923_v3 = vadd.f32 %v2922_v22, %v2921_v47  ;;  %v2841_v18 = vadd.f32 %v2840_v51, %v2839_v23  ;;  %v6016_v11 = vld [vmem:[%s11736_s1 + $0x74] ss:$8 sps:$4 sm:$0x77]  }
 0x201   :  { %v2896_v20 = vrot.slane %v2895_v52, 2  ;;  %v2950_v39 = vrot.slane %v2949_v16, 4  ;;  %v2978_v12 = vrot.slane %v2977_v26, 4  ;;  %v3082_v33 = vrot.slane %v6011_v28, %v12224_v13 }
 0x202   :  { %v2814_v63 = vrot.slane %v2813_v19, 1  ;;  %v2869_v35 = vadd.f32 %v2868_v1, %v2867_v24  ;;  %v2924_v14 = vrot.slane %v2923_v3, 2  ;;  %v2842_v59 = vrot.slane %v2841_v18, 1 }
 0x203   :  { %5545 = vmatmul.mubr.msk.f32.vlgmr.msra.gmra.mrb[24].mxu0 %vm157_vm0, %v12223_v43  ;;  %5553 = vmatmul.mubr.msk.f32.vlgmr.msra.gmra.mrb[24].mxu1 %vm157_vm0, %v8288_v53  ;;  %v2897_v54 = vadd.f32 %v2896_v20, %v2895_v52  ;;  %v2951_v36 = vadd.f32 %v2950_v39, %v2949_v16  ;;  %v2979_v48 = vadd.f32 %v2978_v12, %v2977_v26 }
 0x204   :  { %5546 = vmatprep.mubr.msk.f32.mxu0 %vm157_vm0, %v8370_v60  ;;  %5554 = vmatprep.mubr.msk.f32.mxu1 %vm157_vm0, %v3619_v2  ;;  %v2815_v37 = vadd.f32 %v2814_v63, %v2813_v19  ;;  %v2870_v53 = vrot.slane %v2869_v35, 1  ;;  %v2925_v17 = vadd.f32 %v2924_v14, %v2923_v3  ;;  %v3089_v56 = vrot.slane %v6013_v8, %v12224_v13 }
 0x205   :  { %v2843_v30 = vadd.f32 %v2842_v59, %v2841_v18  ;;  %v2898_v58 = vrot.slane %v2897_v54, 1  ;;  %v2952_v23 = vrot.slane %v2951_v36, 2  ;;  %v2980_v41 = vrot.slane %v2979_v48, 2 }
 0x206   :  { %v2871_v60 = vadd.f32 %v2870_v53, %v2869_v35  ;;  %v2926_v47 = vrot.slane %v2925_v17, 1  ;;  %v3042_v15 = vadd.f32 %v12225_v55, %v2815_v37  ;;  %v3096_v24 = vrot.slane %v6014_v21, %v12224_v13 }
 0x207   :  { %5547 = vmatmul.mubr.msk.f32.gmra.mrb[26].mxu0 %vm157_vm0, %v8507_v46  ;;  %v2899_v22 = vadd.f32 %v2898_v58, %v2897_v54  ;;  %v2953_v28 = vadd.f32 %v2952_v23, %v2951_v36  ;;  %v2981_v62 = vadd.f32 %v2980_v41, %v2979_v48  ;;  %v3046_v7 = vadd.f32 %v12225_v55, %v2843_v30 }
 0x208   :  { %v2927_v50 = vadd.f32 %v2926_v47, %v2925_v17  ;;  %v3050_v10 = vadd.f32 %v12225_v55, %v2871_v60  ;;  %v3103_v38 = vrot.slane %v6016_v11, %v12224_v13  ;;  %v3104_v6 = vcombine.low %v3082_v33, %v3096_v24  ;;  %v12226_v11 = vld [vmem:[#allocation6_spill] sm:$0xff] }
 0x209   :  { %v2954_v51 = vrot.slane %v2953_v28, 1  ;;  %v2982_v52 = vrot.slane %v2981_v62, 1  ;;  %v3054_v46 = vadd.f32 %v12225_v55, %v2899_v22  ;;  %v3596_v16 = vrot.slane %v3046_v7, 7 }
 0x20a   :  { %v3058_v26 = vadd.f32 %v12225_v55, %v2927_v50  ;;  %v3598_v2 = vrot.slane %v3050_v10, 6  ;;  %v3105_v19 = vcombine.high %v3082_v33, %v3096_v24  ;;  %v3106_v1 = vcombine.low %v3089_v56, %v3103_v38  ;;  %v6205_v50 = vld [vmem:[%s11735_s0 + $0x48] sm:$0x7f] }
 0x20b   :  { %v2955_v3 = vadd.f32 %v2954_v51, %v2953_v28  ;;  %v2983_v8 = vadd.f32 %v2982_v52, %v2981_v62  ;;  %v3597_v18 = vsel %vm1084_vm1, %v3596_v16, %v3042_v15  ;;  %v3600_v20 = vrot.slane %v3054_v46, 5  ;;  %v6203_v15 = vld [vmem:[%s11735_s0 + $0x8] sm:$0x7f] }
 0x20c   :  { %v3599_v39 = vsel %vm1087_vm2, %v3598_v2, %v3597_v18  ;;  %v3602_v12 = vrot.slane %v3058_v26, 4  ;;  %v3107_v43 = vcombine.high %v3089_v56, %v3103_v38  ;;  %v8670_v63 = vrot.slane %v3104_v6, %v12224_v13  ;;  %v6204_v62 = vld [vmem:[%s11735_s0 + $0x28] sm:$0x7f] }
 0x20d   :  { %v3062_v35 = vadd.f32 %v12225_v55, %v2955_v3  ;;  %v3066_v14 = vadd.f32 %v12225_v55, %v2983_v8  ;;  %v3601_v21 = vsel %vm1090_vm3, %v3600_v20, %v3599_v39  ;;  %v8676_v33 = vrot.slane %v3106_v1, %v12224_v13  ;;  %v6206_v38 = vld [vmem:[%s11735_s0 + $0x88] sm:$0x7f] }
 0x20e   :  { %v3603_v59 = vsel %vm1093_vm4, %v3602_v12, %v3601_v21  ;;  %v8680_v54 = vrot.slane %v3105_v19, %v12224_v13  ;;  %v8683_v36 = vrot.slane %v3107_v43, %v12224_v13  ;;  %v8687_v48 = vcombine.high %v8670_v63, %v8670_v63  ;;  %v6207_v52 = vld [vmem:[%s11735_s0 + $0x68] sm:$0x7f]  ;;  %v12227_v12 = vld [vmem:[#allocation7_spill] sm:$0xff] }
 0x20f   :  { %v3604_v37 = vrot.slane %v3062_v35, 3  ;;  %v3606_v53 = vrot.slane %v3066_v14, 2  ;;  %v8691_v17 = vcombine.high %v8676_v33, %v8676_v33  ;;  %v8695_v56 = vrot.slane %v8670_v63, %v12226_v11  ;;  %v6208_v2 = vld [vmem:[%s11735_s0 + $0xa8] sm:$0x7f] }
 0x210   :  { %v8699_v30 = vcombine.high %v8680_v54, %v8680_v54  ;;  %v8703_v58 = vrot.slane %v8680_v54, %v12226_v11  ;;  %v8707_v23 = vrot.slane %v8687_v48, %v12226_v11  ;;  %v8711_v41 = vrot.slane %v8676_v33, %v12226_v11  ;;  %v6209_v1 = vld [vmem:[%s11735_s0 + $0xc8] sm:$0x7f] }
 0x211   :  { %v3605_v60 = vsel %vm1096_vm5, %v3604_v37, %v3603_v59  ;;  %v8716_v47 = vrot.slane %v8683_v36, %v12226_v11  ;;  %v8720_v55 = vrot.slane %v8691_v17, %v12226_v11  ;;  %v3280_v24 = vmul.f32 %v6203_v15, %v8695_v56  ;;  %v8763_v20 = vld [vmem:[%s11737_s2 + $0x3] ss:$8 sm:$0xf] }
 0x212   :  { %v3607_v22 = vsel %vm1099_vm6, %v3606_v53, %v3605_v60  ;;  %v8729_v28 = vrot.slane %v8699_v30, %v12226_v11  ;;  %v3284_v7 = vmul.f32 %v6204_v62, %v8703_v58  ;;  %v3288_v10 = vmul.f32 %v6205_v50, %v8707_v23  ;;  %v6210_v15 = vld [vmem:[%s11735_s0] sm:$0x7f] }
 0x213   :  { %5555 = vmatmul.mubr.msk.f32.gmra.mrb[26].mxu1 %vm157_vm0, %v3607_v22  ;;  %v3296_v6 = vmul.f32 %v6206_v38, %v8711_v41  ;;  %v3348_v51 = vsel %vm157_vm0, %v3280_v24, 0.0  ;;  %v3300_v19 = vmul.f32 %v6208_v2, %v8716_v47  ;;  %v3304_v3 = vmul.f32 %v6209_v1, %v8720_v55  ;;  %v6211_v22 = vld [vmem:[%s11735_s0 + $0x20] sm:$0x7f] }
 0x214   :  { %v3292_v46 = vmul.f32 %v6207_v52, %v8729_v28  ;;  %v3349_v16 = vsel %vm157_vm0, %v3284_v7, 0.0  ;;  %v3351_v26 = vsel %vm157_vm0, %v3288_v10, 0.0  ;;  %v8768_v43 = vrot.slane %v8670_v63, %v12227_v12  ;;  %v6212_v7 = vld [vmem:[%s11735_s0 + $0x40] sm:$0x7f] }
 0x215   :  { %v3350_v8 = vadd.f32 %v3349_v16, %v3348_v51  ;;  %v3355_v18 = vsel %vm157_vm0, %v3296_v6, 0.0  ;;  %v8772_v35 = vrot.slane %v8680_v54, %v12227_v12  ;;  %v8776_v14 = vrot.slane %v8687_v48, %v12227_v12  ;;  %v6213_v6 = vld [vmem:[%s11735_s0 + $0x60] sm:$0x7f] }
 0x216   :  { %v3353_v39 = vsel %vm157_vm0, %v3292_v46, 0.0  ;;  %v8780_v59 = vrot.slane %v8699_v30, %v12227_v12  ;;  %v8784_v37 = vrot.slane %v8676_v33, %v12227_v12  ;;  %v8788_v53 = vrot.slane %v8683_v36, %v12227_v12  ;;  %v6214_v52 = vld [vmem:[%s11735_s0 + $0x80] sm:$0x7f] }
 0x217   :  { %v3352_v21 = vadd.f32 %v3351_v26, %v3350_v8  ;;  %v8792_v60 = vrot.slane %v8691_v17, %v12227_v12  ;;  %v3279_v24 = vmul.f32 %v6210_v15, %v8768_v43  ;;  %v3283_v62 = vmul.f32 %v6211_v22, %v8772_v35 }
 0x218   :  { %v3287_v50 = vmul.f32 %v6212_v7, %v8776_v14  ;;  %v8808_v38 = vrot.slane %v8763_v20, %v12226_v11  ;;  %v3291_v51 = vmul.f32 %v6213_v6, %v8780_v59  ;;  %v3295_v46 = vmul.f32 %v6214_v52, %v8784_v37 }
 0x219   :  { %v3354_v10 = vadd.f32 %v3353_v39, %v3352_v21  ;;  %v3357_v16 = vsel %vm157_vm0, %v3300_v19, 0.0  ;;  %v3335_v26 = vsel %vm157_vm0, %v3279_v24, 0.0  ;;  %v3336_v2 = vsel %vm157_vm0, %v3283_v62, 0.0  ;;  %v6215_v21 = vld [vmem:[%s11735_s0 + $0xa0] sm:$0x7f] }
 0x21a   :  { %v3338_v1 = vsel %vm157_vm0, %v3287_v50, 0.0  ;;  %v3359_v39 = vsel %vm157_vm0, %v3304_v3, 0.0  ;;  %v3299_v15 = vmul.f32 %v6215_v21, %v8788_v53  ;;  %v3337_v22 = vadd.f32 %v3336_v2, %v3335_v26  ;;  %v6216_v19 = vld [vmem:[%s11735_s0 + $0xc0] sm:$0x7f] }
 0x21b   :  { %v3356_v8 = vadd.f32 %v3355_v18, %v3354_v10  ;;  %v3303_v24 = vmul.f32 %v6216_v19, %v8792_v60  ;;  %v3340_v62 = vsel %vm157_vm0, %v3291_v51, 0.0  ;;  %v3342_v7 = vsel %vm157_vm0, %v3295_v46, 0.0  ;;  %v12228_v18 = vld [vmem:[#allocation8_spill] sm:$0xff] }
 0x21c   :  { %v8835_v3 = vrot.slane %v8670_v63, %v12228_v18  ;;  %v3339_v10 = vadd.f32 %v3338_v1, %v3337_v22  ;;  %v8839_v6 = vrot.slane %v8680_v54, %v12228_v18  ;;  %v8843_v52 = vrot.slane %v8687_v48, %v12228_v18  ;;  %v6218_v22 = vld [vmem:[%s11735_s0 + $0x38] sm:$0x7f] }
 0x21d   :  { %v3358_v50 = vadd.f32 %v3357_v16, %v3356_v8  ;;  %v8847_v26 = vrot.slane %v8699_v30, %v12228_v18  ;;  %v8851_v51 = vrot.slane %v8676_v33, %v12228_v18  ;;  %v8855_v46 = vrot.slane %v8683_v36, %v12228_v18  ;;  %v6217_v8 = vld [vmem:[%s11735_s0 + $0x18] sm:$0x7f] }
 0x21e   :  { %v8859_v16 = vrot.slane %v8691_v17, %v12228_v18  ;;  %v3341_v1 = vadd.f32 %v3340_v62, %v3339_v10  ;;  %v3282_v21 = vmul.f32 %v6217_v8, %v8835_v3  ;;  %v3286_v19 = vmul.f32 %v6218_v22, %v8839_v6  ;;  %v6220_v62 = vld [vmem:[%s11735_s0 + $0x78] sm:$0x7f] }
 0x21f   :  { %v3360_v2 = vadd.f32 %v3359_v39, %v3358_v50  ;;  %v3344_v13 = vsel %vm157_vm0, %v3299_v15, 0.0  ;;  %v3290_v39 = vmul.f32 %v6219_v61, %v8843_v52  ;;  %v3294_v50 = vmul.f32 %v6220_v62, %v8847_v26  ;;  %v6221_v10 = vld [vmem:[%s11735_s0 + $0x98] sm:$0x7f] }
 0x220   :  { %v3298_v8 = vmul.f32 %v6221_v10, %v8851_v51  ;;  %v3343_v22 = vadd.f32 %v3342_v7, %v3341_v1  ;;  %v3346_v11 = vsel %vm157_vm0, %v3303_v24, 0.0  ;;  %v3374_v34 = vsel %vm157_vm0, %v3282_v21, 0.0  ;;  %v6222_v62 = vld [vmem:[%s11735_s0 + $0xb8] sm:$0x7f] }
 0x221   :  { %v3461_v15 = vadd.f32 %v8808_v38, %v3360_v2  ;;  %v8887_v61 = vrot.slane %v8763_v20, %v12227_v12  ;;  %v3302_v25 = vmul.f32 %v6222_v62, %v8855_v46  ;;  %v3375_v27 = vsel %vm157_vm0, %v3286_v19, 0.0  ;;  %v6223_v24 = vld [vmem:[%s11735_s0 + $0xd8] sm:$0x7f] }
 0x222   :  { %v3377_v10 = vsel %vm157_vm0, %v3290_v39, 0.0  ;;  %v3345_v7 = vadd.f32 %v3344_v13, %v3343_v22  ;;  %v3306_v2 = vmul.f32 %v6223_v24, %v8859_v16  ;;  %v3376_v1 = vadd.f32 %v3375_v27, %v3374_v34  ;;  %v6227_v22 = vld [vmem:[%s11735_s0 + $0x70] sm:$0x7f] }
 0x223   :  { %12229 = vst [vmem:[#allocation50_spill] sm:$0xff] %v8887_v61  ;;  %5548 = vmatprep.mubr.msk.f32.mxu0 %vm157_vm0, %v3461_v15  ;;  %v3379_v21 = vsel %vm157_vm0, %v3294_v50, 0.0  ;;  %v3381_v12 = vsel %vm157_vm0, %v3298_v8, 0.0  ;;  %v8904_v62 = vrot.slane %v8670_v63, %v12230_v9  ;;  %v8908_v19 = vrot.slane %v8680_v54, %v12230_v9  ;;  %v6228_v24 = vld [vmem:[%s11735_s0 + $0x90] sm:$0x7f] }
 0x224   :  { %v8912_v13 = vrot.slane %v8687_v48, %v12230_v9  ;;  %v3347_v39 = vadd.f32 %v3346_v11, %v3345_v7  ;;  %v3378_v15 = vadd.f32 %v3377_v10, %v3376_v1  ;;  %v8916_v27 = vrot.slane %v8699_v30, %v12230_v9  ;;  %v6224_v48 = vld [vmem:[%s11735_s0 + $0x10] sm:$0x7f] }
 0x225   :  { %v8920_v34 = vrot.slane %v8676_v33, %v12230_v9  ;;  %v8924_v63 = vrot.slane %v8683_v36, %v12230_v9  ;;  %v8928_v54 = vrot.slane %v8691_v17, %v12230_v9  ;;  %v3281_v11 = vmul.f32 %v6224_v48, %v8904_v62  ;;  %v6225_v30 = vld [vmem:[%s11735_s0 + $0x30] sm:$0x7f] }
 0x226   :  { %v3285_v33 = vmul.f32 %v6225_v30, %v8908_v19  ;;  %v3460_v50 = vadd.f32 %v8887_v61, %v3347_v39  ;;  %v3380_v36 = vadd.f32 %v3379_v21, %v3378_v15  ;;  %v6226_v17 = vld [vmem:[%s11735_s0 + $0x50] sm:$0x7f]  ;;  %v3293_v10 = vmul.f32 %v6227_v22, %v8916_v27  ;;  %v8979_v61 = vpop.f32.mrb[8].mxu0 }
 0x227   :  { %v3289_v8 = vmul.f32 %v6226_v17, %v8912_v13  ;;  %v3383_v7 = vsel %vm157_vm0, %v3302_v25, 0.0  ;;  %v3297_v1 = vmul.f32 %v6228_v24, %v8920_v34  ;;  %v6229_v21 = vld [vmem:[%s11735_s0 + $0xb0] sm:$0x7f]  ;;  %v3361_v15 = vsel %vm157_vm0, %v3281_v11, 0.0 }
 0x228   :  { %v3301_v39 = vmul.f32 %v6229_v21, %v8924_v63  ;;  %5549 = vmatmul.mubr.msk.f32.gmra.mrb[28].mxu0 %vm157_vm0, %v3460_v50  ;;  %v3382_v48 = vadd.f32 %v3381_v12, %v3380_v36  ;;  %v3385_v30 = vsel %vm157_vm0, %v3306_v2, 0.0  ;;  %v3362_v25 = vsel %vm157_vm0, %v3285_v33, 0.0  ;;  %v6230_v24 = vld [vmem:[%s11735_s0 + $0xd0] sm:$0x7f]  ;;  %v6231_v33 = vld [vmem:[%s11735_s0 + $0xe8] sm:$0x7f] }
 0x229   :  { %v3364_v17 = vsel %vm157_vm0, %v3289_v8, 0.0  ;;  %v8963_v22 = vrot.slane %v8763_v20, %v12228_v18  ;;  %v3305_v21 = vmul.f32 %v6230_v24, %v8928_v54  ;;  %v3363_v11 = vadd.f32 %v3362_v25, %v3361_v15  ;;  %v6232_v8 = vld [vmem:[%s11735_s0 + $0x108] sm:$0x7f]  ;;  %v8981_v15 = vpop.f32.mrb[8].mxu1 }
 0x22a   :  { %v3366_v50 = vsel %vm157_vm0, %v3293_v10, 0.0  ;;  %v3384_v12 = vadd.f32 %v3383_v7, %v3382_v48  ;;  %v3368_v2 = vsel %vm157_vm0, %v3297_v1, 0.0  ;;  %v3308_v36 = vmul.f32 %v6231_v33, %v8695_v56  ;;  %v6233_v1 = vld [vmem:[%s11735_s0 + $0x128] sm:$0x7f]  ;;  %v8994_v24 = vpop.f32.mrb[9].mxu1 }
 0x22b   :  { %v3312_v18 = vmul.f32 %v6232_v8, %v8703_v58  ;;  %v3365_v10 = vadd.f32 %v3364_v17, %v3363_v11  ;;  %v3370_v7 = vsel %vm157_vm0, %v3301_v39, 0.0  ;;  %v3316_v48 = vmul.f32 %v6233_v1, %v8707_v23  ;;  %v6234_v56 = vld [vmem:[%s11735_s0 + $0x148] sm:$0x7f]  ;;  %v8992_v58 = vpop.f32.mrb[9].mxu0 }
 0x22c   :  { %v3320_v25 = vmul.f32 %v6234_v56, %v8729_v28  ;;  %v3386_v33 = vadd.f32 %v3385_v30, %v3384_v12  ;;  %v6235_v39 = vld [vmem:[%s11735_s0 + $0x168] sm:$0x7f]  ;;  %v3400_v8 = vsel %vm157_vm0, %v3308_v36, 0.0 }
 0x22d   :  { %v3324_v17 = vmul.f32 %v6235_v39, %v8711_v41  ;;  %v6236_v23 = vld [vmem:[%s11735_s0 + $0x188] sm:$0x7f]  ;;  %v3367_v28 = vadd.f32 %v3366_v50, %v3365_v10  ;;  %v3401_v12 = vsel %vm157_vm0, %v3312_v18, 0.0  ;;  %v3403_v56 = vsel %vm157_vm0, %v3316_v48, 0.0 }
 0x22e   :  { %v3328_v11 = vmul.f32 %v6236_v23, %v8716_v47  ;;  %v6237_v1 = vld [vmem:[%s11735_s0 + $0x1a8] sm:$0x7f]  ;;  %v3463_v41 = vadd.f32 %v8963_v22, %v3386_v33  ;;  %v3372_v39 = vsel %vm157_vm0, %v3305_v21, 0.0  ;;  %v9015_v47 = vrot.slane %v8763_v20, %v12230_v9  ;;  %v12231_v21 = vld [vmem:[#allocation36_spill] sm:$0xff] }
 0x22f   :  { %v3332_v30 = vmul.f32 %v6237_v1, %v8720_v55  ;;  %v3402_v36 = vadd.f32 %v3401_v12, %v3400_v8  ;;  %v3369_v50 = vadd.f32 %v3368_v2, %v3367_v28  ;;  %v3405_v10 = vsel %vm157_vm0, %v3320_v25, 0.0  ;;  %v12232_v20 = vld [vmem:[#allocation37_spill] sm:$0xff] }
 0x230   :  { %v3307_v23 = vmul.f32 %v8303_v32, %v8768_v43  ;;  %v3311_v55 = vmul.f32 %v8313_v49, %v8772_v35  ;;  %5556 = vmatprep.mubr.msk.f32.mxu1 %vm157_vm0, %v3463_v41  ;;  %v3407_v48 = vsel %vm157_vm0, %v3324_v17, 0.0  ;;  %v3315_v33 = vmul.f32 %v12231_v21, %v8776_v14  ;;  %v12233_v49 = vld [vmem:[#allocation42_spill] sm:$0xff]  ;;  %v12234_v14 = vld [vmem:[#allocation43_spill] sm:$0xff] }
 0x231   :  { %v3404_v18 = vadd.f32 %v3403_v56, %v3402_v36  ;;  %v3319_v8 = vmul.f32 %v12232_v20, %v8780_v59  ;;  %v3371_v2 = vadd.f32 %v3370_v7, %v3369_v50  ;;  %v3409_v25 = vsel %vm157_vm0, %v3328_v11, 0.0  ;;  %v12235_v59 = vld [vmem:[#allocation44_spill] sm:$0xff] }
 0x232   :  { %v3411_v28 = vsel %vm157_vm0, %v3332_v30, 0.0  ;;  %v3387_v32 = vsel %vm157_vm0, %v3307_v23, 0.0  ;;  %v3323_v35 = vmul.f32 %v12233_v49, %v8784_v37  ;;  %v3388_v1 = vsel %vm157_vm0, %v3311_v55, 0.0  ;;  %v12238_v49 = vld [vmem:[#allocation47_spill] sm:$0xff] }
 0x233   :  { %v3406_v43 = vadd.f32 %v3405_v10, %v3404_v18  ;;  %v3390_v17 = vsel %vm157_vm0, %v3315_v33, 0.0  ;;  %v3373_v12 = vadd.f32 %v3372_v39, %v3371_v2  ;;  %v3327_v56 = vmul.f32 %v12234_v14, %v8788_v53 }
 0x234   :  { %v3331_v7 = vmul.f32 %v12235_v59, %v8792_v60  ;;  %v3389_v11 = vadd.f32 %v3388_v1, %v3387_v32  ;;  %v3392_v30 = vsel %vm157_vm0, %v3319_v8, 0.0  ;;  %v3310_v36 = vmul.f32 %v8382_v45, %v8835_v3  ;;  %v12241_v59 = vld [vmem:[#allocation7_spill] sm:$0xff] }
 0x235   :  { %v3408_v41 = vadd.f32 %v3407_v48, %v3406_v43  ;;  %v3314_v37 = vmul.f32 %v8393_v5, %v8839_v6  ;;  %v3462_v50 = vadd.f32 %v9015_v47, %v3373_v12  ;;  %v3318_v39 = vmul.f32 %v8400_v4, %v8843_v52  ;;  %v12240_v12 = vld [vmem:[#allocation50_spill] sm:$0xff] }
 0x236   :  { %v3391_v10 = vadd.f32 %v3390_v17, %v3389_v11  ;;  %v3322_v53 = vmul.f32 %v8412_v40, %v8847_v26  ;;  %v3394_v23 = vsel %vm157_vm0, %v3323_v35, 0.0  ;;  %v3326_v55 = vmul.f32 %v8426_v31, %v8851_v51 }
 0x237   :  { %v3410_v60 = vadd.f32 %v3409_v25, %v3408_v41  ;;  %v3330_v45 = vmul.f32 %v8436_v29, %v8855_v46  ;;  %5557 = vmatmul.mubr.msk.f32.gmra.mrb[28].mxu1 %vm157_vm0, %v3462_v50  ;;  %v3426_v3 = vsel %vm157_vm0, %v3310_v36, 0.0  ;;  %v3427_v6 = vsel %vm157_vm0, %v3314_v37, 0.0  ;;  %v12242_v36 = vld [vmem:[#allocation6_spill] sm:$0xff] }
 0x238   :  { %v3393_v5 = vadd.f32 %v3392_v30, %v3391_v10  ;;  %v3429_v4 = vsel %vm157_vm0, %v3318_v39, 0.0  ;;  %v3396_v40 = vsel %vm157_vm0, %v3327_v56, 0.0  ;;  %v3398_v26 = vsel %vm157_vm0, %v3331_v7, 0.0 }
 0x239   :  { %v3412_v52 = vadd.f32 %v3411_v28, %v3410_v60  ;;  %v3428_v18 = vadd.f32 %v3427_v6, %v3426_v3  ;;  %v3334_v31 = vmul.f32 %v8450_v57, %v8859_v16  ;;  %v3431_v29 = vsel %vm157_vm0, %v3322_v53, 0.0  ;;  %v12236_v57 = vld [vmem:[#allocation45_spill] sm:$0xff] }
 0x23a   :  { %v3395_v48 = vadd.f32 %v3394_v23, %v3393_v5  ;;  %v3309_v51 = vmul.f32 %v8525_v44, %v8904_v62  ;;  %v3313_v33 = vmul.f32 %v8536_v42, %v8908_v19  ;;  %v3317_v20 = vmul.f32 %v8557_v0, %v8912_v13  ;;  %v5416_v0 = vld [vmem:[%s11737_s2 + $0x4] ss:$8 sm:$0xf] }
 0x23b   :  { %v3465_v46 = vadd.f32 %v8808_v38, %v3412_v52  ;;  %v3430_v21 = vadd.f32 %v3429_v4, %v3428_v18  ;;  %v3433_v2 = vsel %vm157_vm0, %v3326_v55, 0.0  ;;  %v3435_v25 = vsel %vm157_vm0, %v3330_v45, 0.0  ;;  %v12237_v38 = vld [vmem:[#allocation46_spill] sm:$0xff] }
 0x23c   :  { %v3397_v8 = vadd.f32 %v3396_v40, %v3395_v48  ;;  %v3321_v16 = vmul.f32 %v12236_v57, %v8916_v27  ;;  %v3325_v62 = vmul.f32 %v12237_v38, %v8920_v34  ;;  %v3413_v28 = vsel %vm157_vm0, %v3309_v51, 0.0  ;;  %v12239_v34 = vld [vmem:[#allocation48_spill] sm:$0xff] }
 0x23d   :  { %5550 = vmatprep.mubr.msk.f32.mxu0 %vm157_vm0, %v3465_v46  ;;  %v3432_v44 = vadd.f32 %v3431_v29, %v3430_v21  ;;  %v3414_v42 = vsel %vm157_vm0, %v3313_v33, 0.0  ;;  %v3437_v13 = vsel %vm157_vm0, %v3334_v31, 0.0  ;;  %v3416_v27 = vsel %vm157_vm0, %v3317_v20, 0.0  ;;  %v5569_v21 = vld [vmem:[%s11740_s5 + $0xc8] sm:$0xff]  ;;  %v5563_v33 = vld [vmem:[%s11740_s5 + $0x98] sm:$0xff] }
 0x23e   :  { %v3399_v19 = vadd.f32 %v3398_v26, %v3397_v8  ;;  %v3415_v32 = vadd.f32 %v3414_v42, %v3413_v28  ;;  %v3329_v35 = vmul.f32 %v12238_v49, %v8924_v63  ;;  %v3333_v1 = vmul.f32 %v12239_v34, %v8928_v54  ;;  %v12243_v63 = vld [vmem:[#allocation8_spill] sm:$0xff]  ;;  %v5571_v8 = vld [vmem:[%s11740_s5 + $0xd8] sm:$0xff] }
 0x23f   :  { %v3434_v43 = vadd.f32 %v3433_v2, %v3432_v44  ;;  %v3418_v17 = vsel %vm157_vm0, %v3321_v16, 0.0  ;;  %v9091_v7 = vrot.slane %v5416_v0, %v12241_v59  ;;  %v9094_v11 = vrot.slane %v5416_v0, %v12230_v9 }
 0x240   :  { %v3464_v14 = vadd.f32 %v12240_v12, %v3399_v19  ;;  %v3417_v56 = vadd.f32 %v3416_v27, %v3415_v32  ;;  %v3420_v30 = vsel %vm157_vm0, %v3325_v62, 0.0  ;;  %v9098_v37 = vrot.slane %v5416_v0, %v12242_v36  ;;  %v5562_v12 = vld [vmem:[%s11740_s5 + $0x90] sm:$0xff] }
 0x241   :  { %v3436_v41 = vadd.f32 %v3435_v25, %v3434_v43  ;;  %v9101_v50 = vrot.slane %v5416_v0, %v12243_v63  ;;  %v1858_v10 = vadd.f32 %v9091_v7, %v8979_v61  ;;  %v1860_v39 = vadd.f32 %v9094_v11, %v8981_v15  ;;  %v12245_v0 = vld [vmem:[#allocation23_spill] sm:$0xff] }
 0x242   :  { %5551 = vmatmul.mubr.msk.f32.gmra.mrb[30].mxu0 %vm157_vm0, %v3464_v14  ;;  %v3419_v54 = vadd.f32 %v3418_v17, %v3417_v56  ;;  %v3422_v60 = vsel %vm157_vm0, %v3329_v35, 0.0  ;;  %v1859_v23 = vadd.f32 %v9098_v37, %v8992_v58  ;;  %v12244_v45 = vmov 0.0   ;;  %v5568_v17 = vld [vmem:[%s11740_s5 + $0xc0] sm:$0xff]  ;;  %v5570_v56 = vld [vmem:[%s11740_s5 + $0xd0] sm:$0xff] }
 0x243   :  { %v3438_v53 = vadd.f32 %v3437_v13, %v3436_v41  ;;  %v1861_v55 = vadd.f32 %v9101_v50, %v8994_v24  ;;  %3997 = vmatprep.mubr.f32.mxu0 %v12244_v45  ;;  %v5451_v3 = vmul.f32 -1.442695, %v1858_v10  ;;  %v5453_v6 = vmul.f32 -1.442695, %v1860_v39 }
 0x244   :  { %v3421_v5 = vadd.f32 %v3420_v30, %v3419_v54  ;;  %v3424_v61 = vsel %vm157_vm0, %v3333_v1, 0.0  ;;  %v5452_v52 = vmul.f32 -1.442695, %v1859_v23  ;;  %v5989_v2 = vpack.c.bf16 %v5571_v8, %v5563_v33  ;;  %v5560_v1 = vld [vmem:[%s11740_s5 + $0x80] sm:$0xff] }
 0x245   :  { %v3467_v4 = vadd.f32 %v8963_v22, %v3438_v53  ;;  %v5454_v15 = vmul.f32 -1.442695, %v1861_v55  ;;  %6017 = vpow2.f32 %v5451_v3  ;;  %v5987_v14 = vpack.c.bf16 %v5568_v17, %v5560_v1  ;;  %v5575_v1 = vld [vmem:[%s11740_s5 + $0xf8] sm:$0xff] }
 0x246   :  { %v3423_v40 = vadd.f32 %v3422_v60, %v3421_v5  ;;  %6019 = vpow2.f32 %v5453_v6  ;;  %5990 = vmatprep.subr.bf16.mxu1 %v5989_v2  ;;  %v5991_v41 = vpack.c.bf16 %v5570_v56, %v5562_v12 }
 0x247   :  { %5558 = vmatprep.mubr.msk.f32.mxu1 %vm157_vm0, %v3467_v4  ;;  %6021 = vpow2.f32 %v5452_v52 }
 0x248   :  { %v3425_v58 = vadd.f32 %v3424_v61, %v3423_v40  ;;  %6023 = vpow2.f32 %v5454_v15  ;;  %5992 = vmatpush1.bf16.msra.mxu1 %v5991_v41 }
 0x24a   :  { %v3466_v24 = vadd.f32 %v9015_v47, %v3425_v58  ;;  %v5561_v47 = vld [vmem:[%s11740_s5 + $0x88] sm:$0xff] }
 0x24b   :  { %v5985_v20 = vpack.c.bf16 %v5569_v21, %v5561_v47 }
 0x24c   :  { %5559 = vmatmul.mubr.msk.f32.gmra.mrb[30].mxu1 %vm157_vm0, %v3466_v24 }
 0x24d   :  { %4082 = vmatprep.mubr.f32.mxu1 %v12244_v45  ;;  %5986 = vmatprep.subr.bf16.mxu0 %v5985_v20 }
 0x24e   :  { %5988 = vmatpush1.bf16.msra.mxu0 %v5987_v14 }
 0x24f   :  { %v6018_v26 = vpop.eup %6017 }
 0x250   :  { %v6020_v22 = vpop.eup %6019  ;;  %v1890_v18 = vadd.f32 1.0, %v6018_v26 }
 0x251   :  { %v6022_v48 = vpop.eup %6021  ;;  %v1892_v31 = vadd.f32 1.0, %v6020_v22 }
 0x252   :  { %v6024_v29 = vpop.eup %6023  ;;  %6025 = vrcp.f32 %v1890_v18  ;;  %v1891_v51 = vadd.f32 1.0, %v6022_v48 }
 0x253   :  { %6027 = vrcp.f32 %v1892_v31  ;;  %v1893_v46 = vadd.f32 1.0, %v6024_v29 }
 0x254   :  { %6029 = vrcp.f32 %v1891_v51 }
 0x255   :  { %6031 = vrcp.f32 %v1893_v46 }
 0x25c   :  { %v6026_v25 = vpop.eup %6025 }
 0x25d   :  { %v6028_v57 = vpop.eup %6027 }
 0x25e   :  { %v6030_v16 = vpop.eup %6029 }
 0x25f   :  { %v6032_v44 = vpop.eup %6031  ;;  %v1999_v38 = vcombine.low %v6026_v25, %v6030_v16  ;;  %v2000_v62 = vcombine.high %v6026_v25, %v6030_v16 }
 0x260   :  { %v2001_v28 = vcombine.low %v6028_v57, %v6032_v44  ;;  %v2002_v42 = vcombine.high %v6028_v57, %v6032_v44 }
 0x261   :  { %v9133_v19 = vrot.slane %v1999_v38, %v12245_v0  ;;  %v9136_v13 = vrot.slane %v2000_v62, %v12245_v0  ;;  %v5565_v38 = vld [vmem:[%s11740_s5 + $0xa8] sm:$0xff] }
 0x262   :  { %v9139_v32 = vrot.slane %v2001_v28, %v12245_v0  ;;  %v9142_v27 = vrot.slane %v2002_v42, %v12245_v0  ;;  %v5573_v62 = vld [vmem:[%s11740_s5 + $0xe8] sm:$0xff]  ;;  %v5567_v28 = vld [vmem:[%s11740_s5 + $0xb8] sm:$0xff] }
 0x263   :  { %v5993_v42 = vpack.c.bf16 %v5573_v62, %v5565_v38  ;;  %v5997_v17 = vpack.c.bf16 %v5575_v1, %v5567_v28 }
 0x264   :  { %v2031_v43 = vcombine.low %v9133_v19, %v9139_v32  ;;  %v2032_v49 = vcombine.high %v9133_v19, %v9139_v32  ;;  %v2033_v35 = vcombine.low %v9136_v13, %v9142_v27  ;;  %v2034_v34 = vcombine.high %v9136_v13, %v9142_v27 }
 0x265   :  { %5994 = vmatprep.subr.bf16.mxu0 %v5993_v42  ;;  %5998 = vmatprep.subr.bf16.mxu1 %v5997_v17 }
 0x271   :  { %v1569_v30 = vpop.f32.mrb[10].mxu0  ;;  %v1654_v54 = vpop.f32.mrb[10].mxu1 }
 0x272   :  { %v1862_v10 = vadd.f32 %v9091_v7, %v1569_v30  ;;  %v1864_v39 = vadd.f32 %v9094_v11, %v1654_v54  ;;  %v1571_v53 = vpop.f32.mrb[11].mxu0  ;;  %v1656_v60 = vpop.f32.mrb[11].mxu1 }
 0x273   :  { %v1863_v23 = vadd.f32 %v9098_v37, %v1571_v53  ;;  %v1865_v55 = vadd.f32 %v9101_v50, %v1656_v60  ;;  %v5417_v53 = vld [vmem:[%s11737_s2 + $0x6] ss:$8 sm:$0xf] }
 0x274   :  { %v5455_v5 = vmul.f32 -1.442695, %v1862_v10  ;;  %v5457_v3 = vmul.f32 -1.442695, %v1864_v39 }
 0x275   :  { %v5456_v6 = vmul.f32 -1.442695, %v1863_v23  ;;  %v5458_v4 = vmul.f32 -1.442695, %v1865_v55  ;;  %v9207_v55 = vrot.slane %v2031_v43, %v12245_v0  ;;  %v1922_v43 = vrot.slane %v5417_v53, %v12242_v36 }
 0x276   :  { %6033 = vpow2.f32 %v5455_v5 }
 0x277   :  { %6035 = vpow2.f32 %v5457_v3  ;;  %v2136_v27 = vrot.slane %v9207_v55, %v12241_v59 }
 0x278   :  { %6037 = vpow2.f32 %v5456_v6  ;;  %v1918_v6 = vrot.slane %v5417_v53, %v12241_v59 }
 0x279   :  { %6039 = vpow2.f32 %v5458_v4  ;;  %v1926_v4 = vrot.slane %v5417_v53, %v12230_v9 }
 0x280   :  { %v6034_v61 = vpop.eup %6033 }
 0x281   :  { %v6036_v52 = vpop.eup %6035  ;;  %v1894_v15 = vadd.f32 1.0, %v6034_v61  ;;  %v9215_v61 = vrot.slane %v2033_v35, %v12245_v0  ;;  %v9233_v35 = vcombine.high %v9207_v55, %v9207_v55 }
 0x282   :  { %v6038_v7 = vpop.eup %6037  ;;  %v1896_v40 = vadd.f32 1.0, %v6036_v52  ;;  %v9221_v52 = vrot.slane %v2032_v49, %v12245_v0 }
 0x283   :  { %v6040_v11 = vpop.eup %6039  ;;  %6041 = vrcp.f32 %v1894_v15  ;;  %v1895_v58 = vadd.f32 1.0, %v6038_v7  ;;  %v1930_v15 = vrot.slane %v5417_v53, %v12243_v63  ;;  %v2176_v53 = vrot.slane %v9233_v35, %v12230_v9 }
 0x284   :  { %6043 = vrcp.f32 %v1896_v40  ;;  %v1897_v37 = vadd.f32 1.0, %v6040_v11  ;;  %v9229_v11 = vrot.slane %v2034_v34, %v12245_v0  ;;  %v2140_v34 = vrot.slane %v9207_v55, %v12242_v36 }
 0x285   :  { %6045 = vrcp.f32 %v1895_v58  ;;  %v2156_v42 = vrot.slane %v9221_v52, %v12242_v36 }
 0x286   :  { %6047 = vrcp.f32 %v1897_v37  ;;  %v9237_v37 = vcombine.high %v9215_v61, %v9215_v61 }
 0x28d   :  { %v6042_v50 = vpop.eup %6041 }
 0x28e   :  { %v6044_v24 = vpop.eup %6043 }
 0x28f   :  { %v6046_v26 = vpop.eup %6045 }
 0x290   :  { %v6048_v22 = vpop.eup %6047  ;;  %v2066_v18 = vcombine.low %v6042_v50, %v6046_v26  ;;  %v2067_v48 = vcombine.high %v6042_v50, %v6046_v26  ;;  %v9241_v50 = vcombine.high %v9221_v52, %v9221_v52 }
 0x291   :  { %v2068_v31 = vcombine.low %v6044_v24, %v6048_v22  ;;  %v2069_v29 = vcombine.high %v6044_v24, %v6048_v22 }
 0x292   :  { %v9169_v51 = vrot.slane %v2066_v18, %v12245_v0  ;;  %v9172_v46 = vrot.slane %v2067_v48, %v12245_v0  ;;  %v2144_v18 = vrot.slane %v9207_v55, %v12230_v9  ;;  %v2148_v48 = vrot.slane %v9207_v55, %v12243_v63 }
 0x293   :  { %v9175_v47 = vrot.slane %v2068_v31, %v12245_v0  ;;  %v9178_v21 = vrot.slane %v2069_v29, %v12245_v0 }
 0x295   :  { %v2098_v33 = vcombine.low %v9169_v51, %v9175_v47  ;;  %v2099_v20 = vcombine.high %v9169_v51, %v9175_v47  ;;  %v2100_v8 = vcombine.low %v9172_v46, %v9178_v21  ;;  %v2101_v2 = vcombine.high %v9172_v46, %v9178_v21 }
 0x296   :  { %v1575_v25 = vpop.f32.mrb[12].mxu0  ;;  %v1660_v57 = vpop.f32.mrb[12].mxu1  ;;  %v2224_v51 = vrot.slane %v9229_v11, %v12230_v9  ;;  %v2228_v47 = vrot.slane %v9229_v11, %v12243_v63 }
 0x297   :  { %v1576_v16 = vpop.f32.mrb[13].mxu0  ;;  %v1661_v44 = vpop.f32.mrb[13].mxu1 }
 0x298   :  { %v2152_v16 = vrot.slane %v9221_v52, %v12241_v59 }
 0x2ab   :  { %v1579_v12 = vpop.f32.mrb[14].mxu0  ;;  %v1664_v14 = vpop.f32.mrb[14].mxu1 }
 0x2ac   :  { %v1580_v56 = vpop.f32.mrb[15].mxu0  ;;  %v1665_v41 = vpop.f32.mrb[15].mxu1  ;;  %v2160_v12 = vrot.slane %v9221_v52, %v12230_v9 }
 0x2ad   :  { %v2164_v41 = vrot.slane %v9221_v52, %v12243_v63 }
 0x2af   :  { %v1733_v30 = vpop.f32.mrb[16].mxu0  ;;  %v1818_v54 = vpop.f32.mrb[16].mxu1 }
 0x2b0   :  { %v1734_v10 = vpop.f32.mrb[17].mxu0  ;;  %v1819_v39 = vpop.f32.mrb[17].mxu1 }
 0x2b1   :  { %v2168_v10 = vrot.slane %v9233_v35, %v12241_v59  ;;  %v2172_v39 = vrot.slane %v9233_v35, %v12242_v36 }
 0x2b4   :  { %v1737_v60 = vpop.f32.mrb[18].mxu0  ;;  %v1822_v23 = vpop.f32.mrb[18].mxu1 }
 0x2b5   :  { %v1738_v5 = vpop.f32.mrb[19].mxu0  ;;  %v1823_v3 = vpop.f32.mrb[19].mxu1  ;;  %v2180_v60 = vrot.slane %v9233_v35, %v12243_v63  ;;  %v2184_v23 = vrot.slane %v9241_v50, %v12241_v59 }
 0x2b6   :  { %v2188_v5 = vrot.slane %v9241_v50, %v12242_v36  ;;  %v2192_v3 = vrot.slane %v9241_v50, %v12230_v9 }
 0x2b8   :  { %v1741_v7 = vpop.f32.mrb[20].mxu0 }
 0x2b9   :  { %v1826_v40 = vpop.f32.mrb[20].mxu1  ;;  %v1935_v58 = vadd.f32 %v1918_v6, %v1741_v7  ;;  %v1743_v32 = vpop.f32.mrb[21].mxu0  ;;  %v9293_v7 = vrot.slane %v2099_v20, %v12245_v0  ;;  %v2232_v20 = vrot.slane %v9237_v37, %v12241_v59 }
 0x2ba   :  { %v1937_v19 = vadd.f32 %v1926_v4, %v1826_v40  ;;  %v1828_v49 = vpop.f32.mrb[21].mxu1  ;;  %v1936_v24 = vadd.f32 %v1922_v43, %v1743_v32  ;;  %v2204_v40 = vrot.slane %v9215_v61, %v12242_v36 }
 0x2bb   :  { %v1938_v13 = vadd.f32 %v1930_v15, %v1828_v49  ;;  %v5459_v26 = vmul.f32 -1.442695, %v1935_v58  ;;  %v2212_v58 = vrot.slane %v9215_v61, %v12243_v63  ;;  %v9315_v49 = vrot.slane %v2101_v2, %v12245_v0 }
 0x2bc   :  { %v5461_v22 = vmul.f32 -1.442695, %v1937_v19  ;;  %v5460_v31 = vmul.f32 -1.442695, %v1936_v24  ;;  %v1747_v25 = vpop.f32.mrb[22].mxu0  ;;  %v2220_v19 = vrot.slane %v9229_v11, %v12242_v36  ;;  %v2236_v24 = vrot.slane %v9237_v37, %v12242_v36 }
 0x2bd   :  { %v5462_v29 = vmul.f32 -1.442695, %v1938_v13  ;;  %v1832_v57 = vpop.f32.mrb[22].mxu1  ;;  %6049 = vpow2.f32 %v5459_v26  ;;  %v1939_v44 = vadd.f32 %v1918_v6, %v1747_v25  ;;  %v1749_v62 = vpop.f32.mrb[23].mxu0  ;;  %v2196_v6 = vrot.slane %v9241_v50, %v12243_v63 }
 0x2be   :  { %v1941_v38 = vadd.f32 %v1926_v4, %v1832_v57  ;;  %v1834_v28 = vpop.f32.mrb[23].mxu1  ;;  %6051 = vpow2.f32 %v5461_v22  ;;  %v1940_v1 = vadd.f32 %v1922_v43, %v1749_v62  ;;  %v2200_v4 = vrot.slane %v9215_v61, %v12241_v59 }
 0x2bf   :  { %v1942_v17 = vadd.f32 %v1930_v15, %v1834_v28  ;;  %6053 = vpow2.f32 %v5460_v31  ;;  %v5463_v14 = vmul.f32 -1.442695, %v1939_v44  ;;  %v9281_v43 = vrot.slane %v2098_v33, %v12245_v0 }
 0x2c0   :  { %v5465_v56 = vmul.f32 -1.442695, %v1941_v38  ;;  %6055 = vpow2.f32 %v5462_v29  ;;  %v5464_v30 = vmul.f32 -1.442695, %v1940_v1  ;;  %v9287_v15 = vrot.slane %v2100_v8, %v12245_v0 }
 0x2c1   :  { %v5466_v54 = vmul.f32 -1.442695, %v1942_v17  ;;  %6057 = vpow2.f32 %v5463_v14  ;;  %v2208_v33 = vrot.slane %v9215_v61, %v12230_v9  ;;  %v2216_v8 = vrot.slane %v9229_v11, %v12241_v59 }
 0x2c2   :  { %6059 = vpow2.f32 %v5465_v56  ;;  %v9325_v31 = vcombine.high %v9281_v43, %v9281_v43  ;;  %v9329_v29 = vcombine.high %v9287_v15, %v9287_v15  ;;  %v9333_v46 = vcombine.high %v9293_v7, %v9293_v7 }
 0x2c3   :  { %6061 = vpow2.f32 %v5464_v30  ;;  %v12259_v11 = vrot.slane %v9237_v37, %v12230_v9 }
 0x2c4   :  { %6063 = vpow2.f32 %v5466_v54 }
 0x2c7   :  { %v6050_v32 = vpop.eup %6049 }
 0x2c8   :  { %v6052_v22 = vpop.eup %6051  ;;  %v1967_v21 = vadd.f32 1.0, %v6050_v32 }
 0x2c9   :  { %v6054_v2 = vpop.eup %6053  ;;  %v1969_v38 = vadd.f32 1.0, %v6052_v22 }
 0x2ca   :  { %v6056_v62 = vpop.eup %6055  ;;  %6065 = vrcp.f32 %v1967_v21  ;;  %v1968_v17 = vadd.f32 1.0, %v6054_v2 }
 0x2cb   :  { %v6058_v14 = vpop.eup %6057  ;;  %6067 = vrcp.f32 %v1969_v38  ;;  %v1970_v54 = vadd.f32 1.0, %v6056_v62 }
 0x2cc   :  { %v6060_v32 = vpop.eup %6059  ;;  %6069 = vrcp.f32 %v1968_v17  ;;  %v1971_v1 = vadd.f32 1.0, %v6058_v14  ;;  %v9393_v14 = vld [vmem:[%s11740_s5 + $0xb0] sm:$0xff] }
 0x2cd   :  { %v6062_v21 = vpop.eup %6061  ;;  %6071 = vrcp.f32 %v1970_v54  ;;  %v1973_v30 = vadd.f32 1.0, %v6060_v32  ;;  %v9388_v54 = vld [vmem:[%s11740_s5 + $0xe0] sm:$0xff] }
 0x2ce   :  { %v6064_v38 = vpop.eup %6063  ;;  %6073 = vrcp.f32 %v1971_v1  ;;  %v1972_v28 = vadd.f32 1.0, %v6062_v21  ;;  %v9374_v21 = vld [vmem:[%s11739_s4 + $0x1] ss:$0 sm:$0xff] }
 0x2cf   :  { %6075 = vrcp.f32 %v1973_v30  ;;  %v1974_v2 = vadd.f32 1.0, %v6064_v38  ;;  %v9379_v30 = vld [vmem:[%s11740_s5 + $0xa0] sm:$0xff]  ;;  %v9398_v38 = vld [vmem:[%s11740_s5 + $0xf0] sm:$0xff] }
 0x2d0   :  { %6077 = vrcp.f32 %v1972_v28 }
 0x2d1   :  { %6079 = vrcp.f32 %v1974_v2 }
 0x2d6   :  { %v5785_v1 = vpop.f32.mrb[24].mxu0  ;;  %v5829_v17 = vpop.f32.mrb[24].mxu1 }
 0x2d7   :  { %v5786_v28 = vpop.f32.mrb[25].mxu0  ;;  %v5830_v62 = vpop.f32.mrb[25].mxu1 }
 0x2d8   :  { %v5787_v32 = vadd.f32 %v5786_v28, %v5785_v1  ;;  %v5831_v22 = vadd.f32 %v5830_v62, %v5829_v17  ;;  %v6066_v1 = vpop.eup %6065 }
 0x2d9   :  { %v6068_v25 = vpop.eup %6067  ;;  %v9424_v26 = vmul.f32 %v6066_v1, %v2136_v27  ;;  %v9434_v2 = vmul.f32 %v6066_v1, %v2168_v10  ;;  %v9439_v57 = vmul.f32 %v6066_v1, %v2184_v23 }
 0x2da   :  { %v3781_v62 = vadd.f32 %v5787_v32, %v9374_v21  ;;  %v5788_v17 = vpop.f32.mrb[26].mxu0  ;;  %v9429_v32 = vmul.f32 %v6066_v1, %v2152_v16  ;;  %v6070_v44 = vpop.eup %6069  ;;  %v9446_v13 = vmul.f32 %v6068_v25, %v2144_v18  ;;  %v9451_v16 = vmul.f32 %v6068_v25, %v2160_v12 }
 0x2db   :  { %v5789_v56 = vpop.f32.mrb[27].mxu0  ;;  %v6072_v10 = vpop.eup %6071  ;;  %v9456_v23 = vmul.f32 %v6070_v44, %v2140_v34  ;;  %v9466_v18 = vmul.f32 %v6070_v44, %v2172_v39  ;;  %v9471_v12 = vmul.f32 %v6068_v25, %v2176_v53  ;;  %2469 = vst [vmem:[%s11743_s8] sm:$0x7f] %v9424_v26  ;;  %2477 = vst [vmem:[%s11743_s8 + $0x40] sm:$0x7f] %v9434_v2 }
 0x2dc   :  { %v9441_v28 = vadd.f32 %v5831_v22, %v3781_v62  ;;  %v5790_v27 = vadd.f32 %v5789_v56, %v5788_v17  ;;  %v9461_v56 = vmul.f32 %v6070_v44, %v2156_v42  ;;  %2473 = vst [vmem:[%s11743_s8 + $0x20] sm:$0x7f] %v9429_v32  ;;  %2481 = vst [vmem:[%s11743_s8 + $0x60] sm:$0x7f] %v9439_v57  ;;  %v9489_v34 = vpop.eup %6073 }
 0x2dd   :  { %v9498_v53 = vmul.f32 %v6072_v10, %v2148_v48  ;;  %v9503_v22 = vmul.f32 %v6072_v10, %v2164_v41  ;;  %2471 = vst [vmem:[%s11743_s8 + $0x10] sm:$0x7f] %v9446_v13  ;;  %2475 = vst [vmem:[%s11743_s8 + $0x30] sm:$0x7f] %v9451_v16  ;;  %v9513_v62 = vpop.eup %6075  ;;  %v9518_v55 = vmul.f32 %v6072_v10, %v2180_v60 }
 0x2de   :  { %v3884_v42 = vadd.f32 3.0, %v9441_v28  ;;  %v9493_v39 = vadd.f32 %v5790_v27, %v9374_v21  ;;  %v9523_v52 = vmul.f32 %v6070_v44, %v2188_v5  ;;  %v9528_v48 = vmul.f32 %v6068_v25, %v2192_v3  ;;  %2470 = vst [vmem:[%s11743_s8 + $0x8] sm:$0x7f] %v9456_v23  ;;  %2474 = vst [vmem:[%s11743_s8 + $0x28] sm:$0x7f] %v9461_v56  ;;  %v9551_v35 = vpop.eup %6077 }
 0x2df   :  { %v9533_v41 = vmul.f32 %v6072_v10, %v2196_v6  ;;  %2478 = vst [vmem:[%s11743_s8 + $0x48] sm:$0x7f] %v9466_v18  ;;  %2479 = vst [vmem:[%s11743_s8 + $0x50] sm:$0x7f] %v9471_v12  ;;  %v9556_v60 = vmul.f32 %v6066_v1, %v2200_v4  ;;  %v9561_v5 = vmul.f32 %v6070_v44, %v2204_v40  ;;  %v9576_v6 = vpop.eup %6079 }
 0x2e0   :  { %12246 = vst [vmem:[#allocation51_spill] sm:$0xff] %v9523_v52  ;;  %12247 = vst [vmem:[#allocation52_spill] sm:$0xff] %v9528_v48  ;;  %v3888_v50 = vmax.f32 %v3884_v42, 0.0  ;;  %v9566_v3 = vmul.f32 %v6068_v25, %v2208_v33  ;;  %v9581_v4 = vmul.f32 %v6072_v10, %v2212_v58  ;;  %v9586_v40 = vmul.f32 %v6066_v1, %v2216_v8 }
 0x2e1   :  { %12248 = vst [vmem:[#allocation53_spill] sm:$0xff] %v9533_v41  ;;  %12249 = vst [vmem:[#allocation54_spill] sm:$0xff] %v9556_v60  ;;  %v9591_v33 = vmul.f32 %v6070_v44, %v2220_v19  ;;  %v9596_v17 = vmul.f32 %v6068_v25, %v2224_v51  ;;  %v9617_v58 = vmul.f32 %v6072_v10, %v2228_v47 }
 0x2e2   :  { %12250 = vst [vmem:[#allocation10_spill] sm:$0xff] %v9561_v5  ;;  %12251 = vst [vmem:[#allocation12_spill] sm:$0xff] %v9566_v3  ;;  %v3892_v61 = vmin.f32 %v3888_v50, 6.0  ;;  %v9622_v8 = vmul.f32 %v6066_v1, %v2232_v20  ;;  %v9627_v19 = vmul.f32 %v6070_v44, %v2236_v24  ;;  %v9644_v51 = vmul.f32 %v6068_v25, %v12259_v11 }
 0x2e3   :  { %2472 = vst [vmem:[%s11743_s8 + $0x18] sm:$0x7f] %v9498_v53  ;;  %2476 = vst [vmem:[%s11743_s8 + $0x38] sm:$0x7f] %v9503_v22  ;;  %v12261_v47 = vrot.slane %v9237_v37, %v12243_v63  ;;  %v12263_v24 = vrot.slane %v9281_v43, %v12241_v59  ;;  %v12265_v1 = vrot.slane %v9281_v43, %v12242_v36 }
 0x2e4   :  { %12252 = vst [vmem:[#allocation39_spill] sm:$0xff] %v9581_v4  ;;  %12253 = vst [vmem:[#allocation11_spill] sm:$0xff] %v9586_v40  ;;  %v3896_v37 = vmul.f32 0.16666667, %v3892_v61  ;;  %v12267_v25 = vrot.slane %v9281_v43, %v12230_v9  ;;  %v12269_v42 = vrot.slane %v9281_v43, %v12243_v63  ;;  %v12271_v11 = vrot.slane %v9293_v7, %v12241_v59 }
 0x2e5   :  { %12254 = vst [vmem:[#allocation38_spill] sm:$0xff] %v9591_v33  ;;  %12255 = vst [vmem:[#allocation13_spill] sm:$0xff] %v9596_v17  ;;  %v9649_v20 = vmul.f32 %v6072_v10, %v12261_v47  ;;  %v9655_v44 = vmul.f32 %v9489_v34, %v12263_v24  ;;  %v9661_v27 = vmul.f32 %v9551_v35, %v12265_v1 }
 0x2e6   :  { %2480 = vst [vmem:[%s11743_s8 + $0x58] sm:$0x7f] %v9518_v55  ;;  %2482 = vst [vmem:[%s11743_s8 + $0x68] sm:$0x7f] %v9523_v52  ;;  %v9683_v10 = vmul.f32 %v9513_v62, %v12267_v25  ;;  %v9689_v50 = vmul.f32 %v9576_v6, %v12269_v42  ;;  %v9695_v47 = vmul.f32 %v9489_v34, %v12271_v11 }
 0x2e7   :  { %2483 = vst [vmem:[%s11743_s8 + $0x70] sm:$0x7f] %v9528_v48  ;;  %2484 = vst [vmem:[%s11743_s8 + $0x78] sm:$0x7f] %v9533_v41  ;;  %v12273_v43 = vrot.slane %v9293_v7, %v12242_v36  ;;  %v12275_v24 = vrot.slane %v9293_v7, %v12230_v9  ;;  %v12277_v25 = vrot.slane %v9293_v7, %v12243_v63 }
 0x2e8   :  { %12256 = vst [vmem:[#allocation40_spill] sm:$0xff] %v9617_v58  ;;  %12257 = vst [vmem:[#allocation14_spill] sm:$0xff] %v9622_v8  ;;  %v12279_v11 = vrot.slane %v9325_v31, %v12241_v59  ;;  %v9750_v7 = vmul.f32 %v3896_v37, %v9441_v28  ;;  %v5832_v28 = vpop.f32.mrb[26].mxu1  ;;  %v12289_v37 = vrot.slane %v9333_v46, %v12242_v36 }
 0x2e9   :  { %12258 = vst [vmem:[#allocation41_spill] sm:$0xff] %v9627_v19  ;;  %2485 = vst [vmem:[%s11743_s8 + $0x80] sm:$0x7f] %v9556_v60  ;;  %v9713_v61 = vmul.f32 %v9551_v35, %v12273_v43  ;;  %v9719_v1 = vmul.f32 %v9513_v62, %v12275_v24  ;;  %v9725_v42 = vmul.f32 %v9576_v6, %v12277_v25 }
 0x2ea   :  { %2486 = vst [vmem:[%s11743_s8 + $0x88] sm:$0x7f] %v9561_v5  ;;  %2487 = vst [vmem:[%s11743_s8 + $0x90] sm:$0x7f] %v9566_v3  ;;  %v12281_v43 = vrot.slane %v9325_v31, %v12242_v36  ;;  %v12283_v25 = vrot.slane %v9325_v31, %v12230_v9  ;;  %5576 = vmatmul.mubr.msk.f32.vlgmr.msra.gmra.mrb[32].mxu0 %vm1484_vm7, %v9750_v7  ;;  %5580 = vmatmul.mubr.msk.f32.vlgmr.msra.gmra.mrb[32].mxu1 %vm1484_vm7, %v9750_v7 }
 0x2eb   :  { %12260 = vst [vmem:[#allocation18_spill] sm:$0xff] %v9644_v51  ;;  %12262 = vst [vmem:[#allocation17_spill] sm:$0xff] %v9649_v20  ;;  %4003 = vmatprep.mubr.f32.mxu0 %v12244_v45  ;;  %4088 = vmatprep.mubr.f32.mxu1 %v12244_v45 }
 0x2ec   :  { %12264 = vst [vmem:[#allocation33_spill] sm:$0xff] %v9655_v44  ;;  %12266 = vst [vmem:[#allocation16_spill] sm:$0xff] %v9661_v27  ;;  %v9756_v24 = vmul.f32 %v9551_v35, %v12281_v43  ;;  %v9792_v43 = vmul.f32 %v9551_v35, %v12289_v37  ;;  %v12297_v37 = vrot.slane %v9287_v15, %v12242_v36 }
 0x2ed   :  { %2488 = vst [vmem:[%s11743_s8 + $0x98] sm:$0x7f] %v9581_v4  ;;  %2489 = vst [vmem:[%s11743_s8 + $0xa0] sm:$0x7f] %v9586_v40 }
 0x2ee   :  { %2490 = vst [vmem:[%s11743_s8 + $0xa8] sm:$0x7f] %v9591_v33  ;;  %2491 = vst [vmem:[%s11743_s8 + $0xb0] sm:$0x7f] %v9596_v17 }
 0x2ef   :  { %12268 = vst [vmem:[#allocation15_spill] sm:$0xff] %v9683_v10  ;;  %12270 = vst [vmem:[#allocation20_spill] sm:$0xff] %v9689_v50 }
 0x2f0   :  { %12272 = vst [vmem:[#allocation19_spill] sm:$0xff] %v9695_v47  ;;  %2492 = vst [vmem:[%s11743_s8 + $0xb8] sm:$0x7f] %v9617_v58 }
 0x2f1   :  { %2493 = vst [vmem:[%s11743_s8 + $0xc0] sm:$0x7f] %v9622_v8  ;;  %2494 = vst [vmem:[%s11743_s8 + $0xc8] sm:$0x7f] %v9627_v19  ;;  %v9731_v19 = vmul.f32 %v9489_v34, %v12279_v11  ;;  %v9762_v11 = vmul.f32 %v9513_v62, %v12283_v25  ;;  %v12291_v25 = vrot.slane %v9333_v46, %v12230_v9 }
 0x2f2   :  { %12274 = vst [vmem:[#allocation22_spill] sm:$0xff] %v9713_v61  ;;  %12276 = vst [vmem:[#allocation21_spill] sm:$0xff] %v9719_v1 }
 0x2f3   :  { %12278 = vst [vmem:[#allocation24_spill] sm:$0xff] %v9725_v42  ;;  %12280 = vst [vmem:[#allocation27_spill] sm:$0xff] %v9731_v19 }
 0x2f4   :  { %2495 = vst [vmem:[%s11743_s8 + $0xd0] sm:$0x7f] %v9644_v51  ;;  %2496 = vst [vmem:[%s11743_s8 + $0xd8] sm:$0x7f] %v9649_v20 }
 0x2f5   :  { %2497 = vst [vmem:[%s11743_s8 + $0x1c0] sm:$0x7f] %v9655_v44  ;;  %2498 = vst [vmem:[%s11743_s8 + $0x1c8] sm:$0x7f] %v9661_v27  ;;  %v12285_v44 = vrot.slane %v9325_v31, %v12243_v63  ;;  %v12287_v31 = vrot.slane %v9333_v46, %v12241_v59 }
 0x2f6   :  { %12282 = vst [vmem:[#allocation25_spill] sm:$0xff] %v9756_v24  ;;  %12284 = vst [vmem:[#allocation49_spill] sm:$0xff] %v9762_v11 }
 0x2f7   :  { %v9768_v27 = vmul.f32 %v9576_v6, %v12285_v44  ;;  %2499 = vst [vmem:[%s11743_s8 + $0x1d0] sm:$0x7f] %v9683_v10  ;;  %2500 = vst [vmem:[%s11743_s8 + $0x1d8] sm:$0x7f] %v9689_v50  ;;  %v9786_v44 = vmul.f32 %v9489_v34, %v12287_v31  ;;  %v9798_v50 = vmul.f32 %v9513_v62, %v12291_v25 }
 0x2f8   :  { %2501 = vst [vmem:[%s11743_s8 + $0x1e0] sm:$0x7f] %v9695_v47  ;;  %12290 = vst [vmem:[#allocation29_spill] sm:$0xff] %v9792_v43  ;;  %v12293_v47 = vrot.slane %v9333_v46, %v12243_v63  ;;  %v5833_v46 = vpop.f32.mrb[27].mxu1  ;;  %v9836_v25 = vmul.f32 %v9551_v35, %v12297_v37  ;;  %v12302_v37 = vpack.c.bf16 %v9398_v38, %v9393_v14 }
 0x2f9   :  { %12286 = vst [vmem:[#allocation26_spill] sm:$0xff] %v9768_v27  ;;  %12288 = vst [vmem:[#allocation28_spill] sm:$0xff] %v9786_v44  ;;  %v12311_v38 = vrot.slane %v9315_v49, %v12243_v63 }
 0x2fa   :  { %12292 = vst [vmem:[#allocation31_spill] sm:$0xff] %v9798_v50  ;;  %v9804_v10 = vmul.f32 %v9576_v6, %v12293_v47  ;;  %2502 = vst [vmem:[%s11743_s8 + $0x1e8] sm:$0x7f] %v9713_v61  ;;  %v12295_v47 = vrot.slane %v9287_v15, %v12241_v59  ;;  %6000 = vmatpush1.bf16.msra.mxu1 %v12302_v37  ;;  %v12317_v37 = vrot.slane %v9329_v29, %v12230_v9 }
 0x2fb   :  { %2503 = vst [vmem:[%s11743_s8 + $0x1f0] sm:$0x7f] %v9719_v1  ;;  %2504 = vst [vmem:[%s11743_s8 + $0x1f8] sm:$0x7f] %v9725_v42 }
 0x2fc   :  { %12294 = vst [vmem:[#allocation57_spill] sm:$0xff] %v9804_v10  ;;  %2505 = vst [vmem:[%s11743_s8 + $0x200] sm:$0x7f] %v9731_v19  ;;  %v9830_v31 = vmul.f32 %v9489_v34, %v12295_v47  ;;  %v12299_v19 = vrot.slane %v9287_v15, %v12230_v9  ;;  %v5834_v47 = vadd.f32 %v5833_v46, %v5832_v28 }
 0x2fd   :  { %12298 = vst [vmem:[#allocation55_spill] sm:$0xff] %v9836_v25  ;;  %2506 = vst [vmem:[%s11743_s8 + $0x208] sm:$0x7f] %v9756_v24  ;;  %v12303_v24 = vrot.slane %v9287_v15, %v12243_v63  ;;  %v12307_v15 = vrot.slane %v9315_v49, %v12242_v36  ;;  %v12315_v46 = vrot.slane %v9329_v29, %v12242_v36 }
 0x2fe   :  { %12296 = vst [vmem:[#allocation56_spill] sm:$0xff] %v9830_v31  ;;  %v9842_v42 = vmul.f32 %v9513_v62, %v12299_v19  ;;  %2507 = vst [vmem:[%s11743_s8 + $0x210] sm:$0x7f] %v9762_v11  ;;  %v12301_v19 = vpack.c.bf16 %v9388_v54, %v9379_v30  ;;  %v12305_v11 = vrot.slane %v9315_v49, %v12241_v59 }
 0x2ff   :  { %2508 = vst [vmem:[%s11743_s8 + $0x218] sm:$0x7f] %v9768_v27  ;;  %v9866_v1 = vmul.f32 %v9576_v6, %v12303_v24  ;;  %2509 = vst [vmem:[%s11743_s8 + $0x220] sm:$0x7f] %v9786_v44  ;;  %v9896_v14 = vmul.f32 %v9551_v35, %v12307_v15  ;;  %v12309_v54 = vrot.slane %v9315_v49, %v12230_v9 }
 0x300   :  { %12300 = vst [vmem:[#allocation30_spill] sm:$0xff] %v9842_v42  ;;  %5996 = vmatpush1.bf16.msra.mxu0 %v12301_v19  ;;  %v9872_v27 = vmul.f32 %v9489_v34, %v12305_v11  ;;  %2510 = vst [vmem:[%s11743_s8 + $0x228] sm:$0x7f] %v9792_v43  ;;  %v9908_v24 = vmul.f32 %v9576_v6, %v12311_v38  ;;  %v3871_v49 = vadd.f32 %v5834_v47, %v9493_v39 }
 0x301   :  { %12304 = vst [vmem:[#allocation59_spill] sm:$0xff] %v9866_v1  ;;  %2511 = vst [vmem:[%s11743_s8 + $0x230] sm:$0x7f] %v9798_v50  ;;  %v9902_v30 = vmul.f32 %v9513_v62, %v12309_v54  ;;  %v12313_v11 = vrot.slane %v9329_v29, %v12241_v59  ;;  %v9933_v19 = vmul.f32 %v9551_v35, %v12315_v46  ;;  %v5791_v54 = vpop.f32.mrb[28].mxu0 }
 0x302   :  { %12306 = vst [vmem:[#allocation58_spill] sm:$0xff] %v9872_v27  ;;  %2512 = vst [vmem:[%s11743_s8 + $0x238] sm:$0x7f] %v9804_v10  ;;  %v9939_v15 = vmul.f32 %v9513_v62, %v12317_v37  ;;  %v3885_v62 = vadd.f32 3.0, %v3871_v49  ;;  %v5792_v38 = vpop.f32.mrb[29].mxu0 }
 0x303   :  { %12308 = vst [vmem:[#allocation60_spill] sm:$0xff] %v9896_v14  ;;  %12310 = vst [vmem:[#allocation32_spill] sm:$0xff] %v9902_v30  ;;  %v9927_v28 = vmul.f32 %v9489_v34, %v12313_v11  ;;  %v12319_v34 = vrot.slane %v9329_v29, %v12243_v63  ;;  %v5793_v11 = vadd.f32 %v5792_v38, %v5791_v54 }
 0x304   :  { %12312 = vst [vmem:[#allocation64_spill] sm:$0xff] %v9908_v24  ;;  %2513 = vst [vmem:[%s11743_s8 + $0x240] sm:$0x7f] %v9830_v31  ;;  %v3889_v29 = vmax.f32 %v3885_v62, 0.0 }
 0x305   :  { %2514 = vst [vmem:[%s11743_s8 + $0x248] sm:$0x7f] %v9836_v25  ;;  %2515 = vst [vmem:[%s11743_s8 + $0x250] sm:$0x7f] %v9842_v42  ;;  %v9953_v39 = vmul.f32 %v9576_v6, %v12319_v34  ;;  %v3791_v46 = vadd.f32 %v5793_v11, %v9374_v21 }
 0x306   :  { %12314 = vst [vmem:[#allocation63_spill] sm:$0xff] %v9927_v28  ;;  %12316 = vst [vmem:[#allocation62_spill] sm:$0xff] %v9933_v19  ;;  %v3893_v35 = vmin.f32 %v3889_v29, 6.0 }
 0x307   :  { %12318 = vst [vmem:[#allocation61_spill] sm:$0xff] %v9939_v15  ;;  %2516 = vst [vmem:[%s11743_s8 + $0x258] sm:$0x7f] %v9866_v1 }
 0x308   :  { %2517 = vst [vmem:[%s11743_s8 + $0x260] sm:$0x7f] %v9872_v27  ;;  %12320 = vst [vmem:[#allocation66_spill] sm:$0xff] %v9953_v39  ;;  %v3897_v6 = vmul.f32 0.16666667, %v3893_v35 }
 0x309   :  { %2518 = vst [vmem:[%s11743_s8 + $0x268] sm:$0x7f] %v9896_v14  ;;  %2519 = vst [vmem:[%s11743_s8 + $0x270] sm:$0x7f] %v9902_v30 }
 0x30a   :  { %2520 = vst [vmem:[%s11743_s8 + $0x278] sm:$0x7f] %v9908_v24  ;;  %2521 = vst [vmem:[%s11743_s8 + $0x280] sm:$0x7f] %v9927_v28  ;;  %v3901_v47 = vmul.f32 %v3897_v6, %v3871_v49  ;;  %v5835_v37 = vpop.f32.mrb[28].mxu1 }
 0x30b   :  { %2522 = vst [vmem:[%s11743_s8 + $0x288] sm:$0x7f] %v9933_v19  ;;  %2523 = vst [vmem:[%s11743_s8 + $0x290] sm:$0x7f] %v9939_v15  ;;  %v5836_v34 = vpop.f32.mrb[29].mxu1 }
 0x30c   :  { %2524 = vst [vmem:[%s11743_s8 + $0x298] sm:$0x7f] %v9953_v39  ;;  %5577 = vmatmul.mubr.msk.f32.gmra.mrb[34].mxu0 %vm1484_vm7, %v3901_v47  ;;  %5581 = vmatmul.mubr.msk.f32.gmra.mrb[34].mxu1 %vm1484_vm7, %v3901_v47  ;;  %v5837_v39 = vadd.f32 %v5836_v34, %v5835_v37 }
 0x30d   :  { %4009 = vmatprep.mubr.f32.mxu0 %v12244_v45  ;;  %4094 = vmatprep.mubr.f32.mxu1 %v12244_v45 }
 0x30e   :  { %v3876_v62 = vadd.f32 %v5837_v39, %v3791_v46 }
 0x310   :  { %v3886_v29 = vadd.f32 3.0, %v3876_v62 }
 0x312   :  { %v3890_v35 = vmax.f32 %v3886_v29, 0.0 }
 0x314   :  { %v3894_v49 = vmin.f32 %v3890_v35, 6.0 }
 0x315   :  { %v5794_v6 = vpop.f32.mrb[30].mxu0 }
 0x316   :  { %v5795_v15 = vpop.f32.mrb[31].mxu0  ;;  %v3898_v19 = vmul.f32 0.16666667, %v3894_v49 }
 0x317   :  { %v5796_v28 = vadd.f32 %v5795_v15, %v5794_v6 }
 0x318   :  { %v3902_v24 = vmul.f32 %v3898_v19, %v3876_v62 }
 0x319   :  { %v3796_v30 = vadd.f32 %v5796_v28, %v9374_v21  ;;  %v5477_v21 = vld [vmem:[%s11737_s2 + $0x5] ss:$8 sm:$0xf] }
 0x31a   :  { %5578 = vmatmul.mubr.msk.f32.gmra.mrb[36].mxu0 %vm1484_vm7, %v3902_v24  ;;  %5582 = vmatmul.mubr.msk.f32.gmra.mrb[36].mxu1 %vm1484_vm7, %v3902_v24  ;;  %v4281_v28 = vrot.slane %v5477_v21, %v12242_v36 }
 0x31b   :  { %4013 = vmatprep.mubr.f32.mxu0 %v12244_v45  ;;  %4098 = vmatprep.mubr.f32.mxu1 %v12244_v45 }
 0x31f   :  { %v5838_v54 = vpop.f32.mrb[30].mxu1 }
 0x320   :  { %v5839_v39 = vpop.f32.mrb[31].mxu1 }
 0x321   :  { %v5840_v38 = vadd.f32 %v5839_v39, %v5838_v54 }
 0x323   :  { %v3881_v11 = vadd.f32 %v5840_v38, %v3796_v30  ;;  %v4285_v30 = vrot.slane %v5477_v21, %v12230_v9 }
 0x325   :  { %v3887_v46 = vadd.f32 3.0, %v3881_v11 }
 0x327   :  { %v3891_v37 = vmax.f32 %v3887_v46, 0.0 }
 0x329   :  { %v3895_v34 = vmin.f32 %v3891_v37, 6.0 }
 0x32b   :  { %v3899_v29 = vmul.f32 0.16666667, %v3895_v34 }
 0x32d   :  { %v3903_v15 = vmul.f32 %v3899_v29, %v3881_v11 }
 0x32f   :  { %5579 = vmatmul.mubr.msk.f32.gmra.mrb[38].mxu0 %vm1484_vm7, %v3903_v15  ;;  %5583 = vmatmul.mubr.msk.f32.gmra.mrb[38].mxu1 %vm1484_vm7, %v3903_v15 }
 0x330   :  { %4167 = vmatprep.mubr.f32.mxu0 %v12244_v45  ;;  %4252 = vmatprep.mubr.f32.mxu1 %v12244_v45 }
 0x333   :  { %5584 = vmatmul.mubr.msk.f32.vlgmr.msra.gmra.mrb[40].mxu0 %vm1484_vm7, %v9750_v7  ;;  %5588 = vmatmul.mubr.msk.f32.vlgmr.msra.gmra.mrb[40].mxu1 %vm1484_vm7, %v9750_v7  ;;  %v4277_v7 = vrot.slane %v5477_v21, %v12241_v59 }
 0x334   :  { %4171 = vmatprep.mubr.f32.mxu0 %v12244_v45  ;;  %4256 = vmatprep.mubr.f32.mxu1 %v12244_v45 }
 0x337   :  { %5585 = vmatmul.mubr.msk.f32.gmra.mrb[42].mxu0 %vm1484_vm7, %v3901_v47  ;;  %5589 = vmatmul.mubr.msk.f32.gmra.mrb[42].mxu1 %vm1484_vm7, %v3901_v47 }
 0x338   :  { %4175 = vmatprep.mubr.f32.mxu0 %v12244_v45  ;;  %4260 = vmatprep.mubr.f32.mxu1 %v12244_v45 }
 0x33b   :  { %5586 = vmatmul.mubr.msk.f32.gmra.mrb[44].mxu0 %vm1484_vm7, %v3902_v24  ;;  %5590 = vmatmul.mubr.msk.f32.gmra.mrb[44].mxu1 %vm1484_vm7, %v3902_v24  ;;  %v4289_v24 = vrot.slane %v5477_v21, %v12243_v63 }
 0x33c   :  { %4181 = vmatprep.mubr.f32.mxu0 %v12244_v45  ;;  %4266 = vmatprep.mubr.f32.mxu1 %v12244_v45 }
 0x33f   :  { %5587 = vmatmul.mubr.msk.f32.gmra.mrb[46].mxu0 %vm1484_vm7, %v3903_v15  ;;  %5591 = vmatmul.mubr.msk.f32.gmra.mrb[46].mxu1 %vm1484_vm7, %v3903_v15 }
 0x3bd   :  { %v3999_v19 = vpop.f32.mrb[32].mxu0  ;;  %v4084_v47 = vpop.f32.mrb[32].mxu1 }
 0x3be   :  { %v4294_v62 = vadd.f32 %v4277_v7, %v3999_v19  ;;  %v4296_v45 = vadd.f32 %v4285_v30, %v4084_v47  ;;  %v4001_v35 = vpop.f32.mrb[33].mxu0  ;;  %v4086_v49 = vpop.f32.mrb[33].mxu1 }
 0x3bf   :  { %v4295_v6 = vadd.f32 %v4281_v28, %v4001_v35  ;;  %v4297_v54 = vadd.f32 %v4289_v24, %v4086_v49 }
 0x3c0   :  { %v5592_v39 = vmul.f32 -1.442695, %v4294_v62  ;;  %v5594_v38 = vmul.f32 -1.442695, %v4296_v45 }
 0x3c1   :  { %v5593_v11 = vmul.f32 -1.442695, %v4295_v6  ;;  %v5595_v46 = vmul.f32 -1.442695, %v4297_v54 }
 0x3c2   :  { %6081 = vpow2.f32 %v5592_v39 }
 0x3c3   :  { %6083 = vpow2.f32 %v5594_v38 }
 0x3c4   :  { %6085 = vpow2.f32 %v5593_v11 }
 0x3c5   :  { %6087 = vpow2.f32 %v5595_v46 }
 0x3cc   :  { %v6082_v37 = vpop.eup %6081 }
 0x3cd   :  { %v6084_v15 = vpop.eup %6083  ;;  %v4326_v21 = vadd.f32 1.0, %v6082_v37 }
 0x3ce   :  { %v6086_v27 = vpop.eup %6085  ;;  %v4328_v1 = vadd.f32 1.0, %v6084_v15 }
 0x3cf   :  { %v6088_v49 = vpop.eup %6087  ;;  %6089 = vrcp.f32 %v4326_v21  ;;  %v4327_v62 = vadd.f32 1.0, %v6086_v27 }
 0x3d0   :  { %6091 = vrcp.f32 %v4328_v1  ;;  %v4329_v6 = vadd.f32 1.0, %v6088_v49 }
 0x3d1   :  { %6093 = vrcp.f32 %v4327_v62 }
 0x3d2   :  { %6095 = vrcp.f32 %v4329_v6 }
 0x3d9   :  { %v6090_v46 = vpop.eup %6089 }
 0x3da   :  { %v6092_v37 = vpop.eup %6091 }
 0x3df   :  { %v4005_v34 = vpop.f32.mrb[34].mxu0  ;;  %v4090_v29 = vpop.f32.mrb[34].mxu1 }
 0x3e0   :  { %v4298_v14 = vadd.f32 %v4277_v7, %v4005_v34  ;;  %v4007_v19 = vpop.f32.mrb[35].mxu0  ;;  %v4092_v47 = vpop.f32.mrb[35].mxu1  ;;  %v4300_v54 = vadd.f32 %v4285_v30, %v4090_v29 }
 0x3e1   :  { %v4299_v35 = vadd.f32 %v4281_v28, %v4007_v19  ;;  %v4301_v38 = vadd.f32 %v4289_v24, %v4092_v47  ;;  %v6094_v28 = vpop.eup %6093 }
 0x3e2   :  { %v5596_v45 = vmul.f32 -1.442695, %v4298_v14  ;;  %v5598_v11 = vmul.f32 -1.442695, %v4300_v54  ;;  %v6096_v34 = vpop.eup %6095  ;;  %v4435_v15 = vcombine.low %v6090_v46, %v6094_v28  ;;  %v4436_v27 = vcombine.high %v6090_v46, %v6094_v28 }
 0x3e3   :  { %v5597_v39 = vmul.f32 -1.442695, %v4299_v35  ;;  %v5599_v7 = vmul.f32 -1.442695, %v4301_v38  ;;  %v4437_v1 = vcombine.low %v6092_v37, %v6096_v34  ;;  %v4438_v21 = vcombine.high %v6092_v37, %v6096_v34 }
 0x3e4   :  { %6097 = vpow2.f32 %v5596_v45  ;;  %v4445_v30 = vrot.slane %v4435_v15, %v12245_v0  ;;  %v4452_v29 = vrot.slane %v4436_v27, %v12245_v0 }
 0x3e5   :  { %6099 = vpow2.f32 %v5597_v39  ;;  %v4459_v47 = vrot.slane %v4437_v1, %v12245_v0  ;;  %v4466_v35 = vrot.slane %v4438_v21, %v12245_v0 }
 0x3e6   :  { %6101 = vpow2.f32 %v5598_v11 }
 0x3e7   :  { %6103 = vpow2.f32 %v5599_v7  ;;  %v4467_v62 = vcombine.low %v4445_v30, %v4459_v47  ;;  %v4468_v45 = vcombine.high %v4445_v30, %v4459_v47  ;;  %v4469_v6 = vcombine.low %v4452_v29, %v4466_v35 }
 0x3e8   :  { %v4470_v54 = vcombine.high %v4452_v29, %v4466_v35 }
 0x3ed   :  { %v4011_v15 = vpop.f32.mrb[36].mxu0  ;;  %v4096_v27 = vpop.f32.mrb[36].mxu1 }
 0x3ee   :  { %v6098_v14 = vpop.eup %6097  ;;  %v4097_v1 = vpop.f32.mrb[37].mxu1 }
 0x3ef   :  { %v4330_v24 = vadd.f32 1.0, %v6098_v14  ;;  %v6100_v19 = vpop.eup %6099  ;;  %v4012_v14 = vpop.f32.mrb[37].mxu0 }
 0x3f0   :  { %v4331_v49 = vadd.f32 1.0, %v6100_v19  ;;  %v6102_v39 = vpop.eup %6101 }
 0x3f1   :  { %6105 = vrcp.f32 %v4330_v24  ;;  %v6104_v38 = vpop.eup %6103  ;;  %v4332_v11 = vadd.f32 1.0, %v6102_v39 }
 0x3f2   :  { %6107 = vrcp.f32 %v4331_v49  ;;  %v4333_v7 = vadd.f32 1.0, %v6104_v38 }
 0x3f3   :  { %6109 = vrcp.f32 %v4332_v11 }
 0x3f4   :  { %6111 = vrcp.f32 %v4333_v7 }
 0x3fb   :  { %v6106_v46 = vpop.eup %6105 }
 0x3fc   :  { %v6108_v37 = vpop.eup %6107 }
 0x3fd   :  { %v4502_v28 = vcombine.low %v6106_v46, %v6108_v37  ;;  %v4503_v34 = vcombine.high %v6106_v46, %v6108_v37  ;;  %v6110_v21 = vpop.eup %6109 }
 0x3fe   :  { %v6112_v30 = vpop.eup %6111 }
 0x3ff   :  { %v10025_v29 = vrot.slane %v4502_v28, %v12245_v0  ;;  %v10028_v24 = vrot.slane %v4503_v34, %v12245_v0  ;;  %v4504_v19 = vcombine.low %v6110_v21, %v6112_v30  ;;  %v4505_v47 = vcombine.high %v6110_v21, %v6112_v30  ;;  %v5478_v21 = vld [vmem:[%s11737_s2 + $0x7] ss:$8 sm:$0xf] }
 0x400   :  { %v4354_v11 = vrot.slane %v5478_v21, %v12241_v59  ;;  %v4362_v7 = vrot.slane %v5478_v21, %v12230_v9 }
 0x401   :  { %v10031_v35 = vrot.slane %v4504_v19, %v12245_v0  ;;  %v10034_v49 = vrot.slane %v4505_v47, %v12245_v0 }
 0x402   :  { %v4015_v46 = vpop.f32.mrb[38].mxu0  ;;  %v4100_v37 = vpop.f32.mrb[38].mxu1 }
 0x403   :  { %v4016_v28 = vpop.f32.mrb[39].mxu0  ;;  %v4101_v34 = vpop.f32.mrb[39].mxu1  ;;  %v10050_v46 = vrot.slane %v4467_v62, %v12245_v0  ;;  %v10053_v37 = vrot.slane %v4469_v6, %v12245_v0 }
 0x404   :  { %v4358_v28 = vrot.slane %v5478_v21, %v12242_v36  ;;  %v4366_v34 = vrot.slane %v5478_v21, %v12243_v63 }
 0x405   :  { %v10065_v6 = vcombine.high %v10050_v46, %v10050_v46 }
 0x406   :  { %v4169_v15 = vpop.f32.mrb[40].mxu0  ;;  %v4254_v27 = vpop.f32.mrb[40].mxu1 }
 0x407   :  { %v4170_v14 = vpop.f32.mrb[41].mxu0  ;;  %v4255_v1 = vpop.f32.mrb[41].mxu1  ;;  %v10058_v15 = vrot.slane %v4468_v45, %v12245_v0  ;;  %v12337_v17 = vrot.slane %v10065_v6, %v12243_v63 }
 0x409   :  { %v10073_v39 = vcombine.high %v10058_v15, %v10058_v15 }
 0x40a   :  { %v4173_v30 = vpop.f32.mrb[42].mxu0  ;;  %v4258_v19 = vpop.f32.mrb[42].mxu1 }
 0x40b   :  { %v4174_v47 = vpop.f32.mrb[43].mxu0  ;;  %v4259_v38 = vpop.f32.mrb[43].mxu1  ;;  %v12338_v40 = vrot.slane %v10073_v39, %v12243_v63 }
 0x40c   :  { %v10061_v38 = vrot.slane %v4470_v54, %v12245_v0  ;;  %v10069_v47 = vcombine.high %v10053_v37, %v10053_v37 }
 0x40e   :  { %v4177_v27 = vpop.f32.mrb[44].mxu0  ;;  %v4262_v14 = vpop.f32.mrb[44].mxu1  ;;  %v12352_v5 = vrot.slane %v10061_v38, %v12230_v9  ;;  %v12354_v41 = vrot.slane %v10061_v38, %v12243_v63 }
 0x40f   :  { %v4371_v1 = vadd.f32 %v4354_v11, %v4177_v27  ;;  %v4373_v30 = vadd.f32 %v4362_v7, %v4262_v14  ;;  %v4179_v19 = vpop.f32.mrb[45].mxu0  ;;  %v4264_v62 = vpop.f32.mrb[45].mxu1 }
 0x410   :  { %v4372_v21 = vadd.f32 %v4358_v28, %v4179_v19  ;;  %v4374_v45 = vadd.f32 %v4366_v34, %v4264_v62  ;;  %v4596_v62 = vrot.slane %v10058_v15, %v12230_v9 }
 0x411   :  { %v5600_v27 = vmul.f32 -1.442695, %v4371_v1  ;;  %v5602_v14 = vmul.f32 -1.442695, %v4373_v30  ;;  %v4588_v1 = vrot.slane %v10058_v15, %v12241_v59 }
 0x412   :  { %v5601_v31 = vmul.f32 -1.442695, %v4372_v21  ;;  %v5603_v10 = vmul.f32 -1.442695, %v4374_v45  ;;  %v4183_v50 = vpop.f32.mrb[46].mxu0  ;;  %v4268_v19 = vpop.f32.mrb[46].mxu1 }
 0x413   :  { %6113 = vpow2.f32 %v5600_v27  ;;  %v4375_v43 = vadd.f32 %v4354_v11, %v4183_v50  ;;  %v4377_v44 = vadd.f32 %v4362_v7, %v4268_v19  ;;  %v4185_v61 = vpop.f32.mrb[47].mxu0  ;;  %v4270_v54 = vpop.f32.mrb[47].mxu1  ;;  %v4604_v27 = vrot.slane %v10065_v6, %v12241_v59 }
 0x414   :  { %6115 = vpow2.f32 %v5602_v14  ;;  %v4376_v30 = vadd.f32 %v4358_v28, %v4185_v61  ;;  %v4378_v42 = vadd.f32 %v4366_v34, %v4270_v54  ;;  %v12321_v54 = vcombine.low %v10025_v29, %v10031_v35 }
 0x415   :  { %6117 = vpow2.f32 %v5601_v31  ;;  %v5604_v45 = vmul.f32 -1.442695, %v4375_v43  ;;  %v5606_v25 = vmul.f32 -1.442695, %v4377_v44  ;;  %v4612_v43 = vrot.slane %v10065_v6, %v12230_v9 }
 0x416   :  { %6119 = vpow2.f32 %v5603_v10  ;;  %v5605_v50 = vmul.f32 -1.442695, %v4376_v30  ;;  %v5607_v11 = vmul.f32 -1.442695, %v4378_v42  ;;  %v4620_v10 = vrot.slane %v10073_v39, %v12241_v59 }
 0x417   :  { %6121 = vpow2.f32 %v5604_v45  ;;  %v10113_v14 = vrot.slane %v12321_v54, %v12245_v0  ;;  %v12323_v54 = vcombine.high %v10025_v29, %v10031_v35  ;;  %v12324_v30 = vcombine.high %v10028_v24, %v10034_v49 }
 0x418   :  { %6123 = vpow2.f32 %v5606_v25  ;;  %v12322_v25 = vcombine.low %v10028_v24, %v10034_v49 }
 0x419   :  { %6125 = vpow2.f32 %v5605_v50  ;;  %v10131_v34 = vrot.slane %v12323_v54, %v12245_v0  ;;  %v10157_v45 = vcombine.high %v10113_v14, %v10113_v14 }
 0x41a   :  { %v10119_v19 = vrot.slane %v12322_v25, %v12245_v0  ;;  %6127 = vpow2.f32 %v5607_v11  ;;  %v10153_v25 = vrot.slane %v12324_v30, %v12245_v0 }
 0x41b   :  { %v10165_v54 = vcombine.high %v10131_v34, %v10131_v34 }
 0x41c   :  { %v10161_v29 = vcombine.high %v10119_v19, %v10119_v19 }
 0x41d   :  { %v6114_v28 = vpop.eup %6113 }
 0x41e   :  { %v6116_v11 = vpop.eup %6115  ;;  %v4403_v50 = vadd.f32 1.0, %v6114_v28 }
 0x41f   :  { %v6118_v35 = vpop.eup %6117  ;;  %v4405_v24 = vadd.f32 1.0, %v6116_v11 }
 0x420   :  { %v6120_v49 = vpop.eup %6119  ;;  %6129 = vrcp.f32 %v4403_v50  ;;  %v4404_v28 = vadd.f32 1.0, %v6118_v35 }
 0x421   :  { %v6122_v42 = vpop.eup %6121  ;;  %6131 = vrcp.f32 %v4405_v24  ;;  %v4406_v21 = vadd.f32 1.0, %v6120_v49  ;;  %v6320_v24 = vmov 1983009808  }
 0x422   :  { %v6124_v0 = vpop.eup %6123  ;;  %6133 = vrcp.f32 %v4404_v28  ;;  %v4407_v7 = vadd.f32 1.0, %v6122_v42  ;;  %v10197_v35 = vunpack.c.l.s4 %v6320_v24 }
 0x423   :  { %v6126_v50 = vpop.eup %6125  ;;  %6135 = vrcp.f32 %v4406_v21  ;;  %v4409_v61 = vadd.f32 1.0, %v6124_v0  ;;  %v12326_v0 = vrot.slane %v10050_v46, %v12241_v59 }
 0x424   :  { %v6128_v31 = vpop.eup %6127  ;;  %6137 = vrcp.f32 %v4407_v7  ;;  %v4408_v11 = vadd.f32 1.0, %v6126_v50 }
 0x425   :  { %6139 = vrcp.f32 %v4409_v61  ;;  %v4410_v28 = vadd.f32 1.0, %v6128_v31  ;;  %v10208_v31 = vld [vmem:[%s11737_s2 + $0x20] ss:$8 sm:$0xf] }
 0x426   :  { %6141 = vrcp.f32 %v4408_v11  ;;  %v10232_v50 = vrot.slane %v10208_v31, %v12241_v59 }
 0x427   :  { %6143 = vrcp.f32 %v4410_v28 }
 0x428   :  { %12325 = vst [vmem:[#allocation65_spill] sm:$0xff] %v10232_v50 }
 0x42a   :  { %v6130_v21 = vpop.eup %6129 }
 0x42b   :  { %v6132_v61 = vpop.eup %6131  ;;  %v10238_v7 = vmul.f32 %v6130_v21, %v12326_v0  ;;  %v10243_v11 = vmul.f32 %v6130_v21, %v4588_v1  ;;  %v10248_v42 = vmul.f32 %v6130_v21, %v4604_v27  ;;  %v10253_v28 = vmul.f32 %v6130_v21, %v4620_v10 }
 0x42c   :  { %v6134_v24 = vpop.eup %6133  ;;  %v12327_v0 = vrot.slane %v10050_v46, %v12230_v9  ;;  %v10263_v1 = vmul.f32 %v6132_v61, %v4596_v62  ;;  %v10268_v27 = vmul.f32 %v6132_v61, %v4612_v43  ;;  %v12328_v10 = vrot.slane %v10073_v39, %v12230_v9 }
 0x42d   :  { %v6136_v44 = vpop.eup %6135  ;;  %v12331_v62 = vrot.slane %v10058_v15, %v12242_v36  ;;  %v12332_v43 = vrot.slane %v10065_v6, %v12242_v36  ;;  %5608 = vst [vmem:[%s11743_s8 + $0xe0] sm:$0x7f] %v10238_v7  ;;  %5612 = vst [vmem:[%s11743_s8 + $0x100] sm:$0x7f] %v10243_v11  ;;  %v12344_v6 = vrot.slane %v10053_v37, %v12230_v9 }
 0x42e   :  { %v10258_v30 = vmul.f32 %v6132_v61, %v12327_v0  ;;  %v10273_v49 = vmul.f32 %v6132_v61, %v12328_v10  ;;  %v12330_v0 = vrot.slane %v10050_v46, %v12242_v36  ;;  %v12333_v10 = vrot.slane %v10073_v39, %v12242_v36  ;;  %5616 = vst [vmem:[%s11743_s8 + $0x120] sm:$0x7f] %v10248_v42 }
 0x42f   :  { %v10283_v20 = vmul.f32 %v6134_v24, %v12331_v62  ;;  %v10288_v51 = vmul.f32 %v6134_v24, %v12332_v43  ;;  %5620 = vst [vmem:[%s11743_s8 + $0x140] sm:$0x7f] %v10253_v28  ;;  %v12335_v62 = vrot.slane %v10050_v46, %v12243_v63  ;;  %v10326_v33 = vmul.f32 %v6136_v44, %v12337_v17 }
 0x430   :  { %12329 = vst [vmem:[#allocation34_spill] sm:$0xff] %v10273_v49  ;;  %v10278_v50 = vmul.f32 %v6134_v24, %v12330_v0  ;;  %v10293_v8 = vmul.f32 %v6134_v24, %v12333_v10  ;;  %v10311_v0 = vpop.eup %6137  ;;  %v12336_v10 = vrot.slane %v10058_v15, %v12243_v63  ;;  %v10331_v4 = vmul.f32 %v6136_v44, %v12338_v40 }
 0x431   :  { %v10316_v43 = vmul.f32 %v6136_v44, %v12335_v62  ;;  %5610 = vst [vmem:[%s11743_s8 + $0xf0] sm:$0x7f] %v10258_v30  ;;  %5614 = vst [vmem:[%s11743_s8 + $0x110] sm:$0x7f] %v10263_v1  ;;  %v10349_v40 = vpop.eup %6139  ;;  %v12340_v17 = vrot.slane %v10053_v37, %v12241_v59  ;;  %v12342_v46 = vrot.slane %v10053_v37, %v12242_v36 }
 0x432   :  { %12334 = vst [vmem:[#allocation35_spill] sm:$0xff] %v10293_v8  ;;  %v10321_v58 = vmul.f32 %v6136_v44, %v12336_v10  ;;  %12339 = vst [vmem:[#allocation9_spill] sm:$0xff] %v10331_v4  ;;  %v10364_v62 = vmul.f32 %v6132_v61, %v12344_v6  ;;  %v12346_v10 = vrot.slane %v10053_v37, %v12243_v63  ;;  %v10387_v37 = vpop.eup %6141 }
 0x433   :  { %5618 = vst [vmem:[%s11743_s8 + $0x130] sm:$0x7f] %v10268_v27  ;;  %5622 = vst [vmem:[%s11743_s8 + $0x150] sm:$0x7f] %v10273_v49  ;;  %v10354_v39 = vmul.f32 %v6130_v21, %v12340_v17  ;;  %v10359_v15 = vmul.f32 %v6134_v24, %v12342_v46  ;;  %v12348_v17 = vrot.slane %v10061_v38, %v12241_v59 }
 0x434   :  { %12345 = vst [vmem:[#allocation42_spill] sm:$0xff] %v10364_v62  ;;  %v10369_v3 = vmul.f32 %v6136_v44, %v12346_v10  ;;  %5609 = vst [vmem:[%s11743_s8 + $0xe8] sm:$0x7f] %v10278_v50  ;;  %v12350_v6 = vrot.slane %v10061_v38, %v12242_v36  ;;  %v10402_v60 = vmul.f32 %v6132_v61, %v12352_v5 }
 0x435   :  { %12341 = vst [vmem:[#allocation36_spill] sm:$0xff] %v10354_v39  ;;  %12343 = vst [vmem:[#allocation37_spill] sm:$0xff] %v10359_v15  ;;  %v10392_v46 = vmul.f32 %v6130_v21, %v12348_v17  ;;  %v10407_v48 = vmul.f32 %v6136_v44, %v12354_v41  ;;  %v6144_v41 = vpop.eup %6143  ;;  %v12356_v5 = vrot.slane %v10069_v47, %v12241_v59 }
 0x436   :  { %12347 = vst [vmem:[#allocation43_spill] sm:$0xff] %v10369_v3  ;;  %5613 = vst [vmem:[%s11743_s8 + $0x108] sm:$0x7f] %v10283_v20  ;;  %v10397_v10 = vmul.f32 %v6134_v24, %v12350_v6  ;;  %v12358_v17 = vrot.slane %v10069_v47, %v12242_v36  ;;  %v12360_v49 = vrot.slane %v10069_v47, %v12230_v9 }
 0x437   :  { %5617 = vst [vmem:[%s11743_s8 + $0x128] sm:$0x7f] %v10288_v51  ;;  %5621 = vst [vmem:[%s11743_s8 + $0x148] sm:$0x7f] %v10293_v8  ;;  %v10428_v38 = vmul.f32 %v6130_v21, %v12356_v5  ;;  %v12362_v8 = vrot.slane %v10069_v47, %v12243_v63  ;;  %v12368_v21 = vrot.slane %v10113_v14, %v12230_v9 }
 0x438   :  { %12349 = vst [vmem:[#allocation44_spill] sm:$0xff] %v10392_v46  ;;  %12351 = vst [vmem:[#allocation45_spill] sm:$0xff] %v10397_v10  ;;  %v10433_v6 = vmul.f32 %v6134_v24, %v12358_v17  ;;  %v10438_v52 = vmul.f32 %v6132_v61, %v12360_v49  ;;  %v12370_v24 = vrot.slane %v10113_v14, %v12243_v63 }
 0x439   :  { %12353 = vst [vmem:[#allocation46_spill] sm:$0xff] %v10402_v60  ;;  %12355 = vst [vmem:[#allocation47_spill] sm:$0xff] %v10407_v48  ;;  %v10477_v61 = vmul.f32 %v10349_v40, %v12368_v21  ;;  %v12376_v21 = vrot.slane %v10131_v34, %v12230_v9 }
 0x43a   :  { %5611 = vst [vmem:[%s11743_s8 + $0xf8] sm:$0x7f] %v10316_v43  ;;  %5615 = vst [vmem:[%s11743_s8 + $0x118] sm:$0x7f] %v10321_v58  ;;  %v10482_v5 = vmul.f32 %v6144_v41, %v12370_v24 }
 0x43b   :  { %5619 = vst [vmem:[%s11743_s8 + $0x138] sm:$0x7f] %v10326_v33  ;;  %5623 = vst [vmem:[%s11743_s8 + $0x158] sm:$0x7f] %v10331_v4  ;;  %v10443_v4 = vmul.f32 %v6136_v44, %v12362_v8  ;;  %v12364_v8 = vrot.slane %v10113_v14, %v12241_v59  ;;  %v12366_v44 = vrot.slane %v10113_v14, %v12242_v36 }
 0x43c   :  { %12357 = vst [vmem:[#allocation48_spill] sm:$0xff] %v10428_v38  ;;  %12359 = vst [vmem:[#allocation50_spill] sm:$0xff] %v10433_v6  ;;  %v12372_v14 = vrot.slane %v10131_v34, %v12241_v59  ;;  %v10516_v24 = vmul.f32 %v10349_v40, %v12376_v21  ;;  %v12384_v21 = vrot.slane %v10157_v45, %v12230_v9 }
 0x43d   :  { %12361 = vst [vmem:[#allocation7_spill] sm:$0xff] %v10438_v52  ;;  %12363 = vst [vmem:[#allocation6_spill] sm:$0xff] %v10443_v4  ;;  %v10465_v47 = vmul.f32 %v10311_v0, %v12364_v8  ;;  %v10471_v49 = vmul.f32 %v10387_v37, %v12366_v44  ;;  %v12374_v8 = vrot.slane %v10131_v34, %v12242_v36 }
 0x43e   :  { %5624 = vst [vmem:[%s11743_s8 + $0x160] sm:$0x7f] %v10354_v39  ;;  %5625 = vst [vmem:[%s11743_s8 + $0x168] sm:$0x7f] %v10359_v15  ;;  %v10504_v17 = vmul.f32 %v10311_v0, %v12372_v14  ;;  %v12382_v14 = vrot.slane %v10157_v45, %v12242_v36  ;;  %v12479_v39 = vld [vmem:[#allocation63_spill] sm:$0xff]  ;;  %v12480_v15 = vld [vmem:[#allocation62_spill] sm:$0xff] }
 0x43f   :  { %5626 = vst [vmem:[%s11743_s8 + $0x170] sm:$0x7f] %v10364_v62  ;;  %5627 = vst [vmem:[%s11743_s8 + $0x178] sm:$0x7f] %v10369_v3  ;;  %v10510_v44 = vmul.f32 %v10387_v37, %v12374_v8  ;;  %v12450_v62 = vld [vmem:[#allocation19_spill] sm:$0xff]  ;;  %v12482_v3 = vld [vmem:[#allocation66_spill] sm:$0xff] }
 0x440   :  { %12365 = vst [vmem:[#allocation8_spill] sm:$0xff] %v10465_v47  ;;  %12367 = vst [vmem:[#allocation23_spill] sm:$0xff] %v10471_v49  ;;  %v10549_v8 = vmul.f32 %v10387_v37, %v12382_v14 }
 0x441   :  { %12369 = vst [vmem:[#allocation67_spill] sm:$0xff] %v10477_v61  ;;  %12371 = vst [vmem:[#allocation68_spill] sm:$0xff] %v10482_v5 }
 0x442   :  { %5628 = vst [vmem:[%s11743_s8 + $0x180] sm:$0x7f] %v10392_v46  ;;  %5629 = vst [vmem:[%s11743_s8 + $0x188] sm:$0x7f] %v10397_v10  ;;  %v6238_v46 = vld [vmem:[%s11735_s0] sm:$0x7f] }
 0x443   :  { %5630 = vst [vmem:[%s11743_s8 + $0x190] sm:$0x7f] %v10402_v60  ;;  %5631 = vst [vmem:[%s11743_s8 + $0x198] sm:$0x7f] %v10407_v48  ;;  %v12378_v48 = vrot.slane %v10131_v34, %v12243_v63 }
 0x444   :  { %12373 = vst [vmem:[#allocation69_spill] sm:$0xff] %v10504_v17  ;;  %12375 = vst [vmem:[#allocation70_spill] sm:$0xff] %v10510_v44 }
 0x445   :  { %12377 = vst [vmem:[#allocation71_spill] sm:$0xff] %v10516_v24  ;;  %v10521_v60 = vmul.f32 %v6144_v41, %v12378_v48  ;;  %5632 = vst [vmem:[%s11743_s8 + $0x1a0] sm:$0x7f] %v10428_v38  ;;  %v12380_v48 = vrot.slane %v10157_v45, %v12241_v59  ;;  %v12461_v38 = vld [vmem:[#allocation49_spill] sm:$0xff] }
 0x446   :  { %5633 = vst [vmem:[%s11743_s8 + $0x1a8] sm:$0x7f] %v10433_v6  ;;  %5634 = vst [vmem:[%s11743_s8 + $0x1b0] sm:$0x7f] %v10438_v52  ;;  %v10555_v52 = vmul.f32 %v10349_v40, %v12384_v21  ;;  %v12392_v21 = vrot.slane %v10165_v54, %v12230_v9 }
 0x447   :  { %12379 = vst [vmem:[#allocation72_spill] sm:$0xff] %v10521_v60  ;;  %5635 = vst [vmem:[%s11743_s8 + $0x1b8] sm:$0x7f] %v10443_v4  ;;  %v10543_v34 = vmul.f32 %v10311_v0, %v12380_v48  ;;  %v12386_v4 = vrot.slane %v10157_v45, %v12243_v63  ;;  %v12390_v48 = vrot.slane %v10165_v54, %v12242_v36 }
 0x448   :  { %12383 = vst [vmem:[#allocation74_spill] sm:$0xff] %v10549_v8  ;;  %12385 = vst [vmem:[#allocation75_spill] sm:$0xff] %v10555_v52 }
 0x449   :  { %12381 = vst [vmem:[#allocation73_spill] sm:$0xff] %v10543_v34  ;;  %v10560_v6 = vmul.f32 %v6144_v41, %v12386_v4  ;;  %5636 = vst [vmem:[%s11743_s8 + $0x2a0] sm:$0x7f] %v10465_v47  ;;  %v12388_v4 = vrot.slane %v10165_v54, %v12241_v59  ;;  %v10588_v14 = vmul.f32 %v10387_v37, %v12390_v48  ;;  %v12468_v47 = vld [vmem:[#allocation31_spill] sm:$0xff] }
 0x44a   :  { %5637 = vst [vmem:[%s11743_s8 + $0x2a8] sm:$0x7f] %v10471_v49  ;;  %5638 = vst [vmem:[%s11743_s8 + $0x2b0] sm:$0x7f] %v10477_v61  ;;  %v10594_v61 = vmul.f32 %v10349_v40, %v12392_v21  ;;  %v12400_v21 = vrot.slane %v10119_v19, %v12230_v9 }
 0x44b   :  { %12387 = vst [vmem:[#allocation76_spill] sm:$0xff] %v10560_v6  ;;  %5639 = vst [vmem:[%s11743_s8 + $0x2b8] sm:$0x7f] %v10482_v5  ;;  %v10582_v45 = vmul.f32 %v10311_v0, %v12388_v4  ;;  %v12394_v5 = vrot.slane %v10165_v54, %v12243_v63  ;;  %v12396_v54 = vrot.slane %v10119_v19, %v12241_v59 }
 0x44c   :  { %12391 = vst [vmem:[#allocation78_spill] sm:$0xff] %v10588_v14  ;;  %12393 = vst [vmem:[#allocation79_spill] sm:$0xff] %v10594_v61  ;;  %v12398_v4 = vrot.slane %v10119_v19, %v12242_v36 }
 0x44d   :  { %12389 = vst [vmem:[#allocation77_spill] sm:$0xff] %v10582_v45  ;;  %v10599_v49 = vmul.f32 %v6144_v41, %v12394_v5  ;;  %5640 = vst [vmem:[%s11743_s8 + $0x2c0] sm:$0x7f] %v10504_v17  ;;  %v10621_v5 = vmul.f32 %v10311_v0, %v12396_v54  ;;  %v12406_v54 = vrot.slane %v10153_v25, %v12242_v36  ;;  %v12473_v17 = vld [vmem:[#allocation30_spill] sm:$0xff] }
 0x44e   :  { %5641 = vst [vmem:[%s11743_s8 + $0x2c8] sm:$0x7f] %v10510_v44  ;;  %5642 = vst [vmem:[%s11743_s8 + $0x2d0] sm:$0x7f] %v10516_v24  ;;  %v10627_v48 = vmul.f32 %v10387_v37, %v12398_v4  ;;  %v10633_v24 = vmul.f32 %v10349_v40, %v12400_v21  ;;  %v12407_v21 = vrot.slane %v10153_v25, %v12230_v9 }
 0x44f   :  { %12395 = vst [vmem:[#allocation80_spill] sm:$0xff] %v10599_v49  ;;  %5643 = vst [vmem:[%s11743_s8 + $0x2d8] sm:$0x7f] %v10521_v60  ;;  %v12402_v60 = vrot.slane %v10119_v19, %v12243_v63  ;;  %v10666_v4 = vmul.f32 %v10387_v37, %v12406_v54 }
 0x450   :  { %12397 = vst [vmem:[#allocation81_spill] sm:$0xff] %v10621_v5  ;;  %12399 = vst [vmem:[#allocation82_spill] sm:$0xff] %v10627_v48 }
 0x451   :  { %12401 = vst [vmem:[#allocation83_spill] sm:$0xff] %v10633_v24  ;;  %v10638_v44 = vmul.f32 %v6144_v41, %v12402_v60  ;;  %5644 = vst [vmem:[%s11743_s8 + $0x2e0] sm:$0x7f] %v10543_v34  ;;  %v12404_v60 = vrot.slane %v10153_v25, %v12241_v59  ;;  %v12477_v34 = vld [vmem:[#allocation32_spill] sm:$0xff] }
 0x452   :  { %5645 = vst [vmem:[%s11743_s8 + $0x2e8] sm:$0x7f] %v10549_v8  ;;  %5646 = vst [vmem:[%s11743_s8 + $0x2f0] sm:$0x7f] %v10555_v52  ;;  %v10672_v52 = vmul.f32 %v10349_v40, %v12407_v21  ;;  %v12411_v21 = vrot.slane %v10161_v29, %v12230_v9 }
 0x453   :  { %12403 = vst [vmem:[#allocation84_spill] sm:$0xff] %v10638_v44  ;;  %5647 = vst [vmem:[%s11743_s8 + $0x2f8] sm:$0x7f] %v10560_v6  ;;  %v10660_v19 = vmul.f32 %v10311_v0, %v12404_v60  ;;  %v12408_v6 = vrot.slane %v10153_v25, %v12243_v63  ;;  %v12409_v25 = vrot.slane %v10161_v29, %v12241_v59 }
 0x454   :  { %5648 = vst [vmem:[%s11743_s8 + $0x300] sm:$0x7f] %v10582_v45  ;;  %5649 = vst [vmem:[%s11743_s8 + $0x308] sm:$0x7f] %v10588_v14  ;;  %v12410_v60 = vrot.slane %v10161_v29, %v12242_v36  ;;  %v10752_v59 = vrot.slane %v10208_v31, %v12242_v36  ;;  %v4963_v36 = vmax.f32 %v9456_v23, %v10278_v50  ;;  %v12422_v50 = vld [vmem:[#allocation34_spill] sm:$0xff]  ;;  %v12481_v45 = vld [vmem:[#allocation61_spill] sm:$0xff] }
 0x455   :  { %12405 = vst [vmem:[#allocation85_spill] sm:$0xff] %v10660_v19  ;;  %v10677_v8 = vmul.f32 %v6144_v41, %v12408_v6  ;;  %5650 = vst [vmem:[%s11743_s8 + $0x310] sm:$0x7f] %v10594_v61  ;;  %v10699_v6 = vmul.f32 %v10311_v0, %v12409_v25  ;;  %v10711_v61 = vmul.f32 %v10349_v40, %v12411_v21  ;;  %v12417_v40 = vld [vmem:[#allocation5_spill] sm:$0xff]  ;;  %v12436_v23 = vld [vmem:[#allocation14_spill] sm:$0xff] }
 0x456   :  { %5651 = vst [vmem:[%s11743_s8 + $0x318] sm:$0x7f] %v10599_v49  ;;  %v10705_v54 = vmul.f32 %v10387_v37, %v12410_v60  ;;  %v12412_v49 = vrot.slane %v10161_v29, %v12243_v63  ;;  %5652 = vst [vmem:[%s11743_s8 + $0x320] sm:$0x7f] %v10621_v5  ;;  %v10756_v29 = vrot.slane %v10208_v31, %v12230_v9  ;;  %v12418_v37 = vunpack.c.0.s8 %v10197_v35  ;;  %v12425_v21 = vld [vmem:[#allocation53_spill] sm:$0xff]  ;;  %v12475_v25 = vld [vmem:[#allocation58_spill] sm:$0xff] }
 0x457   :  { %5653 = vst [vmem:[%s11743_s8 + $0x328] sm:$0x7f] %v10627_v48  ;;  %5654 = vst [vmem:[%s11743_s8 + $0x330] sm:$0x7f] %v10633_v24  ;;  %v10760_v0 = vrot.slane %v10208_v31, %v12243_v63  ;;  %v4962_v9 = vmax.f32 %v9424_v26, %v10238_v7  ;;  %v4964_v63 = vmax.f32 %v9446_v13, %v10258_v30  ;;  %v12421_v30 = vld [vmem:[#allocation51_spill] sm:$0xff]  ;;  %v12459_v60 = vld [vmem:[#allocation25_spill] sm:$0xff] }
 0x458   :  { %v10716_v14 = vmul.f32 %v6144_v41, %v12412_v49  ;;  %5655 = vst [vmem:[%s11743_s8 + $0x338] sm:$0x7f] %v10638_v44  ;;  %5656 = vst [vmem:[%s11743_s8 + $0x340] sm:$0x7f] %v10660_v19  ;;  %v10765_v41 = vsub.s32 %v12418_v37, %v12417_v40  ;;  %v4965_v35 = vmax.f32 %v9498_v53, %v10316_v43  ;;  %v12426_v37 = vld [vmem:[#allocation54_spill] sm:$0xff]  ;;  %v12430_v7 = vld [vmem:[#allocation11_spill] sm:$0xff] }
 0x459   :  { %5657 = vst [vmem:[%s11743_s8 + $0x348] sm:$0x7f] %v10666_v4  ;;  %5658 = vst [vmem:[%s11743_s8 + $0x350] sm:$0x7f] %v10672_v52  ;;  %v4966_v31 = vmax.f32 %v9429_v32, %v10243_v11  ;;  %v4967_v49 = vmax.f32 %v9461_v56, %v10283_v20  ;;  %v12420_v20 = vld [vmem:[#allocation35_spill] sm:$0xff]  ;;  %v12423_v11 = vld [vmem:[#allocation52_spill] sm:$0xff]  ;;  %v10898_v10 = vmul.f32 %v6238_v46, %v4962_v9 }
 0x45a   :  { %12413 = vst [vmem:[#allocation86_spill] sm:$0xff] %v10716_v14  ;;  %5659 = vst [vmem:[%s11743_s8 + $0x358] sm:$0x7f] %v10677_v8  ;;  %v12463_v53 = vld [vmem:[#allocation26_spill] sm:$0xff]  ;;  %v12464_v32 = vld [vmem:[#allocation28_spill] sm:$0xff] }
 0x45b   :  { %12414 = vst [vmem:[#allocation87_spill] sm:$0xff] %v10752_v59  ;;  %12415 = vst [vmem:[#allocation88_spill] sm:$0xff] %v10756_v29  ;;  %v12457_v29 = vld [vmem:[#allocation27_spill] sm:$0xff]  ;;  %v12466_v56 = vld [vmem:[#allocation29_spill] sm:$0xff] }
 0x45c   :  { %12416 = vst [vmem:[#allocation89_spill] sm:$0xff] %v10760_v0  ;;  %12419 = vst [vmem:[#allocation5_spill] sm:$0xff] %v10765_v41  ;;  %v12443_v0 = vld [vmem:[#allocation33_spill] sm:$0xff]  ;;  %v12471_v40 = vld [vmem:[#allocation56_spill] sm:$0xff] }
 0x45d   :  { %5660 = vst [vmem:[%s11743_s8 + $0x360] sm:$0x7f] %v10699_v6  ;;  %5661 = vst [vmem:[%s11743_s8 + $0x368] sm:$0x7f] %v10705_v54  ;;  %v12470_v43 = vld [vmem:[#allocation57_spill] sm:$0xff]  ;;  %v12472_v13 = vld [vmem:[#allocation55_spill] sm:$0xff] }
 0x45e   :  { %5662 = vst [vmem:[%s11743_s8 + $0x370] sm:$0x7f] %v10711_v61  ;;  %5663 = vst [vmem:[%s11743_s8 + $0x378] sm:$0x7f] %v10716_v14  ;;  %v12474_v26 = vld [vmem:[#allocation59_spill] sm:$0xff]  ;;  %v12476_v41 = vld [vmem:[#allocation60_spill] sm:$0xff] }
 0x45f   :  { %v12478_v59 = vld [vmem:[#allocation64_spill] sm:$0xff]  ;;  %v6239_v5 = vld [vmem:[%s11735_s0 + $0x8] sm:$0x7f]  ;;  %v6240_v24 = vld [vmem:[%s11735_s0 + $0x10] sm:$0x7f] }
 0x460   :  { %v10903_v48 = vmul.f32 %v6239_v5, %v4963_v36  ;;  %v10908_v44 = vmul.f32 %v6240_v24, %v4964_v63  ;;  %v6241_v19 = vld [vmem:[%s11735_s0 + $0x18] sm:$0x7f]  ;;  %v6242_v46 = vld [vmem:[%s11735_s0 + $0x20] sm:$0x7f]  ;;  %v6243_v5 = vld [vmem:[%s11735_s0 + $0x28] sm:$0x7f] }
 0x461   :  { %v10913_v14 = vmul.f32 %v6241_v19, %v4965_v35  ;;  %v10918_v9 = vmul.f32 %v6242_v46, %v4966_v31  ;;  %v10923_v36 = vmul.f32 %v6243_v5, %v4967_v49  ;;  %v6244_v24 = vld [vmem:[%s11735_s0 + $0x30] sm:$0x7f]  ;;  %v12484_v19 = vmax.f32 %v9451_v16, %v10263_v1  ;;  %v6245_v35 = vld [vmem:[%s11735_s0 + $0x38] sm:$0x7f]  ;;  %v6246_v49 = vld [vmem:[%s11735_s0 + $0x40] sm:$0x7f] }
 0x462   :  { %v12485_v31 = vmax.f32 %v9503_v22, %v10321_v58  ;;  %v12486_v5 = vmax.f32 %v9434_v2, %v10248_v42  ;;  %v6247_v16 = vld [vmem:[%s11735_s0 + $0x48] sm:$0x7f]  ;;  %v12487_v1 = vmax.f32 %v9466_v18, %v10288_v51  ;;  %v6248_v22 = vld [vmem:[%s11735_s0 + $0x50] sm:$0x7f]  ;;  %v12488_v58 = vmax.f32 %v9471_v12, %v10268_v27  ;;  %v6249_v2 = vld [vmem:[%s11735_s0 + $0x58] sm:$0x7f] }
 0x463   :  { %12483 = vst [vmem:[#allocation35_spill] sm:$0xff] %v10923_v36  ;;  %v10931_v63 = vmul.f32 %v6244_v24, %v12484_v19  ;;  %v12489_v42 = vmax.f32 %v9518_v55, %v10326_v33  ;;  %v6250_v18 = vld [vmem:[%s11735_s0 + $0x60] sm:$0x7f]  ;;  %v12490_v51 = vmax.f32 %v9439_v57, %v10253_v28  ;;  %v6251_v12 = vld [vmem:[%s11735_s0 + $0x68] sm:$0x7f]  ;;  %v12491_v27 = vmax.f32 %v12421_v30, %v12420_v20 }
 0x464   :  { %v10939_v46 = vmul.f32 %v6245_v35, %v12485_v31  ;;  %v10947_v36 = vmul.f32 %v6246_v49, %v12486_v5  ;;  %v10955_v24 = vmul.f32 %v6247_v16, %v12487_v1  ;;  %v10963_v19 = vmul.f32 %v6248_v22, %v12488_v58  ;;  %v6252_v55 = vld [vmem:[%s11735_s0 + $0x70] sm:$0x7f]  ;;  %v6253_v57 = vld [vmem:[%s11735_s0 + $0x78] sm:$0x7f]  ;;  %v12493_v28 = vld [vmem:[#allocation9_spill] sm:$0xff] }
 0x465   :  { %v10971_v35 = vmul.f32 %v6249_v2, %v12489_v42  ;;  %v10979_v31 = vmul.f32 %v6250_v18, %v12490_v51  ;;  %v10987_v49 = vmul.f32 %v6251_v12, %v12491_v27  ;;  %v12492_v33 = vmax.f32 %v12423_v11, %v12422_v50  ;;  %v6254_v20 = vld [vmem:[%s11735_s0 + $0x80] sm:$0x7f]  ;;  %v6255_v50 = vld [vmem:[%s11735_s0 + $0x88] sm:$0x7f]  ;;  %v12497_v11 = vld [vmem:[#allocation10_spill] sm:$0xff] }
 0x466   :  { %v12494_v16 = vmax.f32 %v12425_v21, %v12493_v28  ;;  %v12495_v30 = vld [vmem:[#allocation36_spill] sm:$0xff]  ;;  %v12498_v2 = vld [vmem:[#allocation37_spill] sm:$0xff]  ;;  %v6256_v21 = vld [vmem:[%s11735_s0 + $0x90] sm:$0x7f] }
 0x467   :  { %v10995_v5 = vmul.f32 %v6252_v55, %v12492_v33  ;;  %v12496_v22 = vmax.f32 %v12426_v37, %v12495_v30  ;;  %v12499_v42 = vmax.f32 %v12497_v11, %v12498_v2  ;;  %v12500_v51 = vld [vmem:[#allocation12_spill] sm:$0xff]  ;;  %v12501_v12 = vld [vmem:[#allocation42_spill] sm:$0xff]  ;;  %v6257_v37 = vld [vmem:[%s11735_s0 + $0x98] sm:$0x7f] }
 0x468   :  { %v11003_v1 = vmul.f32 %v6253_v57, %v12494_v16  ;;  %v12502_v27 = vmax.f32 %v12500_v51, %v12501_v12  ;;  %v12503_v33 = vld [vmem:[#allocation39_spill] sm:$0xff]  ;;  %v12506_v30 = vld [vmem:[#allocation44_spill] sm:$0xff]  ;;  %v6259_v11 = vld [vmem:[%s11735_s0 + $0xa8] sm:$0x7f] }
 0x469   :  { %v11011_v58 = vmul.f32 %v6254_v20, %v12496_v22  ;;  %v11019_v18 = vmul.f32 %v6255_v50, %v12499_v42  ;;  %v12504_v57 = vld [vmem:[#allocation43_spill] sm:$0xff]  ;;  %v6258_v20 = vld [vmem:[%s11735_s0 + $0xa0] sm:$0x7f]  ;;  %v12507_v22 = vmax.f32 %v12430_v7, %v12506_v30  ;;  %v12508_v2 = vld [vmem:[#allocation38_spill] sm:$0xff] }
 0x46a   :  { %v11027_v55 = vmul.f32 %v6256_v21, %v12502_v27  ;;  %v12505_v28 = vmax.f32 %v12503_v33, %v12504_v57  ;;  %v12509_v42 = vld [vmem:[#allocation45_spill] sm:$0xff]  ;;  %v6260_v12 = vld [vmem:[%s11735_s0 + $0xb0] sm:$0x7f]  ;;  %v6261_v7 = vld [vmem:[%s11735_s0 + $0xb8] sm:$0x7f] }
 0x46b   :  { %v11043_v50 = vmul.f32 %v6258_v20, %v12507_v22  ;;  %v12510_v21 = vmax.f32 %v12508_v2, %v12509_v42  ;;  %v12511_v27 = vld [vmem:[#allocation13_spill] sm:$0xff]  ;;  %v12516_v20 = vld [vmem:[#allocation47_spill] sm:$0xff]  ;;  %v12519_v2 = vld [vmem:[#allocation48_spill] sm:$0xff] }
 0x46c   :  { %v11035_v16 = vmul.f32 %v6257_v37, %v12505_v28  ;;  %v12512_v37 = vld [vmem:[#allocation46_spill] sm:$0xff]  ;;  %v12515_v28 = vld [vmem:[#allocation40_spill] sm:$0xff]  ;;  %v12520_v42 = vmax.f32 %v12436_v23, %v12519_v2  ;;  %v6265_v23 = vld [vmem:[%s11735_s0 + $0xd8] sm:$0x7f] }
 0x46d   :  { %v11051_v51 = vmul.f32 %v6259_v11, %v12510_v21  ;;  %v12513_v33 = vmax.f32 %v12511_v27, %v12512_v37  ;;  %v12517_v30 = vmax.f32 %v12515_v28, %v12516_v20  ;;  %v6262_v11 = vld [vmem:[%s11735_s0 + $0xc0] sm:$0x7f]  ;;  %v12522_v27 = vld [vmem:[#allocation41_spill] sm:$0xff]  ;;  %v12523_v37 = vld [vmem:[#allocation50_spill] sm:$0xff] }
 0x46e   :  { %v11075_v21 = vmul.f32 %v6262_v11, %v12520_v42  ;;  %v12525_v28 = vld [vmem:[#allocation18_spill] sm:$0xff]  ;;  %v12526_v20 = vld [vmem:[#allocation7_spill] sm:$0xff]  ;;  %v12529_v11 = vld [vmem:[#allocation17_spill] sm:$0xff] }
 0x46f   :  { %v11059_v57 = vmul.f32 %v6260_v12, %v12513_v33  ;;  %v11067_v22 = vmul.f32 %v6261_v7, %v12517_v30  ;;  %v6263_v12 = vld [vmem:[%s11735_s0 + $0xc8] sm:$0x7f]  ;;  %v12524_v33 = vmax.f32 %v12522_v27, %v12523_v37  ;;  %v6264_v7 = vld [vmem:[%s11735_s0 + $0xd0] sm:$0x7f]  ;;  %v12527_v30 = vmax.f32 %v12525_v28, %v12526_v20  ;;  %v12533_v27 = vld [vmem:[#allocation8_spill] sm:$0xff] }
 0x470   :  { %12521 = vst [vmem:[#allocation52_spill] sm:$0xff] %v11075_v21  ;;  %v12530_v2 = vld [vmem:[#allocation6_spill] sm:$0xff]  ;;  %v12534_v37 = vmax.f32 %v12443_v0, %v12533_v27  ;;  %v12536_v28 = vld [vmem:[#allocation16_spill] sm:$0xff]  ;;  %v12537_v20 = vld [vmem:[#allocation23_spill] sm:$0xff] }
 0x471   :  { %12514 = vst [vmem:[#allocation51_spill] sm:$0xff] %v11059_v57  ;;  %12518 = vst [vmem:[#allocation34_spill] sm:$0xff] %v11067_v22  ;;  %v11083_v57 = vmul.f32 %v6263_v12, %v12524_v33  ;;  %v11091_v22 = vmul.f32 %v6264_v7, %v12527_v30  ;;  %v12531_v42 = vmax.f32 %v12529_v11, %v12530_v2  ;;  %v6266_v12 = vld [vmem:[%s11735_s0 + $0xe0] sm:$0x7f]  ;;  %v6267_v7 = vld [vmem:[%s11735_s0 + $0xe8] sm:$0x7f] }
 0x472   :  { %v11107_v33 = vmul.f32 %v6266_v12, %v12534_v37  ;;  %v12538_v30 = vmax.f32 %v12536_v28, %v12537_v20  ;;  %v12539_v11 = vld [vmem:[#allocation15_spill] sm:$0xff]  ;;  %v12543_v12 = vld [vmem:[#allocation20_spill] sm:$0xff]  ;;  %v12547_v28 = vld [vmem:[#allocation69_spill] sm:$0xff] }
 0x473   :  { %12528 = vst [vmem:[#allocation53_spill] sm:$0xff] %v11091_v22  ;;  %v11099_v21 = vmul.f32 %v6265_v23, %v12531_v42  ;;  %v6268_v23 = vld [vmem:[%s11735_s0 + $0xf0] sm:$0x7f]  ;;  %v12540_v2 = vld [vmem:[#allocation67_spill] sm:$0xff]  ;;  %v12544_v27 = vld [vmem:[#allocation68_spill] sm:$0xff]  ;;  %v12548_v20 = vmax.f32 %v12450_v62, %v12547_v28 }
 0x474   :  { %12535 = vst [vmem:[#allocation11_spill] sm:$0xff] %v11107_v33  ;;  %v11115_v22 = vmul.f32 %v6267_v7, %v12538_v30  ;;  %v12541_v42 = vmax.f32 %v12539_v11, %v12540_v2  ;;  %v6269_v0 = vld [vmem:[%s11735_s0 + $0xf8] sm:$0x7f]  ;;  %v12545_v37 = vmax.f32 %v12543_v12, %v12544_v27  ;;  %v6270_v7 = vld [vmem:[%s11735_s0 + $0x100] sm:$0x7f]  ;;  %v12550_v11 = vld [vmem:[#allocation22_spill] sm:$0xff] }
 0x475   :  { %12532 = vst [vmem:[#allocation54_spill] sm:$0xff] %v11099_v21  ;;  %v11139_v30 = vmul.f32 %v6270_v7, %v12548_v20  ;;  %v12551_v2 = vld [vmem:[#allocation70_spill] sm:$0xff]  ;;  %v12553_v12 = vld [vmem:[#allocation21_spill] sm:$0xff]  ;;  %v12554_v27 = vld [vmem:[#allocation71_spill] sm:$0xff] }
 0x476   :  { %v11123_v21 = vmul.f32 %v6268_v23, %v12541_v42  ;;  %v11131_v33 = vmul.f32 %v6269_v0, %v12545_v37  ;;  %v6271_v23 = vld [vmem:[%s11735_s0 + $0x108] sm:$0x7f]  ;;  %v12552_v42 = vmax.f32 %v12550_v11, %v12551_v2  ;;  %v6272_v0 = vld [vmem:[%s11735_s0 + $0x110] sm:$0x7f]  ;;  %v12555_v37 = vmax.f32 %v12553_v12, %v12554_v27  ;;  %v6273_v62 = vld [vmem:[%s11735_s0 + $0x118] sm:$0x7f] }
 0x477   :  { %12549 = vst [vmem:[#allocation19_spill] sm:$0xff] %v11139_v30  ;;  %v12556_v7 = vld [vmem:[#allocation24_spill] sm:$0xff]  ;;  %v12559_v11 = vld [vmem:[#allocation73_spill] sm:$0xff]  ;;  %v12561_v12 = vld [vmem:[#allocation74_spill] sm:$0xff] }
 0x478   :  { %12542 = vst [vmem:[#allocation14_spill] sm:$0xff] %v11123_v21  ;;  %12546 = vst [vmem:[#allocation33_spill] sm:$0xff] %v11131_v33  ;;  %v11147_v21 = vmul.f32 %v6271_v23, %v12552_v42  ;;  %v11155_v33 = vmul.f32 %v6272_v0, %v12555_v37  ;;  %v12557_v28 = vld [vmem:[#allocation72_spill] sm:$0xff]  ;;  %v12560_v2 = vmax.f32 %v12457_v29, %v12559_v11  ;;  %v6275_v0 = vld [vmem:[%s11735_s0 + $0x128] sm:$0x7f] }
 0x479   :  { %v12558_v20 = vmax.f32 %v12556_v7, %v12557_v28  ;;  %v6274_v23 = vld [vmem:[%s11735_s0 + $0x120] sm:$0x7f]  ;;  %v12562_v27 = vmax.f32 %v12459_v60, %v12561_v12  ;;  %v12564_v7 = vld [vmem:[#allocation75_spill] sm:$0xff]  ;;  %v12570_v12 = vld [vmem:[#allocation77_spill] sm:$0xff] }
 0x47a   :  { %v11171_v42 = vmul.f32 %v6274_v23, %v12560_v2  ;;  %v12565_v28 = vmax.f32 %v12461_v38, %v12564_v7  ;;  %v6277_v29 = vld [vmem:[%s11735_s0 + $0x138] sm:$0x7f]  ;;  %v12567_v23 = vld [vmem:[#allocation76_spill] sm:$0xff]  ;;  %v11205_v38 = vld [vmem:[%s11741_s6 + $0x8] sm:$0x7f] }
 0x47b   :  { %v11163_v30 = vmul.f32 %v6273_v62, %v12558_v20  ;;  %v11179_v37 = vmul.f32 %v6275_v0, %v12562_v27  ;;  %v6276_v62 = vld [vmem:[%s11735_s0 + $0x130] sm:$0x7f]  ;;  %v12568_v11 = vmax.f32 %v12463_v53, %v12567_v23  ;;  %v11200_v60 = vld [vmem:[%s11741_s6] sm:$0x7f]  ;;  %v12571_v27 = vmax.f32 %v12464_v32, %v12570_v12  ;;  %v6279_v7 = vld [vmem:[%s11735_s0 + $0x148] sm:$0x7f] }
 0x47c   :  { %v11187_v20 = vmul.f32 %v6276_v62, %v12565_v28  ;;  %v11210_v0 = vld [vmem:[%s11741_s6 + $0x10] sm:$0x7f]  ;;  %v6278_v53 = vld [vmem:[%s11735_s0 + $0x140] sm:$0x7f]  ;;  %v6281_v32 = vld [vmem:[%s11735_s0 + $0x158] sm:$0x7f] }
 0x47d   :  { %12563 = vst [vmem:[#allocation27_spill] sm:$0xff] %v11179_v37  ;;  %v11195_v2 = vmul.f32 %v6277_v29, %v12568_v11  ;;  %v11218_v62 = vmul.f32 %v6278_v53, %v12571_v27  ;;  %v12573_v28 = vld [vmem:[#allocation78_spill] sm:$0xff]  ;;  %v12579_v53 = vld [vmem:[#allocation80_spill] sm:$0xff] }
 0x47e   :  { %12566 = vst [vmem:[#allocation25_spill] sm:$0xff] %v11187_v20  ;;  %v12574_v29 = vmax.f32 %v12466_v56, %v12573_v28  ;;  %v6280_v11 = vld [vmem:[%s11735_s0 + $0x150] sm:$0x7f]  ;;  %v12580_v12 = vmax.f32 %v12470_v43, %v12579_v53  ;;  %v11247_v56 = vld [vmem:[%s11741_s6 + $0x18] sm:$0x7f] }
 0x47f   :  { %12569 = vst [vmem:[#allocation49_spill] sm:$0xff] %v11195_v2  ;;  %12572 = vst [vmem:[#allocation26_spill] sm:$0xff] %v11218_v62  ;;  %v12576_v2 = vld [vmem:[#allocation79_spill] sm:$0xff]  ;;  %v11262_v43 = vld [vmem:[%s11741_s6 + $0x30] sm:$0x7f] }
 0x480   :  { %v11226_v23 = vmul.f32 %v6279_v7, %v12574_v29  ;;  %v12577_v20 = vmax.f32 %v12468_v47, %v12576_v2  ;;  %v11242_v27 = vmul.f32 %v6281_v32, %v12580_v12  ;;  %v11252_v47 = vld [vmem:[%s11741_s6 + $0x20] sm:$0x7f]  ;;  %v12582_v7 = vld [vmem:[#allocation81_spill] sm:$0xff]  ;;  %v12584_v32 = vld [vmem:[#allocation82_spill] sm:$0xff] }
 0x481   :  { %v6282_v2 = vld [vmem:[%s11735_s0 + $0x160] sm:$0x7f]  ;;  %v12583_v28 = vmax.f32 %v12471_v40, %v12582_v7  ;;  %v12585_v53 = vmax.f32 %v12472_v13, %v12584_v32  ;;  %v6285_v40 = vld [vmem:[%s11735_s0 + $0x178] sm:$0x7f]  ;;  %v6287_v32 = vld [vmem:[%s11735_s0 + $0x188] sm:$0x7f] }
 0x482   :  { %12575 = vst [vmem:[#allocation28_spill] sm:$0xff] %v11226_v23  ;;  %v11234_v37 = vmul.f32 %v6280_v11, %v12577_v20  ;;  %12581 = vst [vmem:[#allocation31_spill] sm:$0xff] %v11242_v27  ;;  %v11257_v20 = vld [vmem:[%s11741_s6 + $0x28] sm:$0x7f]  ;;  %v6284_v27 = vld [vmem:[%s11735_s0 + $0x170] sm:$0x7f] }
 0x483   :  { %v11270_v29 = vmul.f32 %v6282_v2, %v12583_v28  ;;  %v6283_v11 = vld [vmem:[%s11735_s0 + $0x168] sm:$0x7f]  ;;  %v12588_v2 = vld [vmem:[#allocation84_spill] sm:$0xff]  ;;  %v11299_v13 = vld [vmem:[%s11741_s6 + $0x38] sm:$0x7f] }
 0x484   :  { %12578 = vst [vmem:[#allocation29_spill] sm:$0xff] %v11234_v37  ;;  %v11278_v12 = vmul.f32 %v6283_v11, %v12585_v53  ;;  %v12586_v37 = vld [vmem:[#allocation83_spill] sm:$0xff]  ;;  %v12589_v7 = vmax.f32 %v12474_v26, %v12588_v2  ;;  %v6286_v26 = vld [vmem:[%s11735_s0 + $0x180] sm:$0x7f]  ;;  %v12593_v53 = vmax.f32 %v12476_v41, %v10666_v4  ;;  %v6288_v2 = vld [vmem:[%s11735_s0 + $0x190] sm:$0x7f] }
 0x485   :  { %v12587_v23 = vmax.f32 %v12473_v17, %v12586_v37  ;;  %v11304_v17 = vld [vmem:[%s11741_s6 + $0x40] sm:$0x7f]  ;;  %v11309_v37 = vld [vmem:[%s11741_s6 + $0x48] sm:$0x7f]  ;;  %v11346_v4 = vld [vmem:[%s11741_s6 + $0x50] sm:$0x7f] }
 0x486   :  { %v11294_v28 = vmul.f32 %v6285_v40, %v12589_v7  ;;  %v11325_v40 = vmul.f32 %v6287_v32, %v12593_v53  ;;  %v12594_v7 = vmax.f32 %v12477_v34, %v10672_v52  ;;  %v11351_v52 = vld [vmem:[%s11741_s6 + $0x58] sm:$0x7f]  ;;  %v11356_v34 = vld [vmem:[%s11741_s6 + $0x60] sm:$0x7f]  ;;  %v12598_v32 = vmax.f32 %v12480_v15, %v10705_v54  ;;  %v5089_v15 = vld [vmem:[%s11741_s6 + $0x68] sm:$0x7f] }
 0x487   :  { %v11286_v62 = vmul.f32 %v6284_v27, %v12587_v23  ;;  %v12591_v23 = vld [vmem:[#allocation85_spill] sm:$0xff]  ;;  %v5090_v54 = vld [vmem:[%s11741_s6 + $0x70] sm:$0x7f] }
 0x488   :  { %12590 = vst [vmem:[#allocation57_spill] sm:$0xff] %v11294_v28  ;;  %v12592_v27 = vmax.f32 %v12475_v25, %v12591_v23  ;;  %v11333_v28 = vmul.f32 %v6288_v2, %v12594_v7  ;;  %v6289_v25 = vld [vmem:[%s11735_s0 + $0x198] sm:$0x7f]  ;;  %v6292_v2 = vld [vmem:[%s11735_s0 + $0x1b0] sm:$0x7f]  ;;  %v12600_v7 = vmax.f32 %v12481_v45, %v10711_v61 }
 0x489   :  { %v5091_v61 = vld [vmem:[%s11741_s6 + $0x78] sm:$0x7f]  ;;  %v5092_v45 = vld [vmem:[%s11741_s6 + $0x80] sm:$0x7f] }
 0x48a   :  { %v11317_v11 = vmul.f32 %v6286_v26, %v12592_v27  ;;  %v12595_v26 = vmax.f32 %v12478_v59, %v10677_v8  ;;  %v6290_v8 = vld [vmem:[%s11735_s0 + $0x1a0] sm:$0x7f]  ;;  %v12596_v59 = vmax.f32 %v12479_v39, %v10699_v6  ;;  %v6291_v27 = vld [vmem:[%s11735_s0 + $0x1a8] sm:$0x7f]  ;;  %v6293_v39 = vld [vmem:[%s11735_s0 + $0x1b8] sm:$0x7f] }
 0x48b   :  { %v11372_v53 = vmul.f32 %v6291_v27, %v12598_v32  ;;  %v12602_v6 = vld [vmem:[#allocation86_spill] sm:$0xff]  ;;  %v11410_v27 = vmul.f32 %v11200_v60, %v10898_v10  ;;  %v11414_v32 = vmul.f32 %v11205_v38, %v10903_v48  ;;  %v5096_v10 = vld [vmem:[%s11741_s6 + $0xa0] sm:$0x7f]  ;;  %v5097_v48 = vld [vmem:[%s11741_s6 + $0xa8] sm:$0x7f] }
 0x48c   :  { %v11341_v23 = vmul.f32 %v6289_v25, %v12595_v26  ;;  %v11364_v41 = vmul.f32 %v6290_v8, %v12596_v59  ;;  %v11380_v25 = vmul.f32 %v6292_v2, %v12600_v7  ;;  %v12603_v26 = vmax.f32 %v12482_v3, %v12602_v6  ;;  %v5093_v3 = vld [vmem:[%s11741_s6 + $0x88] sm:$0x7f]  ;;  %v5094_v59 = vld [vmem:[%s11741_s6 + $0x90] sm:$0x7f]  ;;  %v12609_v6 = vld [vmem:[#allocation35_spill] sm:$0xff] }
 0x48d   :  { %12599 = vst [vmem:[#allocation55_spill] sm:$0xff] %v11372_v53  ;;  %12605 = vst [vmem:[#allocation58_spill] sm:$0xff] %v11410_v27  ;;  %v11418_v2 = vmul.f32 %v11210_v0, %v10908_v44  ;;  %v11422_v7 = vmul.f32 %v11247_v56, %v10913_v14  ;;  %v5108_v44 = vmul.f32 %v11252_v47, %v10918_v9  ;;  %v5099_v9 = vld [vmem:[%s11741_s6 + $0xb8] sm:$0x7f] }
 0x48e   :  { %12597 = vst [vmem:[#allocation56_spill] sm:$0xff] %v11364_v41  ;;  %12601 = vst [vmem:[#allocation30_spill] sm:$0xff] %v11380_v25  ;;  %v11388_v8 = vmul.f32 %v6293_v39, %v12603_v26  ;;  %v5095_v39 = vld [vmem:[%s11741_s6 + $0x98] sm:$0x7f]  ;;  %v11437_v26 = vmul.f32 %v11257_v20, %v12609_v6  ;;  %v11441_v14 = vmul.f32 %v11262_v43, %v10931_v63  ;;  %v5100_v6 = vld [vmem:[%s11741_s6 + $0xc0] sm:$0x7f] }
 0x48f   :  { %12606 = vst [vmem:[#allocation60_spill] sm:$0xff] %v11414_v32  ;;  %12607 = vst [vmem:[#allocation32_spill] sm:$0xff] %v11418_v2  ;;  %v5098_v2 = vld [vmem:[%s11741_s6 + $0xb0] sm:$0x7f]  ;;  %v5112_v63 = vmul.f32 %v11304_v17, %v10947_v36  ;;  %v5103_v36 = vld [vmem:[%s11741_s6 + $0xd8] sm:$0x7f]  ;;  %v11489_v25 = vmul.f32 %v5094_v59, %v11027_v55  ;;  %v11492_v27 = vmul.f32 %v5095_v39, %v11035_v16 }
 0x490   :  { %12604 = vst [vmem:[#allocation59_spill] sm:$0xff] %v11388_v8  ;;  %12608 = vst [vmem:[#allocation64_spill] sm:$0xff] %v11422_v7  ;;  %v11445_v7 = vmul.f32 %v11299_v13, %v10939_v46  ;;  %v11462_v46 = vmul.f32 %v11346_v4, %v10963_v19  ;;  %v5102_v32 = vld [vmem:[%s11741_s6 + $0xd0] sm:$0x7f]  ;;  %v5117_v19 = vmul.f32 %v5089_v15, %v10987_v49  ;;  %v12619_v53 = vld [vmem:[#allocation51_spill] sm:$0xff] }
 0x491   :  { %12610 = vst [vmem:[#allocation63_spill] sm:$0xff] %v11437_v26  ;;  %12611 = vst [vmem:[#allocation62_spill] sm:$0xff] %v11441_v14  ;;  %v5113_v14 = vmul.f32 %v11309_v37, %v10955_v24  ;;  %v5101_v26 = vld [vmem:[%s11741_s6 + $0xc8] sm:$0x7f]  ;;  %v5116_v24 = vmul.f32 %v11356_v34, %v10979_v31  ;;  %v5121_v8 = vmul.f32 %v5093_v3, %v11019_v18  ;;  %s6321_s6 = smov [#allocation2]  }
 0x492   :  { %12612 = vst [vmem:[#allocation61_spill] sm:$0xff] %v11445_v7  ;;  %12613 = vst [vmem:[#allocation66_spill] sm:$0xff] %v11462_v46  ;;  %v11466_v7 = vmul.f32 %v11351_v52, %v10971_v35  ;;  %v11481_v35 = vmul.f32 %v5090_v54, %v10995_v5  ;;  %v5120_v46 = vmul.f32 %v5092_v45, %v11011_v58  ;;  %v12622_v41 = vld [vmem:[#allocation53_spill] sm:$0xff]  ;;  %s5399_s10 = sshll.u32 %s6321_s6, 4  ;;  %s5400_s10 = int_to_ptr.vmem [resolvable:$true] %s5399_s10 }
 0x493   :  { %12617 = vst [vmem:[#allocation37_spill] sm:$0xff] %v11489_v25  ;;  %12618 = vst [vmem:[#allocation12_spill] sm:$0xff] %v11492_v27  ;;  %v5124_v31 = vmul.f32 %v5096_v10, %v11043_v50  ;;  %v5125_v49 = vmul.f32 %v5097_v48, %v11051_v51  ;;  %v11497_v5 = vmul.f32 %v5098_v2, %v12619_v53  ;;  %v12623_v25 = vld [vmem:[#allocation54_spill] sm:$0xff]  ;;  %v12624_v27 = vld [vmem:[#allocation11_spill] sm:$0xff]  ;;  %s6294_s8 = scalar_lea.vmem %s5400_s10, 128  ;;  %p6299_p1 = scmp.lt.s32.totalorder %s5400_s10, %s5400_s10 }
 0x494   :  { %12614 = vst [vmem:[#allocation9_spill] sm:$0xff] %v11466_v7  ;;  %12615 = vst [vmem:[#allocation36_spill] sm:$0xff] %v11481_v35  ;;  %v11484_v7 = vmul.f32 %v5091_v61, %v11003_v1  ;;  %v12620_v35 = vld [vmem:[#allocation34_spill] sm:$0xff]  ;;  %v5129_v18 = vmul.f32 %v5101_v26, %v11083_v57  ;;  %v11505_v55 = vmul.f32 %v5102_v32, %v12622_v41  ;;  %v12627_v41 = vld [vmem:[#allocation19_spill] sm:$0xff]  ;;  %p6295_p0 = scmp.ne.s32.totalorder %s5400_s10, %s6294_s8  ;;  %p6300_p2 = scmp.lt.s32.totalorder %s6294_s8, %s6294_s8 }
 0x495   :  { %v11500_v1 = vmul.f32 %v5099_v9, %v12620_v35  ;;  %v11508_v16 = vmul.f32 %v5103_v36, %v12623_v25  ;;  %v11512_v50 = vmul.f32 %v11200_v60, %v12624_v27  ;;  %v11516_v51 = vmul.f32 %v11205_v38, %v11115_v22  ;;  %v12625_v53 = vld [vmem:[#allocation14_spill] sm:$0xff]  ;;  %v12629_v27 = vld [vmem:[#allocation25_spill] sm:$0xff] }
 0x496   :  { %12616 = vst [vmem:[#allocation10_spill] sm:$0xff] %v11484_v7  ;;  %v12621_v7 = vld [vmem:[#allocation52_spill] sm:$0xff]  ;;  %v11520_v35 = vmul.f32 %v11210_v0, %v12625_v53  ;;  %v11528_v25 = vmul.f32 %v11252_v47, %v12627_v41  ;;  %v11532_v60 = vmul.f32 %v11257_v20, %v11147_v21  ;;  %v11536_v22 = vmul.f32 %v11262_v43, %v11155_v33  ;;  %v12630_v20 = vld [vmem:[#allocation49_spill] sm:$0xff]  ;;  %v12631_v43 = vld [vmem:[#allocation26_spill] sm:$0xff]  ;;  %p6301_p3 = por %p6300_p2, %p6299_p1 }
 0x497   :  { %v5128_v58 = vmul.f32 %v5100_v6, %v12621_v7  ;;  %v12626_v7 = vld [vmem:[#allocation33_spill] sm:$0xff]  ;;  %v11540_v38 = vmul.f32 %v11299_v13, %v11163_v30  ;;  %v11544_v0 = vmul.f32 %v11304_v17, %v11171_v42  ;;  %v11552_v21 = vmul.f32 %v11346_v4, %v12629_v27  ;;  %v12632_v13 = vld [vmem:[#allocation28_spill] sm:$0xff] }
 0x498   :  { %v11524_v57 = vmul.f32 %v11247_v56, %v12626_v7  ;;  %v12628_v56 = vld [vmem:[#allocation27_spill] sm:$0xff]  ;;  %v11556_v33 = vmul.f32 %v11351_v52, %v12630_v20  ;;  %v11560_v30 = vmul.f32 %v11356_v34, %v12631_v43  ;;  %v11563_v53 = vmul.f32 %v5089_v15, %v12632_v13  ;;  %v12633_v42 = vld [vmem:[#allocation29_spill] sm:$0xff]  ;;  %p6302_p4 = pnand %p6301_p3, %p6295_p0 }
 0x499   :  { %v11548_v47 = vmul.f32 %v11309_v37, %v12628_v56  ;;  %v11566_v17 = vmul.f32 %v5090_v54, %v12633_v42  ;;  %v12634_v37 = vld [vmem:[#allocation31_spill] sm:$0xff]  ;;  %v11572_v4 = vmul.f32 %v5092_v45, %v11270_v29  ;;  %v11575_v41 = vmul.f32 %v5093_v3, %v11278_v12  ;;  %v12635_v34 = vld [vmem:[#allocation57_spill] sm:$0xff]  ;;  %v12636_v12 = vld [vmem:[#allocation56_spill] sm:$0xff] }
 0x49a   :  { %v11569_v7 = vmul.f32 %v5091_v61, %v12634_v37  ;;  %v11578_v52 = vmul.f32 %v5094_v59, %v11286_v62  ;;  %v11581_v56 = vmul.f32 %v5095_v39, %v12635_v34  ;;  %v11584_v15 = vmul.f32 %v5096_v10, %v11317_v11  ;;  %v12637_v62 = vld [vmem:[#allocation55_spill] sm:$0xff]  ;;  %v12638_v59 = vld [vmem:[#allocation58_spill] sm:$0xff]  ;;  %v12643_v37 = vld [vmem:[#allocation32_spill] sm:$0xff] }
 0x49b   :  { %v11587_v54 = vmul.f32 %v5097_v48, %v11325_v40  ;;  %v11590_v61 = vmul.f32 %v5098_v2, %v11333_v28  ;;  %v11593_v29 = vmul.f32 %v5099_v9, %v11341_v23  ;;  %v11596_v45 = vmul.f32 %v5100_v6, %v12636_v12  ;;  %v12639_v10 = vld [vmem:[#allocation30_spill] sm:$0xff]  ;;  %v12640_v48 = vld [vmem:[#allocation59_spill] sm:$0xff] }
 0x49c   :  { %v11599_v3 = vmul.f32 %v5101_v26, %v12637_v62  ;;  %v5160_v39 = vsel %vm157_vm0, %v12638_v59, 0.0  ;;  %v5161_v11 = vsel %vm157_vm0, %v5108_v44, 0.0  ;;  %v11605_v40 = vmul.f32 %v5102_v32, %v12639_v10  ;;  %v12641_v26 = vld [vmem:[#allocation60_spill] sm:$0xff]  ;;  %v12642_v20 = vld [vmem:[#allocation63_spill] sm:$0xff] }
 0x49d   :  { %v11608_v28 = vmul.f32 %v5103_v36, %v12640_v48  ;;  %v5162_v2 = vadd.f32 %v5161_v11, %v5160_v39  ;;  %v5163_v23 = vsel %vm157_vm0, %v5112_v63, 0.0  ;;  %v5165_v9 = vsel %vm157_vm0, %v5116_v24, 0.0  ;;  %v12645_v11 = vld [vmem:[#allocation66_spill] sm:$0xff]  ;;  %v12646_v10 = vld [vmem:[#allocation64_spill] sm:$0xff] }
 0x49e   :  { %v5167_v6 = vsel %vm157_vm0, %v5120_v46, 0.0  ;;  %v5179_v27 = vsel %vm157_vm0, %v12641_v26, 0.0  ;;  %v5180_v43 = vsel %vm157_vm0, %v12642_v20, 0.0  ;;  %v5169_v32 = vsel %vm157_vm0, %v5124_v31, 0.0  ;;  %v12644_v46 = vld [vmem:[#allocation62_spill] sm:$0xff]  ;;  %v12647_v26 = vld [vmem:[#allocation61_spill] sm:$0xff] }
 0x49f   :  { %v5164_v44 = vadd.f32 %v5163_v23, %v5162_v2  ;;  %v5171_v13 = vsel %vm157_vm0, %v5128_v58, 0.0  ;;  %v5181_v36 = vadd.f32 %v5180_v43, %v5179_v27  ;;  %v5182_v42 = vsel %vm157_vm0, %v5113_v14, 0.0  ;;  %v12648_v27 = vld [vmem:[#allocation36_spill] sm:$0xff]  ;;  %v12649_v20 = vld [vmem:[#allocation37_spill] sm:$0xff] }
 0x4a0   :  { %v5184_v63 = vsel %vm157_vm0, %v5117_v19, 0.0  ;;  %v5198_v24 = vsel %vm157_vm0, %v12643_v37, 0.0  ;;  %v5199_v34 = vsel %vm157_vm0, %v12644_v46, 0.0  ;;  %v5186_v59 = vsel %vm157_vm0, %v5121_v8, 0.0  ;;  %v12650_v37 = vld [vmem:[#allocation9_spill] sm:$0xff] }
 0x4a1   :  { %v5166_v12 = vadd.f32 %v5165_v9, %v5164_v44  ;;  %v5183_v62 = vadd.f32 %v5182_v42, %v5181_v36  ;;  %v5200_v39 = vadd.f32 %v5199_v34, %v5198_v24  ;;  %v5188_v31 = vsel %vm157_vm0, %v5125_v49, 0.0  ;;  %v12651_v24 = vld [vmem:[#allocation10_spill] sm:$0xff] }
 0x4a2   :  { %v5190_v58 = vsel %vm157_vm0, %v5129_v18, 0.0  ;;  %v5201_v14 = vsel %vm157_vm0, %v12645_v11, 0.0  ;;  %v5217_v19 = vsel %vm157_vm0, %v12646_v10, 0.0  ;;  %v5218_v9 = vsel %vm157_vm0, %v12647_v26, 0.0 }
 0x4a3   :  { %v5168_v48 = vadd.f32 %v5167_v6, %v5166_v12  ;;  %v5185_v2 = vadd.f32 %v5184_v63, %v5183_v62  ;;  %v5202_v23 = vadd.f32 %v5201_v14, %v5200_v39  ;;  %v5203_v8 = vsel %vm157_vm0, %v12648_v27, 0.0  ;;  %v12652_v14 = vld [vmem:[#allocation12_spill] sm:$0xff] }
 0x4a4   :  { %v5205_v49 = vsel %vm157_vm0, %v12649_v20, 0.0  ;;  %v5207_v18 = vsel %vm157_vm0, %v11497_v5, 0.0  ;;  %v5219_v43 = vadd.f32 %v5218_v9, %v5217_v19  ;;  %v5220_v6 = vsel %vm157_vm0, %v12650_v37, 0.0 }
 0x4a5   :  { %v5170_v44 = vadd.f32 %v5169_v32, %v5168_v48  ;;  %v5187_v36 = vadd.f32 %v5186_v59, %v5185_v2  ;;  %v5204_v42 = vadd.f32 %v5203_v8, %v5202_v23  ;;  %v5222_v46 = vsel %vm157_vm0, %v12651_v24, 0.0 }
 0x4a6   :  { %v5221_v63 = vadd.f32 %v5220_v6, %v5219_v43  ;;  %v5236_v34 = vsel %vm157_vm0, %v11512_v50, 0.0  ;;  %v5237_v12 = vsel %vm157_vm0, %v11528_v25, 0.0  ;;  %v5209_v32 = vsel %vm157_vm0, %v11505_v55, 0.0 }
 0x4a7   :  { %v5172_v62 = vadd.f32 %v5171_v13, %v5170_v44  ;;  %v5189_v39 = vadd.f32 %v5188_v31, %v5187_v36  ;;  %v5206_v5 = vadd.f32 %v5205_v49, %v5204_v42  ;;  %v5238_v11 = vadd.f32 %v5237_v12, %v5236_v34 }
 0x4a8   :  { %v5223_v59 = vadd.f32 %v5222_v46, %v5221_v63  ;;  %v5224_v10 = vsel %vm157_vm0, %v12652_v14, 0.0  ;;  %v5239_v19 = vsel %vm157_vm0, %v11544_v0, 0.0  ;;  %v5226_v25 = vsel %vm157_vm0, %v11500_v1, 0.0 }
 0x4a9   :  { %v5173_v48 = vrot.slane %v5172_v62, 4  ;;  %v5191_v2 = vadd.f32 %v5190_v58, %v5189_v39  ;;  %v5208_v50 = vadd.f32 %v5207_v18, %v5206_v5  ;;  %v5240_v23 = vadd.f32 %v5239_v19, %v5238_v11 }
 0x4aa   :  { %v5225_v26 = vadd.f32 %v5224_v10, %v5223_v59  ;;  %v5241_v13 = vsel %vm157_vm0, %v11560_v30, 0.0  ;;  %v5255_v55 = vsel %vm157_vm0, %v11516_v51, 0.0  ;;  %v5228_v0 = vsel %vm157_vm0, %v11508_v16, 0.0 }
 0x4ab   :  { %v5174_v31 = vadd.f32 %v5173_v48, %v5172_v62  ;;  %v5192_v9 = vrot.slane %v5191_v2, 4  ;;  %v5210_v27 = vadd.f32 %v5209_v32, %v5208_v50  ;;  %v5242_v8 = vadd.f32 %v5241_v13, %v5240_v23 }
 0x4ac   :  { %v5227_v20 = vadd.f32 %v5226_v25, %v5225_v26  ;;  %v5243_v58 = vsel %vm157_vm0, %v11572_v4, 0.0  ;;  %v5256_v1 = vsel %vm157_vm0, %v11532_v60, 0.0  ;;  %v5245_v51 = vsel %vm157_vm0, %v11584_v15, 0.0 }
 0x4ad   :  { %v5175_v49 = vrot.slane %v5174_v31, 2  ;;  %v5193_v18 = vadd.f32 %v5192_v9, %v5191_v2  ;;  %v5211_v30 = vrot.slane %v5210_v27, 4  ;;  %v5244_v43 = vadd.f32 %v5243_v58, %v5242_v8 }
 0x4ae   :  { %v5229_v44 = vadd.f32 %v5228_v0, %v5227_v20  ;;  %v5257_v36 = vadd.f32 %v5256_v1, %v5255_v55  ;;  %v5258_v42 = vsel %vm157_vm0, %v11548_v47, 0.0  ;;  %v5247_v60 = vsel %vm157_vm0, %v11596_v45, 0.0 }
 0x4af   :  { %v5176_v37 = vadd.f32 %v5175_v49, %v5174_v31  ;;  %v5194_v16 = vrot.slane %v5193_v18, 2  ;;  %v5212_v6 = vadd.f32 %v5211_v30, %v5210_v27  ;;  %v5246_v63 = vadd.f32 %v5245_v51, %v5244_v43 }
 0x4b0   :  { %v5230_v4 = vrot.slane %v5229_v44, 4  ;;  %v5259_v24 = vadd.f32 %v5258_v42, %v5257_v36  ;;  %v5260_v46 = vsel %vm157_vm0, %v11563_v53, 0.0  ;;  %v5274_v15 = vsel %vm157_vm0, %v11520_v35, 0.0  ;;  %v12653_v36 = vld [vmem:[#allocation65_spill] sm:$0xff] }
 0x4b1   :  { %v5195_v34 = vadd.f32 %v5194_v16, %v5193_v18  ;;  %v5213_v12 = vrot.slane %v5212_v6, 2  ;;  %v5248_v62 = vadd.f32 %v5247_v60, %v5246_v63  ;;  %v5177_v39 = vrot.slane %v5176_v37, 1  ;;  %v12655_v63 = vld [vmem:[#allocation88_spill] sm:$0xff] }
 0x4b2   :  { %v5231_v47 = vadd.f32 %v5230_v4, %v5229_v44  ;;  %v5261_v5 = vadd.f32 %v5260_v46, %v5259_v24  ;;  %v5275_v11 = vsel %vm157_vm0, %v11536_v22, 0.0  ;;  %v5262_v45 = vsel %vm157_vm0, %v11575_v41, 0.0  ;;  %v12656_v4 = vld [vmem:[#allocation89_spill] sm:$0xff] }
 0x4b3   :  { %v5196_v32 = vrot.slane %v5195_v34, 1  ;;  %v5214_v59 = vadd.f32 %v5213_v12, %v5212_v6  ;;  %v5249_v14 = vrot.slane %v5248_v62, 4  ;;  %v5264_v19 = vsel %vm157_vm0, %v11587_v54, 0.0 }
 0x4b4   :  { %v5232_v10 = vrot.slane %v5231_v47, 2  ;;  %v5263_v53 = vadd.f32 %v5262_v45, %v5261_v5  ;;  %v5276_v48 = vadd.f32 %v5275_v11, %v5274_v15  ;;  %v5266_v50 = vsel %vm157_vm0, %v11599_v3, 0.0 }
 0x4b5   :  { %v5215_v2 = vrot.slane %v5214_v59, 1  ;;  %v5250_v35 = vadd.f32 %v5249_v14, %v5248_v62  ;;  %v5277_v22 = vsel %vm157_vm0, %v11552_v21, 0.0  ;;  %v5178_v23 = vadd.f32 %v5177_v39, %v5176_v37 }
 0x4b6   :  { %v5233_v26 = vadd.f32 %v5232_v10, %v5231_v47  ;;  %v5265_v25 = vadd.f32 %v5264_v19, %v5263_v53  ;;  %v5278_v13 = vadd.f32 %v5277_v22, %v5276_v48  ;;  %v5197_v55 = vadd.f32 %v5196_v32, %v5195_v34 }
 0x4b7   :  { %v5251_v41 = vrot.slane %v5250_v35, 2  ;;  %v5279_v31 = vsel %vm157_vm0, %v11566_v17, 0.0  ;;  %v5293_v54 = vsel %vm157_vm0, %v11524_v57, 0.0  ;;  %v5294_v3 = vsel %vm157_vm0, %v11540_v38, 0.0 }
 0x4b8   :  { %v5234_v9 = vrot.slane %v5233_v26, 1  ;;  %v5267_v27 = vadd.f32 %v5266_v50, %v5265_v25  ;;  %v5280_v8 = vadd.f32 %v5279_v31, %v5278_v13  ;;  %v5216_v20 = vadd.f32 %v5215_v2, %v5214_v59 }
 0x4b9   :  { %v5252_v21 = vadd.f32 %v5251_v41, %v5250_v35  ;;  %v5281_v0 = vsel %vm157_vm0, %v11578_v52, 0.0  ;;  %v5295_v58 = vadd.f32 %v5294_v3, %v5293_v54  ;;  %v5296_v17 = vsel %vm157_vm0, %v11556_v33, 0.0  ;;  %v12654_v52 = vld [vmem:[#allocation87_spill] sm:$0xff] }
 0x4ba   :  { %v5235_v1 = vadd.f32 %v5234_v9, %v5233_v26  ;;  %v5268_v49 = vrot.slane %v5267_v27, 4  ;;  %v5282_v18 = vadd.f32 %v5281_v0, %v5280_v8  ;;  %v5283_v57 = vsel %vm157_vm0, %v11590_v61, 0.0 }
 0x4bb   :  { %v5253_v30 = vrot.slane %v5252_v21, 1  ;;  %v5297_v43 = vadd.f32 %v5296_v17, %v5295_v58  ;;  %v5298_v38 = vsel %vm157_vm0, %v11569_v7, 0.0  ;;  %v5333_v42 = vadd.f32 %v12653_v36, %v5178_v23 }
 0x4bc   :  { %v5269_v44 = vadd.f32 %v5268_v49, %v5267_v27  ;;  %v5284_v51 = vadd.f32 %v5283_v57, %v5282_v18  ;;  %v5334_v37 = vadd.f32 %v12654_v52, %v5197_v55  ;;  %v5285_v16 = vsel %vm157_vm0, %v11605_v40, 0.0  ;;  %v12657_v40 = vld [vmem:[#allocation5_spill] sm:$0xff] }
 0x4bd   :  { %v5299_v6 = vadd.f32 %v5298_v38, %v5297_v43  ;;  %v5335_v33 = vadd.f32 %v12655_v63, %v5216_v20  ;;  %v5336_v60 = vadd.f32 %v12656_v4, %v5235_v1  ;;  %v5300_v46 = vsel %vm157_vm0, %v11581_v56, 0.0 }
 0x4be   :  { %v5270_v24 = vrot.slane %v5269_v44, 2  ;;  %v5286_v61 = vadd.f32 %v5285_v16, %v5284_v51  ;;  %v5349_v7 = vcombine.low %v5333_v42, %v5334_v37  ;;  %v5302_v12 = vsel %vm157_vm0, %v11593_v29, 0.0 }
 0x4bf   :  { %v5301_v34 = vadd.f32 %v5300_v46, %v5299_v6  ;;  %v5350_v62 = vcombine.low %v5335_v33, %v5336_v60  ;;  %v5254_v15 = vadd.f32 %v5253_v30, %v5252_v21  ;;  %v5304_v45 = vsel %vm157_vm0, %v11608_v28, 0.0 }
 0x4c0   :  { %v5271_v39 = vadd.f32 %v5270_v24, %v5269_v44  ;;  %v5287_v47 = vrot.slane %v5286_v61, 4  ;;  %v5357_v5 = vrot.slane %v5349_v7, %v12657_v40 }
 0x4c1   :  { %v5303_v11 = vadd.f32 %v5302_v12, %v5301_v34  ;;  %v5364_v32 = vrot.slane %v5350_v62, %v12657_v40  ;;  %v5337_v29 = vadd.f32 %v12653_v36, %v5254_v15 }
 0x4c2   :  { %v5272_v59 = vrot.slane %v5271_v39, 1  ;;  %v5288_v14 = vadd.f32 %v5287_v47, %v5286_v61 }
 0x4c3   :  { %v5305_v56 = vadd.f32 %v5304_v45, %v5303_v11  ;;  %v5365_v10 = vcombine.low %v5357_v5, %v5364_v32 }
 0x4c4   :  { %v5273_v53 = vadd.f32 %v5272_v59, %v5271_v39  ;;  %v5289_v19 = vrot.slane %v5288_v14, 2 }
 0x4c5   :  { %v5306_v48 = vrot.slane %v5305_v56, 4 }
 0x4c6   :  { %v5290_v2 = vadd.f32 %v5289_v19, %v5288_v14  ;;  %v5338_v35 = vadd.f32 %v12654_v52, %v5273_v53 }
 0x4c7   :  { %v5307_v50 = vadd.f32 %v5306_v48, %v5305_v56 }
 0x4c8   :  { %v5291_v22 = vrot.slane %v5290_v2, 1  ;;  %v5366_v23 = vcombine.low %v5337_v29, %v5338_v35 }
 0x4c9   :  { %v5308_v26 = vrot.slane %v5307_v50, 2 }
 0x4ca   :  { %v5292_v25 = vadd.f32 %v5291_v22, %v5290_v2  ;;  %v5374_v9 = vrot.slane %v5366_v23, %v12657_v40 }
 0x4cb   :  { %v5309_v13 = vadd.f32 %v5308_v26, %v5307_v50 }
 0x4cc   :  { %v5339_v28 = vadd.f32 %v12655_v63, %v5292_v25 }
 0x4cd   :  { %v5310_v55 = vrot.slane %v5309_v13, 1 }
 0x4cf   :  { %v5311_v41 = vadd.f32 %v5310_v55, %v5309_v13 }
 0x4d1   :  { %v5340_v31 = vadd.f32 %v12656_v4, %v5311_v41 }
 0x4d3   :  { %v5367_v54 = vcombine.low %v5339_v28, %v5340_v31 }
 0x4d5   :  { %v5381_v27 = vrot.slane %v5367_v54, %v12657_v40 }
 0x4d7   :  { %v5382_v8 = vcombine.low %v5374_v9, %v5381_v27 }
 0x4d9   :  { %v5385_v3 = vrot.slane %v5382_v8, 7 }
 0x4db   :  { %v5386_v20 = vsel %vm1084_vm1, %v5385_v3, %v5365_v10 }
 0x4dc   :  { %v5387_v21 = vsel %vm1090_vm3, %v5385_v3, %v5386_v20 }
 0x4dd   :  { %v5388_v0 = vsel %vm1096_vm5, %v5385_v3, %v5387_v21 }
 0x4de   :  { %v5390_v58 = vsel %vm5389_vm8, %v5385_v3, %v5388_v0 }
 0x4df   :  { %5392 = vst [vmem:[#allocation2] sm:$0xff] %v5390_v58 }
 0x4e0   :  { %6305 = shalt.err (!%p6302_p4)
}
 0x4e1   :  { %s6306_s13 = scalar_lea.hbm %s11742_s7, 128 }
 0x4e2   :  { %p6307_p5 = scmp.ne.s32.totalorder %s11742_s7, %s6306_s13  ;;  %p6310_p6 = scmp.lt.u32.totalorder %s6306_s13, %s11742_s7 }
 0x4e4   :  { %p6312_p7 = pnand %p6310_p6, %p6307_p5 }
 0x4e6   :  { %6315 = shalt.err (!%p6312_p7)
}
 0x4e7   :  { %5402 = dma.vmem_to_hbm [thread:$0]  %s5400_s10, 128, %s11742_s7, [#allocation3]  }
 0x4e8   :  { %6316 = dma.done.wait [#allocation3], 128  }
 0x4e9   :  { %6317 = vsyncadd [#allocation3], 4294967168 }
 0x4ea   :  { %5410 = vsyncpa [#allocation3], 1 }

</bundles_post_ra>
